<compile_context>
chip_gen: v7x
topology: tpu7x:2x2x1
jax: 0.10.0
libtpu: 0.0.40
codegen_flags: <defaults>
</compile_context>

<pallas_src>
import jax
import jax.numpy as jnp
from jax.experimental import pallas as pl
from jax.experimental.pallas import tpu as pltpu


# ------------------------- Pallas kernels ------------------------- #

def _conv0_in_relu_kernel(x_ref, w_ref, b_ref, o_ref):
    """conv0 (ConvTranspose2d k4 s1 p0 on a 1x1 input) + InstanceNorm + ReLU.

    x_ref: (1, Cin)   w_ref: (16, Cin, Cout)   b_ref: (1, Cout)
    o_ref: (16, Cout)  -- row s = output pixel (oy*4 + ox)
    """
    x = x_ref[...]                                           # (1, Cin)
    b = b_ref[...]                                           # (1, Cout)
    acts = []
    for s in range(16):
        acts.append(jnp.dot(x, w_ref[s], preferred_element_type=jnp.float32) + b)

    total = acts[0]
    for a in acts[1:]:
        total = total + a
    mean = total * (1.0 / 16.0)                              # (1, Cout)

    sq = None
    for a in acts:
        d = a - mean
        sq = d * d if sq is None else sq + d * d
    inv_std = jax.lax.rsqrt(sq * (1.0 / 16.0) + 1e-5)        # biased var, eps=1e-5

    for s in range(16):
        y = jnp.maximum((acts[s] - mean) * inv_std, 0.0)     # (1, Cout)
        o_ref[s:s + 1, :] = y


def _make_subpixel_kernel(final):
    """ConvTranspose2d(k=4, s=2, p=1) via sub-pixel decomposition.

    taps_ref: (9, Cin, H*W)   -- taps[(oy*3+ox)] = padded_input[oy:oy+H, ox:ox+W]
    w_ref:    (16, Cout, Cin) -- index = (2*ry+rx)*4 + (2*dy+dx)
    b_ref:    (Cout, 1)
    o_ref:    (4, Cout, H*W)  -- output parity plane s = 2*ry+rx
    """

    def kernel(taps_ref, w_ref, b_ref, o_ref):
        hw = taps_ref.shape[-1]
        b = b_ref[...]                                       # (Cout, 1)
        subs = []
        for ry in range(2):
            for rx in range(2):
                s = 2 * ry + rx
                acc = None
                for dy in range(2):
                    for dx in range(2):
                        t = 2 * dy + dx
                        o = (ry + dy) * 3 + (rx + dx)
                        d = jnp.dot(w_ref[4 * s + t], taps_ref[o],
                                    preferred_element_type=jnp.float32)
                        acc = d if acc is None else acc + d
                subs.append(acc + b)                         # (Cout, HW)

        if final:                                            # conv4: sigmoid only
            for s in range(4):
                y = jax.nn.sigmoid(subs[s])
                o_ref[s:s + 1, :, :] = y.reshape((1,) + y.shape)
        else:                                                # InstanceNorm + ReLU
            inv_n = 1.0 / (4.0 * hw)
            total = subs[0] + subs[1] + subs[2] + subs[3]
            mean = jnp.sum(total, axis=1, keepdims=True) * inv_n          # (Cout,1)
            var = None
            for s in range(4):
                d = subs[s] - mean
                sq = jnp.sum(d * d, axis=1, keepdims=True)
                var = sq if var is None else var + sq
            inv_std = jax.lax.rsqrt(var * inv_n + 1e-5)
            for s in range(4):
                y = jnp.maximum((subs[s] - mean) * inv_std, 0.0)          # (Cout,HW)
                o_ref[s:s + 1, :, :] = y.reshape((1,) + y.shape)

    return kernel


# ------------------------- pallas_call wrappers ------------------------- #

def _conv0_in_relu(x, w0k, b0):
    """x: (N, 1, Cin), w0k: (16, Cin, C), b0: (1, C) -> (N, 16, C)."""
    N, _, cin = x.shape
    c = w0k.shape[2]
    return pl.pallas_call(
        _conv0_in_relu_kernel,
        out_shape=jax.ShapeDtypeStruct((N, 16, c), jnp.float32),
        grid=(N,),
        in_specs=[
            pl.BlockSpec((None, 1, cin), lambda n: (n, 0, 0)),
            pl.BlockSpec((16, cin, c), lambda n: (0, 0, 0)),
            pl.BlockSpec((1, c), lambda n: (0, 0)),
        ],
        out_specs=pl.BlockSpec((None, 16, c), lambda n: (n, 0, 0)),
        compiler_params=pltpu.CompilerParams(
            dimension_semantics=("parallel",)),
    )(x, w0k, b0)


def _subpixel_layer(taps, wk, b, *, final=False):
    """taps: (N, 9, Cin, HW), wk: (16, Cout, Cin), b: (Cout, 1) -> (N, 4, Cout, HW)."""
    N, _, cin, hw = taps.shape
    cout = wk.shape[1]
    return pl.pallas_call(
        _make_subpixel_kernel(final),
        out_shape=jax.ShapeDtypeStruct((N, 4, cout, hw), jnp.float32),
        grid=(N,),
        in_specs=[
            pl.BlockSpec((None, 9, cin, hw), lambda n: (n, 0, 0, 0)),
            pl.BlockSpec((16, cout, cin), lambda n: (0, 0, 0)),
            pl.BlockSpec((cout, 1), lambda n: (0, 0)),
        ],
        out_specs=pl.BlockSpec((None, 4, cout, hw), lambda n: (n, 0, 0, 0)),
        compiler_params=pltpu.CompilerParams(
            dimension_semantics=("parallel",)),
    )(taps, wk, b)


# ------------------------- wrapper-side glue (tiny XLA ops) ------------------------- #

def _pack_conv0_weights(w):
    """PyTorch (Cin, Cout, 4, 4) -> (16, Cin, Cout); output pixel (oy,ox) = tap (ky,kx)."""
    mats = []
    for oy in range(4):
        for ox in range(4):
            mats.append(w[:, :, oy, ox])                     # (Cin, Cout)
    return jnp.stack(mats, axis=0)


def _pack_subpixel_weights(w):
    """PyTorch (Cin, Cout, 4, 4) -> (16, Cout, Cin) for the sub-pixel decomposition."""
    mats = []
    for ry in range(2):
        for rx in range(2):
            for dy in range(2):
                for dx in range(2):
                    ky = 3 - ry - 2 * dy
                    kx = 3 - rx - 2 * dx
                    mats.append(jnp.transpose(w[:, :, ky, kx], (1, 0)))   # (Cout, Cin)
    return jnp.stack(mats, axis=0)


def _build_taps(y):
    """y: (N, H, W, C) NHWC -> (N, 9, C, H*W) shifted taps of the zero-padded input."""
    N, H, W, C = y.shape
    yp = jnp.pad(y, ((0, 0), (1, 1), (1, 1), (0, 0)))
    sl = [yp[:, oy:oy + H, ox:ox + W, :] for oy in range(3) for ox in range(3)]
    t = jnp.stack(sl, axis=1)                                # (N, 9, H, W, C)
    return jnp.transpose(t, (0, 1, 4, 2, 3)).reshape(N, 9, C, H * W)


def _unshuffle(planes, H, W):
    """planes: (N, 4, C, H*W) parity planes -> (N, 2H, 2W, C) spatial image."""
    N, _, C, _ = planes.shape
    p = planes.reshape(N, 2, 2, C, H, W)                     # (n, ry, rx, c, p, q)
    p = jnp.transpose(p, (0, 4, 1, 5, 2, 3))                 # (n, p, ry, q, rx, c)
    return p.reshape(N, 2 * H, 2 * W, C)


# ------------------------- Model ------------------------- #

def init_params(key, z_len, label_nc, theta_len, ngf):
    f = ngf
    defs = [
        (z_len + label_nc + theta_len, f * 8),   # conv0: k4 s1 p0
        (f * 8, f * 4),                          # conv1: k4 s2 p1
        (f * 4, f * 2),                          # conv2
        (f * 2, f),                              # conv3
        (f, 1),                                  # conv4
    ]
    params = []
    for i, (cin, cout) in enumerate(defs):
        kw, kb = jax.random.split(jax.random.fold_in(key, i))
        bound = 1.0 / (cin * 16.0) ** 0.5
        w = jax.random.uniform(kw, (cin, cout, 4, 4), jnp.float32, -bound, bound)
        b = jax.random.uniform(kb, (cout,), jnp.float32, -bound, bound)
        params.append((w, b))
    return params


@jax.jit
def shape_decoder_forward(params, z, conditioning, theta):
    """z: (N, z_len, 1, 1), conditioning: (N, label_nc, 1, 1), theta: (N, theta_len).
    Returns (N, 1, 64, 64), NCHW like the PyTorch module."""
    N = z.shape[0]
    (w0, b0), (w1, b1), (w2, b2), (w3, b3), (w4, b4) = params

    x0 = jnp.concatenate(
        [z.reshape(N, -1), conditioning.reshape(N, -1), theta], axis=1)
    x0 = x0[:, None, :]                                      # (N, 1, Cin0)

    # conv0 + InstanceNorm + ReLU (fused kernel)
    c0 = w0.shape[1]
    e1p = _conv0_in_relu(x0, _pack_conv0_weights(w0), b0[None, :])   # (N, 16, c0)
    e1 = e1p.reshape(N, 4, 4, c0)                            # NHWC, 4x4

    def layer(x_nhwc, w, b, *, final=False):
        _, H, W, _ = x_nhwc.shape
        taps = _build_taps(x_nhwc)
        planes = _subpixel_layer(taps, _pack_subpixel_weights(w), b[:, None],
                                 final=final)
        return planes, H, W

    p2, H1, W1 = layer(e1, w1, b1)                           # (N, 4, 32, 16)
    e2 = _unshuffle(p2, H1, W1)                              # (N, 8, 8, 32)
    p3, H2, W2 = layer(e2, w2, b2)                           # (N, 4, 16, 64)
    e3 = _unshuffle(p3, H2, W2)                              # (N, 16, 16, 16)
    p4, H3, W3 = layer(e3, w3, b3)                           # (N, 4, 8, 256)
    e4 = _unshuffle(p4, H3, W3)                              # (N, 32, 32, 8)
    p5, H4, W4 = layer(e4, w4, b4, final=True)               # (N, 4, 1, 1024)

    img = p5.reshape(N, 2, 2, H4, W4)                        # (n, ry, rx, p, q)
    img = jnp.transpose(img, (0, 3, 1, 4, 2)).reshape(N, 2 * H4, 2 * W4)
    return img[:, None, :, :]                                # (N, 1, 64, 64) NCHW


# ------------------------- Pure-JAX reference (for verification) ------------------------- #

def _ref_conv_transpose(x_nhwc, w, b, *, stride, padding, k=4):
    q = k - 1 - padding
    w_hwio = jnp.transpose(w[:, :, ::-1, ::-1], (2, 3, 0, 1))
    y = jax.lax.conv_general_dilated(
        x_nhwc, w_hwio, window_strides=(1, 1),
        padding=[(q, q), (q, q)], lhs_dilation=(stride, stride),
        dimension_numbers=("NHWC", "HWIO", "NHWC"),
        precision=jax.lax.Precision.HIGHEST)
    return y + b.reshape(1, 1, 1, -1)


def _ref_inorm_relu(x):
    mean = jnp.mean(x, axis=(1, 2), keepdims=True)
    var = jnp.mean((x - mean) ** 2, axis=(1, 2), keepdims=True)
    return jnp.maximum((x - mean) * jax.lax.rsqrt(var + 1e-5), 0.0)


def reference_forward(params, z, conditioning, theta):
    x = jnp.concatenate([z, conditioning, theta[:, :, None, None]], axis=1)
    x = jnp.transpose(x, (0, 2, 3, 1))
    (w0, b0), (w1, b1), (w2, b2), (w3, b3), (w4, b4) = params
    e1 = _ref_inorm_relu(_ref_conv_transpose(x, w0, b0, stride=1, padding=0))
    e2 = _ref_inorm_relu(_ref_conv_transpose(e1, w1, b1, stride=2, padding=1))
    e3 = _ref_inorm_relu(_ref_conv_transpose(e2, w2, b2, stride=2, padding=1))
    e4 = _ref_inorm_relu(_ref_conv_transpose(e3, w3, b3, stride=2, padding=1))
    inst = jax.nn.sigmoid(_ref_conv_transpose(e4, w4, b4, stride=2, padding=1))
    return jnp.transpose(inst, (0, 3, 1, 2))


# ------------------------- Main ------------------------- #

if __name__ == "__main__":
    key = jax.random.PRNGKey(0)
    N, z_len, label_nc, theta_len, ngf = 2, 8, 4, 6, 8
    kz, kc, kt, kp = jax.random.split(key, 4)
    z = jax.random.normal(kz, (N, z_len, 1, 1), jnp.float32)
    conditioning = jax.random.normal(kc, (N, label_nc, 1, 1), jnp.float32)
    theta = jax.random.normal(kt, (N, theta_len), jnp.float32)
    params = init_params(kp, z_len, label_nc, theta_len, ngf)

    out = jax.block_until_ready(shape_decoder_forward(params, z, conditioning, theta))
    assert out.shape == (N, 1, 64, 64), out.shape
    assert out.dtype == jnp.float32

    ref = jax.block_until_ready(reference_forward(params, z, conditioning, theta))
    max_err = float(jnp.max(jnp.abs(out - ref)))
    assert max_err < 1e-2, f"max abs err vs reference: {max_err}"

    print("KERNEL_OK")
</pallas_src>

<mosaic_0001>
module attributes {stable_mosaic.version = 11 : i64} {
  func.func @_conv0_in_relu_kernel(%arg0: i32, %arg1: memref<1x1x18xf32, #tpu.memory_space<vmem>>, %arg2: memref<16x18x64xf32, #tpu.memory_space<vmem>>, %arg3: memref<1x64xf32, #tpu.memory_space<vmem>>, %arg4: memref<1x16x64xf32, #tpu.memory_space<vmem>>) attributes {dimension_semantics = [#tpu.dimension_semantics<parallel>], iteration_bounds = array<i64: 2>, scalar_prefetch = 0 : i64, scratch_operands = 0 : i64, tpu.core_type = #tpu.core_type<tc>, window_params = [{transform_indices = @transform_0, window_bounds = array<i64: 1, 1, 18>}, {pipeline_mode = #tpu.pipeline_mode<synchronous>, transform_indices = @transform_1, window_bounds = array<i64: 16, 18, 64>}, {pipeline_mode = #tpu.pipeline_mode<synchronous>, transform_indices = @transform_2, window_bounds = array<i64: 1, 64>}, {transform_indices = @transform_3, window_bounds = array<i64: 1, 16, 64>}]} {
    %c0 = arith.constant 0 : index
    %c0_0 = arith.constant 0 : index
    %c0_1 = arith.constant 0 : index
    %0 = vector.load %arg1[%c0, %c0_0, %c0_1] : memref<1x1x18xf32, #tpu.memory_space<vmem>>, vector<1x1x18xf32>
    %1 = vector.shape_cast %0 : vector<1x1x18xf32> to vector<1x18xf32>
    %c0_2 = arith.constant 0 : index
    %c0_3 = arith.constant 0 : index
    %2 = vector.load %arg3[%c0_2, %c0_3] : memref<1x64xf32, #tpu.memory_space<vmem>>, vector<1x64xf32>
    %c0_4 = arith.constant 0 : index
    %c0_5 = arith.constant 0 : index
    %c0_6 = arith.constant 0 : index
    %3 = vector.load %arg2[%c0_4, %c0_5, %c0_6] : memref<16x18x64xf32, #tpu.memory_space<vmem>>, vector<1x18x64xf32>
    %4 = vector.shape_cast %3 : vector<1x18x64xf32> to vector<18x64xf32>
    %cst = arith.constant dense<0.000000e+00> : vector<1x64xf32>
    %5 = tpu.matmul %1, %4, %cst {dimension_numbers = #tpu.dot_dimension_numbers<[1], [0], [0], [1], [0, 0, 1, 1], [], []>} : vector<1x18xf32>, vector<18x64xf32>, vector<1x64xf32> -> vector<1x64xf32>
    %6 = arith.addf %5, %2 : vector<1x64xf32>
    %c1 = arith.constant 1 : index
    %c0_7 = arith.constant 0 : index
    %c0_8 = arith.constant 0 : index
    %7 = vector.load %arg2[%c1, %c0_7, %c0_8] : memref<16x18x64xf32, #tpu.memory_space<vmem>>, vector<1x18x64xf32>
    %8 = vector.shape_cast %7 : vector<1x18x64xf32> to vector<18x64xf32>
    %cst_9 = arith.constant dense<0.000000e+00> : vector<1x64xf32>
    %9 = tpu.matmul %1, %8, %cst_9 {dimension_numbers = #tpu.dot_dimension_numbers<[1], [0], [0], [1], [0, 0, 1, 1], [], []>} : vector<1x18xf32>, vector<18x64xf32>, vector<1x64xf32> -> vector<1x64xf32>
    %10 = arith.addf %9, %2 : vector<1x64xf32>
    %c2 = arith.constant 2 : index
    %c0_10 = arith.constant 0 : index
    %c0_11 = arith.constant 0 : index
    %11 = vector.load %arg2[%c2, %c0_10, %c0_11] : memref<16x18x64xf32, #tpu.memory_space<vmem>>, vector<1x18x64xf32>
    %12 = vector.shape_cast %11 : vector<1x18x64xf32> to vector<18x64xf32>
    %cst_12 = arith.constant dense<0.000000e+00> : vector<1x64xf32>
    %13 = tpu.matmul %1, %12, %cst_12 {dimension_numbers = #tpu.dot_dimension_numbers<[1], [0], [0], [1], [0, 0, 1, 1], [], []>} : vector<1x18xf32>, vector<18x64xf32>, vector<1x64xf32> -> vector<1x64xf32>
    %14 = arith.addf %13, %2 : vector<1x64xf32>
    %c3 = arith.constant 3 : index
    %c0_13 = arith.constant 0 : index
    %c0_14 = arith.constant 0 : index
    %15 = vector.load %arg2[%c3, %c0_13, %c0_14] : memref<16x18x64xf32, #tpu.memory_space<vmem>>, vector<1x18x64xf32>
    %16 = vector.shape_cast %15 : vector<1x18x64xf32> to vector<18x64xf32>
    %cst_15 = arith.constant dense<0.000000e+00> : vector<1x64xf32>
    %17 = tpu.matmul %1, %16, %cst_15 {dimension_numbers = #tpu.dot_dimension_numbers<[1], [0], [0], [1], [0, 0, 1, 1], [], []>} : vector<1x18xf32>, vector<18x64xf32>, vector<1x64xf32> -> vector<1x64xf32>
    %18 = arith.addf %17, %2 : vector<1x64xf32>
    %c4 = arith.constant 4 : index
    %c0_16 = arith.constant 0 : index
    %c0_17 = arith.constant 0 : index
    %19 = vector.load %arg2[%c4, %c0_16, %c0_17] : memref<16x18x64xf32, #tpu.memory_space<vmem>>, vector<1x18x64xf32>
    %20 = vector.shape_cast %19 : vector<1x18x64xf32> to vector<18x64xf32>
    %cst_18 = arith.constant dense<0.000000e+00> : vector<1x64xf32>
    %21 = tpu.matmul %1, %20, %cst_18 {dimension_numbers = #tpu.dot_dimension_numbers<[1], [0], [0], [1], [0, 0, 1, 1], [], []>} : vector<1x18xf32>, vector<18x64xf32>, vector<1x64xf32> -> vector<1x64xf32>
    %22 = arith.addf %21, %2 : vector<1x64xf32>
    %c5 = arith.constant 5 : index
    %c0_19 = arith.constant 0 : index
    %c0_20 = arith.constant 0 : index
    %23 = vector.load %arg2[%c5, %c0_19, %c0_20] : memref<16x18x64xf32, #tpu.memory_space<vmem>>, vector<1x18x64xf32>
    %24 = vector.shape_cast %23 : vector<1x18x64xf32> to vector<18x64xf32>
    %cst_21 = arith.constant dense<0.000000e+00> : vector<1x64xf32>
    %25 = tpu.matmul %1, %24, %cst_21 {dimension_numbers = #tpu.dot_dimension_numbers<[1], [0], [0], [1], [0, 0, 1, 1], [], []>} : vector<1x18xf32>, vector<18x64xf32>, vector<1x64xf32> -> vector<1x64xf32>
    %26 = arith.addf %25, %2 : vector<1x64xf32>
    %c6 = arith.constant 6 : index
    %c0_22 = arith.constant 0 : index
    %c0_23 = arith.constant 0 : index
    %27 = vector.load %arg2[%c6, %c0_22, %c0_23] : memref<16x18x64xf32, #tpu.memory_space<vmem>>, vector<1x18x64xf32>
    %28 = vector.shape_cast %27 : vector<1x18x64xf32> to vector<18x64xf32>
    %cst_24 = arith.constant dense<0.000000e+00> : vector<1x64xf32>
    %29 = tpu.matmul %1, %28, %cst_24 {dimension_numbers = #tpu.dot_dimension_numbers<[1], [0], [0], [1], [0, 0, 1, 1], [], []>} : vector<1x18xf32>, vector<18x64xf32>, vector<1x64xf32> -> vector<1x64xf32>
    %30 = arith.addf %29, %2 : vector<1x64xf32>
    %c7 = arith.constant 7 : index
    %c0_25 = arith.constant 0 : index
    %c0_26 = arith.constant 0 : index
    %31 = vector.load %arg2[%c7, %c0_25, %c0_26] : memref<16x18x64xf32, #tpu.memory_space<vmem>>, vector<1x18x64xf32>
    %32 = vector.shape_cast %31 : vector<1x18x64xf32> to vector<18x64xf32>
    %cst_27 = arith.constant dense<0.000000e+00> : vector<1x64xf32>
    %33 = tpu.matmul %1, %32, %cst_27 {dimension_numbers = #tpu.dot_dimension_numbers<[1], [0], [0], [1], [0, 0, 1, 1], [], []>} : vector<1x18xf32>, vector<18x64xf32>, vector<1x64xf32> -> vector<1x64xf32>
    %34 = arith.addf %33, %2 : vector<1x64xf32>
    %c8 = arith.constant 8 : index
    %c0_28 = arith.constant 0 : index
    %c0_29 = arith.constant 0 : index
    %35 = vector.load %arg2[%c8, %c0_28, %c0_29] : memref<16x18x64xf32, #tpu.memory_space<vmem>>, vector<1x18x64xf32>
    %36 = vector.shape_cast %35 : vector<1x18x64xf32> to vector<18x64xf32>
    %cst_30 = arith.constant dense<0.000000e+00> : vector<1x64xf32>
    %37 = tpu.matmul %1, %36, %cst_30 {dimension_numbers = #tpu.dot_dimension_numbers<[1], [0], [0], [1], [0, 0, 1, 1], [], []>} : vector<1x18xf32>, vector<18x64xf32>, vector<1x64xf32> -> vector<1x64xf32>
    %38 = arith.addf %37, %2 : vector<1x64xf32>
    %c9 = arith.constant 9 : index
    %c0_31 = arith.constant 0 : index
    %c0_32 = arith.constant 0 : index
    %39 = vector.load %arg2[%c9, %c0_31, %c0_32] : memref<16x18x64xf32, #tpu.memory_space<vmem>>, vector<1x18x64xf32>
    %40 = vector.shape_cast %39 : vector<1x18x64xf32> to vector<18x64xf32>
    %cst_33 = arith.constant dense<0.000000e+00> : vector<1x64xf32>
    %41 = tpu.matmul %1, %40, %cst_33 {dimension_numbers = #tpu.dot_dimension_numbers<[1], [0], [0], [1], [0, 0, 1, 1], [], []>} : vector<1x18xf32>, vector<18x64xf32>, vector<1x64xf32> -> vector<1x64xf32>
    %42 = arith.addf %41, %2 : vector<1x64xf32>
    %c10 = arith.constant 10 : index
    %c0_34 = arith.constant 0 : index
    %c0_35 = arith.constant 0 : index
    %43 = vector.load %arg2[%c10, %c0_34, %c0_35] : memref<16x18x64xf32, #tpu.memory_space<vmem>>, vector<1x18x64xf32>
    %44 = vector.shape_cast %43 : vector<1x18x64xf32> to vector<18x64xf32>
    %cst_36 = arith.constant dense<0.000000e+00> : vector<1x64xf32>
    %45 = tpu.matmul %1, %44, %cst_36 {dimension_numbers = #tpu.dot_dimension_numbers<[1], [0], [0], [1], [0, 0, 1, 1], [], []>} : vector<1x18xf32>, vector<18x64xf32>, vector<1x64xf32> -> vector<1x64xf32>
    %46 = arith.addf %45, %2 : vector<1x64xf32>
    %c11 = arith.constant 11 : index
    %c0_37 = arith.constant 0 : index
    %c0_38 = arith.constant 0 : index
    %47 = vector.load %arg2[%c11, %c0_37, %c0_38] : memref<16x18x64xf32, #tpu.memory_space<vmem>>, vector<1x18x64xf32>
    %48 = vector.shape_cast %47 : vector<1x18x64xf32> to vector<18x64xf32>
    %cst_39 = arith.constant dense<0.000000e+00> : vector<1x64xf32>
    %49 = tpu.matmul %1, %48, %cst_39 {dimension_numbers = #tpu.dot_dimension_numbers<[1], [0], [0], [1], [0, 0, 1, 1], [], []>} : vector<1x18xf32>, vector<18x64xf32>, vector<1x64xf32> -> vector<1x64xf32>
    %50 = arith.addf %49, %2 : vector<1x64xf32>
    %c12 = arith.constant 12 : index
    %c0_40 = arith.constant 0 : index
    %c0_41 = arith.constant 0 : index
    %51 = vector.load %arg2[%c12, %c0_40, %c0_41] : memref<16x18x64xf32, #tpu.memory_space<vmem>>, vector<1x18x64xf32>
    %52 = vector.shape_cast %51 : vector<1x18x64xf32> to vector<18x64xf32>
    %cst_42 = arith.constant dense<0.000000e+00> : vector<1x64xf32>
    %53 = tpu.matmul %1, %52, %cst_42 {dimension_numbers = #tpu.dot_dimension_numbers<[1], [0], [0], [1], [0, 0, 1, 1], [], []>} : vector<1x18xf32>, vector<18x64xf32>, vector<1x64xf32> -> vector<1x64xf32>
    %54 = arith.addf %53, %2 : vector<1x64xf32>
    %c13 = arith.constant 13 : index
    %c0_43 = arith.constant 0 : index
    %c0_44 = arith.constant 0 : index
    %55 = vector.load %arg2[%c13, %c0_43, %c0_44] : memref<16x18x64xf32, #tpu.memory_space<vmem>>, vector<1x18x64xf32>
    %56 = vector.shape_cast %55 : vector<1x18x64xf32> to vector<18x64xf32>
    %cst_45 = arith.constant dense<0.000000e+00> : vector<1x64xf32>
    %57 = tpu.matmul %1, %56, %cst_45 {dimension_numbers = #tpu.dot_dimension_numbers<[1], [0], [0], [1], [0, 0, 1, 1], [], []>} : vector<1x18xf32>, vector<18x64xf32>, vector<1x64xf32> -> vector<1x64xf32>
    %58 = arith.addf %57, %2 : vector<1x64xf32>
    %c14 = arith.constant 14 : index
    %c0_46 = arith.constant 0 : index
    %c0_47 = arith.constant 0 : index
    %59 = vector.load %arg2[%c14, %c0_46, %c0_47] : memref<16x18x64xf32, #tpu.memory_space<vmem>>, vector<1x18x64xf32>
    %60 = vector.shape_cast %59 : vector<1x18x64xf32> to vector<18x64xf32>
    %cst_48 = arith.constant dense<0.000000e+00> : vector<1x64xf32>
    %61 = tpu.matmul %1, %60, %cst_48 {dimension_numbers = #tpu.dot_dimension_numbers<[1], [0], [0], [1], [0, 0, 1, 1], [], []>} : vector<1x18xf32>, vector<18x64xf32>, vector<1x64xf32> -> vector<1x64xf32>
    %62 = arith.addf %61, %2 : vector<1x64xf32>
    %c15 = arith.constant 15 : index
    %c0_49 = arith.constant 0 : index
    %c0_50 = arith.constant 0 : index
    %63 = vector.load %arg2[%c15, %c0_49, %c0_50] : memref<16x18x64xf32, #tpu.memory_space<vmem>>, vector<1x18x64xf32>
    %64 = vector.shape_cast %63 : vector<1x18x64xf32> to vector<18x64xf32>
    %cst_51 = arith.constant dense<0.000000e+00> : vector<1x64xf32>
    %65 = tpu.matmul %1, %64, %cst_51 {dimension_numbers = #tpu.dot_dimension_numbers<[1], [0], [0], [1], [0, 0, 1, 1], [], []>} : vector<1x18xf32>, vector<18x64xf32>, vector<1x64xf32> -> vector<1x64xf32>
    %66 = arith.addf %65, %2 : vector<1x64xf32>
    %67 = arith.addf %6, %10 : vector<1x64xf32>
    %68 = arith.addf %67, %14 : vector<1x64xf32>
    %69 = arith.addf %68, %18 : vector<1x64xf32>
    %70 = arith.addf %69, %22 : vector<1x64xf32>
    %71 = arith.addf %70, %26 : vector<1x64xf32>
    %72 = arith.addf %71, %30 : vector<1x64xf32>
    %73 = arith.addf %72, %34 : vector<1x64xf32>
    %74 = arith.addf %73, %38 : vector<1x64xf32>
    %75 = arith.addf %74, %42 : vector<1x64xf32>
    %76 = arith.addf %75, %46 : vector<1x64xf32>
    %77 = arith.addf %76, %50 : vector<1x64xf32>
    %78 = arith.addf %77, %54 : vector<1x64xf32>
    %79 = arith.addf %78, %58 : vector<1x64xf32>
    %80 = arith.addf %79, %62 : vector<1x64xf32>
    %81 = arith.addf %80, %66 : vector<1x64xf32>
    %cst_52 = arith.constant 6.250000e-02 : f32
    %82 = vector.broadcast %cst_52 : f32 to vector<1x64xf32>
    %83 = arith.mulf %81, %82 : vector<1x64xf32>
    %84 = arith.subf %6, %83 : vector<1x64xf32>
    %85 = arith.mulf %84, %84 : vector<1x64xf32>
    %86 = arith.subf %10, %83 : vector<1x64xf32>
    %87 = arith.mulf %86, %86 : vector<1x64xf32>
    %88 = arith.addf %85, %87 : vector<1x64xf32>
    %89 = arith.subf %14, %83 : vector<1x64xf32>
    %90 = arith.mulf %89, %89 : vector<1x64xf32>
    %91 = arith.addf %88, %90 : vector<1x64xf32>
    %92 = arith.subf %18, %83 : vector<1x64xf32>
    %93 = arith.mulf %92, %92 : vector<1x64xf32>
    %94 = arith.addf %91, %93 : vector<1x64xf32>
    %95 = arith.subf %22, %83 : vector<1x64xf32>
    %96 = arith.mulf %95, %95 : vector<1x64xf32>
    %97 = arith.addf %94, %96 : vector<1x64xf32>
    %98 = arith.subf %26, %83 : vector<1x64xf32>
    %99 = arith.mulf %98, %98 : vector<1x64xf32>
    %100 = arith.addf %97, %99 : vector<1x64xf32>
    %101 = arith.subf %30, %83 : vector<1x64xf32>
    %102 = arith.mulf %101, %101 : vector<1x64xf32>
    %103 = arith.addf %100, %102 : vector<1x64xf32>
    %104 = arith.subf %34, %83 : vector<1x64xf32>
    %105 = arith.mulf %104, %104 : vector<1x64xf32>
    %106 = arith.addf %103, %105 : vector<1x64xf32>
    %107 = arith.subf %38, %83 : vector<1x64xf32>
    %108 = arith.mulf %107, %107 : vector<1x64xf32>
    %109 = arith.addf %106, %108 : vector<1x64xf32>
    %110 = arith.subf %42, %83 : vector<1x64xf32>
    %111 = arith.mulf %110, %110 : vector<1x64xf32>
    %112 = arith.addf %109, %111 : vector<1x64xf32>
    %113 = arith.subf %46, %83 : vector<1x64xf32>
    %114 = arith.mulf %113, %113 : vector<1x64xf32>
    %115 = arith.addf %112, %114 : vector<1x64xf32>
    %116 = arith.subf %50, %83 : vector<1x64xf32>
    %117 = arith.mulf %116, %116 : vector<1x64xf32>
    %118 = arith.addf %115, %117 : vector<1x64xf32>
    %119 = arith.subf %54, %83 : vector<1x64xf32>
    %120 = arith.mulf %119, %119 : vector<1x64xf32>
    %121 = arith.addf %118, %120 : vector<1x64xf32>
    %122 = arith.subf %58, %83 : vector<1x64xf32>
    %123 = arith.mulf %122, %122 : vector<1x64xf32>
    %124 = arith.addf %121, %123 : vector<1x64xf32>
    %125 = arith.subf %62, %83 : vector<1x64xf32>
    %126 = arith.mulf %125, %125 : vector<1x64xf32>
    %127 = arith.addf %124, %126 : vector<1x64xf32>
    %128 = arith.subf %66, %83 : vector<1x64xf32>
    %129 = arith.mulf %128, %128 : vector<1x64xf32>
    %130 = arith.addf %127, %129 : vector<1x64xf32>
    %cst_53 = arith.constant 6.250000e-02 : f32
    %131 = vector.broadcast %cst_53 : f32 to vector<1x64xf32>
    %132 = arith.mulf %130, %131 : vector<1x64xf32>
    %cst_54 = arith.constant 9.99999974E-6 : f32
    %133 = vector.broadcast %cst_54 : f32 to vector<1x64xf32>
    %134 = arith.addf %132, %133 : vector<1x64xf32>
    %135 = math.rsqrt %134 : vector<1x64xf32>
    %136 = arith.subf %6, %83 : vector<1x64xf32>
    %137 = arith.mulf %136, %135 : vector<1x64xf32>
    %cst_55 = arith.constant 0.000000e+00 : f32
    %138 = vector.broadcast %cst_55 : f32 to vector<1x64xf32>
    %139 = arith.maximumf %137, %138 : vector<1x64xf32>
    %c0_56 = arith.constant 0 : index
    %c0_57 = arith.constant 0 : index
    %c0_58 = arith.constant 0 : index
    %140 = vector.load %arg4[%c0_56, %c0_57, %c0_58] : memref<1x16x64xf32, #tpu.memory_space<vmem>>, vector<1x1x64xf32>
    %141 = vector.shape_cast %140 : vector<1x1x64xf32> to vector<1x64xf32>
    %142 = vector.shape_cast %139 : vector<1x64xf32> to vector<1x1x64xf32>
    tpu.vector_store %arg4[%c0_56, %c0_57, %c0_58], %142 {strides = array<i32>} : memref<1x16x64xf32, #tpu.memory_space<vmem>>, vector<1x1x64xf32>,
    %143 = arith.subf %10, %83 : vector<1x64xf32>
    %144 = arith.mulf %143, %135 : vector<1x64xf32>
    %cst_59 = arith.constant 0.000000e+00 : f32
    %145 = vector.broadcast %cst_59 : f32 to vector<1x64xf32>
    %146 = arith.maximumf %144, %145 : vector<1x64xf32>
    %c0_60 = arith.constant 0 : index
    %c1_61 = arith.constant 1 : index
    %c0_62 = arith.constant 0 : index
    %147 = vector.load %arg4[%c0_60, %c1_61, %c0_62] : memref<1x16x64xf32, #tpu.memory_space<vmem>>, vector<1x1x64xf32>
    %148 = vector.shape_cast %147 : vector<1x1x64xf32> to vector<1x64xf32>
    %149 = vector.shape_cast %146 : vector<1x64xf32> to vector<1x1x64xf32>
    tpu.vector_store %arg4[%c0_60, %c1_61, %c0_62], %149 {strides = array<i32>} : memref<1x16x64xf32, #tpu.memory_space<vmem>>, vector<1x1x64xf32>,
    %150 = arith.subf %14, %83 : vector<1x64xf32>
    %151 = arith.mulf %150, %135 : vector<1x64xf32>
    %cst_63 = arith.constant 0.000000e+00 : f32
    %152 = vector.broadcast %cst_63 : f32 to vector<1x64xf32>
    %153 = arith.maximumf %151, %152 : vector<1x64xf32>
    %c0_64 = arith.constant 0 : index
    %c2_65 = arith.constant 2 : index
    %c0_66 = arith.constant 0 : index
    %154 = vector.load %arg4[%c0_64, %c2_65, %c0_66] : memref<1x16x64xf32, #tpu.memory_space<vmem>>, vector<1x1x64xf32>
    %155 = vector.shape_cast %154 : vector<1x1x64xf32> to vector<1x64xf32>
    %156 = vector.shape_cast %153 : vector<1x64xf32> to vector<1x1x64xf32>
    tpu.vector_store %arg4[%c0_64, %c2_65, %c0_66], %156 {strides = array<i32>} : memref<1x16x64xf32, #tpu.memory_space<vmem>>, vector<1x1x64xf32>,
    %157 = arith.subf %18, %83 : vector<1x64xf32>
    %158 = arith.mulf %157, %135 : vector<1x64xf32>
    %cst_67 = arith.constant 0.000000e+00 : f32
    %159 = vector.broadcast %cst_67 : f32 to vector<1x64xf32>
    %160 = arith.maximumf %158, %159 : vector<1x64xf32>
    %c0_68 = arith.constant 0 : index
    %c3_69 = arith.constant 3 : index
    %c0_70 = arith.constant 0 : index
    %161 = vector.load %arg4[%c0_68, %c3_69, %c0_70] : memref<1x16x64xf32, #tpu.memory_space<vmem>>, vector<1x1x64xf32>
    %162 = vector.shape_cast %161 : vector<1x1x64xf32> to vector<1x64xf32>
    %163 = vector.shape_cast %160 : vector<1x64xf32> to vector<1x1x64xf32>
    tpu.vector_store %arg4[%c0_68, %c3_69, %c0_70], %163 {strides = array<i32>} : memref<1x16x64xf32, #tpu.memory_space<vmem>>, vector<1x1x64xf32>,
    %164 = arith.subf %22, %83 : vector<1x64xf32>
    %165 = arith.mulf %164, %135 : vector<1x64xf32>
    %cst_71 = arith.constant 0.000000e+00 : f32
    %166 = vector.broadcast %cst_71 : f32 to vector<1x64xf32>
    %167 = arith.maximumf %165, %166 : vector<1x64xf32>
    %c0_72 = arith.constant 0 : index
    %c4_73 = arith.constant 4 : index
    %c0_74 = arith.constant 0 : index
    %168 = vector.load %arg4[%c0_72, %c4_73, %c0_74] : memref<1x16x64xf32, #tpu.memory_space<vmem>>, vector<1x1x64xf32>
    %169 = vector.shape_cast %168 : vector<1x1x64xf32> to vector<1x64xf32>
    %170 = vector.shape_cast %167 : vector<1x64xf32> to vector<1x1x64xf32>
    tpu.vector_store %arg4[%c0_72, %c4_73, %c0_74], %170 {strides = array<i32>} : memref<1x16x64xf32, #tpu.memory_space<vmem>>, vector<1x1x64xf32>,
    %171 = arith.subf %26, %83 : vector<1x64xf32>
    %172 = arith.mulf %171, %135 : vector<1x64xf32>
    %cst_75 = arith.constant 0.000000e+00 : f32
    %173 = vector.broadcast %cst_75 : f32 to vector<1x64xf32>
    %174 = arith.maximumf %172, %173 : vector<1x64xf32>
    %c0_76 = arith.constant 0 : index
    %c5_77 = arith.constant 5 : index
    %c0_78 = arith.constant 0 : index
    %175 = vector.load %arg4[%c0_76, %c5_77, %c0_78] : memref<1x16x64xf32, #tpu.memory_space<vmem>>, vector<1x1x64xf32>
    %176 = vector.shape_cast %175 : vector<1x1x64xf32> to vector<1x64xf32>
    %177 = vector.shape_cast %174 : vector<1x64xf32> to vector<1x1x64xf32>
    tpu.vector_store %arg4[%c0_76, %c5_77, %c0_78], %177 {strides = array<i32>} : memref<1x16x64xf32, #tpu.memory_space<vmem>>, vector<1x1x64xf32>,
    %178 = arith.subf %30, %83 : vector<1x64xf32>
    %179 = arith.mulf %178, %135 : vector<1x64xf32>
    %cst_79 = arith.constant 0.000000e+00 : f32
    %180 = vector.broadcast %cst_79 : f32 to vector<1x64xf32>
    %181 = arith.maximumf %179, %180 : vector<1x64xf32>
    %c0_80 = arith.constant 0 : index
    %c6_81 = arith.constant 6 : index
    %c0_82 = arith.constant 0 : index
    %182 = vector.load %arg4[%c0_80, %c6_81, %c0_82] : memref<1x16x64xf32, #tpu.memory_space<vmem>>, vector<1x1x64xf32>
    %183 = vector.shape_cast %182 : vector<1x1x64xf32> to vector<1x64xf32>
    %184 = vector.shape_cast %181 : vector<1x64xf32> to vector<1x1x64xf32>
    tpu.vector_store %arg4[%c0_80, %c6_81, %c0_82], %184 {strides = array<i32>} : memref<1x16x64xf32, #tpu.memory_space<vmem>>, vector<1x1x64xf32>,
    %185 = arith.subf %34, %83 : vector<1x64xf32>
    %186 = arith.mulf %185, %135 : vector<1x64xf32>
    %cst_83 = arith.constant 0.000000e+00 : f32
    %187 = vector.broadcast %cst_83 : f32 to vector<1x64xf32>
    %188 = arith.maximumf %186, %187 : vector<1x64xf32>
    %c0_84 = arith.constant 0 : index
    %c7_85 = arith.constant 7 : index
    %c0_86 = arith.constant 0 : index
    %189 = vector.load %arg4[%c0_84, %c7_85, %c0_86] : memref<1x16x64xf32, #tpu.memory_space<vmem>>, vector<1x1x64xf32>
    %190 = vector.shape_cast %189 : vector<1x1x64xf32> to vector<1x64xf32>
    %191 = vector.shape_cast %188 : vector<1x64xf32> to vector<1x1x64xf32>
    tpu.vector_store %arg4[%c0_84, %c7_85, %c0_86], %191 {strides = array<i32>} : memref<1x16x64xf32, #tpu.memory_space<vmem>>, vector<1x1x64xf32>,
    %192 = arith.subf %38, %83 : vector<1x64xf32>
    %193 = arith.mulf %192, %135 : vector<1x64xf32>
    %cst_87 = arith.constant 0.000000e+00 : f32
    %194 = vector.broadcast %cst_87 : f32 to vector<1x64xf32>
    %195 = arith.maximumf %193, %194 : vector<1x64xf32>
    %c0_88 = arith.constant 0 : index
    %c8_89 = arith.constant 8 : index
    %c0_90 = arith.constant 0 : index
    %196 = vector.load %arg4[%c0_88, %c8_89, %c0_90] : memref<1x16x64xf32, #tpu.memory_space<vmem>>, vector<1x1x64xf32>
    %197 = vector.shape_cast %196 : vector<1x1x64xf32> to vector<1x64xf32>
    %198 = vector.shape_cast %195 : vector<1x64xf32> to vector<1x1x64xf32>
    tpu.vector_store %arg4[%c0_88, %c8_89, %c0_90], %198 {strides = array<i32>} : memref<1x16x64xf32, #tpu.memory_space<vmem>>, vector<1x1x64xf32>,
    %199 = arith.subf %42, %83 : vector<1x64xf32>
    %200 = arith.mulf %199, %135 : vector<1x64xf32>
    %cst_91 = arith.constant 0.000000e+00 : f32
    %201 = vector.broadcast %cst_91 : f32 to vector<1x64xf32>
    %202 = arith.maximumf %200, %201 : vector<1x64xf32>
    %c0_92 = arith.constant 0 : index
    %c9_93 = arith.constant 9 : index
    %c0_94 = arith.constant 0 : index
    %203 = vector.load %arg4[%c0_92, %c9_93, %c0_94] : memref<1x16x64xf32, #tpu.memory_space<vmem>>, vector<1x1x64xf32>
    %204 = vector.shape_cast %203 : vector<1x1x64xf32> to vector<1x64xf32>
    %205 = vector.shape_cast %202 : vector<1x64xf32> to vector<1x1x64xf32>
    tpu.vector_store %arg4[%c0_92, %c9_93, %c0_94], %205 {strides = array<i32>} : memref<1x16x64xf32, #tpu.memory_space<vmem>>, vector<1x1x64xf32>,
    %206 = arith.subf %46, %83 : vector<1x64xf32>
    %207 = arith.mulf %206, %135 : vector<1x64xf32>
    %cst_95 = arith.constant 0.000000e+00 : f32
    %208 = vector.broadcast %cst_95 : f32 to vector<1x64xf32>
    %209 = arith.maximumf %207, %208 : vector<1x64xf32>
    %c0_96 = arith.constant 0 : index
    %c10_97 = arith.constant 10 : index
    %c0_98 = arith.constant 0 : index
    %210 = vector.load %arg4[%c0_96, %c10_97, %c0_98] : memref<1x16x64xf32, #tpu.memory_space<vmem>>, vector<1x1x64xf32>
    %211 = vector.shape_cast %210 : vector<1x1x64xf32> to vector<1x64xf32>
    %212 = vector.shape_cast %209 : vector<1x64xf32> to vector<1x1x64xf32>
    tpu.vector_store %arg4[%c0_96, %c10_97, %c0_98], %212 {strides = array<i32>} : memref<1x16x64xf32, #tpu.memory_space<vmem>>, vector<1x1x64xf32>,
    %213 = arith.subf %50, %83 : vector<1x64xf32>
    %214 = arith.mulf %213, %135 : vector<1x64xf32>
    %cst_99 = arith.constant 0.000000e+00 : f32
    %215 = vector.broadcast %cst_99 : f32 to vector<1x64xf32>
    %216 = arith.maximumf %214, %215 : vector<1x64xf32>
    %c0_100 = arith.constant 0 : index
    %c11_101 = arith.constant 11 : index
    %c0_102 = arith.constant 0 : index
    %217 = vector.load %arg4[%c0_100, %c11_101, %c0_102] : memref<1x16x64xf32, #tpu.memory_space<vmem>>, vector<1x1x64xf32>
    %218 = vector.shape_cast %217 : vector<1x1x64xf32> to vector<1x64xf32>
    %219 = vector.shape_cast %216 : vector<1x64xf32> to vector<1x1x64xf32>
    tpu.vector_store %arg4[%c0_100, %c11_101, %c0_102], %219 {strides = array<i32>} : memref<1x16x64xf32, #tpu.memory_space<vmem>>, vector<1x1x64xf32>,
    %220 = arith.subf %54, %83 : vector<1x64xf32>
    %221 = arith.mulf %220, %135 : vector<1x64xf32>
    %cst_103 = arith.constant 0.000000e+00 : f32
    %222 = vector.broadcast %cst_103 : f32 to vector<1x64xf32>
    %223 = arith.maximumf %221, %222 : vector<1x64xf32>
    %c0_104 = arith.constant 0 : index
    %c12_105 = arith.constant 12 : index
    %c0_106 = arith.constant 0 : index
    %224 = vector.load %arg4[%c0_104, %c12_105, %c0_106] : memref<1x16x64xf32, #tpu.memory_space<vmem>>, vector<1x1x64xf32>
    %225 = vector.shape_cast %224 : vector<1x1x64xf32> to vector<1x64xf32>
    %226 = vector.shape_cast %223 : vector<1x64xf32> to vector<1x1x64xf32>
    tpu.vector_store %arg4[%c0_104, %c12_105, %c0_106], %226 {strides = array<i32>} : memref<1x16x64xf32, #tpu.memory_space<vmem>>, vector<1x1x64xf32>,
    %227 = arith.subf %58, %83 : vector<1x64xf32>
    %228 = arith.mulf %227, %135 : vector<1x64xf32>
    %cst_107 = arith.constant 0.000000e+00 : f32
    %229 = vector.broadcast %cst_107 : f32 to vector<1x64xf32>
    %230 = arith.maximumf %228, %229 : vector<1x64xf32>
    %c0_108 = arith.constant 0 : index
    %c13_109 = arith.constant 13 : index
    %c0_110 = arith.constant 0 : index
    %231 = vector.load %arg4[%c0_108, %c13_109, %c0_110] : memref<1x16x64xf32, #tpu.memory_space<vmem>>, vector<1x1x64xf32>
    %232 = vector.shape_cast %231 : vector<1x1x64xf32> to vector<1x64xf32>
    %233 = vector.shape_cast %230 : vector<1x64xf32> to vector<1x1x64xf32>
    tpu.vector_store %arg4[%c0_108, %c13_109, %c0_110], %233 {strides = array<i32>} : memref<1x16x64xf32, #tpu.memory_space<vmem>>, vector<1x1x64xf32>,
    %234 = arith.subf %62, %83 : vector<1x64xf32>
    %235 = arith.mulf %234, %135 : vector<1x64xf32>
    %cst_111 = arith.constant 0.000000e+00 : f32
    %236 = vector.broadcast %cst_111 : f32 to vector<1x64xf32>
    %237 = arith.maximumf %235, %236 : vector<1x64xf32>
    %c0_112 = arith.constant 0 : index
    %c14_113 = arith.constant 14 : index
    %c0_114 = arith.constant 0 : index
    %238 = vector.load %arg4[%c0_112, %c14_113, %c0_114] : memref<1x16x64xf32, #tpu.memory_space<vmem>>, vector<1x1x64xf32>
    %239 = vector.shape_cast %238 : vector<1x1x64xf32> to vector<1x64xf32>
    %240 = vector.shape_cast %237 : vector<1x64xf32> to vector<1x1x64xf32>
    tpu.vector_store %arg4[%c0_112, %c14_113, %c0_114], %240 {strides = array<i32>} : memref<1x16x64xf32, #tpu.memory_space<vmem>>, vector<1x1x64xf32>,
    %241 = arith.subf %66, %83 : vector<1x64xf32>
    %242 = arith.mulf %241, %135 : vector<1x64xf32>
    %cst_115 = arith.constant 0.000000e+00 : f32
    %243 = vector.broadcast %cst_115 : f32 to vector<1x64xf32>
    %244 = arith.maximumf %242, %243 : vector<1x64xf32>
    %c0_116 = arith.constant 0 : index
    %c15_117 = arith.constant 15 : index
    %c0_118 = arith.constant 0 : index
    %245 = vector.load %arg4[%c0_116, %c15_117, %c0_118] : memref<1x16x64xf32, #tpu.memory_space<vmem>>, vector<1x1x64xf32>
    %246 = vector.shape_cast %245 : vector<1x1x64xf32> to vector<1x64xf32>
    %247 = vector.shape_cast %244 : vector<1x64xf32> to vector<1x1x64xf32>
    tpu.vector_store %arg4[%c0_116, %c15_117, %c0_118], %247 {strides = array<i32>} : memref<1x16x64xf32, #tpu.memory_space<vmem>>, vector<1x1x64xf32>,
    return
  }
  func.func @transform_0(%arg0: i32) -> (i32, i32, i32) {
    %c0_i32 = arith.constant 0 : i32
    %c0_i32_0 = arith.constant 0 : i32
    %c0_i32_1 = arith.constant 0 : i32
    return %arg0, %c0_i32, %c0_i32_0 : i32, i32, i32
  }
  func.func @transform_1(%arg0: i32) -> (i32, i32, i32) {
    %c0_i32 = arith.constant 0 : i32
    %c0_i32_0 = arith.constant 0 : i32
    %c0_i32_1 = arith.constant 0 : i32
    %c0_i32_2 = arith.constant 0 : i32
    return %c0_i32, %c0_i32_0, %c0_i32_1 : i32, i32, i32
  }
  func.func @transform_2(%arg0: i32) -> (i32, i32) {
    %c0_i32 = arith.constant 0 : i32
    %c0_i32_0 = arith.constant 0 : i32
    %c0_i32_1 = arith.constant 0 : i32
    return %c0_i32, %c0_i32_0 : i32, i32
  }
  func.func @transform_3(%arg0: i32) -> (i32, i32, i32) {
    %c0_i32 = arith.constant 0 : i32
    %c0_i32_0 = arith.constant 0 : i32
    %c0_i32_1 = arith.constant 0 : i32
    return %arg0, %c0_i32, %c0_i32_0 : i32, i32, i32
  }
}

module attributes {stable_mosaic.version = 11 : i64} {
  func.func @kernel(%arg0: i32, %arg1: memref<1x9x64x16xf32, #tpu.memory_space<vmem>>, %arg2: memref<16x32x64xf32, #tpu.memory_space<vmem>>, %arg3: memref<32x1xf32, #tpu.memory_space<vmem>>, %arg4: memref<1x4x32x16xf32, #tpu.memory_space<vmem>>) attributes {dimension_semantics = [#tpu.dimension_semantics<parallel>], iteration_bounds = array<i64: 2>, scalar_prefetch = 0 : i64, scratch_operands = 0 : i64, tpu.core_type = #tpu.core_type<tc>, window_params = [{transform_indices = @transform_0, window_bounds = array<i64: 1, 9, 64, 16>}, {pipeline_mode = #tpu.pipeline_mode<synchronous>, transform_indices = @transform_1, window_bounds = array<i64: 16, 32, 64>}, {pipeline_mode = #tpu.pipeline_mode<synchronous>, transform_indices = @transform_2, window_bounds = array<i64: 32, 1>}, {transform_indices = @transform_3, window_bounds = array<i64: 1, 4, 32, 16>}]} {
    %c0 = arith.constant 0 : index
    %c0_0 = arith.constant 0 : index
    %0 = vector.load %arg3[%c0, %c0_0] : memref<32x1xf32, #tpu.memory_space<vmem>>, vector<32x1xf32>
    %c0_1 = arith.constant 0 : index
    %c0_2 = arith.constant 0 : index
    %c0_3 = arith.constant 0 : index
    %1 = vector.load %arg2[%c0_1, %c0_2, %c0_3] : memref<16x32x64xf32, #tpu.memory_space<vmem>>, vector<1x32x64xf32>
    %2 = vector.shape_cast %1 : vector<1x32x64xf32> to vector<32x64xf32>
    %c0_4 = arith.constant 0 : index
    %c0_5 = arith.constant 0 : index
    %c0_6 = arith.constant 0 : index
    %c0_7 = arith.constant 0 : index
    %3 = vector.load %arg1[%c0_4, %c0_5, %c0_6, %c0_7] : memref<1x9x64x16xf32, #tpu.memory_space<vmem>>, vector<1x1x64x16xf32>
    %4 = vector.shape_cast %3 : vector<1x1x64x16xf32> to vector<64x16xf32>
    %cst = arith.constant dense<0.000000e+00> : vector<32x16xf32>
    %5 = tpu.matmul %2, %4, %cst {dimension_numbers = #tpu.dot_dimension_numbers<[1], [0], [0], [1], [0, 0, 1, 1], [], []>} : vector<32x64xf32>, vector<64x16xf32>, vector<32x16xf32> -> vector<32x16xf32>
    %c1 = arith.constant 1 : index
    %c0_8 = arith.constant 0 : index
    %c0_9 = arith.constant 0 : index
    %6 = vector.load %arg2[%c1, %c0_8, %c0_9] : memref<16x32x64xf32, #tpu.memory_space<vmem>>, vector<1x32x64xf32>
    %7 = vector.shape_cast %6 : vector<1x32x64xf32> to vector<32x64xf32>
    %c0_10 = arith.constant 0 : index
    %c1_11 = arith.constant 1 : index
    %c0_12 = arith.constant 0 : index
    %c0_13 = arith.constant 0 : index
    %8 = vector.load %arg1[%c0_10, %c1_11, %c0_12, %c0_13] : memref<1x9x64x16xf32, #tpu.memory_space<vmem>>, vector<1x1x64x16xf32>
    %9 = vector.shape_cast %8 : vector<1x1x64x16xf32> to vector<64x16xf32>
    %cst_14 = arith.constant dense<0.000000e+00> : vector<32x16xf32>
    %10 = tpu.matmul %7, %9, %cst_14 {dimension_numbers = #tpu.dot_dimension_numbers<[1], [0], [0], [1], [0, 0, 1, 1], [], []>} : vector<32x64xf32>, vector<64x16xf32>, vector<32x16xf32> -> vector<32x16xf32>
    %11 = arith.addf %5, %10 : vector<32x16xf32>
    %c2 = arith.constant 2 : index
    %c0_15 = arith.constant 0 : index
    %c0_16 = arith.constant 0 : index
    %12 = vector.load %arg2[%c2, %c0_15, %c0_16] : memref<16x32x64xf32, #tpu.memory_space<vmem>>, vector<1x32x64xf32>
    %13 = vector.shape_cast %12 : vector<1x32x64xf32> to vector<32x64xf32>
    %c0_17 = arith.constant 0 : index
    %c3 = arith.constant 3 : index
    %c0_18 = arith.constant 0 : index
    %c0_19 = arith.constant 0 : index
    %14 = vector.load %arg1[%c0_17, %c3, %c0_18, %c0_19] : memref<1x9x64x16xf32, #tpu.memory_space<vmem>>, vector<1x1x64x16xf32>
    %15 = vector.shape_cast %14 : vector<1x1x64x16xf32> to vector<64x16xf32>
    %cst_20 = arith.constant dense<0.000000e+00> : vector<32x16xf32>
    %16 = tpu.matmul %13, %15, %cst_20 {dimension_numbers = #tpu.dot_dimension_numbers<[1], [0], [0], [1], [0, 0, 1, 1], [], []>} : vector<32x64xf32>, vector<64x16xf32>, vector<32x16xf32> -> vector<32x16xf32>
    %17 = arith.addf %11, %16 : vector<32x16xf32>
    %c3_21 = arith.constant 3 : index
    %c0_22 = arith.constant 0 : index
    %c0_23 = arith.constant 0 : index
    %18 = vector.load %arg2[%c3_21, %c0_22, %c0_23] : memref<16x32x64xf32, #tpu.memory_space<vmem>>, vector<1x32x64xf32>
    %19 = vector.shape_cast %18 : vector<1x32x64xf32> to vector<32x64xf32>
    %c0_24 = arith.constant 0 : index
    %c4 = arith.constant 4 : index
    %c0_25 = arith.constant 0 : index
    %c0_26 = arith.constant 0 : index
    %20 = vector.load %arg1[%c0_24, %c4, %c0_25, %c0_26] : memref<1x9x64x16xf32, #tpu.memory_space<vmem>>, vector<1x1x64x16xf32>
    %21 = vector.shape_cast %20 : vector<1x1x64x16xf32> to vector<64x16xf32>
    %cst_27 = arith.constant dense<0.000000e+00> : vector<32x16xf32>
    %22 = tpu.matmul %19, %21, %cst_27 {dimension_numbers = #tpu.dot_dimension_numbers<[1], [0], [0], [1], [0, 0, 1, 1], [], []>} : vector<32x64xf32>, vector<64x16xf32>, vector<32x16xf32> -> vector<32x16xf32>
    %23 = arith.addf %17, %22 : vector<32x16xf32>
    %24 = vector.broadcast %0 : vector<32x1xf32> to vector<32x16xf32>
    %25 = arith.addf %23, %24 : vector<32x16xf32>
    %c4_28 = arith.constant 4 : index
    %c0_29 = arith.constant 0 : index
    %c0_30 = arith.constant 0 : index
    %26 = vector.load %arg2[%c4_28, %c0_29, %c0_30] : memref<16x32x64xf32, #tpu.memory_space<vmem>>, vector<1x32x64xf32>
    %27 = vector.shape_cast %26 : vector<1x32x64xf32> to vector<32x64xf32>
    %c0_31 = arith.constant 0 : index
    %c1_32 = arith.constant 1 : index
    %c0_33 = arith.constant 0 : index
    %c0_34 = arith.constant 0 : index
    %28 = vector.load %arg1[%c0_31, %c1_32, %c0_33, %c0_34] : memref<1x9x64x16xf32, #tpu.memory_space<vmem>>, vector<1x1x64x16xf32>
    %29 = vector.shape_cast %28 : vector<1x1x64x16xf32> to vector<64x16xf32>
    %cst_35 = arith.constant dense<0.000000e+00> : vector<32x16xf32>
    %30 = tpu.matmul %27, %29, %cst_35 {dimension_numbers = #tpu.dot_dimension_numbers<[1], [0], [0], [1], [0, 0, 1, 1], [], []>} : vector<32x64xf32>, vector<64x16xf32>, vector<32x16xf32> -> vector<32x16xf32>
    %c5 = arith.constant 5 : index
    %c0_36 = arith.constant 0 : index
    %c0_37 = arith.constant 0 : index
    %31 = vector.load %arg2[%c5, %c0_36, %c0_37] : memref<16x32x64xf32, #tpu.memory_space<vmem>>, vector<1x32x64xf32>
    %32 = vector.shape_cast %31 : vector<1x32x64xf32> to vector<32x64xf32>
    %c0_38 = arith.constant 0 : index
    %c2_39 = arith.constant 2 : index
    %c0_40 = arith.constant 0 : index
    %c0_41 = arith.constant 0 : index
    %33 = vector.load %arg1[%c0_38, %c2_39, %c0_40, %c0_41] : memref<1x9x64x16xf32, #tpu.memory_space<vmem>>, vector<1x1x64x16xf32>
    %34 = vector.shape_cast %33 : vector<1x1x64x16xf32> to vector<64x16xf32>
    %cst_42 = arith.constant dense<0.000000e+00> : vector<32x16xf32>
    %35 = tpu.matmul %32, %34, %cst_42 {dimension_numbers = #tpu.dot_dimension_numbers<[1], [0], [0], [1], [0, 0, 1, 1], [], []>} : vector<32x64xf32>, vector<64x16xf32>, vector<32x16xf32> -> vector<32x16xf32>
    %36 = arith.addf %30, %35 : vector<32x16xf32>
    %c6 = arith.constant 6 : index
    %c0_43 = arith.constant 0 : index
    %c0_44 = arith.constant 0 : index
    %37 = vector.load %arg2[%c6, %c0_43, %c0_44] : memref<16x32x64xf32, #tpu.memory_space<vmem>>, vector<1x32x64xf32>
    %38 = vector.shape_cast %37 : vector<1x32x64xf32> to vector<32x64xf32>
    %c0_45 = arith.constant 0 : index
    %c4_46 = arith.constant 4 : index
    %c0_47 = arith.constant 0 : index
    %c0_48 = arith.constant 0 : index
    %39 = vector.load %arg1[%c0_45, %c4_46, %c0_47, %c0_48] : memref<1x9x64x16xf32, #tpu.memory_space<vmem>>, vector<1x1x64x16xf32>
    %40 = vector.shape_cast %39 : vector<1x1x64x16xf32> to vector<64x16xf32>
    %cst_49 = arith.constant dense<0.000000e+00> : vector<32x16xf32>
    %41 = tpu.matmul %38, %40, %cst_49 {dimension_numbers = #tpu.dot_dimension_numbers<[1], [0], [0], [1], [0, 0, 1, 1], [], []>} : vector<32x64xf32>, vector<64x16xf32>, vector<32x16xf32> -> vector<32x16xf32>
    %42 = arith.addf %36, %41 : vector<32x16xf32>
    %c7 = arith.constant 7 : index
    %c0_50 = arith.constant 0 : index
    %c0_51 = arith.constant 0 : index
    %43 = vector.load %arg2[%c7, %c0_50, %c0_51] : memref<16x32x64xf32, #tpu.memory_space<vmem>>, vector<1x32x64xf32>
    %44 = vector.shape_cast %43 : vector<1x32x64xf32> to vector<32x64xf32>
    %c0_52 = arith.constant 0 : index
    %c5_53 = arith.constant 5 : index
    %c0_54 = arith.constant 0 : index
    %c0_55 = arith.constant 0 : index
    %45 = vector.load %arg1[%c0_52, %c5_53, %c0_54, %c0_55] : memref<1x9x64x16xf32, #tpu.memory_space<vmem>>, vector<1x1x64x16xf32>
    %46 = vector.shape_cast %45 : vector<1x1x64x16xf32> to vector<64x16xf32>
    %cst_56 = arith.constant dense<0.000000e+00> : vector<32x16xf32>
    %47 = tpu.matmul %44, %46, %cst_56 {dimension_numbers = #tpu.dot_dimension_numbers<[1], [0], [0], [1], [0, 0, 1, 1], [], []>} : vector<32x64xf32>, vector<64x16xf32>, vector<32x16xf32> -> vector<32x16xf32>
    %48 = arith.addf %42, %47 : vector<32x16xf32>
    %49 = vector.broadcast %0 : vector<32x1xf32> to vector<32x16xf32>
    %50 = arith.addf %48, %49 : vector<32x16xf32>
    %c8 = arith.constant 8 : index
    %c0_57 = arith.constant 0 : index
    %c0_58 = arith.constant 0 : index
    %51 = vector.load %arg2[%c8, %c0_57, %c0_58] : memref<16x32x64xf32, #tpu.memory_space<vmem>>, vector<1x32x64xf32>
    %52 = vector.shape_cast %51 : vector<1x32x64xf32> to vector<32x64xf32>
    %c0_59 = arith.constant 0 : index
    %c3_60 = arith.constant 3 : index
    %c0_61 = arith.constant 0 : index
    %c0_62 = arith.constant 0 : index
    %53 = vector.load %arg1[%c0_59, %c3_60, %c0_61, %c0_62] : memref<1x9x64x16xf32, #tpu.memory_space<vmem>>, vector<1x1x64x16xf32>
    %54 = vector.shape_cast %53 : vector<1x1x64x16xf32> to vector<64x16xf32>
    %cst_63 = arith.constant dense<0.000000e+00> : vector<32x16xf32>
    %55 = tpu.matmul %52, %54, %cst_63 {dimension_numbers = #tpu.dot_dimension_numbers<[1], [0], [0], [1], [0, 0, 1, 1], [], []>} : vector<32x64xf32>, vector<64x16xf32>, vector<32x16xf32> -> vector<32x16xf32>
    %c9 = arith.constant 9 : index
    %c0_64 = arith.constant 0 : index
    %c0_65 = arith.constant 0 : index
    %56 = vector.load %arg2[%c9, %c0_64, %c0_65] : memref<16x32x64xf32, #tpu.memory_space<vmem>>, vector<1x32x64xf32>
    %57 = vector.shape_cast %56 : vector<1x32x64xf32> to vector<32x64xf32>
    %c0_66 = arith.constant 0 : index
    %c4_67 = arith.constant 4 : index
    %c0_68 = arith.constant 0 : index
    %c0_69 = arith.constant 0 : index
    %58 = vector.load %arg1[%c0_66, %c4_67, %c0_68, %c0_69] : memref<1x9x64x16xf32, #tpu.memory_space<vmem>>, vector<1x1x64x16xf32>
    %59 = vector.shape_cast %58 : vector<1x1x64x16xf32> to vector<64x16xf32>
    %cst_70 = arith.constant dense<0.000000e+00> : vector<32x16xf32>
    %60 = tpu.matmul %57, %59, %cst_70 {dimension_numbers = #tpu.dot_dimension_numbers<[1], [0], [0], [1], [0, 0, 1, 1], [], []>} : vector<32x64xf32>, vector<64x16xf32>, vector<32x16xf32> -> vector<32x16xf32>
    %61 = arith.addf %55, %60 : vector<32x16xf32>
    %c10 = arith.constant 10 : index
    %c0_71 = arith.constant 0 : index
    %c0_72 = arith.constant 0 : index
    %62 = vector.load %arg2[%c10, %c0_71, %c0_72] : memref<16x32x64xf32, #tpu.memory_space<vmem>>, vector<1x32x64xf32>
    %63 = vector.shape_cast %62 : vector<1x32x64xf32> to vector<32x64xf32>
    %c0_73 = arith.constant 0 : index
    %c6_74 = arith.constant 6 : index
    %c0_75 = arith.constant 0 : index
    %c0_76 = arith.constant 0 : index
    %64 = vector.load %arg1[%c0_73, %c6_74, %c0_75, %c0_76] : memref<1x9x64x16xf32, #tpu.memory_space<vmem>>, vector<1x1x64x16xf32>
    %65 = vector.shape_cast %64 : vector<1x1x64x16xf32> to vector<64x16xf32>
    %cst_77 = arith.constant dense<0.000000e+00> : vector<32x16xf32>
    %66 = tpu.matmul %63, %65, %cst_77 {dimension_numbers = #tpu.dot_dimension_numbers<[1], [0], [0], [1], [0, 0, 1, 1], [], []>} : vector<32x64xf32>, vector<64x16xf32>, vector<32x16xf32> -> vector<32x16xf32>
    %67 = arith.addf %61, %66 : vector<32x16xf32>
    %c11 = arith.constant 11 : index
    %c0_78 = arith.constant 0 : index
    %c0_79 = arith.constant 0 : index
    %68 = vector.load %arg2[%c11, %c0_78, %c0_79] : memref<16x32x64xf32, #tpu.memory_space<vmem>>, vector<1x32x64xf32>
    %69 = vector.shape_cast %68 : vector<1x32x64xf32> to vector<32x64xf32>
    %c0_80 = arith.constant 0 : index
    %c7_81 = arith.constant 7 : index
    %c0_82 = arith.constant 0 : index
    %c0_83 = arith.constant 0 : index
    %70 = vector.load %arg1[%c0_80, %c7_81, %c0_82, %c0_83] : memref<1x9x64x16xf32, #tpu.memory_space<vmem>>, vector<1x1x64x16xf32>
    %71 = vector.shape_cast %70 : vector<1x1x64x16xf32> to vector<64x16xf32>
    %cst_84 = arith.constant dense<0.000000e+00> : vector<32x16xf32>
    %72 = tpu.matmul %69, %71, %cst_84 {dimension_numbers = #tpu.dot_dimension_numbers<[1], [0], [0], [1], [0, 0, 1, 1], [], []>} : vector<32x64xf32>, vector<64x16xf32>, vector<32x16xf32> -> vector<32x16xf32>
    %73 = arith.addf %67, %72 : vector<32x16xf32>
    %74 = vector.broadcast %0 : vector<32x1xf32> to vector<32x16xf32>
    %75 = arith.addf %73, %74 : vector<32x16xf32>
    %c12 = arith.constant 12 : index
    %c0_85 = arith.constant 0 : index
    %c0_86 = arith.constant 0 : index
    %76 = vector.load %arg2[%c12, %c0_85, %c0_86] : memref<16x32x64xf32, #tpu.memory_space<vmem>>, vector<1x32x64xf32>
    %77 = vector.shape_cast %76 : vector<1x32x64xf32> to vector<32x64xf32>
    %c0_87 = arith.constant 0 : index
    %c4_88 = arith.constant 4 : index
    %c0_89 = arith.constant 0 : index
    %c0_90 = arith.constant 0 : index
    %78 = vector.load %arg1[%c0_87, %c4_88, %c0_89, %c0_90] : memref<1x9x64x16xf32, #tpu.memory_space<vmem>>, vector<1x1x64x16xf32>
    %79 = vector.shape_cast %78 : vector<1x1x64x16xf32> to vector<64x16xf32>
    %cst_91 = arith.constant dense<0.000000e+00> : vector<32x16xf32>
    %80 = tpu.matmul %77, %79, %cst_91 {dimension_numbers = #tpu.dot_dimension_numbers<[1], [0], [0], [1], [0, 0, 1, 1], [], []>} : vector<32x64xf32>, vector<64x16xf32>, vector<32x16xf32> -> vector<32x16xf32>
    %c13 = arith.constant 13 : index
    %c0_92 = arith.constant 0 : index
    %c0_93 = arith.constant 0 : index
    %81 = vector.load %arg2[%c13, %c0_92, %c0_93] : memref<16x32x64xf32, #tpu.memory_space<vmem>>, vector<1x32x64xf32>
    %82 = vector.shape_cast %81 : vector<1x32x64xf32> to vector<32x64xf32>
    %c0_94 = arith.constant 0 : index
    %c5_95 = arith.constant 5 : index
    %c0_96 = arith.constant 0 : index
    %c0_97 = arith.constant 0 : index
    %83 = vector.load %arg1[%c0_94, %c5_95, %c0_96, %c0_97] : memref<1x9x64x16xf32, #tpu.memory_space<vmem>>, vector<1x1x64x16xf32>
    %84 = vector.shape_cast %83 : vector<1x1x64x16xf32> to vector<64x16xf32>
    %cst_98 = arith.constant dense<0.000000e+00> : vector<32x16xf32>
    %85 = tpu.matmul %82, %84, %cst_98 {dimension_numbers = #tpu.dot_dimension_numbers<[1], [0], [0], [1], [0, 0, 1, 1], [], []>} : vector<32x64xf32>, vector<64x16xf32>, vector<32x16xf32> -> vector<32x16xf32>
    %86 = arith.addf %80, %85 : vector<32x16xf32>
    %c14 = arith.constant 14 : index
    %c0_99 = arith.constant 0 : index
    %c0_100 = arith.constant 0 : index
    %87 = vector.load %arg2[%c14, %c0_99, %c0_100] : memref<16x32x64xf32, #tpu.memory_space<vmem>>, vector<1x32x64xf32>
    %88 = vector.shape_cast %87 : vector<1x32x64xf32> to vector<32x64xf32>
    %c0_101 = arith.constant 0 : index
    %c7_102 = arith.constant 7 : index
    %c0_103 = arith.constant 0 : index
    %c0_104 = arith.constant 0 : index
    %89 = vector.load %arg1[%c0_101, %c7_102, %c0_103, %c0_104] : memref<1x9x64x16xf32, #tpu.memory_space<vmem>>, vector<1x1x64x16xf32>
    %90 = vector.shape_cast %89 : vector<1x1x64x16xf32> to vector<64x16xf32>
    %cst_105 = arith.constant dense<0.000000e+00> : vector<32x16xf32>
    %91 = tpu.matmul %88, %90, %cst_105 {dimension_numbers = #tpu.dot_dimension_numbers<[1], [0], [0], [1], [0, 0, 1, 1], [], []>} : vector<32x64xf32>, vector<64x16xf32>, vector<32x16xf32> -> vector<32x16xf32>
    %92 = arith.addf %86, %91 : vector<32x16xf32>
    %c15 = arith.constant 15 : index
    %c0_106 = arith.constant 0 : index
    %c0_107 = arith.constant 0 : index
    %93 = vector.load %arg2[%c15, %c0_106, %c0_107] : memref<16x32x64xf32, #tpu.memory_space<vmem>>, vector<1x32x64xf32>
    %94 = vector.shape_cast %93 : vector<1x32x64xf32> to vector<32x64xf32>
    %c0_108 = arith.constant 0 : index
    %c8_109 = arith.constant 8 : index
    %c0_110 = arith.constant 0 : index
    %c0_111 = arith.constant 0 : index
    %95 = vector.load %arg1[%c0_108, %c8_109, %c0_110, %c0_111] : memref<1x9x64x16xf32, #tpu.memory_space<vmem>>, vector<1x1x64x16xf32>
    %96 = vector.shape_cast %95 : vector<1x1x64x16xf32> to vector<64x16xf32>
    %cst_112 = arith.constant dense<0.000000e+00> : vector<32x16xf32>
    %97 = tpu.matmul %94, %96, %cst_112 {dimension_numbers = #tpu.dot_dimension_numbers<[1], [0], [0], [1], [0, 0, 1, 1], [], []>} : vector<32x64xf32>, vector<64x16xf32>, vector<32x16xf32> -> vector<32x16xf32>
    %98 = arith.addf %92, %97 : vector<32x16xf32>
    %99 = vector.broadcast %0 : vector<32x1xf32> to vector<32x16xf32>
    %100 = arith.addf %98, %99 : vector<32x16xf32>
    %101 = arith.addf %25, %50 : vector<32x16xf32>
    %102 = arith.addf %101, %75 : vector<32x16xf32>
    %103 = arith.addf %102, %100 : vector<32x16xf32>
    %cst_113 = arith.constant dense<0.000000e+00> : vector<32xf32>
    %104 = vector.multi_reduction <add>, %103, %cst_113 [1] : vector<32x16xf32> to vector<32xf32>
    %105 = vector.shape_cast %104 : vector<32xf32> to vector<32x1xf32>
    %cst_114 = arith.constant 1.562500e-02 : f32
    %106 = vector.broadcast %cst_114 : f32 to vector<32x1xf32>
    %107 = arith.mulf %105, %106 : vector<32x1xf32>
    %108 = vector.broadcast %107 : vector<32x1xf32> to vector<32x16xf32>
    %109 = arith.subf %25, %108 : vector<32x16xf32>
    %110 = arith.mulf %109, %109 : vector<32x16xf32>
    %cst_115 = arith.constant dense<0.000000e+00> : vector<32xf32>
    %111 = vector.multi_reduction <add>, %110, %cst_115 [1] : vector<32x16xf32> to vector<32xf32>
    %112 = vector.shape_cast %111 : vector<32xf32> to vector<32x1xf32>
    %113 = vector.broadcast %107 : vector<32x1xf32> to vector<32x16xf32>
    %114 = arith.subf %50, %113 : vector<32x16xf32>
    %115 = arith.mulf %114, %114 : vector<32x16xf32>
    %cst_116 = arith.constant dense<0.000000e+00> : vector<32xf32>
    %116 = vector.multi_reduction <add>, %115, %cst_116 [1] : vector<32x16xf32> to vector<32xf32>
    %117 = vector.shape_cast %116 : vector<32xf32> to vector<32x1xf32>
    %118 = arith.addf %112, %117 : vector<32x1xf32>
    %119 = vector.broadcast %107 : vector<32x1xf32> to vector<32x16xf32>
    %120 = arith.subf %75, %119 : vector<32x16xf32>
    %121 = arith.mulf %120, %120 : vector<32x16xf32>
    %cst_117 = arith.constant dense<0.000000e+00> : vector<32xf32>
    %122 = vector.multi_reduction <add>, %121, %cst_117 [1] : vector<32x16xf32> to vector<32xf32>
    %123 = vector.shape_cast %122 : vector<32xf32> to vector<32x1xf32>
    %124 = arith.addf %118, %123 : vector<32x1xf32>
    %125 = vector.broadcast %107 : vector<32x1xf32> to vector<32x16xf32>
    %126 = arith.subf %100, %125 : vector<32x16xf32>
    %127 = arith.mulf %126, %126 : vector<32x16xf32>
    %cst_118 = arith.constant dense<0.000000e+00> : vector<32xf32>
    %128 = vector.multi_reduction <add>, %127, %cst_118 [1] : vector<32x16xf32> to vector<32xf32>
    %129 = vector.shape_cast %128 : vector<32xf32> to vector<32x1xf32>
    %130 = arith.addf %124, %129 : vector<32x1xf32>
    %cst_119 = arith.constant 1.562500e-02 : f32
    %131 = vector.broadcast %cst_119 : f32 to vector<32x1xf32>
    %132 = arith.mulf %130, %131 : vector<32x1xf32>
    %cst_120 = arith.constant 9.99999974E-6 : f32
    %133 = vector.broadcast %cst_120 : f32 to vector<32x1xf32>
    %134 = arith.addf %132, %133 : vector<32x1xf32>
    %135 = math.rsqrt %134 : vector<32x1xf32>
    %136 = vector.broadcast %107 : vector<32x1xf32> to vector<32x16xf32>
    %137 = arith.subf %25, %136 : vector<32x16xf32>
    %138 = vector.broadcast %135 : vector<32x1xf32> to vector<32x16xf32>
    %139 = arith.mulf %137, %138 : vector<32x16xf32>
    %cst_121 = arith.constant 0.000000e+00 : f32
    %140 = vector.broadcast %cst_121 : f32 to vector<32x16xf32>
    %141 = arith.maximumf %139, %140 : vector<32x16xf32>
    %142 = vector.shape_cast %141 : vector<32x16xf32> to vector<1x32x16xf32>
    %c0_122 = arith.constant 0 : index
    %c0_123 = arith.constant 0 : index
    %c0_124 = arith.constant 0 : index
    %c0_125 = arith.constant 0 : index
    %143 = vector.load %arg4[%c0_122, %c0_123, %c0_124, %c0_125] : memref<1x4x32x16xf32, #tpu.memory_space<vmem>>, vector<1x1x32x16xf32>
    %144 = vector.shape_cast %143 : vector<1x1x32x16xf32> to vector<1x32x16xf32>
    %145 = vector.shape_cast %142 : vector<1x32x16xf32> to vector<1x1x32x16xf32>
    tpu.vector_store %arg4[%c0_122, %c0_123, %c0_124, %c0_125], %145 {strides = array<i32>} : memref<1x4x32x16xf32, #tpu.memory_space<vmem>>, vector<1x1x32x16xf32>,
    %146 = vector.broadcast %107 : vector<32x1xf32> to vector<32x16xf32>
    %147 = arith.subf %50, %146 : vector<32x16xf32>
    %148 = vector.broadcast %135 : vector<32x1xf32> to vector<32x16xf32>
    %149 = arith.mulf %147, %148 : vector<32x16xf32>
    %cst_126 = arith.constant 0.000000e+00 : f32
    %150 = vector.broadcast %cst_126 : f32 to vector<32x16xf32>
    %151 = arith.maximumf %149, %150 : vector<32x16xf32>
    %152 = vector.shape_cast %151 : vector<32x16xf32> to vector<1x32x16xf32>
    %c0_127 = arith.constant 0 : index
    %c1_128 = arith.constant 1 : index
    %c0_129 = arith.constant 0 : index
    %c0_130 = arith.constant 0 : index
    %153 = vector.load %arg4[%c0_127, %c1_128, %c0_129, %c0_130] : memref<1x4x32x16xf32, #tpu.memory_space<vmem>>, vector<1x1x32x16xf32>
    %154 = vector.shape_cast %153 : vector<1x1x32x16xf32> to vector<1x32x16xf32>
    %155 = vector.shape_cast %152 : vector<1x32x16xf32> to vector<1x1x32x16xf32>
    tpu.vector_store %arg4[%c0_127, %c1_128, %c0_129, %c0_130], %155 {strides = array<i32>} : memref<1x4x32x16xf32, #tpu.memory_space<vmem>>, vector<1x1x32x16xf32>,
    %156 = vector.broadcast %107 : vector<32x1xf32> to vector<32x16xf32>
    %157 = arith.subf %75, %156 : vector<32x16xf32>
    %158 = vector.broadcast %135 : vector<32x1xf32> to vector<32x16xf32>
    %159 = arith.mulf %157, %158 : vector<32x16xf32>
    %cst_131 = arith.constant 0.000000e+00 : f32
    %160 = vector.broadcast %cst_131 : f32 to vector<32x16xf32>
    %161 = arith.maximumf %159, %160 : vector<32x16xf32>
    %162 = vector.shape_cast %161 : vector<32x16xf32> to vector<1x32x16xf32>
    %c0_132 = arith.constant 0 : index
    %c2_133 = arith.constant 2 : index
    %c0_134 = arith.constant 0 : index
    %c0_135 = arith.constant 0 : index
    %163 = vector.load %arg4[%c0_132, %c2_133, %c0_134, %c0_135] : memref<1x4x32x16xf32, #tpu.memory_space<vmem>>, vector<1x1x32x16xf32>
    %164 = vector.shape_cast %163 : vector<1x1x32x16xf32> to vector<1x32x16xf32>
    %165 = vector.shape_cast %162 : vector<1x32x16xf32> to vector<1x1x32x16xf32>
    tpu.vector_store %arg4[%c0_132, %c2_133, %c0_134, %c0_135], %165 {strides = array<i32>} : memref<1x4x32x16xf32, #tpu.memory_space<vmem>>, vector<1x1x32x16xf32>,
    %166 = vector.broadcast %107 : vector<32x1xf32> to vector<32x16xf32>
    %167 = arith.subf %100, %166 : vector<32x16xf32>
    %168 = vector.broadcast %135 : vector<32x1xf32> to vector<32x16xf32>
    %169 = arith.mulf %167, %168 : vector<32x16xf32>
    %cst_136 = arith.constant 0.000000e+00 : f32
    %170 = vector.broadcast %cst_136 : f32 to vector<32x16xf32>
    %171 = arith.maximumf %169, %170 : vector<32x16xf32>
    %172 = vector.shape_cast %171 : vector<32x16xf32> to vector<1x32x16xf32>
    %c0_137 = arith.constant 0 : index
    %c3_138 = arith.constant 3 : index
    %c0_139 = arith.constant 0 : index
    %c0_140 = arith.constant 0 : index
    %173 = vector.load %arg4[%c0_137, %c3_138, %c0_139, %c0_140] : memref<1x4x32x16xf32, #tpu.memory_space<vmem>>, vector<1x1x32x16xf32>
    %174 = vector.shape_cast %173 : vector<1x1x32x16xf32> to vector<1x32x16xf32>
    %175 = vector.shape_cast %172 : vector<1x32x16xf32> to vector<1x1x32x16xf32>
    tpu.vector_store %arg4[%c0_137, %c3_138, %c0_139, %c0_140], %175 {strides = array<i32>} : memref<1x4x32x16xf32, #tpu.memory_space<vmem>>, vector<1x1x32x16xf32>,
    return
  }
  func.func @transform_0(%arg0: i32) -> (i32, i32, i32, i32) {
    %c0_i32 = arith.constant 0 : i32
    %c0_i32_0 = arith.constant 0 : i32
    %c0_i32_1 = arith.constant 0 : i32
    %c0_i32_2 = arith.constant 0 : i32
    return %arg0, %c0_i32, %c0_i32_0, %c0_i32_1 : i32, i32, i32, i32
  }
  func.func @transform_1(%arg0: i32) -> (i32, i32, i32) {
    %c0_i32 = arith.constant 0 : i32
    %c0_i32_0 = arith.constant 0 : i32
    %c0_i32_1 = arith.constant 0 : i32
    %c0_i32_2 = arith.constant 0 : i32
    return %c0_i32, %c0_i32_0, %c0_i32_1 : i32, i32, i32
  }
  func.func @transform_2(%arg0: i32) -> (i32, i32) {
    %c0_i32 = arith.constant 0 : i32
    %c0_i32_0 = arith.constant 0 : i32
    %c0_i32_1 = arith.constant 0 : i32
    return %c0_i32, %c0_i32_0 : i32, i32
  }
  func.func @transform_3(%arg0: i32) -> (i32, i32, i32, i32) {
    %c0_i32 = arith.constant 0 : i32
    %c0_i32_0 = arith.constant 0 : i32
    %c0_i32_1 = arith.constant 0 : i32
    %c0_i32_2 = arith.constant 0 : i32
    return %arg0, %c0_i32, %c0_i32_0, %c0_i32_1 : i32, i32, i32, i32
  }
}

module attributes {stable_mosaic.version = 11 : i64} {
  func.func @kernel(%arg0: i32, %arg1: memref<1x9x32x64xf32, #tpu.memory_space<vmem>>, %arg2: memref<16x16x32xf32, #tpu.memory_space<vmem>>, %arg3: memref<16x1xf32, #tpu.memory_space<vmem>>, %arg4: memref<1x4x16x64xf32, #tpu.memory_space<vmem>>) attributes {dimension_semantics = [#tpu.dimension_semantics<parallel>], iteration_bounds = array<i64: 2>, scalar_prefetch = 0 : i64, scratch_operands = 0 : i64, tpu.core_type = #tpu.core_type<tc>, window_params = [{transform_indices = @transform_0, window_bounds = array<i64: 1, 9, 32, 64>}, {pipeline_mode = #tpu.pipeline_mode<synchronous>, transform_indices = @transform_1, window_bounds = array<i64: 16, 16, 32>}, {pipeline_mode = #tpu.pipeline_mode<synchronous>, transform_indices = @transform_2, window_bounds = array<i64: 16, 1>}, {transform_indices = @transform_3, window_bounds = array<i64: 1, 4, 16, 64>}]} {
    %c0 = arith.constant 0 : index
    %c0_0 = arith.constant 0 : index
    %0 = vector.load %arg3[%c0, %c0_0] : memref<16x1xf32, #tpu.memory_space<vmem>>, vector<16x1xf32>
    %c0_1 = arith.constant 0 : index
    %c0_2 = arith.constant 0 : index
    %c0_3 = arith.constant 0 : index
    %1 = vector.load %arg2[%c0_1, %c0_2, %c0_3] : memref<16x16x32xf32, #tpu.memory_space<vmem>>, vector<1x16x32xf32>
    %2 = vector.shape_cast %1 : vector<1x16x32xf32> to vector<16x32xf32>
    %c0_4 = arith.constant 0 : index
    %c0_5 = arith.constant 0 : index
    %c0_6 = arith.constant 0 : index
    %c0_7 = arith.constant 0 : index
    %3 = vector.load %arg1[%c0_4, %c0_5, %c0_6, %c0_7] : memref<1x9x32x64xf32, #tpu.memory_space<vmem>>, vector<1x1x32x64xf32>
    %4 = vector.shape_cast %3 : vector<1x1x32x64xf32> to vector<32x64xf32>
    %cst = arith.constant dense<0.000000e+00> : vector<16x64xf32>
    %5 = tpu.matmul %2, %4, %cst {dimension_numbers = #tpu.dot_dimension_numbers<[1], [0], [0], [1], [0, 0, 1, 1], [], []>} : vector<16x32xf32>, vector<32x64xf32>, vector<16x64xf32> -> vector<16x64xf32>
    %c1 = arith.constant 1 : index
    %c0_8 = arith.constant 0 : index
    %c0_9 = arith.constant 0 : index
    %6 = vector.load %arg2[%c1, %c0_8, %c0_9] : memref<16x16x32xf32, #tpu.memory_space<vmem>>, vector<1x16x32xf32>
    %7 = vector.shape_cast %6 : vector<1x16x32xf32> to vector<16x32xf32>
    %c0_10 = arith.constant 0 : index
    %c1_11 = arith.constant 1 : index
    %c0_12 = arith.constant 0 : index
    %c0_13 = arith.constant 0 : index
    %8 = vector.load %arg1[%c0_10, %c1_11, %c0_12, %c0_13] : memref<1x9x32x64xf32, #tpu.memory_space<vmem>>, vector<1x1x32x64xf32>
    %9 = vector.shape_cast %8 : vector<1x1x32x64xf32> to vector<32x64xf32>
    %cst_14 = arith.constant dense<0.000000e+00> : vector<16x64xf32>
    %10 = tpu.matmul %7, %9, %cst_14 {dimension_numbers = #tpu.dot_dimension_numbers<[1], [0], [0], [1], [0, 0, 1, 1], [], []>} : vector<16x32xf32>, vector<32x64xf32>, vector<16x64xf32> -> vector<16x64xf32>
    %11 = arith.addf %5, %10 : vector<16x64xf32>
    %c2 = arith.constant 2 : index
    %c0_15 = arith.constant 0 : index
    %c0_16 = arith.constant 0 : index
    %12 = vector.load %arg2[%c2, %c0_15, %c0_16] : memref<16x16x32xf32, #tpu.memory_space<vmem>>, vector<1x16x32xf32>
    %13 = vector.shape_cast %12 : vector<1x16x32xf32> to vector<16x32xf32>
    %c0_17 = arith.constant 0 : index
    %c3 = arith.constant 3 : index
    %c0_18 = arith.constant 0 : index
    %c0_19 = arith.constant 0 : index
    %14 = vector.load %arg1[%c0_17, %c3, %c0_18, %c0_19] : memref<1x9x32x64xf32, #tpu.memory_space<vmem>>, vector<1x1x32x64xf32>
    %15 = vector.shape_cast %14 : vector<1x1x32x64xf32> to vector<32x64xf32>
    %cst_20 = arith.constant dense<0.000000e+00> : vector<16x64xf32>
    %16 = tpu.matmul %13, %15, %cst_20 {dimension_numbers = #tpu.dot_dimension_numbers<[1], [0], [0], [1], [0, 0, 1, 1], [], []>} : vector<16x32xf32>, vector<32x64xf32>, vector<16x64xf32> -> vector<16x64xf32>
    %17 = arith.addf %11, %16 : vector<16x64xf32>
    %c3_21 = arith.constant 3 : index
    %c0_22 = arith.constant 0 : index
    %c0_23 = arith.constant 0 : index
    %18 = vector.load %arg2[%c3_21, %c0_22, %c0_23] : memref<16x16x32xf32, #tpu.memory_space<vmem>>, vector<1x16x32xf32>
    %19 = vector.shape_cast %18 : vector<1x16x32xf32> to vector<16x32xf32>
    %c0_24 = arith.constant 0 : index
    %c4 = arith.constant 4 : index
    %c0_25 = arith.constant 0 : index
    %c0_26 = arith.constant 0 : index
    %20 = vector.load %arg1[%c0_24, %c4, %c0_25, %c0_26] : memref<1x9x32x64xf32, #tpu.memory_space<vmem>>, vector<1x1x32x64xf32>
    %21 = vector.shape_cast %20 : vector<1x1x32x64xf32> to vector<32x64xf32>
    %cst_27 = arith.constant dense<0.000000e+00> : vector<16x64xf32>
    %22 = tpu.matmul %19, %21, %cst_27 {dimension_numbers = #tpu.dot_dimension_numbers<[1], [0], [0], [1], [0, 0, 1, 1], [], []>} : vector<16x32xf32>, vector<32x64xf32>, vector<16x64xf32> -> vector<16x64xf32>
    %23 = arith.addf %17, %22 : vector<16x64xf32>
    %24 = vector.broadcast %0 : vector<16x1xf32> to vector<16x64xf32>
    %25 = arith.addf %23, %24 : vector<16x64xf32>
    %c4_28 = arith.constant 4 : index
    %c0_29 = arith.constant 0 : index
    %c0_30 = arith.constant 0 : index
    %26 = vector.load %arg2[%c4_28, %c0_29, %c0_30] : memref<16x16x32xf32, #tpu.memory_space<vmem>>, vector<1x16x32xf32>
    %27 = vector.shape_cast %26 : vector<1x16x32xf32> to vector<16x32xf32>
    %c0_31 = arith.constant 0 : index
    %c1_32 = arith.constant 1 : index
    %c0_33 = arith.constant 0 : index
    %c0_34 = arith.constant 0 : index
    %28 = vector.load %arg1[%c0_31, %c1_32, %c0_33, %c0_34] : memref<1x9x32x64xf32, #tpu.memory_space<vmem>>, vector<1x1x32x64xf32>
    %29 = vector.shape_cast %28 : vector<1x1x32x64xf32> to vector<32x64xf32>
    %cst_35 = arith.constant dense<0.000000e+00> : vector<16x64xf32>
    %30 = tpu.matmul %27, %29, %cst_35 {dimension_numbers = #tpu.dot_dimension_numbers<[1], [0], [0], [1], [0, 0, 1, 1], [], []>} : vector<16x32xf32>, vector<32x64xf32>, vector<16x64xf32> -> vector<16x64xf32>
    %c5 = arith.constant 5 : index
    %c0_36 = arith.constant 0 : index
    %c0_37 = arith.constant 0 : index
    %31 = vector.load %arg2[%c5, %c0_36, %c0_37] : memref<16x16x32xf32, #tpu.memory_space<vmem>>, vector<1x16x32xf32>
    %32 = vector.shape_cast %31 : vector<1x16x32xf32> to vector<16x32xf32>
    %c0_38 = arith.constant 0 : index
    %c2_39 = arith.constant 2 : index
    %c0_40 = arith.constant 0 : index
    %c0_41 = arith.constant 0 : index
    %33 = vector.load %arg1[%c0_38, %c2_39, %c0_40, %c0_41] : memref<1x9x32x64xf32, #tpu.memory_space<vmem>>, vector<1x1x32x64xf32>
    %34 = vector.shape_cast %33 : vector<1x1x32x64xf32> to vector<32x64xf32>
    %cst_42 = arith.constant dense<0.000000e+00> : vector<16x64xf32>
    %35 = tpu.matmul %32, %34, %cst_42 {dimension_numbers = #tpu.dot_dimension_numbers<[1], [0], [0], [1], [0, 0, 1, 1], [], []>} : vector<16x32xf32>, vector<32x64xf32>, vector<16x64xf32> -> vector<16x64xf32>
    %36 = arith.addf %30, %35 : vector<16x64xf32>
    %c6 = arith.constant 6 : index
    %c0_43 = arith.constant 0 : index
    %c0_44 = arith.constant 0 : index
    %37 = vector.load %arg2[%c6, %c0_43, %c0_44] : memref<16x16x32xf32, #tpu.memory_space<vmem>>, vector<1x16x32xf32>
    %38 = vector.shape_cast %37 : vector<1x16x32xf32> to vector<16x32xf32>
    %c0_45 = arith.constant 0 : index
    %c4_46 = arith.constant 4 : index
    %c0_47 = arith.constant 0 : index
    %c0_48 = arith.constant 0 : index
    %39 = vector.load %arg1[%c0_45, %c4_46, %c0_47, %c0_48] : memref<1x9x32x64xf32, #tpu.memory_space<vmem>>, vector<1x1x32x64xf32>
    %40 = vector.shape_cast %39 : vector<1x1x32x64xf32> to vector<32x64xf32>
    %cst_49 = arith.constant dense<0.000000e+00> : vector<16x64xf32>
    %41 = tpu.matmul %38, %40, %cst_49 {dimension_numbers = #tpu.dot_dimension_numbers<[1], [0], [0], [1], [0, 0, 1, 1], [], []>} : vector<16x32xf32>, vector<32x64xf32>, vector<16x64xf32> -> vector<16x64xf32>
    %42 = arith.addf %36, %41 : vector<16x64xf32>
    %c7 = arith.constant 7 : index
    %c0_50 = arith.constant 0 : index
    %c0_51 = arith.constant 0 : index
    %43 = vector.load %arg2[%c7, %c0_50, %c0_51] : memref<16x16x32xf32, #tpu.memory_space<vmem>>, vector<1x16x32xf32>
    %44 = vector.shape_cast %43 : vector<1x16x32xf32> to vector<16x32xf32>
    %c0_52 = arith.constant 0 : index
    %c5_53 = arith.constant 5 : index
    %c0_54 = arith.constant 0 : index
    %c0_55 = arith.constant 0 : index
    %45 = vector.load %arg1[%c0_52, %c5_53, %c0_54, %c0_55] : memref<1x9x32x64xf32, #tpu.memory_space<vmem>>, vector<1x1x32x64xf32>
    %46 = vector.shape_cast %45 : vector<1x1x32x64xf32> to vector<32x64xf32>
    %cst_56 = arith.constant dense<0.000000e+00> : vector<16x64xf32>
    %47 = tpu.matmul %44, %46, %cst_56 {dimension_numbers = #tpu.dot_dimension_numbers<[1], [0], [0], [1], [0, 0, 1, 1], [], []>} : vector<16x32xf32>, vector<32x64xf32>, vector<16x64xf32> -> vector<16x64xf32>
    %48 = arith.addf %42, %47 : vector<16x64xf32>
    %49 = vector.broadcast %0 : vector<16x1xf32> to vector<16x64xf32>
    %50 = arith.addf %48, %49 : vector<16x64xf32>
    %c8 = arith.constant 8 : index
    %c0_57 = arith.constant 0 : index
    %c0_58 = arith.constant 0 : index
    %51 = vector.load %arg2[%c8, %c0_57, %c0_58] : memref<16x16x32xf32, #tpu.memory_space<vmem>>, vector<1x16x32xf32>
    %52 = vector.shape_cast %51 : vector<1x16x32xf32> to vector<16x32xf32>
    %c0_59 = arith.constant 0 : index
    %c3_60 = arith.constant 3 : index
    %c0_61 = arith.constant 0 : index
    %c0_62 = arith.constant 0 : index
    %53 = vector.load %arg1[%c0_59, %c3_60, %c0_61, %c0_62] : memref<1x9x32x64xf32, #tpu.memory_space<vmem>>, vector<1x1x32x64xf32>
    %54 = vector.shape_cast %53 : vector<1x1x32x64xf32> to vector<32x64xf32>
    %cst_63 = arith.constant dense<0.000000e+00> : vector<16x64xf32>
    %55 = tpu.matmul %52, %54, %cst_63 {dimension_numbers = #tpu.dot_dimension_numbers<[1], [0], [0], [1], [0, 0, 1, 1], [], []>} : vector<16x32xf32>, vector<32x64xf32>, vector<16x64xf32> -> vector<16x64xf32>
    %c9 = arith.constant 9 : index
    %c0_64 = arith.constant 0 : index
    %c0_65 = arith.constant 0 : index
    %56 = vector.load %arg2[%c9, %c0_64, %c0_65] : memref<16x16x32xf32, #tpu.memory_space<vmem>>, vector<1x16x32xf32>
    %57 = vector.shape_cast %56 : vector<1x16x32xf32> to vector<16x32xf32>
    %c0_66 = arith.constant 0 : index
    %c4_67 = arith.constant 4 : index
    %c0_68 = arith.constant 0 : index
    %c0_69 = arith.constant 0 : index
    %58 = vector.load %arg1[%c0_66, %c4_67, %c0_68, %c0_69] : memref<1x9x32x64xf32, #tpu.memory_space<vmem>>, vector<1x1x32x64xf32>
    %59 = vector.shape_cast %58 : vector<1x1x32x64xf32> to vector<32x64xf32>
    %cst_70 = arith.constant dense<0.000000e+00> : vector<16x64xf32>
    %60 = tpu.matmul %57, %59, %cst_70 {dimension_numbers = #tpu.dot_dimension_numbers<[1], [0], [0], [1], [0, 0, 1, 1], [], []>} : vector<16x32xf32>, vector<32x64xf32>, vector<16x64xf32> -> vector<16x64xf32>
    %61 = arith.addf %55, %60 : vector<16x64xf32>
    %c10 = arith.constant 10 : index
    %c0_71 = arith.constant 0 : index
    %c0_72 = arith.constant 0 : index
    %62 = vector.load %arg2[%c10, %c0_71, %c0_72] : memref<16x16x32xf32, #tpu.memory_space<vmem>>, vector<1x16x32xf32>
    %63 = vector.shape_cast %62 : vector<1x16x32xf32> to vector<16x32xf32>
    %c0_73 = arith.constant 0 : index
    %c6_74 = arith.constant 6 : index
    %c0_75 = arith.constant 0 : index
    %c0_76 = arith.constant 0 : index
    %64 = vector.load %arg1[%c0_73, %c6_74, %c0_75, %c0_76] : memref<1x9x32x64xf32, #tpu.memory_space<vmem>>, vector<1x1x32x64xf32>
    %65 = vector.shape_cast %64 : vector<1x1x32x64xf32> to vector<32x64xf32>
    %cst_77 = arith.constant dense<0.000000e+00> : vector<16x64xf32>
    %66 = tpu.matmul %63, %65, %cst_77 {dimension_numbers = #tpu.dot_dimension_numbers<[1], [0], [0], [1], [0, 0, 1, 1], [], []>} : vector<16x32xf32>, vector<32x64xf32>, vector<16x64xf32> -> vector<16x64xf32>
    %67 = arith.addf %61, %66 : vector<16x64xf32>
    %c11 = arith.constant 11 : index
    %c0_78 = arith.constant 0 : index
    %c0_79 = arith.constant 0 : index
    %68 = vector.load %arg2[%c11, %c0_78, %c0_79] : memref<16x16x32xf32, #tpu.memory_space<vmem>>, vector<1x16x32xf32>
    %69 = vector.shape_cast %68 : vector<1x16x32xf32> to vector<16x32xf32>
    %c0_80 = arith.constant 0 : index
    %c7_81 = arith.constant 7 : index
    %c0_82 = arith.constant 0 : index
    %c0_83 = arith.constant 0 : index
    %70 = vector.load %arg1[%c0_80, %c7_81, %c0_82, %c0_83] : memref<1x9x32x64xf32, #tpu.memory_space<vmem>>, vector<1x1x32x64xf32>
    %71 = vector.shape_cast %70 : vector<1x1x32x64xf32> to vector<32x64xf32>
    %cst_84 = arith.constant dense<0.000000e+00> : vector<16x64xf32>
    %72 = tpu.matmul %69, %71, %cst_84 {dimension_numbers = #tpu.dot_dimension_numbers<[1], [0], [0], [1], [0, 0, 1, 1], [], []>} : vector<16x32xf32>, vector<32x64xf32>, vector<16x64xf32> -> vector<16x64xf32>
    %73 = arith.addf %67, %72 : vector<16x64xf32>
    %74 = vector.broadcast %0 : vector<16x1xf32> to vector<16x64xf32>
    %75 = arith.addf %73, %74 : vector<16x64xf32>
    %c12 = arith.constant 12 : index
    %c0_85 = arith.constant 0 : index
    %c0_86 = arith.constant 0 : index
    %76 = vector.load %arg2[%c12, %c0_85, %c0_86] : memref<16x16x32xf32, #tpu.memory_space<vmem>>, vector<1x16x32xf32>
    %77 = vector.shape_cast %76 : vector<1x16x32xf32> to vector<16x32xf32>
    %c0_87 = arith.constant 0 : index
    %c4_88 = arith.constant 4 : index
    %c0_89 = arith.constant 0 : index
    %c0_90 = arith.constant 0 : index
    %78 = vector.load %arg1[%c0_87, %c4_88, %c0_89, %c0_90] : memref<1x9x32x64xf32, #tpu.memory_space<vmem>>, vector<1x1x32x64xf32>
    %79 = vector.shape_cast %78 : vector<1x1x32x64xf32> to vector<32x64xf32>
    %cst_91 = arith.constant dense<0.000000e+00> : vector<16x64xf32>
    %80 = tpu.matmul %77, %79, %cst_91 {dimension_numbers = #tpu.dot_dimension_numbers<[1], [0], [0], [1], [0, 0, 1, 1], [], []>} : vector<16x32xf32>, vector<32x64xf32>, vector<16x64xf32> -> vector<16x64xf32>
    %c13 = arith.constant 13 : index
    %c0_92 = arith.constant 0 : index
    %c0_93 = arith.constant 0 : index
    %81 = vector.load %arg2[%c13, %c0_92, %c0_93] : memref<16x16x32xf32, #tpu.memory_space<vmem>>, vector<1x16x32xf32>
    %82 = vector.shape_cast %81 : vector<1x16x32xf32> to vector<16x32xf32>
    %c0_94 = arith.constant 0 : index
    %c5_95 = arith.constant 5 : index
    %c0_96 = arith.constant 0 : index
    %c0_97 = arith.constant 0 : index
    %83 = vector.load %arg1[%c0_94, %c5_95, %c0_96, %c0_97] : memref<1x9x32x64xf32, #tpu.memory_space<vmem>>, vector<1x1x32x64xf32>
    %84 = vector.shape_cast %83 : vector<1x1x32x64xf32> to vector<32x64xf32>
    %cst_98 = arith.constant dense<0.000000e+00> : vector<16x64xf32>
    %85 = tpu.matmul %82, %84, %cst_98 {dimension_numbers = #tpu.dot_dimension_numbers<[1], [0], [0], [1], [0, 0, 1, 1], [], []>} : vector<16x32xf32>, vector<32x64xf32>, vector<16x64xf32> -> vector<16x64xf32>
    %86 = arith.addf %80, %85 : vector<16x64xf32>
    %c14 = arith.constant 14 : index
    %c0_99 = arith.constant 0 : index
    %c0_100 = arith.constant 0 : index
    %87 = vector.load %arg2[%c14, %c0_99, %c0_100] : memref<16x16x32xf32, #tpu.memory_space<vmem>>, vector<1x16x32xf32>
    %88 = vector.shape_cast %87 : vector<1x16x32xf32> to vector<16x32xf32>
    %c0_101 = arith.constant 0 : index
    %c7_102 = arith.constant 7 : index
    %c0_103 = arith.constant 0 : index
    %c0_104 = arith.constant 0 : index
    %89 = vector.load %arg1[%c0_101, %c7_102, %c0_103, %c0_104] : memref<1x9x32x64xf32, #tpu.memory_space<vmem>>, vector<1x1x32x64xf32>
    %90 = vector.shape_cast %89 : vector<1x1x32x64xf32> to vector<32x64xf32>
    %cst_105 = arith.constant dense<0.000000e+00> : vector<16x64xf32>
    %91 = tpu.matmul %88, %90, %cst_105 {dimension_numbers = #tpu.dot_dimension_numbers<[1], [0], [0], [1], [0, 0, 1, 1], [], []>} : vector<16x32xf32>, vector<32x64xf32>, vector<16x64xf32> -> vector<16x64xf32>
    %92 = arith.addf %86, %91 : vector<16x64xf32>
    %c15 = arith.constant 15 : index
    %c0_106 = arith.constant 0 : index
    %c0_107 = arith.constant 0 : index
    %93 = vector.load %arg2[%c15, %c0_106, %c0_107] : memref<16x16x32xf32, #tpu.memory_space<vmem>>, vector<1x16x32xf32>
    %94 = vector.shape_cast %93 : vector<1x16x32xf32> to vector<16x32xf32>
    %c0_108 = arith.constant 0 : index
    %c8_109 = arith.constant 8 : index
    %c0_110 = arith.constant 0 : index
    %c0_111 = arith.constant 0 : index
    %95 = vector.load %arg1[%c0_108, %c8_109, %c0_110, %c0_111] : memref<1x9x32x64xf32, #tpu.memory_space<vmem>>, vector<1x1x32x64xf32>
    %96 = vector.shape_cast %95 : vector<1x1x32x64xf32> to vector<32x64xf32>
    %cst_112 = arith.constant dense<0.000000e+00> : vector<16x64xf32>
    %97 = tpu.matmul %94, %96, %cst_112 {dimension_numbers = #tpu.dot_dimension_numbers<[1], [0], [0], [1], [0, 0, 1, 1], [], []>} : vector<16x32xf32>, vector<32x64xf32>, vector<16x64xf32> -> vector<16x64xf32>
    %98 = arith.addf %92, %97 : vector<16x64xf32>
    %99 = vector.broadcast %0 : vector<16x1xf32> to vector<16x64xf32>
    %100 = arith.addf %98, %99 : vector<16x64xf32>
    %101 = arith.addf %25, %50 : vector<16x64xf32>
    %102 = arith.addf %101, %75 : vector<16x64xf32>
    %103 = arith.addf %102, %100 : vector<16x64xf32>
    %cst_113 = arith.constant dense<0.000000e+00> : vector<16xf32>
    %104 = vector.multi_reduction <add>, %103, %cst_113 [1] : vector<16x64xf32> to vector<16xf32>
    %105 = vector.shape_cast %104 : vector<16xf32> to vector<16x1xf32>
    %cst_114 = arith.constant 3.906250e-03 : f32
    %106 = vector.broadcast %cst_114 : f32 to vector<16x1xf32>
    %107 = arith.mulf %105, %106 : vector<16x1xf32>
    %108 = vector.broadcast %107 : vector<16x1xf32> to vector<16x64xf32>
    %109 = arith.subf %25, %108 : vector<16x64xf32>
    %110 = arith.mulf %109, %109 : vector<16x64xf32>
    %cst_115 = arith.constant dense<0.000000e+00> : vector<16xf32>
    %111 = vector.multi_reduction <add>, %110, %cst_115 [1] : vector<16x64xf32> to vector<16xf32>
    %112 = vector.shape_cast %111 : vector<16xf32> to vector<16x1xf32>
    %113 = vector.broadcast %107 : vector<16x1xf32> to vector<16x64xf32>
    %114 = arith.subf %50, %113 : vector<16x64xf32>
    %115 = arith.mulf %114, %114 : vector<16x64xf32>
    %cst_116 = arith.constant dense<0.000000e+00> : vector<16xf32>
    %116 = vector.multi_reduction <add>, %115, %cst_116 [1] : vector<16x64xf32> to vector<16xf32>
    %117 = vector.shape_cast %116 : vector<16xf32> to vector<16x1xf32>
    %118 = arith.addf %112, %117 : vector<16x1xf32>
    %119 = vector.broadcast %107 : vector<16x1xf32> to vector<16x64xf32>
    %120 = arith.subf %75, %119 : vector<16x64xf32>
    %121 = arith.mulf %120, %120 : vector<16x64xf32>
    %cst_117 = arith.constant dense<0.000000e+00> : vector<16xf32>
    %122 = vector.multi_reduction <add>, %121, %cst_117 [1] : vector<16x64xf32> to vector<16xf32>
    %123 = vector.shape_cast %122 : vector<16xf32> to vector<16x1xf32>
    %124 = arith.addf %118, %123 : vector<16x1xf32>
    %125 = vector.broadcast %107 : vector<16x1xf32> to vector<16x64xf32>
    %126 = arith.subf %100, %125 : vector<16x64xf32>
    %127 = arith.mulf %126, %126 : vector<16x64xf32>
    %cst_118 = arith.constant dense<0.000000e+00> : vector<16xf32>
    %128 = vector.multi_reduction <add>, %127, %cst_118 [1] : vector<16x64xf32> to vector<16xf32>
    %129 = vector.shape_cast %128 : vector<16xf32> to vector<16x1xf32>
    %130 = arith.addf %124, %129 : vector<16x1xf32>
    %cst_119 = arith.constant 3.906250e-03 : f32
    %131 = vector.broadcast %cst_119 : f32 to vector<16x1xf32>
    %132 = arith.mulf %130, %131 : vector<16x1xf32>
    %cst_120 = arith.constant 9.99999974E-6 : f32
    %133 = vector.broadcast %cst_120 : f32 to vector<16x1xf32>
    %134 = arith.addf %132, %133 : vector<16x1xf32>
    %135 = math.rsqrt %134 : vector<16x1xf32>
    %136 = vector.broadcast %107 : vector<16x1xf32> to vector<16x64xf32>
    %137 = arith.subf %25, %136 : vector<16x64xf32>
    %138 = vector.broadcast %135 : vector<16x1xf32> to vector<16x64xf32>
    %139 = arith.mulf %137, %138 : vector<16x64xf32>
    %cst_121 = arith.constant 0.000000e+00 : f32
    %140 = vector.broadcast %cst_121 : f32 to vector<16x64xf32>
    %141 = arith.maximumf %139, %140 : vector<16x64xf32>
    %142 = vector.shape_cast %141 : vector<16x64xf32> to vector<1x16x64xf32>
    %c0_122 = arith.constant 0 : index
    %c0_123 = arith.constant 0 : index
    %c0_124 = arith.constant 0 : index
    %c0_125 = arith.constant 0 : index
    %143 = vector.load %arg4[%c0_122, %c0_123, %c0_124, %c0_125] : memref<1x4x16x64xf32, #tpu.memory_space<vmem>>, vector<1x1x16x64xf32>
    %144 = vector.shape_cast %143 : vector<1x1x16x64xf32> to vector<1x16x64xf32>
    %145 = vector.shape_cast %142 : vector<1x16x64xf32> to vector<1x1x16x64xf32>
    tpu.vector_store %arg4[%c0_122, %c0_123, %c0_124, %c0_125], %145 {strides = array<i32>} : memref<1x4x16x64xf32, #tpu.memory_space<vmem>>, vector<1x1x16x64xf32>,
    %146 = vector.broadcast %107 : vector<16x1xf32> to vector<16x64xf32>
    %147 = arith.subf %50, %146 : vector<16x64xf32>
    %148 = vector.broadcast %135 : vector<16x1xf32> to vector<16x64xf32>
    %149 = arith.mulf %147, %148 : vector<16x64xf32>
    %cst_126 = arith.constant 0.000000e+00 : f32
    %150 = vector.broadcast %cst_126 : f32 to vector<16x64xf32>
    %151 = arith.maximumf %149, %150 : vector<16x64xf32>
    %152 = vector.shape_cast %151 : vector<16x64xf32> to vector<1x16x64xf32>
    %c0_127 = arith.constant 0 : index
    %c1_128 = arith.constant 1 : index
    %c0_129 = arith.constant 0 : index
    %c0_130 = arith.constant 0 : index
    %153 = vector.load %arg4[%c0_127, %c1_128, %c0_129, %c0_130] : memref<1x4x16x64xf32, #tpu.memory_space<vmem>>, vector<1x1x16x64xf32>
    %154 = vector.shape_cast %153 : vector<1x1x16x64xf32> to vector<1x16x64xf32>
    %155 = vector.shape_cast %152 : vector<1x16x64xf32> to vector<1x1x16x64xf32>
    tpu.vector_store %arg4[%c0_127, %c1_128, %c0_129, %c0_130], %155 {strides = array<i32>} : memref<1x4x16x64xf32, #tpu.memory_space<vmem>>, vector<1x1x16x64xf32>,
    %156 = vector.broadcast %107 : vector<16x1xf32> to vector<16x64xf32>
    %157 = arith.subf %75, %156 : vector<16x64xf32>
    %158 = vector.broadcast %135 : vector<16x1xf32> to vector<16x64xf32>
    %159 = arith.mulf %157, %158 : vector<16x64xf32>
    %cst_131 = arith.constant 0.000000e+00 : f32
    %160 = vector.broadcast %cst_131 : f32 to vector<16x64xf32>
    %161 = arith.maximumf %159, %160 : vector<16x64xf32>
    %162 = vector.shape_cast %161 : vector<16x64xf32> to vector<1x16x64xf32>
    %c0_132 = arith.constant 0 : index
    %c2_133 = arith.constant 2 : index
    %c0_134 = arith.constant 0 : index
    %c0_135 = arith.constant 0 : index
    %163 = vector.load %arg4[%c0_132, %c2_133, %c0_134, %c0_135] : memref<1x4x16x64xf32, #tpu.memory_space<vmem>>, vector<1x1x16x64xf32>
    %164 = vector.shape_cast %163 : vector<1x1x16x64xf32> to vector<1x16x64xf32>
    %165 = vector.shape_cast %162 : vector<1x16x64xf32> to vector<1x1x16x64xf32>
    tpu.vector_store %arg4[%c0_132, %c2_133, %c0_134, %c0_135], %165 {strides = array<i32>} : memref<1x4x16x64xf32, #tpu.memory_space<vmem>>, vector<1x1x16x64xf32>,
    %166 = vector.broadcast %107 : vector<16x1xf32> to vector<16x64xf32>
    %167 = arith.subf %100, %166 : vector<16x64xf32>
    %168 = vector.broadcast %135 : vector<16x1xf32> to vector<16x64xf32>
    %169 = arith.mulf %167, %168 : vector<16x64xf32>
    %cst_136 = arith.constant 0.000000e+00 : f32
    %170 = vector.broadcast %cst_136 : f32 to vector<16x64xf32>
    %171 = arith.maximumf %169, %170 : vector<16x64xf32>
    %172 = vector.shape_cast %171 : vector<16x64xf32> to vector<1x16x64xf32>
    %c0_137 = arith.constant 0 : index
    %c3_138 = arith.constant 3 : index
    %c0_139 = arith.constant 0 : index
    %c0_140 = arith.constant 0 : index
    %173 = vector.load %arg4[%c0_137, %c3_138, %c0_139, %c0_140] : memref<1x4x16x64xf32, #tpu.memory_space<vmem>>, vector<1x1x16x64xf32>
    %174 = vector.shape_cast %173 : vector<1x1x16x64xf32> to vector<1x16x64xf32>
    %175 = vector.shape_cast %172 : vector<1x16x64xf32> to vector<1x1x16x64xf32>
    tpu.vector_store %arg4[%c0_137, %c3_138, %c0_139, %c0_140], %175 {strides = array<i32>} : memref<1x4x16x64xf32, #tpu.memory_space<vmem>>, vector<1x1x16x64xf32>,
    return
  }
  func.func @transform_0(%arg0: i32) -> (i32, i32, i32, i32) {
    %c0_i32 = arith.constant 0 : i32
    %c0_i32_0 = arith.constant 0 : i32
    %c0_i32_1 = arith.constant 0 : i32
    %c0_i32_2 = arith.constant 0 : i32
    return %arg0, %c0_i32, %c0_i32_0, %c0_i32_1 : i32, i32, i32, i32
  }
  func.func @transform_1(%arg0: i32) -> (i32, i32, i32) {
    %c0_i32 = arith.constant 0 : i32
    %c0_i32_0 = arith.constant 0 : i32
    %c0_i32_1 = arith.constant 0 : i32
    %c0_i32_2 = arith.constant 0 : i32
    return %c0_i32, %c0_i32_0, %c0_i32_1 : i32, i32, i32
  }
  func.func @transform_2(%arg0: i32) -> (i32, i32) {
    %c0_i32 = arith.constant 0 : i32
    %c0_i32_0 = arith.constant 0 : i32
    %c0_i32_1 = arith.constant 0 : i32
    return %c0_i32, %c0_i32_0 : i32, i32
  }
  func.func @transform_3(%arg0: i32) -> (i32, i32, i32, i32) {
    %c0_i32 = arith.constant 0 : i32
    %c0_i32_0 = arith.constant 0 : i32
    %c0_i32_1 = arith.constant 0 : i32
    %c0_i32_2 = arith.constant 0 : i32
    return %arg0, %c0_i32, %c0_i32_0, %c0_i32_1 : i32, i32, i32, i32
  }
}

module attributes {stable_mosaic.version = 11 : i64} {
  func.func @kernel(%arg0: i32, %arg1: memref<1x9x16x256xf32, #tpu.memory_space<vmem>>, %arg2: memref<16x8x16xf32, #tpu.memory_space<vmem>>, %arg3: memref<8x1xf32, #tpu.memory_space<vmem>>, %arg4: memref<1x4x8x256xf32, #tpu.memory_space<vmem>>) attributes {dimension_semantics = [#tpu.dimension_semantics<parallel>], iteration_bounds = array<i64: 2>, scalar_prefetch = 0 : i64, scratch_operands = 0 : i64, tpu.core_type = #tpu.core_type<tc>, window_params = [{transform_indices = @transform_0, window_bounds = array<i64: 1, 9, 16, 256>}, {pipeline_mode = #tpu.pipeline_mode<synchronous>, transform_indices = @transform_1, window_bounds = array<i64: 16, 8, 16>}, {pipeline_mode = #tpu.pipeline_mode<synchronous>, transform_indices = @transform_2, window_bounds = array<i64: 8, 1>}, {transform_indices = @transform_3, window_bounds = array<i64: 1, 4, 8, 256>}]} {
    %c0 = arith.constant 0 : index
    %c0_0 = arith.constant 0 : index
    %0 = vector.load %arg3[%c0, %c0_0] : memref<8x1xf32, #tpu.memory_space<vmem>>, vector<8x1xf32>
    %c0_1 = arith.constant 0 : index
    %c0_2 = arith.constant 0 : index
    %c0_3 = arith.constant 0 : index
    %1 = vector.load %arg2[%c0_1, %c0_2, %c0_3] : memref<16x8x16xf32, #tpu.memory_space<vmem>>, vector<1x8x16xf32>
    %2 = vector.shape_cast %1 : vector<1x8x16xf32> to vector<8x16xf32>
    %c0_4 = arith.constant 0 : index
    %c0_5 = arith.constant 0 : index
    %c0_6 = arith.constant 0 : index
    %c0_7 = arith.constant 0 : index
    %3 = vector.load %arg1[%c0_4, %c0_5, %c0_6, %c0_7] : memref<1x9x16x256xf32, #tpu.memory_space<vmem>>, vector<1x1x16x256xf32>
    %4 = vector.shape_cast %3 : vector<1x1x16x256xf32> to vector<16x256xf32>
    %cst = arith.constant dense<0.000000e+00> : vector<8x256xf32>
    %5 = tpu.matmul %2, %4, %cst {dimension_numbers = #tpu.dot_dimension_numbers<[1], [0], [0], [1], [0, 0, 1, 1], [], []>} : vector<8x16xf32>, vector<16x256xf32>, vector<8x256xf32> -> vector<8x256xf32>
    %c1 = arith.constant 1 : index
    %c0_8 = arith.constant 0 : index
    %c0_9 = arith.constant 0 : index
    %6 = vector.load %arg2[%c1, %c0_8, %c0_9] : memref<16x8x16xf32, #tpu.memory_space<vmem>>, vector<1x8x16xf32>
    %7 = vector.shape_cast %6 : vector<1x8x16xf32> to vector<8x16xf32>
    %c0_10 = arith.constant 0 : index
    %c1_11 = arith.constant 1 : index
    %c0_12 = arith.constant 0 : index
    %c0_13 = arith.constant 0 : index
    %8 = vector.load %arg1[%c0_10, %c1_11, %c0_12, %c0_13] : memref<1x9x16x256xf32, #tpu.memory_space<vmem>>, vector<1x1x16x256xf32>
    %9 = vector.shape_cast %8 : vector<1x1x16x256xf32> to vector<16x256xf32>
    %cst_14 = arith.constant dense<0.000000e+00> : vector<8x256xf32>
    %10 = tpu.matmul %7, %9, %cst_14 {dimension_numbers = #tpu.dot_dimension_numbers<[1], [0], [0], [1], [0, 0, 1, 1], [], []>} : vector<8x16xf32>, vector<16x256xf32>, vector<8x256xf32> -> vector<8x256xf32>
    %11 = arith.addf %5, %10 : vector<8x256xf32>
    %c2 = arith.constant 2 : index
    %c0_15 = arith.constant 0 : index
    %c0_16 = arith.constant 0 : index
    %12 = vector.load %arg2[%c2, %c0_15, %c0_16] : memref<16x8x16xf32, #tpu.memory_space<vmem>>, vector<1x8x16xf32>
    %13 = vector.shape_cast %12 : vector<1x8x16xf32> to vector<8x16xf32>
    %c0_17 = arith.constant 0 : index
    %c3 = arith.constant 3 : index
    %c0_18 = arith.constant 0 : index
    %c0_19 = arith.constant 0 : index
    %14 = vector.load %arg1[%c0_17, %c3, %c0_18, %c0_19] : memref<1x9x16x256xf32, #tpu.memory_space<vmem>>, vector<1x1x16x256xf32>
    %15 = vector.shape_cast %14 : vector<1x1x16x256xf32> to vector<16x256xf32>
    %cst_20 = arith.constant dense<0.000000e+00> : vector<8x256xf32>
    %16 = tpu.matmul %13, %15, %cst_20 {dimension_numbers = #tpu.dot_dimension_numbers<[1], [0], [0], [1], [0, 0, 1, 1], [], []>} : vector<8x16xf32>, vector<16x256xf32>, vector<8x256xf32> -> vector<8x256xf32>
    %17 = arith.addf %11, %16 : vector<8x256xf32>
    %c3_21 = arith.constant 3 : index
    %c0_22 = arith.constant 0 : index
    %c0_23 = arith.constant 0 : index
    %18 = vector.load %arg2[%c3_21, %c0_22, %c0_23] : memref<16x8x16xf32, #tpu.memory_space<vmem>>, vector<1x8x16xf32>
    %19 = vector.shape_cast %18 : vector<1x8x16xf32> to vector<8x16xf32>
    %c0_24 = arith.constant 0 : index
    %c4 = arith.constant 4 : index
    %c0_25 = arith.constant 0 : index
    %c0_26 = arith.constant 0 : index
    %20 = vector.load %arg1[%c0_24, %c4, %c0_25, %c0_26] : memref<1x9x16x256xf32, #tpu.memory_space<vmem>>, vector<1x1x16x256xf32>
    %21 = vector.shape_cast %20 : vector<1x1x16x256xf32> to vector<16x256xf32>
    %cst_27 = arith.constant dense<0.000000e+00> : vector<8x256xf32>
    %22 = tpu.matmul %19, %21, %cst_27 {dimension_numbers = #tpu.dot_dimension_numbers<[1], [0], [0], [1], [0, 0, 1, 1], [], []>} : vector<8x16xf32>, vector<16x256xf32>, vector<8x256xf32> -> vector<8x256xf32>
    %23 = arith.addf %17, %22 : vector<8x256xf32>
    %24 = vector.broadcast %0 : vector<8x1xf32> to vector<8x256xf32>
    %25 = arith.addf %23, %24 : vector<8x256xf32>
    %c4_28 = arith.constant 4 : index
    %c0_29 = arith.constant 0 : index
    %c0_30 = arith.constant 0 : index
    %26 = vector.load %arg2[%c4_28, %c0_29, %c0_30] : memref<16x8x16xf32, #tpu.memory_space<vmem>>, vector<1x8x16xf32>
    %27 = vector.shape_cast %26 : vector<1x8x16xf32> to vector<8x16xf32>
    %c0_31 = arith.constant 0 : index
    %c1_32 = arith.constant 1 : index
    %c0_33 = arith.constant 0 : index
    %c0_34 = arith.constant 0 : index
    %28 = vector.load %arg1[%c0_31, %c1_32, %c0_33, %c0_34] : memref<1x9x16x256xf32, #tpu.memory_space<vmem>>, vector<1x1x16x256xf32>
    %29 = vector.shape_cast %28 : vector<1x1x16x256xf32> to vector<16x256xf32>
    %cst_35 = arith.constant dense<0.000000e+00> : vector<8x256xf32>
    %30 = tpu.matmul %27, %29, %cst_35 {dimension_numbers = #tpu.dot_dimension_numbers<[1], [0], [0], [1], [0, 0, 1, 1], [], []>} : vector<8x16xf32>, vector<16x256xf32>, vector<8x256xf32> -> vector<8x256xf32>
    %c5 = arith.constant 5 : index
    %c0_36 = arith.constant 0 : index
    %c0_37 = arith.constant 0 : index
    %31 = vector.load %arg2[%c5, %c0_36, %c0_37] : memref<16x8x16xf32, #tpu.memory_space<vmem>>, vector<1x8x16xf32>
    %32 = vector.shape_cast %31 : vector<1x8x16xf32> to vector<8x16xf32>
    %c0_38 = arith.constant 0 : index
    %c2_39 = arith.constant 2 : index
    %c0_40 = arith.constant 0 : index
    %c0_41 = arith.constant 0 : index
    %33 = vector.load %arg1[%c0_38, %c2_39, %c0_40, %c0_41] : memref<1x9x16x256xf32, #tpu.memory_space<vmem>>, vector<1x1x16x256xf32>
    %34 = vector.shape_cast %33 : vector<1x1x16x256xf32> to vector<16x256xf32>
    %cst_42 = arith.constant dense<0.000000e+00> : vector<8x256xf32>
    %35 = tpu.matmul %32, %34, %cst_42 {dimension_numbers = #tpu.dot_dimension_numbers<[1], [0], [0], [1], [0, 0, 1, 1], [], []>} : vector<8x16xf32>, vector<16x256xf32>, vector<8x256xf32> -> vector<8x256xf32>
    %36 = arith.addf %30, %35 : vector<8x256xf32>
    %c6 = arith.constant 6 : index
    %c0_43 = arith.constant 0 : index
    %c0_44 = arith.constant 0 : index
    %37 = vector.load %arg2[%c6, %c0_43, %c0_44] : memref<16x8x16xf32, #tpu.memory_space<vmem>>, vector<1x8x16xf32>
    %38 = vector.shape_cast %37 : vector<1x8x16xf32> to vector<8x16xf32>
    %c0_45 = arith.constant 0 : index
    %c4_46 = arith.constant 4 : index
    %c0_47 = arith.constant 0 : index
    %c0_48 = arith.constant 0 : index
    %39 = vector.load %arg1[%c0_45, %c4_46, %c0_47, %c0_48] : memref<1x9x16x256xf32, #tpu.memory_space<vmem>>, vector<1x1x16x256xf32>
    %40 = vector.shape_cast %39 : vector<1x1x16x256xf32> to vector<16x256xf32>
    %cst_49 = arith.constant dense<0.000000e+00> : vector<8x256xf32>
    %41 = tpu.matmul %38, %40, %cst_49 {dimension_numbers = #tpu.dot_dimension_numbers<[1], [0], [0], [1], [0, 0, 1, 1], [], []>} : vector<8x16xf32>, vector<16x256xf32>, vector<8x256xf32> -> vector<8x256xf32>
    %42 = arith.addf %36, %41 : vector<8x256xf32>
    %c7 = arith.constant 7 : index
    %c0_50 = arith.constant 0 : index
    %c0_51 = arith.constant 0 : index
    %43 = vector.load %arg2[%c7, %c0_50, %c0_51] : memref<16x8x16xf32, #tpu.memory_space<vmem>>, vector<1x8x16xf32>
    %44 = vector.shape_cast %43 : vector<1x8x16xf32> to vector<8x16xf32>
    %c0_52 = arith.constant 0 : index
    %c5_53 = arith.constant 5 : index
    %c0_54 = arith.constant 0 : index
    %c0_55 = arith.constant 0 : index
    %45 = vector.load %arg1[%c0_52, %c5_53, %c0_54, %c0_55] : memref<1x9x16x256xf32, #tpu.memory_space<vmem>>, vector<1x1x16x256xf32>
    %46 = vector.shape_cast %45 : vector<1x1x16x256xf32> to vector<16x256xf32>
    %cst_56 = arith.constant dense<0.000000e+00> : vector<8x256xf32>
    %47 = tpu.matmul %44, %46, %cst_56 {dimension_numbers = #tpu.dot_dimension_numbers<[1], [0], [0], [1], [0, 0, 1, 1], [], []>} : vector<8x16xf32>, vector<16x256xf32>, vector<8x256xf32> -> vector<8x256xf32>
    %48 = arith.addf %42, %47 : vector<8x256xf32>
    %49 = vector.broadcast %0 : vector<8x1xf32> to vector<8x256xf32>
    %50 = arith.addf %48, %49 : vector<8x256xf32>
    %c8 = arith.constant 8 : index
    %c0_57 = arith.constant 0 : index
    %c0_58 = arith.constant 0 : index
    %51 = vector.load %arg2[%c8, %c0_57, %c0_58] : memref<16x8x16xf32, #tpu.memory_space<vmem>>, vector<1x8x16xf32>
    %52 = vector.shape_cast %51 : vector<1x8x16xf32> to vector<8x16xf32>
    %c0_59 = arith.constant 0 : index
    %c3_60 = arith.constant 3 : index
    %c0_61 = arith.constant 0 : index
    %c0_62 = arith.constant 0 : index
    %53 = vector.load %arg1[%c0_59, %c3_60, %c0_61, %c0_62] : memref<1x9x16x256xf32, #tpu.memory_space<vmem>>, vector<1x1x16x256xf32>
    %54 = vector.shape_cast %53 : vector<1x1x16x256xf32> to vector<16x256xf32>
    %cst_63 = arith.constant dense<0.000000e+00> : vector<8x256xf32>
    %55 = tpu.matmul %52, %54, %cst_63 {dimension_numbers = #tpu.dot_dimension_numbers<[1], [0], [0], [1], [0, 0, 1, 1], [], []>} : vector<8x16xf32>, vector<16x256xf32>, vector<8x256xf32> -> vector<8x256xf32>
    %c9 = arith.constant 9 : index
    %c0_64 = arith.constant 0 : index
    %c0_65 = arith.constant 0 : index
    %56 = vector.load %arg2[%c9, %c0_64, %c0_65] : memref<16x8x16xf32, #tpu.memory_space<vmem>>, vector<1x8x16xf32>
    %57 = vector.shape_cast %56 : vector<1x8x16xf32> to vector<8x16xf32>
    %c0_66 = arith.constant 0 : index
    %c4_67 = arith.constant 4 : index
    %c0_68 = arith.constant 0 : index
    %c0_69 = arith.constant 0 : index
    %58 = vector.load %arg1[%c0_66, %c4_67, %c0_68, %c0_69] : memref<1x9x16x256xf32, #tpu.memory_space<vmem>>, vector<1x1x16x256xf32>
    %59 = vector.shape_cast %58 : vector<1x1x16x256xf32> to vector<16x256xf32>
    %cst_70 = arith.constant dense<0.000000e+00> : vector<8x256xf32>
    %60 = tpu.matmul %57, %59, %cst_70 {dimension_numbers = #tpu.dot_dimension_numbers<[1], [0], [0], [1], [0, 0, 1, 1], [], []>} : vector<8x16xf32>, vector<16x256xf32>, vector<8x256xf32> -> vector<8x256xf32>
    %61 = arith.addf %55, %60 : vector<8x256xf32>
    %c10 = arith.constant 10 : index
    %c0_71 = arith.constant 0 : index
    %c0_72 = arith.constant 0 : index
    %62 = vector.load %arg2[%c10, %c0_71, %c0_72] : memref<16x8x16xf32, #tpu.memory_space<vmem>>, vector<1x8x16xf32>
    %63 = vector.shape_cast %62 : vector<1x8x16xf32> to vector<8x16xf32>
    %c0_73 = arith.constant 0 : index
    %c6_74 = arith.constant 6 : index
    %c0_75 = arith.constant 0 : index
    %c0_76 = arith.constant 0 : index
    %64 = vector.load %arg1[%c0_73, %c6_74, %c0_75, %c0_76] : memref<1x9x16x256xf32, #tpu.memory_space<vmem>>, vector<1x1x16x256xf32>
    %65 = vector.shape_cast %64 : vector<1x1x16x256xf32> to vector<16x256xf32>
    %cst_77 = arith.constant dense<0.000000e+00> : vector<8x256xf32>
    %66 = tpu.matmul %63, %65, %cst_77 {dimension_numbers = #tpu.dot_dimension_numbers<[1], [0], [0], [1], [0, 0, 1, 1], [], []>} : vector<8x16xf32>, vector<16x256xf32>, vector<8x256xf32> -> vector<8x256xf32>
    %67 = arith.addf %61, %66 : vector<8x256xf32>
    %c11 = arith.constant 11 : index
    %c0_78 = arith.constant 0 : index
    %c0_79 = arith.constant 0 : index
    %68 = vector.load %arg2[%c11, %c0_78, %c0_79] : memref<16x8x16xf32, #tpu.memory_space<vmem>>, vector<1x8x16xf32>
    %69 = vector.shape_cast %68 : vector<1x8x16xf32> to vector<8x16xf32>
    %c0_80 = arith.constant 0 : index
    %c7_81 = arith.constant 7 : index
    %c0_82 = arith.constant 0 : index
    %c0_83 = arith.constant 0 : index
    %70 = vector.load %arg1[%c0_80, %c7_81, %c0_82, %c0_83] : memref<1x9x16x256xf32, #tpu.memory_space<vmem>>, vector<1x1x16x256xf32>
    %71 = vector.shape_cast %70 : vector<1x1x16x256xf32> to vector<16x256xf32>
    %cst_84 = arith.constant dense<0.000000e+00> : vector<8x256xf32>
    %72 = tpu.matmul %69, %71, %cst_84 {dimension_numbers = #tpu.dot_dimension_numbers<[1], [0], [0], [1], [0, 0, 1, 1], [], []>} : vector<8x16xf32>, vector<16x256xf32>, vector<8x256xf32> -> vector<8x256xf32>
    %73 = arith.addf %67, %72 : vector<8x256xf32>
    %74 = vector.broadcast %0 : vector<8x1xf32> to vector<8x256xf32>
    %75 = arith.addf %73, %74 : vector<8x256xf32>
    %c12 = arith.constant 12 : index
    %c0_85 = arith.constant 0 : index
    %c0_86 = arith.constant 0 : index
    %76 = vector.load %arg2[%c12, %c0_85, %c0_86] : memref<16x8x16xf32, #tpu.memory_space<vmem>>, vector<1x8x16xf32>
    %77 = vector.shape_cast %76 : vector<1x8x16xf32> to vector<8x16xf32>
    %c0_87 = arith.constant 0 : index
    %c4_88 = arith.constant 4 : index
    %c0_89 = arith.constant 0 : index
    %c0_90 = arith.constant 0 : index
    %78 = vector.load %arg1[%c0_87, %c4_88, %c0_89, %c0_90] : memref<1x9x16x256xf32, #tpu.memory_space<vmem>>, vector<1x1x16x256xf32>
    %79 = vector.shape_cast %78 : vector<1x1x16x256xf32> to vector<16x256xf32>
    %cst_91 = arith.constant dense<0.000000e+00> : vector<8x256xf32>
    %80 = tpu.matmul %77, %79, %cst_91 {dimension_numbers = #tpu.dot_dimension_numbers<[1], [0], [0], [1], [0, 0, 1, 1], [], []>} : vector<8x16xf32>, vector<16x256xf32>, vector<8x256xf32> -> vector<8x256xf32>
    %c13 = arith.constant 13 : index
    %c0_92 = arith.constant 0 : index
    %c0_93 = arith.constant 0 : index
    %81 = vector.load %arg2[%c13, %c0_92, %c0_93] : memref<16x8x16xf32, #tpu.memory_space<vmem>>, vector<1x8x16xf32>
    %82 = vector.shape_cast %81 : vector<1x8x16xf32> to vector<8x16xf32>
    %c0_94 = arith.constant 0 : index
    %c5_95 = arith.constant 5 : index
    %c0_96 = arith.constant 0 : index
    %c0_97 = arith.constant 0 : index
    %83 = vector.load %arg1[%c0_94, %c5_95, %c0_96, %c0_97] : memref<1x9x16x256xf32, #tpu.memory_space<vmem>>, vector<1x1x16x256xf32>
    %84 = vector.shape_cast %83 : vector<1x1x16x256xf32> to vector<16x256xf32>
    %cst_98 = arith.constant dense<0.000000e+00> : vector<8x256xf32>
    %85 = tpu.matmul %82, %84, %cst_98 {dimension_numbers = #tpu.dot_dimension_numbers<[1], [0], [0], [1], [0, 0, 1, 1], [], []>} : vector<8x16xf32>, vector<16x256xf32>, vector<8x256xf32> -> vector<8x256xf32>
    %86 = arith.addf %80, %85 : vector<8x256xf32>
    %c14 = arith.constant 14 : index
    %c0_99 = arith.constant 0 : index
    %c0_100 = arith.constant 0 : index
    %87 = vector.load %arg2[%c14, %c0_99, %c0_100] : memref<16x8x16xf32, #tpu.memory_space<vmem>>, vector<1x8x16xf32>
    %88 = vector.shape_cast %87 : vector<1x8x16xf32> to vector<8x16xf32>
    %c0_101 = arith.constant 0 : index
    %c7_102 = arith.constant 7 : index
    %c0_103 = arith.constant 0 : index
    %c0_104 = arith.constant 0 : index
    %89 = vector.load %arg1[%c0_101, %c7_102, %c0_103, %c0_104] : memref<1x9x16x256xf32, #tpu.memory_space<vmem>>, vector<1x1x16x256xf32>
    %90 = vector.shape_cast %89 : vector<1x1x16x256xf32> to vector<16x256xf32>
    %cst_105 = arith.constant dense<0.000000e+00> : vector<8x256xf32>
    %91 = tpu.matmul %88, %90, %cst_105 {dimension_numbers = #tpu.dot_dimension_numbers<[1], [0], [0], [1], [0, 0, 1, 1], [], []>} : vector<8x16xf32>, vector<16x256xf32>, vector<8x256xf32> -> vector<8x256xf32>
    %92 = arith.addf %86, %91 : vector<8x256xf32>
    %c15 = arith.constant 15 : index
    %c0_106 = arith.constant 0 : index
    %c0_107 = arith.constant 0 : index
    %93 = vector.load %arg2[%c15, %c0_106, %c0_107] : memref<16x8x16xf32, #tpu.memory_space<vmem>>, vector<1x8x16xf32>
    %94 = vector.shape_cast %93 : vector<1x8x16xf32> to vector<8x16xf32>
    %c0_108 = arith.constant 0 : index
    %c8_109 = arith.constant 8 : index
    %c0_110 = arith.constant 0 : index
    %c0_111 = arith.constant 0 : index
    %95 = vector.load %arg1[%c0_108, %c8_109, %c0_110, %c0_111] : memref<1x9x16x256xf32, #tpu.memory_space<vmem>>, vector<1x1x16x256xf32>
    %96 = vector.shape_cast %95 : vector<1x1x16x256xf32> to vector<16x256xf32>
    %cst_112 = arith.constant dense<0.000000e+00> : vector<8x256xf32>
    %97 = tpu.matmul %94, %96, %cst_112 {dimension_numbers = #tpu.dot_dimension_numbers<[1], [0], [0], [1], [0, 0, 1, 1], [], []>} : vector<8x16xf32>, vector<16x256xf32>, vector<8x256xf32> -> vector<8x256xf32>
    %98 = arith.addf %92, %97 : vector<8x256xf32>
    %99 = vector.broadcast %0 : vector<8x1xf32> to vector<8x256xf32>
    %100 = arith.addf %98, %99 : vector<8x256xf32>
    %101 = arith.addf %25, %50 : vector<8x256xf32>
    %102 = arith.addf %101, %75 : vector<8x256xf32>
    %103 = arith.addf %102, %100 : vector<8x256xf32>
    %cst_113 = arith.constant dense<0.000000e+00> : vector<8xf32>
    %104 = vector.multi_reduction <add>, %103, %cst_113 [1] : vector<8x256xf32> to vector<8xf32>
    %105 = vector.shape_cast %104 : vector<8xf32> to vector<8x1xf32>
    %cst_114 = arith.constant 9.765625E-4 : f32
    %106 = vector.broadcast %cst_114 : f32 to vector<8x1xf32>
    %107 = arith.mulf %105, %106 : vector<8x1xf32>
    %108 = vector.broadcast %107 : vector<8x1xf32> to vector<8x256xf32>
    %109 = arith.subf %25, %108 : vector<8x256xf32>
    %110 = arith.mulf %109, %109 : vector<8x256xf32>
    %cst_115 = arith.constant dense<0.000000e+00> : vector<8xf32>
    %111 = vector.multi_reduction <add>, %110, %cst_115 [1] : vector<8x256xf32> to vector<8xf32>
    %112 = vector.shape_cast %111 : vector<8xf32> to vector<8x1xf32>
    %113 = vector.broadcast %107 : vector<8x1xf32> to vector<8x256xf32>
    %114 = arith.subf %50, %113 : vector<8x256xf32>
    %115 = arith.mulf %114, %114 : vector<8x256xf32>
    %cst_116 = arith.constant dense<0.000000e+00> : vector<8xf32>
    %116 = vector.multi_reduction <add>, %115, %cst_116 [1] : vector<8x256xf32> to vector<8xf32>
    %117 = vector.shape_cast %116 : vector<8xf32> to vector<8x1xf32>
    %118 = arith.addf %112, %117 : vector<8x1xf32>
    %119 = vector.broadcast %107 : vector<8x1xf32> to vector<8x256xf32>
    %120 = arith.subf %75, %119 : vector<8x256xf32>
    %121 = arith.mulf %120, %120 : vector<8x256xf32>
    %cst_117 = arith.constant dense<0.000000e+00> : vector<8xf32>
    %122 = vector.multi_reduction <add>, %121, %cst_117 [1] : vector<8x256xf32> to vector<8xf32>
    %123 = vector.shape_cast %122 : vector<8xf32> to vector<8x1xf32>
    %124 = arith.addf %118, %123 : vector<8x1xf32>
    %125 = vector.broadcast %107 : vector<8x1xf32> to vector<8x256xf32>
    %126 = arith.subf %100, %125 : vector<8x256xf32>
    %127 = arith.mulf %126, %126 : vector<8x256xf32>
    %cst_118 = arith.constant dense<0.000000e+00> : vector<8xf32>
    %128 = vector.multi_reduction <add>, %127, %cst_118 [1] : vector<8x256xf32> to vector<8xf32>
    %129 = vector.shape_cast %128 : vector<8xf32> to vector<8x1xf32>
    %130 = arith.addf %124, %129 : vector<8x1xf32>
    %cst_119 = arith.constant 9.765625E-4 : f32
    %131 = vector.broadcast %cst_119 : f32 to vector<8x1xf32>
    %132 = arith.mulf %130, %131 : vector<8x1xf32>
    %cst_120 = arith.constant 9.99999974E-6 : f32
    %133 = vector.broadcast %cst_120 : f32 to vector<8x1xf32>
    %134 = arith.addf %132, %133 : vector<8x1xf32>
    %135 = math.rsqrt %134 : vector<8x1xf32>
    %136 = vector.broadcast %107 : vector<8x1xf32> to vector<8x256xf32>
    %137 = arith.subf %25, %136 : vector<8x256xf32>
    %138 = vector.broadcast %135 : vector<8x1xf32> to vector<8x256xf32>
    %139 = arith.mulf %137, %138 : vector<8x256xf32>
    %cst_121 = arith.constant 0.000000e+00 : f32
    %140 = vector.broadcast %cst_121 : f32 to vector<8x256xf32>
    %141 = arith.maximumf %139, %140 : vector<8x256xf32>
    %142 = vector.shape_cast %141 : vector<8x256xf32> to vector<1x8x256xf32>
    %c0_122 = arith.constant 0 : index
    %c0_123 = arith.constant 0 : index
    %c0_124 = arith.constant 0 : index
    %c0_125 = arith.constant 0 : index
    %143 = vector.load %arg4[%c0_122, %c0_123, %c0_124, %c0_125] : memref<1x4x8x256xf32, #tpu.memory_space<vmem>>, vector<1x1x8x256xf32>
    %144 = vector.shape_cast %143 : vector<1x1x8x256xf32> to vector<1x8x256xf32>
    %145 = vector.shape_cast %142 : vector<1x8x256xf32> to vector<1x1x8x256xf32>
    tpu.vector_store %arg4[%c0_122, %c0_123, %c0_124, %c0_125], %145 {strides = array<i32>} : memref<1x4x8x256xf32, #tpu.memory_space<vmem>>, vector<1x1x8x256xf32>,
    %146 = vector.broadcast %107 : vector<8x1xf32> to vector<8x256xf32>
    %147 = arith.subf %50, %146 : vector<8x256xf32>
    %148 = vector.broadcast %135 : vector<8x1xf32> to vector<8x256xf32>
    %149 = arith.mulf %147, %148 : vector<8x256xf32>
    %cst_126 = arith.constant 0.000000e+00 : f32
    %150 = vector.broadcast %cst_126 : f32 to vector<8x256xf32>
    %151 = arith.maximumf %149, %150 : vector<8x256xf32>
    %152 = vector.shape_cast %151 : vector<8x256xf32> to vector<1x8x256xf32>
    %c0_127 = arith.constant 0 : index
    %c1_128 = arith.constant 1 : index
    %c0_129 = arith.constant 0 : index
    %c0_130 = arith.constant 0 : index
    %153 = vector.load %arg4[%c0_127, %c1_128, %c0_129, %c0_130] : memref<1x4x8x256xf32, #tpu.memory_space<vmem>>, vector<1x1x8x256xf32>
    %154 = vector.shape_cast %153 : vector<1x1x8x256xf32> to vector<1x8x256xf32>
    %155 = vector.shape_cast %152 : vector<1x8x256xf32> to vector<1x1x8x256xf32>
    tpu.vector_store %arg4[%c0_127, %c1_128, %c0_129, %c0_130], %155 {strides = array<i32>} : memref<1x4x8x256xf32, #tpu.memory_space<vmem>>, vector<1x1x8x256xf32>,
    %156 = vector.broadcast %107 : vector<8x1xf32> to vector<8x256xf32>
    %157 = arith.subf %75, %156 : vector<8x256xf32>
    %158 = vector.broadcast %135 : vector<8x1xf32> to vector<8x256xf32>
    %159 = arith.mulf %157, %158 : vector<8x256xf32>
    %cst_131 = arith.constant 0.000000e+00 : f32
    %160 = vector.broadcast %cst_131 : f32 to vector<8x256xf32>
    %161 = arith.maximumf %159, %160 : vector<8x256xf32>
    %162 = vector.shape_cast %161 : vector<8x256xf32> to vector<1x8x256xf32>
    %c0_132 = arith.constant 0 : index
    %c2_133 = arith.constant 2 : index
    %c0_134 = arith.constant 0 : index
    %c0_135 = arith.constant 0 : index
    %163 = vector.load %arg4[%c0_132, %c2_133, %c0_134, %c0_135] : memref<1x4x8x256xf32, #tpu.memory_space<vmem>>, vector<1x1x8x256xf32>
    %164 = vector.shape_cast %163 : vector<1x1x8x256xf32> to vector<1x8x256xf32>
    %165 = vector.shape_cast %162 : vector<1x8x256xf32> to vector<1x1x8x256xf32>
    tpu.vector_store %arg4[%c0_132, %c2_133, %c0_134, %c0_135], %165 {strides = array<i32>} : memref<1x4x8x256xf32, #tpu.memory_space<vmem>>, vector<1x1x8x256xf32>,
    %166 = vector.broadcast %107 : vector<8x1xf32> to vector<8x256xf32>
    %167 = arith.subf %100, %166 : vector<8x256xf32>
    %168 = vector.broadcast %135 : vector<8x1xf32> to vector<8x256xf32>
    %169 = arith.mulf %167, %168 : vector<8x256xf32>
    %cst_136 = arith.constant 0.000000e+00 : f32
    %170 = vector.broadcast %cst_136 : f32 to vector<8x256xf32>
    %171 = arith.maximumf %169, %170 : vector<8x256xf32>
    %172 = vector.shape_cast %171 : vector<8x256xf32> to vector<1x8x256xf32>
    %c0_137 = arith.constant 0 : index
    %c3_138 = arith.constant 3 : index
    %c0_139 = arith.constant 0 : index
    %c0_140 = arith.constant 0 : index
    %173 = vector.load %arg4[%c0_137, %c3_138, %c0_139, %c0_140] : memref<1x4x8x256xf32, #tpu.memory_space<vmem>>, vector<1x1x8x256xf32>
    %174 = vector.shape_cast %173 : vector<1x1x8x256xf32> to vector<1x8x256xf32>
    %175 = vector.shape_cast %172 : vector<1x8x256xf32> to vector<1x1x8x256xf32>
    tpu.vector_store %arg4[%c0_137, %c3_138, %c0_139, %c0_140], %175 {strides = array<i32>} : memref<1x4x8x256xf32, #tpu.memory_space<vmem>>, vector<1x1x8x256xf32>,
    return
  }
  func.func @transform_0(%arg0: i32) -> (i32, i32, i32, i32) {
    %c0_i32 = arith.constant 0 : i32
    %c0_i32_0 = arith.constant 0 : i32
    %c0_i32_1 = arith.constant 0 : i32
    %c0_i32_2 = arith.constant 0 : i32
    return %arg0, %c0_i32, %c0_i32_0, %c0_i32_1 : i32, i32, i32, i32
  }
  func.func @transform_1(%arg0: i32) -> (i32, i32, i32) {
    %c0_i32 = arith.constant 0 : i32
    %c0_i32_0 = arith.constant 0 : i32
    %c0_i32_1 = arith.constant 0 : i32
    %c0_i32_2 = arith.constant 0 : i32
    return %c0_i32, %c0_i32_0, %c0_i32_1 : i32, i32, i32
  }
  func.func @transform_2(%arg0: i32) -> (i32, i32) {
    %c0_i32 = arith.constant 0 : i32
    %c0_i32_0 = arith.constant 0 : i32
    %c0_i32_1 = arith.constant 0 : i32
    return %c0_i32, %c0_i32_0 : i32, i32
  }
  func.func @transform_3(%arg0: i32) -> (i32, i32, i32, i32) {
    %c0_i32 = arith.constant 0 : i32
    %c0_i32_0 = arith.constant 0 : i32
    %c0_i32_1 = arith.constant 0 : i32
    %c0_i32_2 = arith.constant 0 : i32
    return %arg0, %c0_i32, %c0_i32_0, %c0_i32_1 : i32, i32, i32, i32
  }
}

module attributes {stable_mosaic.version = 11 : i64} {
  func.func @kernel(%arg0: i32, %arg1: memref<1x9x8x1024xf32, #tpu.memory_space<vmem>>, %arg2: memref<16x1x8xf32, #tpu.memory_space<vmem>>, %arg3: memref<1x1xf32, #tpu.memory_space<vmem>>, %arg4: memref<1x4x1x1024xf32, #tpu.memory_space<vmem>>) attributes {dimension_semantics = [#tpu.dimension_semantics<parallel>], iteration_bounds = array<i64: 2>, scalar_prefetch = 0 : i64, scratch_operands = 0 : i64, tpu.core_type = #tpu.core_type<tc>, window_params = [{transform_indices = @transform_0, window_bounds = array<i64: 1, 9, 8, 1024>}, {pipeline_mode = #tpu.pipeline_mode<synchronous>, transform_indices = @transform_1, window_bounds = array<i64: 16, 1, 8>}, {pipeline_mode = #tpu.pipeline_mode<synchronous>, transform_indices = @transform_2, window_bounds = array<i64: 1, 1>}, {transform_indices = @transform_3, window_bounds = array<i64: 1, 4, 1, 1024>}]} {
    %c0 = arith.constant 0 : index
    %c0_0 = arith.constant 0 : index
    %0 = vector.load %arg3[%c0, %c0_0] : memref<1x1xf32, #tpu.memory_space<vmem>>, vector<1x1xf32>
    %c0_1 = arith.constant 0 : index
    %c0_2 = arith.constant 0 : index
    %c0_3 = arith.constant 0 : index
    %1 = vector.load %arg2[%c0_1, %c0_2, %c0_3] : memref<16x1x8xf32, #tpu.memory_space<vmem>>, vector<1x1x8xf32>
    %2 = vector.shape_cast %1 : vector<1x1x8xf32> to vector<1x8xf32>
    %c0_4 = arith.constant 0 : index
    %c0_5 = arith.constant 0 : index
    %c0_6 = arith.constant 0 : index
    %c0_7 = arith.constant 0 : index
    %3 = vector.load %arg1[%c0_4, %c0_5, %c0_6, %c0_7] : memref<1x9x8x1024xf32, #tpu.memory_space<vmem>>, vector<1x1x8x1024xf32>
    %4 = vector.shape_cast %3 : vector<1x1x8x1024xf32> to vector<8x1024xf32>
    %cst = arith.constant dense<0.000000e+00> : vector<1x1024xf32>
    %5 = tpu.matmul %2, %4, %cst {dimension_numbers = #tpu.dot_dimension_numbers<[1], [0], [0], [1], [0, 0, 1, 1], [], []>} : vector<1x8xf32>, vector<8x1024xf32>, vector<1x1024xf32> -> vector<1x1024xf32>
    %c1 = arith.constant 1 : index
    %c0_8 = arith.constant 0 : index
    %c0_9 = arith.constant 0 : index
    %6 = vector.load %arg2[%c1, %c0_8, %c0_9] : memref<16x1x8xf32, #tpu.memory_space<vmem>>, vector<1x1x8xf32>
    %7 = vector.shape_cast %6 : vector<1x1x8xf32> to vector<1x8xf32>
    %c0_10 = arith.constant 0 : index
    %c1_11 = arith.constant 1 : index
    %c0_12 = arith.constant 0 : index
    %c0_13 = arith.constant 0 : index
    %8 = vector.load %arg1[%c0_10, %c1_11, %c0_12, %c0_13] : memref<1x9x8x1024xf32, #tpu.memory_space<vmem>>, vector<1x1x8x1024xf32>
    %9 = vector.shape_cast %8 : vector<1x1x8x1024xf32> to vector<8x1024xf32>
    %cst_14 = arith.constant dense<0.000000e+00> : vector<1x1024xf32>
    %10 = tpu.matmul %7, %9, %cst_14 {dimension_numbers = #tpu.dot_dimension_numbers<[1], [0], [0], [1], [0, 0, 1, 1], [], []>} : vector<1x8xf32>, vector<8x1024xf32>, vector<1x1024xf32> -> vector<1x1024xf32>
    %11 = arith.addf %5, %10 : vector<1x1024xf32>
    %c2 = arith.constant 2 : index
    %c0_15 = arith.constant 0 : index
    %c0_16 = arith.constant 0 : index
    %12 = vector.load %arg2[%c2, %c0_15, %c0_16] : memref<16x1x8xf32, #tpu.memory_space<vmem>>, vector<1x1x8xf32>
    %13 = vector.shape_cast %12 : vector<1x1x8xf32> to vector<1x8xf32>
    %c0_17 = arith.constant 0 : index
    %c3 = arith.constant 3 : index
    %c0_18 = arith.constant 0 : index
    %c0_19 = arith.constant 0 : index
    %14 = vector.load %arg1[%c0_17, %c3, %c0_18, %c0_19] : memref<1x9x8x1024xf32, #tpu.memory_space<vmem>>, vector<1x1x8x1024xf32>
    %15 = vector.shape_cast %14 : vector<1x1x8x1024xf32> to vector<8x1024xf32>
    %cst_20 = arith.constant dense<0.000000e+00> : vector<1x1024xf32>
    %16 = tpu.matmul %13, %15, %cst_20 {dimension_numbers = #tpu.dot_dimension_numbers<[1], [0], [0], [1], [0, 0, 1, 1], [], []>} : vector<1x8xf32>, vector<8x1024xf32>, vector<1x1024xf32> -> vector<1x1024xf32>
    %17 = arith.addf %11, %16 : vector<1x1024xf32>
    %c3_21 = arith.constant 3 : index
    %c0_22 = arith.constant 0 : index
    %c0_23 = arith.constant 0 : index
    %18 = vector.load %arg2[%c3_21, %c0_22, %c0_23] : memref<16x1x8xf32, #tpu.memory_space<vmem>>, vector<1x1x8xf32>
    %19 = vector.shape_cast %18 : vector<1x1x8xf32> to vector<1x8xf32>
    %c0_24 = arith.constant 0 : index
    %c4 = arith.constant 4 : index
    %c0_25 = arith.constant 0 : index
    %c0_26 = arith.constant 0 : index
    %20 = vector.load %arg1[%c0_24, %c4, %c0_25, %c0_26] : memref<1x9x8x1024xf32, #tpu.memory_space<vmem>>, vector<1x1x8x1024xf32>
    %21 = vector.shape_cast %20 : vector<1x1x8x1024xf32> to vector<8x1024xf32>
    %cst_27 = arith.constant dense<0.000000e+00> : vector<1x1024xf32>
    %22 = tpu.matmul %19, %21, %cst_27 {dimension_numbers = #tpu.dot_dimension_numbers<[1], [0], [0], [1], [0, 0, 1, 1], [], []>} : vector<1x8xf32>, vector<8x1024xf32>, vector<1x1024xf32> -> vector<1x1024xf32>
    %23 = arith.addf %17, %22 : vector<1x1024xf32>
    %24 = vector.broadcast %0 : vector<1x1xf32> to vector<1x1024xf32>
    %25 = arith.addf %23, %24 : vector<1x1024xf32>
    %c4_28 = arith.constant 4 : index
    %c0_29 = arith.constant 0 : index
    %c0_30 = arith.constant 0 : index
    %26 = vector.load %arg2[%c4_28, %c0_29, %c0_30] : memref<16x1x8xf32, #tpu.memory_space<vmem>>, vector<1x1x8xf32>
    %27 = vector.shape_cast %26 : vector<1x1x8xf32> to vector<1x8xf32>
    %c0_31 = arith.constant 0 : index
    %c1_32 = arith.constant 1 : index
    %c0_33 = arith.constant 0 : index
    %c0_34 = arith.constant 0 : index
    %28 = vector.load %arg1[%c0_31, %c1_32, %c0_33, %c0_34] : memref<1x9x8x1024xf32, #tpu.memory_space<vmem>>, vector<1x1x8x1024xf32>
    %29 = vector.shape_cast %28 : vector<1x1x8x1024xf32> to vector<8x1024xf32>
    %cst_35 = arith.constant dense<0.000000e+00> : vector<1x1024xf32>
    %30 = tpu.matmul %27, %29, %cst_35 {dimension_numbers = #tpu.dot_dimension_numbers<[1], [0], [0], [1], [0, 0, 1, 1], [], []>} : vector<1x8xf32>, vector<8x1024xf32>, vector<1x1024xf32> -> vector<1x1024xf32>
    %c5 = arith.constant 5 : index
    %c0_36 = arith.constant 0 : index
    %c0_37 = arith.constant 0 : index
    %31 = vector.load %arg2[%c5, %c0_36, %c0_37] : memref<16x1x8xf32, #tpu.memory_space<vmem>>, vector<1x1x8xf32>
    %32 = vector.shape_cast %31 : vector<1x1x8xf32> to vector<1x8xf32>
    %c0_38 = arith.constant 0 : index
    %c2_39 = arith.constant 2 : index
    %c0_40 = arith.constant 0 : index
    %c0_41 = arith.constant 0 : index
    %33 = vector.load %arg1[%c0_38, %c2_39, %c0_40, %c0_41] : memref<1x9x8x1024xf32, #tpu.memory_space<vmem>>, vector<1x1x8x1024xf32>
    %34 = vector.shape_cast %33 : vector<1x1x8x1024xf32> to vector<8x1024xf32>
    %cst_42 = arith.constant dense<0.000000e+00> : vector<1x1024xf32>
    %35 = tpu.matmul %32, %34, %cst_42 {dimension_numbers = #tpu.dot_dimension_numbers<[1], [0], [0], [1], [0, 0, 1, 1], [], []>} : vector<1x8xf32>, vector<8x1024xf32>, vector<1x1024xf32> -> vector<1x1024xf32>
    %36 = arith.addf %30, %35 : vector<1x1024xf32>
    %c6 = arith.constant 6 : index
    %c0_43 = arith.constant 0 : index
    %c0_44 = arith.constant 0 : index
    %37 = vector.load %arg2[%c6, %c0_43, %c0_44] : memref<16x1x8xf32, #tpu.memory_space<vmem>>, vector<1x1x8xf32>
    %38 = vector.shape_cast %37 : vector<1x1x8xf32> to vector<1x8xf32>
    %c0_45 = arith.constant 0 : index
    %c4_46 = arith.constant 4 : index
    %c0_47 = arith.constant 0 : index
    %c0_48 = arith.constant 0 : index
    %39 = vector.load %arg1[%c0_45, %c4_46, %c0_47, %c0_48] : memref<1x9x8x1024xf32, #tpu.memory_space<vmem>>, vector<1x1x8x1024xf32>
    %40 = vector.shape_cast %39 : vector<1x1x8x1024xf32> to vector<8x1024xf32>
    %cst_49 = arith.constant dense<0.000000e+00> : vector<1x1024xf32>
    %41 = tpu.matmul %38, %40, %cst_49 {dimension_numbers = #tpu.dot_dimension_numbers<[1], [0], [0], [1], [0, 0, 1, 1], [], []>} : vector<1x8xf32>, vector<8x1024xf32>, vector<1x1024xf32> -> vector<1x1024xf32>
    %42 = arith.addf %36, %41 : vector<1x1024xf32>
    %c7 = arith.constant 7 : index
    %c0_50 = arith.constant 0 : index
    %c0_51 = arith.constant 0 : index
    %43 = vector.load %arg2[%c7, %c0_50, %c0_51] : memref<16x1x8xf32, #tpu.memory_space<vmem>>, vector<1x1x8xf32>
    %44 = vector.shape_cast %43 : vector<1x1x8xf32> to vector<1x8xf32>
    %c0_52 = arith.constant 0 : index
    %c5_53 = arith.constant 5 : index
    %c0_54 = arith.constant 0 : index
    %c0_55 = arith.constant 0 : index
    %45 = vector.load %arg1[%c0_52, %c5_53, %c0_54, %c0_55] : memref<1x9x8x1024xf32, #tpu.memory_space<vmem>>, vector<1x1x8x1024xf32>
    %46 = vector.shape_cast %45 : vector<1x1x8x1024xf32> to vector<8x1024xf32>
    %cst_56 = arith.constant dense<0.000000e+00> : vector<1x1024xf32>
    %47 = tpu.matmul %44, %46, %cst_56 {dimension_numbers = #tpu.dot_dimension_numbers<[1], [0], [0], [1], [0, 0, 1, 1], [], []>} : vector<1x8xf32>, vector<8x1024xf32>, vector<1x1024xf32> -> vector<1x1024xf32>
    %48 = arith.addf %42, %47 : vector<1x1024xf32>
    %49 = vector.broadcast %0 : vector<1x1xf32> to vector<1x1024xf32>
    %50 = arith.addf %48, %49 : vector<1x1024xf32>
    %c8 = arith.constant 8 : index
    %c0_57 = arith.constant 0 : index
    %c0_58 = arith.constant 0 : index
    %51 = vector.load %arg2[%c8, %c0_57, %c0_58] : memref<16x1x8xf32, #tpu.memory_space<vmem>>, vector<1x1x8xf32>
    %52 = vector.shape_cast %51 : vector<1x1x8xf32> to vector<1x8xf32>
    %c0_59 = arith.constant 0 : index
    %c3_60 = arith.constant 3 : index
    %c0_61 = arith.constant 0 : index
    %c0_62 = arith.constant 0 : index
    %53 = vector.load %arg1[%c0_59, %c3_60, %c0_61, %c0_62] : memref<1x9x8x1024xf32, #tpu.memory_space<vmem>>, vector<1x1x8x1024xf32>
    %54 = vector.shape_cast %53 : vector<1x1x8x1024xf32> to vector<8x1024xf32>
    %cst_63 = arith.constant dense<0.000000e+00> : vector<1x1024xf32>
    %55 = tpu.matmul %52, %54, %cst_63 {dimension_numbers = #tpu.dot_dimension_numbers<[1], [0], [0], [1], [0, 0, 1, 1], [], []>} : vector<1x8xf32>, vector<8x1024xf32>, vector<1x1024xf32> -> vector<1x1024xf32>
    %c9 = arith.constant 9 : index
    %c0_64 = arith.constant 0 : index
    %c0_65 = arith.constant 0 : index
    %56 = vector.load %arg2[%c9, %c0_64, %c0_65] : memref<16x1x8xf32, #tpu.memory_space<vmem>>, vector<1x1x8xf32>
    %57 = vector.shape_cast %56 : vector<1x1x8xf32> to vector<1x8xf32>
    %c0_66 = arith.constant 0 : index
    %c4_67 = arith.constant 4 : index
    %c0_68 = arith.constant 0 : index
    %c0_69 = arith.constant 0 : index
    %58 = vector.load %arg1[%c0_66, %c4_67, %c0_68, %c0_69] : memref<1x9x8x1024xf32, #tpu.memory_space<vmem>>, vector<1x1x8x1024xf32>
    %59 = vector.shape_cast %58 : vector<1x1x8x1024xf32> to vector<8x1024xf32>
    %cst_70 = arith.constant dense<0.000000e+00> : vector<1x1024xf32>
    %60 = tpu.matmul %57, %59, %cst_70 {dimension_numbers = #tpu.dot_dimension_numbers<[1], [0], [0], [1], [0, 0, 1, 1], [], []>} : vector<1x8xf32>, vector<8x1024xf32>, vector<1x1024xf32> -> vector<1x1024xf32>
    %61 = arith.addf %55, %60 : vector<1x1024xf32>
    %c10 = arith.constant 10 : index
    %c0_71 = arith.constant 0 : index
    %c0_72 = arith.constant 0 : index
    %62 = vector.load %arg2[%c10, %c0_71, %c0_72] : memref<16x1x8xf32, #tpu.memory_space<vmem>>, vector<1x1x8xf32>
    %63 = vector.shape_cast %62 : vector<1x1x8xf32> to vector<1x8xf32>
    %c0_73 = arith.constant 0 : index
    %c6_74 = arith.constant 6 : index
    %c0_75 = arith.constant 0 : index
    %c0_76 = arith.constant 0 : index
    %64 = vector.load %arg1[%c0_73, %c6_74, %c0_75, %c0_76] : memref<1x9x8x1024xf32, #tpu.memory_space<vmem>>, vector<1x1x8x1024xf32>
    %65 = vector.shape_cast %64 : vector<1x1x8x1024xf32> to vector<8x1024xf32>
    %cst_77 = arith.constant dense<0.000000e+00> : vector<1x1024xf32>
    %66 = tpu.matmul %63, %65, %cst_77 {dimension_numbers = #tpu.dot_dimension_numbers<[1], [0], [0], [1], [0, 0, 1, 1], [], []>} : vector<1x8xf32>, vector<8x1024xf32>, vector<1x1024xf32> -> vector<1x1024xf32>
    %67 = arith.addf %61, %66 : vector<1x1024xf32>
    %c11 = arith.constant 11 : index
    %c0_78 = arith.constant 0 : index
    %c0_79 = arith.constant 0 : index
    %68 = vector.load %arg2[%c11, %c0_78, %c0_79] : memref<16x1x8xf32, #tpu.memory_space<vmem>>, vector<1x1x8xf32>
    %69 = vector.shape_cast %68 : vector<1x1x8xf32> to vector<1x8xf32>
    %c0_80 = arith.constant 0 : index
    %c7_81 = arith.constant 7 : index
    %c0_82 = arith.constant 0 : index
    %c0_83 = arith.constant 0 : index
    %70 = vector.load %arg1[%c0_80, %c7_81, %c0_82, %c0_83] : memref<1x9x8x1024xf32, #tpu.memory_space<vmem>>, vector<1x1x8x1024xf32>
    %71 = vector.shape_cast %70 : vector<1x1x8x1024xf32> to vector<8x1024xf32>
    %cst_84 = arith.constant dense<0.000000e+00> : vector<1x1024xf32>
    %72 = tpu.matmul %69, %71, %cst_84 {dimension_numbers = #tpu.dot_dimension_numbers<[1], [0], [0], [1], [0, 0, 1, 1], [], []>} : vector<1x8xf32>, vector<8x1024xf32>, vector<1x1024xf32> -> vector<1x1024xf32>
    %73 = arith.addf %67, %72 : vector<1x1024xf32>
    %74 = vector.broadcast %0 : vector<1x1xf32> to vector<1x1024xf32>
    %75 = arith.addf %73, %74 : vector<1x1024xf32>
    %c12 = arith.constant 12 : index
    %c0_85 = arith.constant 0 : index
    %c0_86 = arith.constant 0 : index
    %76 = vector.load %arg2[%c12, %c0_85, %c0_86] : memref<16x1x8xf32, #tpu.memory_space<vmem>>, vector<1x1x8xf32>
    %77 = vector.shape_cast %76 : vector<1x1x8xf32> to vector<1x8xf32>
    %c0_87 = arith.constant 0 : index
    %c4_88 = arith.constant 4 : index
    %c0_89 = arith.constant 0 : index
    %c0_90 = arith.constant 0 : index
    %78 = vector.load %arg1[%c0_87, %c4_88, %c0_89, %c0_90] : memref<1x9x8x1024xf32, #tpu.memory_space<vmem>>, vector<1x1x8x1024xf32>
    %79 = vector.shape_cast %78 : vector<1x1x8x1024xf32> to vector<8x1024xf32>
    %cst_91 = arith.constant dense<0.000000e+00> : vector<1x1024xf32>
    %80 = tpu.matmul %77, %79, %cst_91 {dimension_numbers = #tpu.dot_dimension_numbers<[1], [0], [0], [1], [0, 0, 1, 1], [], []>} : vector<1x8xf32>, vector<8x1024xf32>, vector<1x1024xf32> -> vector<1x1024xf32>
    %c13 = arith.constant 13 : index
    %c0_92 = arith.constant 0 : index
    %c0_93 = arith.constant 0 : index
    %81 = vector.load %arg2[%c13, %c0_92, %c0_93] : memref<16x1x8xf32, #tpu.memory_space<vmem>>, vector<1x1x8xf32>
    %82 = vector.shape_cast %81 : vector<1x1x8xf32> to vector<1x8xf32>
    %c0_94 = arith.constant 0 : index
    %c5_95 = arith.constant 5 : index
    %c0_96 = arith.constant 0 : index
    %c0_97 = arith.constant 0 : index
    %83 = vector.load %arg1[%c0_94, %c5_95, %c0_96, %c0_97] : memref<1x9x8x1024xf32, #tpu.memory_space<vmem>>, vector<1x1x8x1024xf32>
    %84 = vector.shape_cast %83 : vector<1x1x8x1024xf32> to vector<8x1024xf32>
    %cst_98 = arith.constant dense<0.000000e+00> : vector<1x1024xf32>
    %85 = tpu.matmul %82, %84, %cst_98 {dimension_numbers = #tpu.dot_dimension_numbers<[1], [0], [0], [1], [0, 0, 1, 1], [], []>} : vector<1x8xf32>, vector<8x1024xf32>, vector<1x1024xf32> -> vector<1x1024xf32>
    %86 = arith.addf %80, %85 : vector<1x1024xf32>
    %c14 = arith.constant 14 : index
    %c0_99 = arith.constant 0 : index
    %c0_100 = arith.constant 0 : index
    %87 = vector.load %arg2[%c14, %c0_99, %c0_100] : memref<16x1x8xf32, #tpu.memory_space<vmem>>, vector<1x1x8xf32>
    %88 = vector.shape_cast %87 : vector<1x1x8xf32> to vector<1x8xf32>
    %c0_101 = arith.constant 0 : index
    %c7_102 = arith.constant 7 : index
    %c0_103 = arith.constant 0 : index
    %c0_104 = arith.constant 0 : index
    %89 = vector.load %arg1[%c0_101, %c7_102, %c0_103, %c0_104] : memref<1x9x8x1024xf32, #tpu.memory_space<vmem>>, vector<1x1x8x1024xf32>
    %90 = vector.shape_cast %89 : vector<1x1x8x1024xf32> to vector<8x1024xf32>
    %cst_105 = arith.constant dense<0.000000e+00> : vector<1x1024xf32>
    %91 = tpu.matmul %88, %90, %cst_105 {dimension_numbers = #tpu.dot_dimension_numbers<[1], [0], [0], [1], [0, 0, 1, 1], [], []>} : vector<1x8xf32>, vector<8x1024xf32>, vector<1x1024xf32> -> vector<1x1024xf32>
    %92 = arith.addf %86, %91 : vector<1x1024xf32>
    %c15 = arith.constant 15 : index
    %c0_106 = arith.constant 0 : index
    %c0_107 = arith.constant 0 : index
    %93 = vector.load %arg2[%c15, %c0_106, %c0_107] : memref<16x1x8xf32, #tpu.memory_space<vmem>>, vector<1x1x8xf32>
    %94 = vector.shape_cast %93 : vector<1x1x8xf32> to vector<1x8xf32>
    %c0_108 = arith.constant 0 : index
    %c8_109 = arith.constant 8 : index
    %c0_110 = arith.constant 0 : index
    %c0_111 = arith.constant 0 : index
    %95 = vector.load %arg1[%c0_108, %c8_109, %c0_110, %c0_111] : memref<1x9x8x1024xf32, #tpu.memory_space<vmem>>, vector<1x1x8x1024xf32>
    %96 = vector.shape_cast %95 : vector<1x1x8x1024xf32> to vector<8x1024xf32>
    %cst_112 = arith.constant dense<0.000000e+00> : vector<1x1024xf32>
    %97 = tpu.matmul %94, %96, %cst_112 {dimension_numbers = #tpu.dot_dimension_numbers<[1], [0], [0], [1], [0, 0, 1, 1], [], []>} : vector<1x8xf32>, vector<8x1024xf32>, vector<1x1024xf32> -> vector<1x1024xf32>
    %98 = arith.addf %92, %97 : vector<1x1024xf32>
    %99 = vector.broadcast %0 : vector<1x1xf32> to vector<1x1024xf32>
    %100 = arith.addf %98, %99 : vector<1x1024xf32>
    %101 = arith.negf %25 : vector<1x1024xf32>
    %102 = math.exp %101 : vector<1x1024xf32>
    %cst_113 = arith.constant 1.000000e+00 : f32
    %103 = vector.broadcast %cst_113 : f32 to vector<1x1024xf32>
    %104 = arith.addf %103, %102 : vector<1x1024xf32>
    %105 = arith.divf %103, %104 : vector<1x1024xf32>
    %106 = vector.shape_cast %105 : vector<1x1024xf32> to vector<1x1x1024xf32>
    %c0_114 = arith.constant 0 : index
    %c0_115 = arith.constant 0 : index
    %c0_116 = arith.constant 0 : index
    %c0_117 = arith.constant 0 : index
    %107 = vector.load %arg4[%c0_114, %c0_115, %c0_116, %c0_117] : memref<1x4x1x1024xf32, #tpu.memory_space<vmem>>, vector<1x1x1x1024xf32>
    %108 = vector.shape_cast %107 : vector<1x1x1x1024xf32> to vector<1x1x1024xf32>
    %109 = vector.shape_cast %106 : vector<1x1x1024xf32> to vector<1x1x1x1024xf32>
    tpu.vector_store %arg4[%c0_114, %c0_115, %c0_116, %c0_117], %109 {strides = array<i32>} : memref<1x4x1x1024xf32, #tpu.memory_space<vmem>>, vector<1x1x1x1024xf32>,
    %110 = arith.negf %50 : vector<1x1024xf32>
    %111 = math.exp %110 : vector<1x1024xf32>
    %cst_118 = arith.constant 1.000000e+00 : f32
    %112 = vector.broadcast %cst_118 : f32 to vector<1x1024xf32>
    %113 = arith.addf %112, %111 : vector<1x1024xf32>
    %114 = arith.divf %112, %113 : vector<1x1024xf32>
    %115 = vector.shape_cast %114 : vector<1x1024xf32> to vector<1x1x1024xf32>
    %c0_119 = arith.constant 0 : index
    %c1_120 = arith.constant 1 : index
    %c0_121 = arith.constant 0 : index
    %c0_122 = arith.constant 0 : index
    %116 = vector.load %arg4[%c0_119, %c1_120, %c0_121, %c0_122] : memref<1x4x1x1024xf32, #tpu.memory_space<vmem>>, vector<1x1x1x1024xf32>
    %117 = vector.shape_cast %116 : vector<1x1x1x1024xf32> to vector<1x1x1024xf32>
    %118 = vector.shape_cast %115 : vector<1x1x1024xf32> to vector<1x1x1x1024xf32>
    tpu.vector_store %arg4[%c0_119, %c1_120, %c0_121, %c0_122], %118 {strides = array<i32>} : memref<1x4x1x1024xf32, #tpu.memory_space<vmem>>, vector<1x1x1x1024xf32>,
    %119 = arith.negf %75 : vector<1x1024xf32>
    %120 = math.exp %119 : vector<1x1024xf32>
    %cst_123 = arith.constant 1.000000e+00 : f32
    %121 = vector.broadcast %cst_123 : f32 to vector<1x1024xf32>
    %122 = arith.addf %121, %120 : vector<1x1024xf32>
    %123 = arith.divf %121, %122 : vector<1x1024xf32>
    %124 = vector.shape_cast %123 : vector<1x1024xf32> to vector<1x1x1024xf32>
    %c0_124 = arith.constant 0 : index
    %c2_125 = arith.constant 2 : index
    %c0_126 = arith.constant 0 : index
    %c0_127 = arith.constant 0 : index
    %125 = vector.load %arg4[%c0_124, %c2_125, %c0_126, %c0_127] : memref<1x4x1x1024xf32, #tpu.memory_space<vmem>>, vector<1x1x1x1024xf32>
    %126 = vector.shape_cast %125 : vector<1x1x1x1024xf32> to vector<1x1x1024xf32>
    %127 = vector.shape_cast %124 : vector<1x1x1024xf32> to vector<1x1x1x1024xf32>
    tpu.vector_store %arg4[%c0_124, %c2_125, %c0_126, %c0_127], %127 {strides = array<i32>} : memref<1x4x1x1024xf32, #tpu.memory_space<vmem>>, vector<1x1x1x1024xf32>,
    %128 = arith.negf %100 : vector<1x1024xf32>
    %129 = math.exp %128 : vector<1x1024xf32>
    %cst_128 = arith.constant 1.000000e+00 : f32
    %130 = vector.broadcast %cst_128 : f32 to vector<1x1024xf32>
    %131 = arith.addf %130, %129 : vector<1x1024xf32>
    %132 = arith.divf %130, %131 : vector<1x1024xf32>
    %133 = vector.shape_cast %132 : vector<1x1024xf32> to vector<1x1x1024xf32>
    %c0_129 = arith.constant 0 : index
    %c3_130 = arith.constant 3 : index
    %c0_131 = arith.constant 0 : index
    %c0_132 = arith.constant 0 : index
    %134 = vector.load %arg4[%c0_129, %c3_130, %c0_131, %c0_132] : memref<1x4x1x1024xf32, #tpu.memory_space<vmem>>, vector<1x1x1x1024xf32>
    %135 = vector.shape_cast %134 : vector<1x1x1x1024xf32> to vector<1x1x1024xf32>
    %136 = vector.shape_cast %133 : vector<1x1x1024xf32> to vector<1x1x1x1024xf32>
    tpu.vector_store %arg4[%c0_129, %c3_130, %c0_131, %c0_132], %136 {strides = array<i32>} : memref<1x4x1x1024xf32, #tpu.memory_space<vmem>>, vector<1x1x1x1024xf32>,
    return
  }
  func.func @transform_0(%arg0: i32) -> (i32, i32, i32, i32) {
    %c0_i32 = arith.constant 0 : i32
    %c0_i32_0 = arith.constant 0 : i32
    %c0_i32_1 = arith.constant 0 : i32
    %c0_i32_2 = arith.constant 0 : i32
    return %arg0, %c0_i32, %c0_i32_0, %c0_i32_1 : i32, i32, i32, i32
  }
  func.func @transform_1(%arg0: i32) -> (i32, i32, i32) {
    %c0_i32 = arith.constant 0 : i32
    %c0_i32_0 = arith.constant 0 : i32
    %c0_i32_1 = arith.constant 0 : i32
    %c0_i32_2 = arith.constant 0 : i32
    return %c0_i32, %c0_i32_0, %c0_i32_1 : i32, i32, i32
  }
  func.func @transform_2(%arg0: i32) -> (i32, i32) {
    %c0_i32 = arith.constant 0 : i32
    %c0_i32_0 = arith.constant 0 : i32
    %c0_i32_1 = arith.constant 0 : i32
    return %c0_i32, %c0_i32_0 : i32, i32
  }
  func.func @transform_3(%arg0: i32) -> (i32, i32, i32, i32) {
    %c0_i32 = arith.constant 0 : i32
    %c0_i32_0 = arith.constant 0 : i32
    %c0_i32_1 = arith.constant 0 : i32
    %c0_i32_2 = arith.constant 0 : i32
    return %arg0, %c0_i32, %c0_i32_0, %c0_i32_1 : i32, i32, i32, i32
  }
}

</mosaic_0001>

<bundles_post_ra>
// kernel: shape_decoder_forward.5
= control target key start
LH: loop header
LB: loop body
LE: loop exit
PB: predicated region body
PF: predicated region fallthrough
CT: control target
= control target key end

     0   :  { %8 = vsyncpa [#allocation3], 0  ;;  %s2028_s12 = smov 0   ;;  %s2399_s0 = inlined_call_operand.vmem [shape: f32[2,1,18], index: 0, kind: input, shape index: {}]   ;;  %s2400_s1 = inlined_call_operand.vmem [shape: f32[16,18,64], index: 1, kind: input, shape index: {}]   ;;  %s2401_s2 = inlined_call_operand.hbm [shape: f32[1,64], index: 2, kind: input, shape index: {}]   ;;  %s2402_s3 = inlined_call_operand.vmem [shape: f32[2,16,64], index: 3, kind: output, shape index: {}]  }
   0x1 LB: > { %s2034_s13 = sadd.s32 4294967295, %s2002_s12   ;;  %p1597_p0 = scmp.ge.s32.totalorder %s2002_s12, 1  ;;  %s2002_s12 = sphi %s2028_s12, %s14_s12  }
   0x2   : > { %p113_p1 = scmp.lt.s32.totalorder %s2002_s12, 3  ;;  %p2403_p3 = scmp.eq.s32.totalorder %s2034_s13, 0 }
   0x3   : > { %s2004_s15 = smov [#allocation2]   ;;  %s1964_s20 = scalar_lea.hbm %s2401_s2, 16 }
   0x4   : > { %p2038_p2 = pnand %p1597_p0, %p113_p1  ;;  %s129_s16 = sshll.u32 %s2004_s15, 4  ;;  %s130_s16 = int_to_ptr.vmem [resolvable:$true] %s129_s16 }
   0x5   : > { %p1965_p6 = scmp.ne.s32.totalorder %s2401_s2, %s1964_s20  ;;  %p1971_p10 = scmp.lt.u32.totalorder %s1964_s20, %s2401_s2 }
   0x6   : > { %s2405_s14 = scalar_select %p2038_p2, 1, 0 }
   0x7   : > { %p1944_p4 = pneg %p2038_p2 }
   0x9   : > { %p2047_p5 = pnand %p2403_p3, %p1944_p4 }
   0xb   : > { %p1966_p7 = pneg %p2047_p5 }
   0xd   : > { %p1967_p8 = pnand %p1966_p7, %p1965_p6 }
   0xf   : > { %p1968_p9 = pneg %p1967_p8 }
  0x11   : > { %p1973_p11 = pnand %p1971_p10, %p1968_p9 }
  0x13   : > { %1976 = shalt.err (!%p1973_p11)
}
  0x14   : > { %s1977_s25 = scalar_lea.vmem %s130_s16, 16  ;;  %s1984_s26 = scalar_lea.vmem %s130_s16, 32 }
  0x15   : > { %p1978_p12 = scmp.ne.s32.totalorder %s130_s16, %s1977_s25  ;;  %p1985_p1 = scmp.lt.s32.totalorder %s130_s16, %s130_s16 }
  0x16   : > { %p1986_p4 = scmp.lt.s32.totalorder %s1984_s26, %s1977_s25 }
  0x17   : > { %p1980_p13 = pnand %p1978_p12, %p1966_p7 }
  0x18   : > { %p1987_p3 = por %p1986_p4, %p1985_p1 }
  0x19   : > { %p1981_p0 = pneg %p1980_p13 }
  0x1b   : > { %p1988_p2 = pnand %p1987_p3, %p1981_p0 }
  0x1d   : > { %1991 = shalt.err (!%p1988_p2)
}
  0x1e   : > { %1947 = dma.hbm_to_vmem [thread:$0]  (!%p2047_p5), %s2401_s2, 16, %s130_s16, [#allocation3]  }
  0x1f   : > { %p2407_p6 = scmp.ne.s32.totalorder %s2405_s14, 0 }
  0x20   : > { %p2408_p8 = scmp.eq.s32.totalorder (!%p2407_p6), %s2034_s13, 0 }
  0x21   : > { %148 = sbr.rel (%p2407_p6) target bundleno = 374 (0x176), region = 32 }
  0x28   : > { %1997 = dma.done.wait (%p2408_p8), [#allocation3], 16   ;;  %p2409_p7 = pmov %p2408_p8 }
  0x29   : > { %v2005_v0 = vmov 0.0|0.0   ;;  %p170_p2 = scmp.lt.s32.totalorder %s2034_s13, 1  ;;  %vm2006_vm0 = vmmov 0   ;;  %v2007_v1 = vmov 0.0   ;;  %v180_v2 = vld [vmem:[%s2400_s1] sm:$0xff]  ;;  %v181_v3 = vld [vmem:[%s2400_s1 + $0x8] sm:$0xff] }
  0x2a   : > { %1999 = vsyncadd (%p2409_p7), [#allocation3], 4294967280  ;;  %1892 = vmatprep.subr.bf16.mxu0 %v2005_v0  ;;  %1895 = vmatprep.subr.bf16.mxu1 %v2005_v0  ;;  %v1606_v4 = vld [vmem:[%s2400_s1 + $0x18] sm:$0xff]  ;;  %v1893_v5 = vpack.c.bf16 %v181_v3, %v180_v2  ;;  %v1607_v6 = vld [vmem:[%s2400_s1 + $0x20] sm:$0xff]  ;;  %vm187_vm1 = vcmask 1041408   ;;  %vm183_vm2 = vcmask 146432  }
  0x2b   : > { %1754 = vmatprep.mubr.msk.f32.mxu0 %vm2006_vm0, %v2007_v1  ;;  %1763 = vmatprep.mubr.msk.f32.mxu1 %vm2006_vm0, %v2007_v1  ;;  %s2411_s13 = smov (!%p170_p2, %s2034_s13), 1  ;;  %v1896_v7 = vpack.c.bf16 %v1607_v6, %v1606_v4  ;;  %v1611_v8 = vld [vmem:[%s2400_s1 + $0x30] sm:$0xff]  ;;  %v1612_v9 = vld [vmem:[%s2400_s1 + $0x38] sm:$0xff]  ;;  %v1616_v11 = vld [vmem:[%s2400_s1 + $0x48] sm:$0xff]  ;;  %vm1484_vm3 = vcmask 516096  }
  0x2c   : > { %s172_s14 = scalar_lea.vmem %s2399_s0, %s2411_s13  ;;  %1894 = vmatpush3.bf16.msra.mxu0 %v1893_v5  ;;  %v182_v10 = vld [vmem:[%s2400_s1 + $0x10] sm:$0x3]  ;;  %v1608_v14 = vld [vmem:[%s2400_s1 + $0x28] sm:$0x3]  ;;  %v1899_v15 = vpack.c.bf16 %v1612_v9, %v1611_v8  ;;  %v1621_v17 = vld [vmem:[%s2400_s1 + $0x60] sm:$0xff]  ;;  %s1683_s28 = sshll.u32 %s2411_s13, 4 }
  0x2d   : > { %1897 = vmatpush3.bf16.msra.mxu1 %v1896_v7  ;;  %1752 = vmatprep.subr.mxu0 %v2007_v1  ;;  %v1617_v12 = vld [vmem:[%s2400_s1 + $0x50] sm:$0xff]  ;;  %v2116_v13 = vld [vmem:[%s172_s14] sm:$0x1]  ;;  %v1622_v18 = vld [vmem:[%s2400_s1 + $0x68] sm:$0xff]  ;;  %s2359_s4 = scalar_lea.vmem %s2402_s3, %s1683_s28 }
  0x2e   : > { %1761 = vmatprep.subr.mxu1 %v2007_v1  ;;  %v1902_v16 = vpack.c.bf16 %v1617_v12, %v1616_v11  ;;  %v1613_v19 = vld [vmem:[%s2400_s1 + $0x40] sm:$0x3]  ;;  %v1626_v20 = vld [vmem:[%s2400_s1 + $0x78] sm:$0xff]  ;;  %v1905_v22 = vpack.c.bf16 %v1622_v18, %v1621_v17  ;;  %v1631_v25 = vld [vmem:[%s2400_s1 + $0x90] sm:$0xff] }
  0x2f   : > { %v1627_v21 = vld [vmem:[%s2400_s1 + $0x80] sm:$0xff]  ;;  %v1618_v23 = vld [vmem:[%s2400_s1 + $0x58] sm:$0x3]  ;;  %v1623_v27 = vld [vmem:[%s2400_s1 + $0x70] sm:$0x3] }
  0x30   : > { %1753 = vmatpush3.msk.msra.mxu0 %vm187_vm1, %v182_v10  ;;  %v1908_v24 = vpack.c.bf16 %v1627_v21, %v1626_v20  ;;  %v1632_v26 = vld [vmem:[%s2400_s1 + $0x98] sm:$0xff]  ;;  %v1636_v28 = vld [vmem:[%s2400_s1 + $0xa8] sm:$0xff]  ;;  %v1637_v29 = vld [vmem:[%s2400_s1 + $0xb0] sm:$0xff] }
  0x31   : > { %1755 = vmatmul.mubr.msk.f32.vlgmr.msra.gmra.mrb[0].mxu0 %vm183_vm2, %v2116_v13  ;;  %1762 = vmatpush3.msk.msra.mxu1 %vm187_vm1, %v1608_v14  ;;  %v1911_v30 = vpack.c.bf16 %v1632_v26, %v1631_v25  ;;  %v1628_v31 = vld [vmem:[%s2400_s1 + $0x88] sm:$0x3]  ;;  %v1914_v32 = vpack.c.bf16 %v1637_v29, %v1636_v28  ;;  %v1641_v33 = vld [vmem:[%s2400_s1 + $0xc0] sm:$0xff]  ;;  %v1646_v36 = vld [vmem:[%s2400_s1 + $0xd8] sm:$0xff] }
  0x32   : > { %1898 = vmatprep.subr.bf16.mxu0 %v2005_v0  ;;  %1764 = vmatmul.mubr.msk.f32.vlgmr.msra.gmra.mrb[0].mxu1 %vm183_vm2, %v2116_v13  ;;  %v1642_v34 = vld [vmem:[%s2400_s1 + $0xc8] sm:$0xff]  ;;  %v1633_v35 = vld [vmem:[%s2400_s1 + $0xa0] sm:$0x3]  ;;  %v1638_v39 = vld [vmem:[%s2400_s1 + $0xb8] sm:$0x3] }
  0x33   : > { %1900 = vmatpush3.bf16.msra.mxu0 %v1899_v15  ;;  %1901 = vmatprep.subr.bf16.mxu1 %v2005_v0  ;;  %v1647_v37 = vld [vmem:[%s2400_s1 + $0xe0] sm:$0xff]  ;;  %v1917_v38 = vpack.c.bf16 %v1642_v34, %v1641_v33  ;;  %v1651_v41 = vld [vmem:[%s2400_s1 + $0xf0] sm:$0xff]  ;;  %v1652_v42 = vld [vmem:[%s2400_s1 + $0xf8] sm:$0xff] }
  0x34   : > { %1903 = vmatpush3.bf16.msra.mxu1 %v1902_v16  ;;  %1770 = vmatprep.subr.mxu0 %v2007_v1  ;;  %v1920_v40 = vpack.c.bf16 %v1647_v37, %v1646_v36  ;;  %v1643_v43 = vld [vmem:[%s2400_s1 + $0xd0] sm:$0x3]  ;;  %v1656_v44 = vld [vmem:[%s2400_s1 + $0x108] sm:$0xff]  ;;  %v1923_v46 = vpack.c.bf16 %v1652_v42, %v1651_v41  ;;  %v1661_v49 = vld [vmem:[%s2400_s1 + $0x120] sm:$0xff] }
  0x35   : > { %1772 = vmatprep.mubr.msk.f32.mxu0 %vm2006_vm0, %v2007_v1  ;;  %1779 = vmatprep.subr.mxu1 %v2007_v1  ;;  %v1657_v45 = vld [vmem:[%s2400_s1 + $0x110] sm:$0xff]  ;;  %v1648_v47 = vld [vmem:[%s2400_s1 + $0xe8] sm:$0x3]  ;;  %v1653_v51 = vld [vmem:[%s2400_s1 + $0x100] sm:$0x3] }
  0x36   : > { %1781 = vmatprep.mubr.msk.f32.mxu1 %vm2006_vm0, %v2007_v1  ;;  %v1926_v48 = vpack.c.bf16 %v1657_v45, %v1656_v44  ;;  %v1662_v50 = vld [vmem:[%s2400_s1 + $0x128] sm:$0xff]  ;;  %v1666_v52 = vld [vmem:[%s2400_s1 + $0x138] sm:$0xff]  ;;  %v1667_v53 = vld [vmem:[%s2400_s1 + $0x140] sm:$0xff] }
  0x37   : > { %1771 = vmatpush3.msk.msra.mxu0 %vm187_vm1, %v1613_v19  ;;  %v1929_v54 = vpack.c.bf16 %v1662_v50, %v1661_v49  ;;  %v1658_v55 = vld [vmem:[%s2400_s1 + $0x118] sm:$0x3]  ;;  %v1932_v56 = vpack.c.bf16 %v1667_v53, %v1666_v52  ;;  %v1671_v57 = vld [vmem:[%s2400_s1 + $0x150] sm:$0xff]  ;;  %v1676_v60 = vld [vmem:[%s2400_s1 + $0x168] sm:$0xff] }
  0x38   : > { %1773 = vmatmul.mubr.msk.f32.vlgmr.msra.gmra.mrb[2].mxu0 %vm183_vm2, %v2116_v13  ;;  %1904 = vmatprep.subr.bf16.mxu0 %v2005_v0  ;;  %v1672_v58 = vld [vmem:[%s2400_s1 + $0x158] sm:$0xff]  ;;  %v1663_v59 = vld [vmem:[%s2400_s1 + $0x130] sm:$0x3]  ;;  %v1668_v63 = vld [vmem:[%s2400_s1 + $0x148] sm:$0x3] }
  0x39   : > { %1780 = vmatpush3.msk.msra.mxu1 %vm187_vm1, %v1618_v23  ;;  %1906 = vmatpush3.bf16.msra.mxu0 %v1905_v22  ;;  %v1677_v61 = vld [vmem:[%s2400_s1 + $0x170] sm:$0xff]  ;;  %v1935_v62 = vpack.c.bf16 %v1672_v58, %v1671_v57  ;;  %v1673_v3 = vld [vmem:[%s2400_s1 + $0x160] sm:$0x3]  ;;  %v1678_v4 = vld [vmem:[%s2400_s1 + $0x178] sm:$0x3] }
  0x3a   : > { %1782 = vmatmul.mubr.msk.f32.vlgmr.msra.gmra.mrb[2].mxu1 %vm183_vm2, %v2116_v13  ;;  %1907 = vmatprep.subr.bf16.mxu1 %v2005_v0  ;;  %v1938_v2 = vpack.c.bf16 %v1677_v61, %v1676_v60 }
  0x3b   : > { %1909 = vmatpush3.bf16.msra.mxu1 %v1908_v24  ;;  %1788 = vmatprep.subr.mxu0 %v2007_v1 }
  0x3c   : > { %1790 = vmatprep.mubr.msk.f32.mxu0 %vm2006_vm0, %v2007_v1  ;;  %1797 = vmatprep.subr.mxu1 %v2007_v1 }
  0x3d   : > { %1789 = vmatpush3.msk.msra.mxu0 %vm187_vm1, %v1623_v27  ;;  %1799 = vmatprep.mubr.msk.f32.mxu1 %vm2006_vm0, %v2007_v1 }
  0x3e   : > { %1791 = vmatmul.mubr.msk.f32.vlgmr.msra.gmra.mrb[4].mxu0 %vm183_vm2, %v2116_v13  ;;  %1910 = vmatprep.subr.bf16.mxu0 %v2005_v0 }
  0x3f   : > { %1798 = vmatpush3.msk.msra.mxu1 %vm187_vm1, %v1628_v31  ;;  %1912 = vmatpush3.bf16.msra.mxu0 %v1911_v30 }
  0x40   : > { %1800 = vmatmul.mubr.msk.f32.vlgmr.msra.gmra.mrb[4].mxu1 %vm183_vm2, %v2116_v13  ;;  %1913 = vmatprep.subr.bf16.mxu1 %v2005_v0 }
  0x41   : > { %1915 = vmatpush3.bf16.msra.mxu1 %v1914_v32  ;;  %1806 = vmatprep.subr.mxu0 %v2007_v1 }
  0x42   : > { %1808 = vmatprep.mubr.msk.f32.mxu0 %vm2006_vm0, %v2007_v1  ;;  %1815 = vmatprep.subr.mxu1 %v2007_v1 }
  0x43   : > { %1807 = vmatpush3.msk.msra.mxu0 %vm187_vm1, %v1633_v35  ;;  %1817 = vmatprep.mubr.msk.f32.mxu1 %vm2006_vm0, %v2007_v1 }
  0x44   : > { %1809 = vmatmul.mubr.msk.f32.vlgmr.msra.gmra.mrb[6].mxu0 %vm183_vm2, %v2116_v13  ;;  %1916 = vmatprep.subr.bf16.mxu0 %v2005_v0 }
  0x45   : > { %1816 = vmatpush3.msk.msra.mxu1 %vm187_vm1, %v1638_v39  ;;  %1918 = vmatpush3.bf16.msra.mxu0 %v1917_v38 }
  0x46   : > { %1818 = vmatmul.mubr.msk.f32.vlgmr.msra.gmra.mrb[6].mxu1 %vm183_vm2, %v2116_v13  ;;  %1919 = vmatprep.subr.bf16.mxu1 %v2005_v0 }
  0x47   : > { %1921 = vmatpush3.bf16.msra.mxu1 %v1920_v40  ;;  %1824 = vmatprep.subr.mxu0 %v2007_v1 }
  0x48   : > { %1826 = vmatprep.mubr.msk.f32.mxu0 %vm2006_vm0, %v2007_v1  ;;  %1833 = vmatprep.subr.mxu1 %v2007_v1 }
  0x49   : > { %1825 = vmatpush3.msk.msra.mxu0 %vm187_vm1, %v1643_v43  ;;  %1835 = vmatprep.mubr.msk.f32.mxu1 %vm2006_vm0, %v2007_v1 }
  0x4a   : > { %1827 = vmatmul.mubr.msk.f32.vlgmr.msra.gmra.mrb[8].mxu0 %vm183_vm2, %v2116_v13  ;;  %1922 = vmatprep.subr.bf16.mxu0 %v2005_v0 }
  0x4b   : > { %1834 = vmatpush3.msk.msra.mxu1 %vm187_vm1, %v1648_v47  ;;  %1924 = vmatpush3.bf16.msra.mxu0 %v1923_v46 }
  0x4c   : > { %1836 = vmatmul.mubr.msk.f32.vlgmr.msra.gmra.mrb[8].mxu1 %vm183_vm2, %v2116_v13  ;;  %1925 = vmatprep.subr.bf16.mxu1 %v2005_v0 }
  0x4d   : > { %1927 = vmatpush3.bf16.msra.mxu1 %v1926_v48  ;;  %1842 = vmatprep.subr.mxu0 %v2007_v1 }
  0x4e   : > { %1844 = vmatprep.mubr.msk.f32.mxu0 %vm2006_vm0, %v2007_v1  ;;  %1851 = vmatprep.subr.mxu1 %v2007_v1 }
  0x4f   : > { %1843 = vmatpush3.msk.msra.mxu0 %vm187_vm1, %v1653_v51  ;;  %1853 = vmatprep.mubr.msk.f32.mxu1 %vm2006_vm0, %v2007_v1 }
  0x50   : > { %1845 = vmatmul.mubr.msk.f32.vlgmr.msra.gmra.mrb[10].mxu0 %vm183_vm2, %v2116_v13  ;;  %1928 = vmatprep.subr.bf16.mxu0 %v2005_v0 }
  0x51   : > { %1852 = vmatpush3.msk.msra.mxu1 %vm187_vm1, %v1658_v55  ;;  %1930 = vmatpush3.bf16.msra.mxu0 %v1929_v54 }
  0x52   : > { %1854 = vmatmul.mubr.msk.f32.vlgmr.msra.gmra.mrb[10].mxu1 %vm183_vm2, %v2116_v13  ;;  %1931 = vmatprep.subr.bf16.mxu1 %v2005_v0 }
  0x53   : > { %1933 = vmatpush3.bf16.msra.mxu1 %v1932_v56  ;;  %1860 = vmatprep.subr.mxu0 %v2007_v1 }
  0x54   : > { %1862 = vmatprep.mubr.msk.f32.mxu0 %vm2006_vm0, %v2007_v1  ;;  %1869 = vmatprep.subr.mxu1 %v2007_v1 }
  0x55   : > { %1861 = vmatpush3.msk.msra.mxu0 %vm187_vm1, %v1663_v59  ;;  %1871 = vmatprep.mubr.msk.f32.mxu1 %vm2006_vm0, %v2007_v1 }
  0x56   : > { %1863 = vmatmul.mubr.msk.f32.vlgmr.msra.gmra.mrb[12].mxu0 %vm183_vm2, %v2116_v13  ;;  %1934 = vmatprep.subr.bf16.mxu0 %v2005_v0 }
  0x57   : > { %1870 = vmatpush3.msk.msra.mxu1 %vm187_vm1, %v1668_v63  ;;  %1936 = vmatpush3.bf16.msra.mxu0 %v1935_v62 }
  0x58   : > { %1872 = vmatmul.mubr.msk.f32.vlgmr.msra.gmra.mrb[12].mxu1 %vm183_vm2, %v2116_v13  ;;  %1937 = vmatprep.subr.bf16.mxu1 %v2005_v0  ;;  %v179_v0 = vld [vmem:[#allocation2] sm:$0x1] }
  0x59   : > { %1939 = vmatpush3.bf16.msra.mxu1 %v1938_v2  ;;  %1878 = vmatprep.subr.mxu0 %v2007_v1 }
  0x5a   : > { %1880 = vmatprep.mubr.msk.f32.mxu0 %vm2006_vm0, %v2007_v1  ;;  %1887 = vmatprep.subr.mxu1 %v2007_v1 }
  0x5b   : > { %1879 = vmatpush3.msk.msra.mxu0 %vm187_vm1, %v1673_v3  ;;  %1889 = vmatprep.mubr.msk.f32.mxu1 %vm2006_vm0, %v2007_v1 }
  0x5c   : > { %1881 = vmatmul.mubr.msk.f32.vlgmr.msra.gmra.mrb[14].mxu0 %vm183_vm2, %v2116_v13 }
  0x5d   : > { %1888 = vmatpush3.msk.msra.mxu1 %vm187_vm1, %v1678_v4 }
  0x5e   : > { %1890 = vmatmul.mubr.msk.f32.vlgmr.msra.gmra.mrb[14].mxu1 %vm183_vm2, %v2116_v13 }
 0x104   : > { %v257_v5 = vpop.f32.mrb[0].mxu0 }
 0x105   : > { %v2339_v6 = vadd.f32 %v257_v5, %v179_v0  ;;  %v1756_v7 = vpop.f32.mrb[1].mxu0  ;;  %v334_v8 = vpop.f32.mrb[0].mxu1 }
 0x106   : > { %v335_v9 = vadd.f32 %v334_v8, %v179_v0  ;;  %v1765_v10 = vpop.f32.mrb[1].mxu1 }
 0x108   : > { %v1416_v11 = vadd.f32 %v335_v9, %v2339_v6 }
 0x10b   : > { %v411_v12 = vpop.f32.mrb[2].mxu0 }
 0x10c   : > { %v412_v1 = vadd.f32 %v411_v12, %v179_v0  ;;  %v1774_v14 = vpop.f32.mrb[3].mxu0 }
 0x10d   : > { %v488_v15 = vpop.f32.mrb[2].mxu1 }
 0x10e   : > { %v1417_v16 = vadd.f32 %v1416_v11, %v412_v1  ;;  %v489_v17 = vadd.f32 %v488_v15, %v179_v0  ;;  %v1783_v18 = vpop.f32.mrb[3].mxu1 }
 0x110   : > { %v1418_v19 = vadd.f32 %v1417_v16, %v489_v17 }
 0x111   : > { %v565_v20 = vpop.f32.mrb[4].mxu0 }
 0x112   : > { %v566_v13 = vadd.f32 %v565_v20, %v179_v0  ;;  %v1792_v21 = vpop.f32.mrb[5].mxu0 }
 0x113   : > { %v642_v22 = vpop.f32.mrb[4].mxu1 }
 0x114   : > { %v1419_v23 = vadd.f32 %v1418_v19, %v566_v13  ;;  %v643_v24 = vadd.f32 %v642_v22, %v179_v0  ;;  %v1801_v25 = vpop.f32.mrb[5].mxu1 }
 0x116   : > { %v1420_v26 = vadd.f32 %v1419_v23, %v643_v24 }
 0x117   : > { %v719_v27 = vpop.f32.mrb[6].mxu0 }
 0x118   : > { %v720_v28 = vadd.f32 %v719_v27, %v179_v0  ;;  %v1810_v29 = vpop.f32.mrb[7].mxu0 }
 0x119   : > { %v796_v30 = vpop.f32.mrb[6].mxu1 }
 0x11a   : > { %v1421_v31 = vadd.f32 %v1420_v26, %v720_v28  ;;  %v797_v32 = vadd.f32 %v796_v30, %v179_v0  ;;  %v1819_v33 = vpop.f32.mrb[7].mxu1 }
 0x11c   : > { %v1422_v34 = vadd.f32 %v1421_v31, %v797_v32 }
 0x11d   : > { %v873_v35 = vpop.f32.mrb[8].mxu0 }
 0x11e   : > { %v874_v36 = vadd.f32 %v873_v35, %v179_v0  ;;  %v1828_v37 = vpop.f32.mrb[9].mxu0 }
 0x11f   : > { %v950_v38 = vpop.f32.mrb[8].mxu1 }
 0x120   : > { %v1423_v39 = vadd.f32 %v1422_v34, %v874_v36  ;;  %v951_v40 = vadd.f32 %v950_v38, %v179_v0  ;;  %v1837_v41 = vpop.f32.mrb[9].mxu1 }
 0x122   : > { %v1424_v42 = vadd.f32 %v1423_v39, %v951_v40 }
 0x123   : > { %v1027_v43 = vpop.f32.mrb[10].mxu0 }
 0x124   : > { %v1028_v44 = vadd.f32 %v1027_v43, %v179_v0  ;;  %v1846_v45 = vpop.f32.mrb[11].mxu0 }
 0x125   : > { %v1104_v46 = vpop.f32.mrb[10].mxu1 }
 0x126   : > { %v1425_v47 = vadd.f32 %v1424_v42, %v1028_v44  ;;  %v1105_v48 = vadd.f32 %v1104_v46, %v179_v0  ;;  %v1855_v49 = vpop.f32.mrb[11].mxu1 }
 0x128   : > { %v1426_v50 = vadd.f32 %v1425_v47, %v1105_v48 }
 0x129   : > { %v1181_v51 = vpop.f32.mrb[12].mxu0 }
 0x12a   : > { %v1182_v52 = vadd.f32 %v1181_v51, %v179_v0  ;;  %v1864_v53 = vpop.f32.mrb[13].mxu0 }
 0x12b   : > { %v1258_v54 = vpop.f32.mrb[12].mxu1 }
 0x12c   : > { %v1427_v55 = vadd.f32 %v1426_v50, %v1182_v52  ;;  %v1259_v56 = vadd.f32 %v1258_v54, %v179_v0  ;;  %v1873_v57 = vpop.f32.mrb[13].mxu1 }
 0x12e   : > { %v1428_v58 = vadd.f32 %v1427_v55, %v1259_v56 }
 0x12f   : > { %v1335_v59 = vpop.f32.mrb[14].mxu0 }
 0x130   : > { %v1336_v60 = vadd.f32 %v1335_v59, %v179_v0  ;;  %v1882_v61 = vpop.f32.mrb[15].mxu0 }
 0x131   : > { %v1412_v62 = vpop.f32.mrb[14].mxu1 }
 0x132   : > { %v1429_v63 = vadd.f32 %v1428_v58, %v1336_v60  ;;  %v1413_v2 = vadd.f32 %v1412_v62, %v179_v0  ;;  %v1891_v3 = vpop.f32.mrb[15].mxu1 }
 0x134   : > { %v1430_v4 = vadd.f32 %v1429_v63, %v1413_v2 }
 0x136   : > { %v1431_v5 = vmul.f32 0.0625, %v1430_v4 }
 0x138   : > { %v1432_v7 = vsub.f32 %v2339_v6, %v1431_v5  ;;  %v1434_v8 = vsub.f32 %v335_v9, %v1431_v5  ;;  %v1437_v10 = vsub.f32 %v412_v1, %v1431_v5  ;;  %v1440_v11 = vsub.f32 %v489_v17, %v1431_v5 }
 0x139   : > { %v1443_v12 = vsub.f32 %v566_v13, %v1431_v5  ;;  %v1446_v14 = vsub.f32 %v643_v24, %v1431_v5  ;;  %v1449_v15 = vsub.f32 %v720_v28, %v1431_v5  ;;  %v1452_v16 = vsub.f32 %v797_v32, %v1431_v5 }
 0x13a   : > { %v1433_v18 = vmul.f32 %v1432_v7, %v1432_v7  ;;  %v1435_v19 = vmul.f32 %v1434_v8, %v1434_v8  ;;  %v1438_v20 = vmul.f32 %v1437_v10, %v1437_v10  ;;  %v1455_v22 = vsub.f32 %v874_v36, %v1431_v5 }
 0x13b   : > { %v1458_v23 = vsub.f32 %v951_v40, %v1431_v5  ;;  %v1461_v25 = vsub.f32 %v1028_v44, %v1431_v5  ;;  %v1464_v0 = vsub.f32 %v1105_v48, %v1431_v5  ;;  %v2343_v26 = vsub.f32 %v1182_v52, %v1431_v5 }
 0x13c   : > { %v1436_v21 = vadd.f32 %v1435_v19, %v1433_v18  ;;  %v2345_v27 = vsub.f32 %v1259_v56, %v1431_v5  ;;  %v2347_v6 = vsub.f32 %v1336_v60, %v1431_v5  ;;  %v1441_v1 = vmul.f32 %v1440_v11, %v1440_v11 }
 0x13d   : > { %v1444_v13 = vmul.f32 %v1443_v12, %v1443_v12  ;;  %v1476_v24 = vsub.f32 %v1413_v2, %v1431_v5  ;;  %v1447_v29 = vmul.f32 %v1446_v14, %v1446_v14  ;;  %v1450_v31 = vmul.f32 %v1449_v15, %v1449_v15 }
 0x13e   : > { %v1439_v9 = vadd.f32 %v1438_v20, %v1436_v21  ;;  %v1453_v33 = vmul.f32 %v1452_v16, %v1452_v16  ;;  %v1456_v35 = vmul.f32 %v1455_v22, %v1455_v22  ;;  %v1459_v37 = vmul.f32 %v1458_v23, %v1458_v23 }
 0x13f   : > { %v1462_v39 = vmul.f32 %v1461_v25, %v1461_v25  ;;  %v1465_v41 = vmul.f32 %v1464_v0, %v1464_v0  ;;  %v1468_v43 = vmul.f32 %v2343_v26, %v2343_v26  ;;  %v1471_v45 = vmul.f32 %v2345_v27, %v2345_v27 }
 0x140   : > { %v1442_v17 = vadd.f32 %v1441_v1, %v1439_v9  ;;  %v1474_v47 = vmul.f32 %v2347_v6, %v2347_v6  ;;  %v1477_v49 = vmul.f32 %v1476_v24, %v1476_v24 }
 0x142   : > { %v1445_v28 = vadd.f32 %v1444_v13, %v1442_v17 }
 0x144   : > { %v1448_v30 = vadd.f32 %v1447_v29, %v1445_v28 }
 0x146   : > { %v1451_v32 = vadd.f32 %v1450_v31, %v1448_v30 }
 0x148   : > { %v1454_v34 = vadd.f32 %v1453_v33, %v1451_v32 }
 0x14a   : > { %v1457_v36 = vadd.f32 %v1456_v35, %v1454_v34 }
 0x14c   : > { %v1460_v38 = vadd.f32 %v1459_v37, %v1457_v36 }
 0x14e   : > { %v1463_v40 = vadd.f32 %v1462_v39, %v1460_v38 }
 0x150   : > { %v1466_v42 = vadd.f32 %v1465_v41, %v1463_v40 }
 0x152   : > { %v1469_v44 = vadd.f32 %v1468_v43, %v1466_v42 }
 0x154   : > { %v1472_v46 = vadd.f32 %v1471_v45, %v1469_v44 }
 0x156   : > { %v1475_v48 = vadd.f32 %v1474_v47, %v1472_v46 }
 0x158   : > { %v1478_v50 = vadd.f32 %v1477_v49, %v1475_v48 }
 0x15a   : > { %v1479_v51 = vmul.f32 0.0625, %v1478_v50 }
 0x15c   : > { %v1480_v52 = vadd.f32 1e-05, %v1479_v51 }
 0x15e   : > { %1962 = vrsqrt.f32 %v1480_v52 }
 0x168   : > { %v1963_v53 = vpop.eup %1962 }
 0x169   : > { %v1482_v54 = vmul.f32 %v1963_v53, %v1432_v7  ;;  %v1486_v55 = vmul.f32 %v1963_v53, %v1434_v8  ;;  %v1489_v56 = vmul.f32 %v1963_v53, %v1437_v10  ;;  %v1492_v57 = vmul.f32 %v1963_v53, %v1440_v11 }
 0x16a   : > { %v1495_v58 = vmul.f32 %v1963_v53, %v1443_v12  ;;  %v1498_v59 = vmul.f32 %v1963_v53, %v1446_v14  ;;  %v1501_v60 = vmul.f32 %v1963_v53, %v1449_v15  ;;  %v1504_v61 = vmul.f32 %v1963_v53, %v1452_v16 }
 0x16b   : > { %v1483_v62 = vmax.f32 %v1482_v54, 0.0  ;;  %v1487_v63 = vmax.f32 %v1486_v55, 0.0  ;;  %v1490_v2 = vmax.f32 %v1489_v56, 0.0  ;;  %v1493_v3 = vmax.f32 %v1492_v57, 0.0 }
 0x16c   : > { %v1496_v4 = vmax.f32 %v1495_v58, 0.0  ;;  %v1499_v5 = vmax.f32 %v1498_v59, 0.0  ;;  %v1502_v7 = vmax.f32 %v1501_v60, 0.0  ;;  %v1505_v8 = vmax.f32 %v1504_v61, 0.0 }
 0x16d   : > { %1485 = vst.msk [vmem:[%s2359_s4] sm:$0x1] %vm1484_vm3, %v1483_v62  ;;  %1488 = vst.msk [vmem:[%s2359_s4 + $0x1] sm:$0x1] %vm1484_vm3, %v1487_v63  ;;  %v1507_v10 = vmul.f32 %v1963_v53, %v1455_v22  ;;  %v1510_v11 = vmul.f32 %v1963_v53, %v1458_v23  ;;  %v1513_v12 = vmul.f32 %v1963_v53, %v1461_v25 }
 0x16e   : > { %1491 = vst.msk [vmem:[%s2359_s4 + $0x2] sm:$0x1] %vm1484_vm3, %v1490_v2  ;;  %1494 = vst.msk [vmem:[%s2359_s4 + $0x3] sm:$0x1] %vm1484_vm3, %v1493_v3  ;;  %v1516_v14 = vmul.f32 %v1963_v53, %v1464_v0  ;;  %v1519_v15 = vmul.f32 %v1963_v53, %v2343_v26  ;;  %v1522_v16 = vmul.f32 %v1963_v53, %v2345_v27 }
 0x16f   : > { %1497 = vst.msk [vmem:[%s2359_s4 + $0x4] sm:$0x1] %vm1484_vm3, %v1496_v4  ;;  %1500 = vst.msk [vmem:[%s2359_s4 + $0x5] sm:$0x1] %vm1484_vm3, %v1499_v5  ;;  %v1525_v18 = vmul.f32 %v1963_v53, %v2347_v6  ;;  %v1528_v19 = vmul.f32 %v1963_v53, %v1476_v24  ;;  %v1508_v20 = vmax.f32 %v1507_v10, 0.0  ;;  %v1511_v21 = vmax.f32 %v1510_v11, 0.0 }
 0x170   : > { %1503 = vst.msk [vmem:[%s2359_s4 + $0x6] sm:$0x1] %vm1484_vm3, %v1502_v7  ;;  %1506 = vst.msk [vmem:[%s2359_s4 + $0x7] sm:$0x1] %vm1484_vm3, %v1505_v8  ;;  %v1514_v22 = vmax.f32 %v1513_v12, 0.0  ;;  %v1517_v23 = vmax.f32 %v1516_v14, 0.0 }
 0x171   : > { %v1520_v25 = vmax.f32 %v1519_v15, 0.0  ;;  %v1523_v0 = vmax.f32 %v1522_v16, 0.0  ;;  %v1526_v9 = vmax.f32 %v1525_v18, 0.0  ;;  %v1529_v1 = vmax.f32 %v1528_v19, 0.0  ;;  %1509 = vst.msk [vmem:[%s2359_s4 + $0x8] sm:$0x1] %vm1484_vm3, %v1508_v20 }
 0x172   : > { %1512 = vst.msk [vmem:[%s2359_s4 + $0x9] sm:$0x1] %vm1484_vm3, %v1511_v21  ;;  %1515 = vst.msk [vmem:[%s2359_s4 + $0xa] sm:$0x1] %vm1484_vm3, %v1514_v22 }
 0x173   : > { %1518 = vst.msk [vmem:[%s2359_s4 + $0xb] sm:$0x1] %vm1484_vm3, %v1517_v23  ;;  %1521 = vst.msk [vmem:[%s2359_s4 + $0xc] sm:$0x1] %vm1484_vm3, %v1520_v25 }
 0x174   : > { %1524 = vst.msk [vmem:[%s2359_s4 + $0xd] sm:$0x1] %vm1484_vm3, %v1523_v0  ;;  %1527 = vst.msk [vmem:[%s2359_s4 + $0xe] sm:$0x1] %vm1484_vm3, %v1526_v9 }
 0x175   : > { %1530 = vst.msk [vmem:[%s2359_s4 + $0xf] sm:$0x1] %vm1484_vm3, %v1529_v1 }
 0x176 PF: > { %s14_s12 = sadd.s32 1, %s2002_s12  }
 0x177   : > { %p11_p3 = scmp.ge.s32.totalorder %s14_s12, 4  }
 0x179   :  { %13 = sbr.rel (!%p11_p3) target bundleno = 1 (0x1), region = 82 }
 0x180   :  { %1552 = vsyncpa [#allocation3], 1 }
 0x181   :  { %1554 = vsyncpa [#allocation3 + $0x1], 1 }

// kernel: shape_decoder_forward.6
= control target key start
LH: loop header
LB: loop body
LE: loop exit
PB: predicated region body
PF: predicated region fallthrough
CT: control target
= control target key end

     0   :  { %s3302_s12 = smov 0   ;;  %s3931_s0 = inlined_call_operand.vmem [shape: f32[2,9,64,16], index: 0, kind: input, shape index: {}]   ;;  %s3932_s1 = inlined_call_operand.vmem [shape: f32[16,32,64], index: 1, kind: input, shape index: {}]   ;;  %s3933_s2 = inlined_call_operand.vmem [shape: f32[32,1], index: 2, kind: input, shape index: {}]   ;;  %s3934_s3 = inlined_call_operand.vmem [shape: f32[2,4,32,16], index: 3, kind: output, shape index: {}]  }
   0x1 LB: > { %s2194_s13 = sadd.s32 4294967295, %s3279_s12   ;;  %p2198_p0 = scmp.ge.s32.totalorder %s3279_s12, 1  ;;  %s3279_s12 = sphi %s3302_s12, %s13_s12  }
   0x2   : > { %p137_p1 = scmp.lt.s32.totalorder %s3279_s12, 3 }
   0x4   : > { %p138_p2 = pnand %p2198_p0, %p137_p1 }
   0x5   : > { %p161_p3 = scmp.lt.s32.totalorder (!%p138_p2), %s2194_s13, 1  ;;  %v2202_v0 = vld [vmem:[%s3932_s1 + $0x20] sm:$0xff] (!%p138_p2)  ;;  %vm201_vm0 = vcmask (!%p138_p2), 523264   ;;  %v3281_v28 = vmov (!%p138_p2), 0   ;;  %v2203_v32 = vld [vmem:[%s3932_s1 + $0x28] sm:$0xff] (!%p138_p2)  ;;  %v2204_v37 = vld [vmem:[%s3932_s1 + $0x30] sm:$0xff] (!%p138_p2) }
   0x6   : > { %141 = sbr.rel (%p138_p2) target bundleno = 715 (0x2cb), region = 32  ;;  %v2258_v1 = vld [vmem:[%s3932_s1 + $0xa0] sm:$0xff] (!%p138_p2)  ;;  %2613 = vmatprep.mubr.msk.f32.mxu0 (!%p138_p2), %vm201_vm0, %v2202_v0  ;;  %3263 = vset.pattern.permute.xlu0 (!%p138_p2), %v3281_v28  ;;  %v2259_v33 = vld [vmem:[%s3932_s1 + $0xa8] sm:$0xff] (!%p138_p2)  ;;  %v2260_v38 = vld [vmem:[%s3932_s1 + $0xb0] sm:$0xff] (!%p138_p2)  ;;  %vm1967_vm1 = vcmask (!%p138_p2), 130048  }
   0x7   : > { %2701 = vmatprep.mubr.msk.f32.mxu1 (!%p138_p2), %vm201_vm0, %v2258_v1  ;;  %3264 = vset.pattern.permute.xlu1 (!%p138_p2), %v3281_v28  ;;  %v2205_v39 = vld [vmem:[%s3932_s1 + $0x38] sm:$0xff] (!%p138_p2)  ;;  %v175_v44 = vld [vmem:[%s3932_s1] sm:$0xff] (!%p138_p2)  ;;  %v176_v57 = vld [vmem:[%s3932_s1 + $0x8] sm:$0xff] (!%p138_p2) }
   0x8   : > { %v2261_v41 = vld [vmem:[%s3932_s1 + $0xb8] sm:$0xff] (!%p138_p2)  ;;  %v2254_v45 = vld [vmem:[%s3932_s1 + $0x80] sm:$0xff] (!%p138_p2)  ;;  %v2255_v58 = vld [vmem:[%s3932_s1 + $0x88] sm:$0xff] (!%p138_p2) }
   0x9   : > { %v177_v1 = vld [vmem:[%s3932_s1 + $0x10] sm:$0xff] (!%p138_p2) }
   0xd   : > { %s3936_s13 = smov (!%p161_p3, %s2194_s13), 1 }
   0xe   : > { %s3253_s18 = smul.u32 576, %s3936_s13  ;;  %s2404_s6 = sshll.u32 %s3936_s13, 7 }
   0xf   : > { %s3882_s9 = scalar_lea.vmem %s3934_s3, %s2404_s6 }
  0x10   : > { %s3324_s21 = scalar_lea.vmem %s3931_s0, %s3253_s18 }
  0x11   : > { %v2206_v2 = vld [vmem:[%s3324_s21 + $0x40] sm:$0xff]  ;;  %v2207_v3 = vld [vmem:[%s3324_s21 + $0x48] sm:$0xff]  ;;  %v2208_v7 = vld [vmem:[%s3324_s21 + $0x50] sm:$0xff] }
  0x12   : > { %v2262_v4 = vld [vmem:[%s3324_s21 + $0x80] sm:$0xff]  ;;  %v2949_v5 = vpack.c.bf16 %v2207_v3, %v2206_v2  ;;  %v2263_v6 = vld [vmem:[%s3324_s21 + $0x88] sm:$0xff]  ;;  %v2209_v8 = vld [vmem:[%s3324_s21 + $0x58] sm:$0xff] }
  0x13   : > { %v3013_v9 = vpack.c.bf16 %v2263_v6, %v2262_v4  ;;  %v3332_v10 = vpack.c.bf16 %v2209_v8, %v2208_v7  ;;  %v2264_v11 = vld [vmem:[%s3324_s21 + $0x90] sm:$0xff]  ;;  %v2265_v12 = vld [vmem:[%s3324_s21 + $0x98] sm:$0xff]  ;;  %v2210_v13 = vld [vmem:[%s3324_s21 + $0x60] sm:$0xff] }
  0x14   : > { %2950 = vmatprep.subr.bf16.mxu0 %v2949_v5  ;;  %v3017_v14 = vpack.c.bf16 %v2265_v12, %v2264_v11  ;;  %v2211_v15 = vld [vmem:[%s3324_s21 + $0x68] sm:$0xff]  ;;  %v2266_v16 = vld [vmem:[%s3324_s21 + $0xa0] sm:$0xff]  ;;  %v2212_v20 = vld [vmem:[%s3324_s21 + $0x70] sm:$0xff] }
  0x15   : > { %v2267_v17 = vld [vmem:[%s3324_s21 + $0xa8] sm:$0xff]  ;;  %3014 = vmatprep.subr.bf16.mxu1 %v3013_v9  ;;  %2952 = vmatpush3.bf16.msra.mxu0 %v2949_v5  ;;  %v3341_v18 = vpack.c.bf16 %v2211_v15, %v2210_v13  ;;  %v2213_v21 = vld [vmem:[%s3324_s21 + $0x78] sm:$0xff]  ;;  %v2268_v22 = vld [vmem:[%s3324_s21 + $0xb0] sm:$0xff] }
  0x16   : > { %3016 = vmatpush3.bf16.msra.mxu1 %v3013_v9  ;;  %2954 = vmatprep.subr.bf16.mxu0 %v3332_v10  ;;  %v3021_v19 = vpack.c.bf16 %v2267_v17, %v2266_v16  ;;  %v2269_v23 = vld [vmem:[%s3324_s21 + $0xb8] sm:$0xff]  ;;  %v3349_v24 = vpack.c.bf16 %v2213_v21, %v2212_v20  ;;  %v179_v26 = vld [vmem:[%s3324_s21] sm:$0xff]  ;;  %v180_v27 = vld [vmem:[%s3324_s21 + $0x8] sm:$0xff] }
  0x17   : > { %3018 = vmatprep.subr.bf16.mxu1 %v3017_v14  ;;  %v3025_v25 = vpack.c.bf16 %v2269_v23, %v2268_v22  ;;  %v2965_v29 = vpack.c.bf16 %v180_v27, %v179_v26  ;;  %v181_v30 = vld [vmem:[%s3324_s21 + $0x10] sm:$0xff]  ;;  %v182_v31 = vld [vmem:[%s3324_s21 + $0x18] sm:$0xff]  ;;  %v183_v35 = vld [vmem:[%s3324_s21 + $0x20] sm:$0xff] }
  0x18   : > { %v2969_v34 = vpack.c.bf16 %v182_v31, %v181_v30  ;;  %v184_v36 = vld [vmem:[%s3324_s21 + $0x28] sm:$0xff]  ;;  %v185_v42 = vld [vmem:[%s3324_s21 + $0x30] sm:$0xff]  ;;  %v186_v43 = vld [vmem:[%s3324_s21 + $0x38] sm:$0xff] }
  0x19   : > { %2956 = vmatpush3.bf16.msra.mxu0 %v3332_v10  ;;  %v2973_v40 = vpack.c.bf16 %v184_v36, %v183_v35  ;;  %v2977_v46 = vpack.c.bf16 %v186_v43, %v185_v42  ;;  %v2226_v47 = vld [vmem:[%s3324_s21 + $0xc0] sm:$0xff]  ;;  %v2227_v48 = vld [vmem:[%s3324_s21 + $0xc8] sm:$0xff]  ;;  %v2228_v53 = vld [vmem:[%s3324_s21 + $0xd0] sm:$0xff] }
  0x1a   : > { %3020 = vmatpush3.bf16.msra.mxu1 %v3017_v14  ;;  %2958 = vmatprep.subr.bf16.mxu0 %v3341_v18  ;;  %v2242_v49 = vld [vmem:[%s3324_s21 + $0x100] sm:$0xff]  ;;  %v2243_v50 = vld [vmem:[%s3324_s21 + $0x108] sm:$0xff]  ;;  %v3402_v51 = vpack.c.bf16 %v2227_v48, %v2226_v47  ;;  %v2229_v54 = vld [vmem:[%s3324_s21 + $0xd8] sm:$0xff] }
  0x1b   : > { %3022 = vmatprep.subr.bf16.mxu1 %v3021_v19  ;;  %v3405_v52 = vpack.c.bf16 %v2243_v50, %v2242_v49  ;;  %v2244_v55 = vld [vmem:[%s3324_s21 + $0x110] sm:$0xff]  ;;  %v2245_v56 = vld [vmem:[%s3324_s21 + $0x118] sm:$0xff]  ;;  %v3419_v59 = vpack.c.bf16 %v2229_v54, %v2228_v53  ;;  %v2230_v61 = vld [vmem:[%s3324_s21 + $0xe0] sm:$0xff] }
  0x1c   : > { %v3422_v60 = vpack.c.bf16 %v2245_v56, %v2244_v55  ;;  %v2231_v62 = vld [vmem:[%s3324_s21 + $0xe8] sm:$0xff]  ;;  %v2246_v63 = vld [vmem:[%s3324_s21 + $0x120] sm:$0xff]  ;;  %v2256_v2 = vld [vmem:[%s3932_s1 + $0x90] sm:$0xff] }
  0x1d   : > { %2960 = vmatpush3.bf16.msra.mxu0 %v3341_v18  ;;  %v2247_v0 = vld [vmem:[%s3324_s21 + $0x128] sm:$0xff]  ;;  %v178_v3 = vld [vmem:[%s3932_s1 + $0x18] sm:$0xff]  ;;  %v3442_v4 = vpack.c.bf16 %v2231_v62, %v2230_v61  ;;  %v2232_v7 = vld [vmem:[%s3324_s21 + $0xf0] sm:$0xff] }
  0x1e   : > { %3024 = vmatpush3.bf16.msra.mxu1 %v3021_v19  ;;  %2962 = vmatprep.subr.bf16.mxu0 %v3349_v24  ;;  %v3448_v6 = vpack.c.bf16 %v2247_v0, %v2246_v63  ;;  %v2233_v8 = vld [vmem:[%s3324_s21 + $0xf8] sm:$0xff]  ;;  %v2248_v9 = vld [vmem:[%s3324_s21 + $0x130] sm:$0xff]  ;;  %v2222_v11 = vld [vmem:[%s3932_s1 + $0x40] sm:$0xff] }
  0x1f   : > { %3026 = vmatprep.subr.bf16.mxu1 %v3025_v25  ;;  %v2278_v12 = vld [vmem:[%s3932_s1 + $0xc0] sm:$0xff]  ;;  %v3470_v14 = vpack.c.bf16 %v2233_v8, %v2232_v7  ;;  %v173_v15 = vld [vmem:[%s3933_s2 + $0x10] sm:$0xff]  ;;  %v172_v19 = vld [vmem:[%s3933_s2 + $0x8] sm:$0xff] }
  0x20   : > { %v171_v13 = vld [vmem:[%s3933_s2] sm:$0xff]  ;;  %638 = vperm.xlu1 %3264, %v173_v15   ;;  %v174_v20 = vld [vmem:[%s3933_s2 + $0x18] sm:$0xff]  ;;  %v2292_v22 = vld [vmem:[%s3324_s21 + $0x150] sm:$0xff] }
  0x21   : > { %2964 = vmatpush3.bf16.msra.mxu0 %v3349_v24  ;;  %v2290_v17 = vld [vmem:[%s3324_s21 + $0x140] sm:$0xff]  ;;  %628 = vperm.xlu0 %3263, %v171_v13   ;;  %v2293_v23 = vld [vmem:[%s3324_s21 + $0x158] sm:$0xff]  ;;  %v2295_v28 = vld [vmem:[%s3324_s21 + $0x168] sm:$0xff] }
  0x22   : > { %3028 = vmatpush3.bf16.msra.mxu1 %v3025_v25  ;;  %2966 = vmatprep.subr.bf16.mxu0 %v2965_v29  ;;  %v2279_v25 = vld [vmem:[%s3932_s1 + $0xc8] sm:$0xff]  ;;  %v3065_v26 = vpack.c.bf16 %v2293_v23, %v2292_v22  ;;  %v2294_v27 = vld [vmem:[%s3324_s21 + $0x160] sm:$0xff]  ;;  %v2280_v30 = vld [vmem:[%s3932_s1 + $0xd0] sm:$0xff] }
  0x23   : > { %3030 = vmatprep.subr.bf16.mxu1 %v2949_v5  ;;  %v2225_v31 = vld [vmem:[%s3932_s1 + $0x58] sm:$0xff]  ;;  %v2238_v36 = vld [vmem:[%s3932_s1 + $0x60] sm:$0xff]  ;;  %v2288_v42 = vld [vmem:[%s3932_s1 + $0xf0] sm:$0xff] }
  0x24   : > { %2614 = vmatmul.mubr.msk.f32.vlgmr.msra.gmra.mrb[0].mxu0 %vm201_vm0, %v2203_v32  ;;  %643 = vperm.xlu1 %3264, %v174_v20   ;;  %v2281_v32 = vld [vmem:[%s3932_s1 + $0xd8] sm:$0xff]  ;;  %v2307_v47 = vld [vmem:[%s3932_s1 + $0x128] sm:$0xff]  ;;  %v2308_v49 = vld [vmem:[%s3932_s1 + $0x130] sm:$0xff] }
  0x25   : > { %2968 = vmatpush3.bf16.msra.mxu0 %v2965_v29  ;;  %2702 = vmatmul.mubr.msk.f32.vlgmr.msra.gmra.mrb[0].mxu1 %vm201_vm0, %v2259_v33  ;;  %v2224_v29 = vld [vmem:[%s3932_s1 + $0x50] sm:$0xff]  ;;  %v3069_v33 = vpack.c.bf16 %v2295_v28, %v2294_v27  ;;  %v2297_v35 = vld [vmem:[%s3324_s21 + $0x178] sm:$0xff]  ;;  %v2355_v48 = vld [vmem:[%s3932_s1 + $0x1a8] sm:$0xff] }
  0x26   : > { %3032 = vmatpush3.bf16.msra.mxu1 %v2949_v5  ;;  %2970 = vmatprep.subr.bf16.mxu0 %v2969_v34  ;;  %v2257_v5 = vld [vmem:[%s3932_s1 + $0x98] sm:$0xff]  ;;  %v2356_v50 = vld [vmem:[%s3932_s1 + $0x1b0] sm:$0xff]  ;;  %v2350_v54 = vld [vmem:[%s3932_s1 + $0x180] sm:$0xff] }
  0x27   : > { %3034 = vmatprep.subr.bf16.mxu1 %v3332_v10  ;;  %2616 = vmatprep.mubr.msk.f32.mxu0 %vm201_vm0, %v2204_v37  ;;  %v2286_v37 = vld [vmem:[%s3932_s1 + $0xe0] sm:$0xff]  ;;  %v2241_v43 = vld [vmem:[%s3932_s1 + $0x78] sm:$0xff]  ;;  %v2323_v56 = vld [vmem:[%s3324_s21 + $0x188] sm:$0xff] }
  0x28   : > { %2704 = vmatprep.mubr.msk.f32.mxu1 %vm201_vm0, %v2260_v38  ;;  %2617 = vmatmul.mubr.msk.f32.gmra.mrb[2].mxu0 %vm201_vm0, %v2205_v39  ;;  %v2239_v39 = vld [vmem:[%s3932_s1 + $0x68] sm:$0xff]  ;;  %v2309_v53 = vld [vmem:[%s3932_s1 + $0x138] sm:$0xff]  ;;  %v2322_v55 = vld [vmem:[%s3324_s21 + $0x180] sm:$0xff] }
  0x29   : > { %2972 = vmatpush3.bf16.msra.mxu0 %v2969_v34  ;;  %2705 = vmatmul.mubr.msk.f32.gmra.mrb[2].mxu1 %vm201_vm0, %v2261_v41  ;;  %v2296_v34 = vld [vmem:[%s3324_s21 + $0x170] sm:$0xff]  ;;  %v2325_v62 = vld [vmem:[%s3324_s21 + $0x198] sm:$0xff]  ;;  %v2342_v7 = vld [vmem:[%s3324_s21 + $0x1e0] sm:$0xff] }
  0x2a   : > { %3036 = vmatpush3.bf16.msra.mxu1 %v3332_v10  ;;  %2974 = vmatprep.subr.bf16.mxu0 %v2973_v40  ;;  %v2249_v10 = vld [vmem:[%s3324_s21 + $0x138] sm:$0xff]  ;;  %v3073_v38 = vpack.c.bf16 %v2297_v35, %v2296_v34  ;;  %v2240_v41 = vld [vmem:[%s3932_s1 + $0x70] sm:$0xff]  ;;  %v2343_v8 = vld [vmem:[%s3324_s21 + $0x1e8] sm:$0xff] }
  0x2b   : > { %3038 = vmatprep.subr.bf16.mxu1 %v3341_v18  ;;  %2635 = vmatprep.mubr.msk.f32.mxu0 %vm201_vm0, %v175_v44  ;;  %v3476_v16 = vpack.c.bf16 %v2249_v10, %v2248_v9  ;;  %v2289_v44 = vld [vmem:[%s3932_s1 + $0xf8] sm:$0xff]  ;;  %v2324_v61 = vld [vmem:[%s3324_s21 + $0x190] sm:$0xff]  ;;  %v2366_v20 = vld [vmem:[%s3932_s1 + $0x1c0] sm:$0xff] }
  0x2c   : > { %2723 = vmatprep.mubr.msk.f32.mxu1 %vm201_vm0, %v2254_v45  ;;  %633 = vperm.xlu0 %3263, %v172_v19   ;;  %v2306_v45 = vld [vmem:[%s3932_s1 + $0x120] sm:$0xff]  ;;  %v2340_v63 = vld [vmem:[%s3324_s21 + $0x1d0] sm:$0xff]  ;;  %v2341_v0 = vld [vmem:[%s3324_s21 + $0x1d8] sm:$0xff] }
  0x2d   : > { %2976 = vmatpush3.bf16.msra.mxu0 %v2973_v40  ;;  %v2287_v40 = vld [vmem:[%s3932_s1 + $0xe8] sm:$0xff]  ;;  %v2304_v9 = vld [vmem:[%s3932_s1 + $0x110] sm:$0xff]  ;;  %v2353_v13 = vld [vmem:[%s3932_s1 + $0x198] sm:$0xff] }
  0x2e   : > { %3040 = vmatpush3.bf16.msra.mxu1 %v3341_v18  ;;  %2978 = vmatprep.subr.bf16.mxu0 %v2977_v46  ;;  %v2291_v18 = vld [vmem:[%s3324_s21 + $0x148] sm:$0xff]  ;;  %v2352_v10 = vld [vmem:[%s3932_s1 + $0x190] sm:$0xff]  ;;  %v2318_v19 = vld [vmem:[%s3932_s1 + $0x140] sm:$0xff] }
  0x2f   : > { %3042 = vmatprep.subr.bf16.mxu1 %v3349_v24  ;;  %v3061_v21 = vpack.c.bf16 %v2291_v18, %v2290_v17  ;;  %v2328_v15 = vld [vmem:[%s3324_s21 + $0x1b0] sm:$0xff]  ;;  %v2345_v18 = vld [vmem:[%s3324_s21 + $0x1f8] sm:$0xff]  ;;  %v2378_v23 = vld [vmem:[%s3324_s21 + $0x200] sm:$0xff] }
  0x30   : > { %v2344_v17 = vld [vmem:[%s3324_s21 + $0x1f0] sm:$0xff]  ;;  %v2381_v27 = vld [vmem:[%s3324_s21 + $0x218] sm:$0xff]  ;;  %v2319_v28 = vld [vmem:[%s3932_s1 + $0x148] sm:$0xff] }
  0x31   : > { %2980 = vmatpush3.bf16.msra.mxu0 %v2977_v46  ;;  %v2354_v46 = vld [vmem:[%s3932_s1 + $0x1a0] sm:$0xff]  ;;  %v3137_v22 = vpack.c.bf16 %v2345_v18, %v2344_v17  ;;  %v2368_v34 = vld [vmem:[%s3932_s1 + $0x1d0] sm:$0xff]  ;;  %v2321_v35 = vld [vmem:[%s3932_s1 + $0x158] sm:$0xff] }
  0x32   : > { %3044 = vmatpush3.bf16.msra.mxu1 %v3349_v24  ;;  %2982 = vmatprep.subr.bf16.mxu0 %v3402_v51  ;;  %v2223_v24 = vld [vmem:[%s3932_s1 + $0x48] sm:$0xff] }
  0x33   : > { %3046 = vmatprep.subr.bf16.mxu1 %v3405_v52 }
  0x34   : > { %2636 = vmatmul.mubr.msk.f32.vlgmr.msra.gmra.mrb[0].mxu0 %vm201_vm0, %v176_v57  ;;  %v2338_v57 = vld [vmem:[%s3324_s21 + $0x1c0] sm:$0xff] }
  0x35   : > { %2984 = vmatpush3.bf16.msra.mxu0 %v3402_v51  ;;  %2724 = vmatmul.mubr.msk.f32.vlgmr.msra.gmra.mrb[0].mxu1 %vm201_vm0, %v2255_v58  ;;  %v2339_v58 = vld [vmem:[%s3324_s21 + $0x1c8] sm:$0xff] }
  0x36   : > { %3048 = vmatpush3.bf16.msra.mxu1 %v3405_v52  ;;  %2986 = vmatprep.subr.bf16.mxu0 %v3419_v59 }
  0x37   : > { %3050 = vmatprep.subr.bf16.mxu1 %v3422_v60  ;;  %2638 = vmatprep.mubr.msk.f32.mxu0 %vm201_vm0, %v177_v1  ;;  %v2303_v1 = vld [vmem:[%s3932_s1 + $0x108] sm:$0xff] }
  0x38   : > { %2726 = vmatprep.mubr.msk.f32.mxu1 %vm201_vm0, %v2256_v2  ;;  %2639 = vmatmul.mubr.msk.f32.gmra.mrb[2].mxu0 %vm201_vm0, %v178_v3  ;;  %v2351_v2 = vld [vmem:[%s3932_s1 + $0x188] sm:$0xff]  ;;  %v3113_v3 = vpack.c.bf16 %v2325_v62, %v2324_v61 }
  0x39   : > { %2988 = vmatpush3.bf16.msra.mxu0 %v3419_v59  ;;  %2727 = vmatmul.mubr.msk.f32.gmra.mrb[2].mxu1 %vm201_vm0, %v2257_v5  ;;  %v2326_v5 = vld [vmem:[%s3324_s21 + $0x1a0] sm:$0xff] }
  0x3a   : > { %3052 = vmatpush3.bf16.msra.mxu1 %v3422_v60  ;;  %2990 = vmatprep.subr.bf16.mxu0 %v3442_v4 }
  0x3b   : > { %3054 = vmatprep.subr.bf16.mxu1 %v3448_v6  ;;  %2657 = vmatprep.mubr.msk.f32.mxu0 %vm201_vm0, %v2222_v11  ;;  %v2305_v11 = vld [vmem:[%s3932_s1 + $0x118] sm:$0xff] }
  0x3c   : > { %2745 = vmatprep.mubr.msk.f32.mxu1 %vm201_vm0, %v2278_v12 }
  0x3d   : > { %2992 = vmatpush3.bf16.msra.mxu0 %v3442_v4 }
  0x3e   : > { %3056 = vmatpush3.bf16.msra.mxu1 %v3448_v6  ;;  %2994 = vmatprep.subr.bf16.mxu0 %v3470_v14 }
  0x3f   : > { %3058 = vmatprep.subr.bf16.mxu1 %v3476_v16 }
  0x41   : > { %2996 = vmatpush3.bf16.msra.mxu0 %v3470_v14 }
  0x42   : > { %3060 = vmatpush3.bf16.msra.mxu1 %v3476_v16  ;;  %2998 = vmatprep.subr.bf16.mxu0 %v3405_v52 }
  0x43   : > { %3062 = vmatprep.subr.bf16.mxu1 %v3061_v21 }
  0x44   : > { %2658 = vmatmul.mubr.msk.f32.vlgmr.msra.gmra.mrb[0].mxu0 %vm201_vm0, %v2223_v24  ;;  %v2379_v24 = vld [vmem:[%s3324_s21 + $0x208] sm:$0xff] }
  0x45   : > { %3000 = vmatpush3.bf16.msra.mxu0 %v3405_v52  ;;  %2746 = vmatmul.mubr.msk.f32.vlgmr.msra.gmra.mrb[0].mxu1 %vm201_vm0, %v2279_v25  ;;  %v3189_v25 = vpack.c.bf16 %v2379_v24, %v2378_v23 }
  0x46   : > { %3064 = vmatpush3.bf16.msra.mxu1 %v3061_v21  ;;  %3002 = vmatprep.subr.bf16.mxu0 %v3422_v60 }
  0x47   : > { %3066 = vmatprep.subr.bf16.mxu1 %v3065_v26  ;;  %2660 = vmatprep.mubr.msk.f32.mxu0 %vm201_vm0, %v2224_v29  ;;  %v2367_v29 = vld [vmem:[%s3932_s1 + $0x1c8] sm:$0xff] }
  0x48   : > { %2748 = vmatprep.mubr.msk.f32.mxu1 %vm201_vm0, %v2280_v30  ;;  %2661 = vmatmul.mubr.msk.f32.gmra.mrb[2].mxu0 %vm201_vm0, %v2225_v31  ;;  %v2382_v31 = vld [vmem:[%s3324_s21 + $0x220] sm:$0xff] }
  0x49   : > { %3004 = vmatpush3.bf16.msra.mxu0 %v3422_v60  ;;  %2749 = vmatmul.mubr.msk.f32.gmra.mrb[2].mxu1 %vm201_vm0, %v2281_v32  ;;  %v2383_v32 = vld [vmem:[%s3324_s21 + $0x228] sm:$0xff] }
  0x4a   : > { %3068 = vmatpush3.bf16.msra.mxu1 %v3065_v26  ;;  %3006 = vmatprep.subr.bf16.mxu0 %v3448_v6 }
  0x4b   : > { %3070 = vmatprep.subr.bf16.mxu1 %v3069_v33  ;;  %2679 = vmatprep.mubr.msk.f32.mxu0 %vm201_vm0, %v2238_v36  ;;  %v2369_v36 = vld [vmem:[%s3932_s1 + $0x1d8] sm:$0xff] }
  0x4c   : > { %2767 = vmatprep.mubr.msk.f32.mxu1 %vm201_vm0, %v2286_v37  ;;  %v3197_v37 = vpack.c.bf16 %v2383_v32, %v2382_v31 }
  0x4d   : > { %3008 = vmatpush3.bf16.msra.mxu0 %v3448_v6 }
  0x4e   : > { %3072 = vmatpush3.bf16.msra.mxu1 %v3069_v33  ;;  %3010 = vmatprep.subr.bf16.mxu0 %v3476_v16 }
  0x4f   : > { %3074 = vmatprep.subr.bf16.mxu1 %v3073_v38 }
  0x51   : > { %3012 = vmatpush3.bf16.msra.mxu0 %v3476_v16 }
  0x52   : > { %3076 = vmatpush3.bf16.msra.mxu1 %v3073_v38  ;;  %3078 = vmatprep.subr.bf16.mxu0 %v3405_v52 }
  0x53   : > { %3142 = vmatprep.subr.bf16.mxu1 %v3061_v21 }
  0x54   : > { %2680 = vmatmul.mubr.msk.f32.vlgmr.msra.gmra.mrb[0].mxu0 %vm201_vm0, %v2239_v39  ;;  %v2385_v39 = vld [vmem:[%s3324_s21 + $0x238] sm:$0xff] }
  0x55   : > { %2768 = vmatmul.mubr.msk.f32.vlgmr.msra.gmra.mrb[0].mxu1 %vm201_vm0, %v2287_v40  ;;  %3080 = vmatpush3.bf16.msra.mxu0 %v3405_v52  ;;  %v2334_v40 = vld [vmem:[%s3932_s1 + $0x160] sm:$0xff] }
  0x56   : > { %3144 = vmatpush3.bf16.msra.mxu1 %v3061_v21  ;;  %2682 = vmatprep.mubr.msk.f32.mxu0 %vm201_vm0, %v2240_v41  ;;  %v2374_v41 = vld [vmem:[%s3932_s1 + $0x1e0] sm:$0xff] }
  0x57   : > { %2770 = vmatprep.mubr.msk.f32.mxu1 %vm201_vm0, %v2288_v42  ;;  %3082 = vmatprep.subr.bf16.mxu0 %v3422_v60 }
  0x58   : > { %2683 = vmatmul.mubr.msk.f32.gmra.mrb[2].mxu0 %vm201_vm0, %v2241_v43  ;;  %3146 = vmatprep.subr.bf16.mxu1 %v3065_v26  ;;  %v2335_v43 = vld [vmem:[%s3932_s1 + $0x168] sm:$0xff] }
  0x59   : > { %2771 = vmatmul.mubr.msk.f32.gmra.mrb[2].mxu1 %vm201_vm0, %v2289_v44  ;;  %3084 = vmatpush3.bf16.msra.mxu0 %v3422_v60  ;;  %v2375_v44 = vld [vmem:[%s3932_s1 + $0x1e8] sm:$0xff] }
  0x5a   : > { %3148 = vmatpush3.bf16.msra.mxu1 %v3065_v26  ;;  %3086 = vmatprep.subr.bf16.mxu0 %v3448_v6  ;;  %v2380_v26 = vld [vmem:[%s3324_s21 + $0x210] sm:$0xff] }
  0x5b   : > { %3150 = vmatprep.subr.bf16.mxu1 %v3069_v33  ;;  %2789 = vmatprep.mubr.msk.f32.mxu0 %vm201_vm0, %v2306_v45  ;;  %v3193_v30 = vpack.c.bf16 %v2381_v27, %v2380_v26  ;;  %v2336_v45 = vld [vmem:[%s3932_s1 + $0x170] sm:$0xff] }
  0x5c   : > { %2877 = vmatprep.mubr.msk.f32.mxu1 %vm201_vm0, %v2354_v46  ;;  %v2376_v46 = vld [vmem:[%s3932_s1 + $0x1f0] sm:$0xff] }
  0x5d   : > { %3088 = vmatpush3.bf16.msra.mxu0 %v3448_v6 }
  0x5e   : > { %3152 = vmatpush3.bf16.msra.mxu1 %v3069_v33  ;;  %3090 = vmatprep.subr.bf16.mxu0 %v3476_v16  ;;  %v2320_v33 = vld [vmem:[%s3932_s1 + $0x150] sm:$0xff] }
  0x5f   : > { %3154 = vmatprep.subr.bf16.mxu1 %v3073_v38 }
  0x61   : > { %3092 = vmatpush3.bf16.msra.mxu0 %v3476_v16 }
  0x62   : > { %3156 = vmatpush3.bf16.msra.mxu1 %v3073_v38  ;;  %3094 = vmatprep.subr.bf16.mxu0 %v3402_v51  ;;  %v2384_v38 = vld [vmem:[%s3324_s21 + $0x230] sm:$0xff] }
  0x63   : > { %3158 = vmatprep.subr.bf16.mxu1 %v3405_v52  ;;  %v3201_v42 = vpack.c.bf16 %v2385_v39, %v2384_v38 }
  0x64   : > { %2790 = vmatmul.mubr.msk.f32.vlgmr.msra.gmra.mrb[4].mxu0 %vm201_vm0, %v2307_v47  ;;  %v2337_v47 = vld [vmem:[%s3932_s1 + $0x178] sm:$0xff] }
  0x65   : > { %3096 = vmatpush3.bf16.msra.mxu0 %v3402_v51  ;;  %2878 = vmatmul.mubr.msk.f32.vlgmr.msra.gmra.mrb[4].mxu1 %vm201_vm0, %v2355_v48  ;;  %v2357_v51 = vld [vmem:[%s3932_s1 + $0x1b8] sm:$0xff] }
  0x66   : > { %3160 = vmatpush3.bf16.msra.mxu1 %v3405_v52  ;;  %3098 = vmatprep.subr.bf16.mxu0 %v3419_v59  ;;  %v2302_v52 = vld [vmem:[%s3932_s1 + $0x100] sm:$0xff]  ;;  %v2377_v48 = vld [vmem:[%s3932_s1 + $0x1f8] sm:$0xff] }
  0x67   : > { %3162 = vmatprep.subr.bf16.mxu1 %v3422_v60  ;;  %2792 = vmatprep.mubr.msk.f32.mxu0 %vm201_vm0, %v2308_v49 }
  0x68   : > { %2880 = vmatprep.mubr.msk.f32.mxu1 %vm201_vm0, %v2356_v50  ;;  %2793 = vmatmul.mubr.msk.f32.gmra.mrb[6].mxu0 %vm201_vm0, %v2309_v53 }
  0x69   : > { %3100 = vmatpush3.bf16.msra.mxu0 %v3419_v59  ;;  %2881 = vmatmul.mubr.msk.f32.gmra.mrb[6].mxu1 %vm201_vm0, %v2357_v51  ;;  %v3109_v59 = vpack.c.bf16 %v2323_v56, %v2322_v55 }
  0x6a   : > { %3164 = vmatpush3.bf16.msra.mxu1 %v3422_v60  ;;  %3102 = vmatprep.subr.bf16.mxu0 %v3442_v4  ;;  %v3630_v60 = vpack.c.bf16 %v2339_v58, %v2338_v57 }
  0x6b   : > { %3166 = vmatprep.subr.bf16.mxu1 %v3448_v6  ;;  %2811 = vmatprep.mubr.msk.f32.mxu0 %vm201_vm0, %v2302_v52 }
  0x6c   : > { %2899 = vmatprep.mubr.msk.f32.mxu1 %vm201_vm0, %v2350_v54 }
  0x6d   : > { %3104 = vmatpush3.bf16.msra.mxu0 %v3442_v4  ;;  %v3645_v4 = vpack.c.bf16 %v2341_v0, %v2340_v63 }
  0x6e   : > { %3168 = vmatpush3.bf16.msra.mxu1 %v3448_v6  ;;  %3106 = vmatprep.subr.bf16.mxu0 %v3470_v14  ;;  %v2327_v6 = vld [vmem:[%s3324_s21 + $0x1a8] sm:$0xff] }
  0x6f   : > { %3170 = vmatprep.subr.bf16.mxu1 %v3476_v16  ;;  %v3117_v12 = vpack.c.bf16 %v2327_v6, %v2326_v5 }
  0x71   : > { %3108 = vmatpush3.bf16.msra.mxu0 %v3470_v14  ;;  %v3667_v14 = vpack.c.bf16 %v2343_v8, %v2342_v7 }
  0x72   : > { %3172 = vmatpush3.bf16.msra.mxu1 %v3476_v16  ;;  %3110 = vmatprep.subr.bf16.mxu0 %v3109_v59  ;;  %v2329_v16 = vld [vmem:[%s3324_s21 + $0x1b8] sm:$0xff] }
  0x73   : > { %3174 = vmatprep.subr.bf16.mxu1 %v3630_v60  ;;  %v3121_v21 = vpack.c.bf16 %v2329_v16, %v2328_v15 }
  0x74   : > { %2812 = vmatmul.mubr.msk.f32.vlgmr.msra.gmra.mrb[4].mxu0 %vm201_vm0, %v2303_v1 }
  0x75   : > { %3112 = vmatpush3.bf16.msra.mxu0 %v3109_v59  ;;  %2900 = vmatmul.mubr.msk.f32.vlgmr.msra.gmra.mrb[4].mxu1 %vm201_vm0, %v2351_v2 }
  0x76   : > { %3176 = vmatpush3.bf16.msra.mxu1 %v3630_v60  ;;  %3114 = vmatprep.subr.bf16.mxu0 %v3113_v3 }
  0x77   : > { %3178 = vmatprep.subr.bf16.mxu1 %v3645_v4  ;;  %2814 = vmatprep.mubr.msk.f32.mxu0 %vm201_vm0, %v2304_v9 }
  0x78   : > { %2902 = vmatprep.mubr.msk.f32.mxu1 %vm201_vm0, %v2352_v10  ;;  %2815 = vmatmul.mubr.msk.f32.gmra.mrb[6].mxu0 %vm201_vm0, %v2305_v11 }
  0x79   : > { %3116 = vmatpush3.bf16.msra.mxu0 %v3113_v3  ;;  %2903 = vmatmul.mubr.msk.f32.gmra.mrb[6].mxu1 %vm201_vm0, %v2353_v13 }
  0x7a   : > { %3180 = vmatpush3.bf16.msra.mxu1 %v3645_v4  ;;  %3118 = vmatprep.subr.bf16.mxu0 %v3117_v12 }
  0x7b   : > { %3182 = vmatprep.subr.bf16.mxu1 %v3667_v14  ;;  %2833 = vmatprep.mubr.msk.f32.mxu0 %vm201_vm0, %v2318_v19 }
  0x7c   : > { %2921 = vmatprep.mubr.msk.f32.mxu1 %vm201_vm0, %v2366_v20 }
  0x7d   : > { %3120 = vmatpush3.bf16.msra.mxu0 %v3117_v12 }
  0x7e   : > { %3184 = vmatpush3.bf16.msra.mxu1 %v3667_v14  ;;  %3122 = vmatprep.subr.bf16.mxu0 %v3121_v21 }
  0x7f   : > { %3186 = vmatprep.subr.bf16.mxu1 %v3137_v22 }
  0x81   : > { %3124 = vmatpush3.bf16.msra.mxu0 %v3121_v21 }
  0x82   : > { %3188 = vmatpush3.bf16.msra.mxu1 %v3137_v22  ;;  %3126 = vmatprep.subr.bf16.mxu0 %v3630_v60 }
  0x83   : > { %3190 = vmatprep.subr.bf16.mxu1 %v3189_v25 }
  0x84   : > { %2834 = vmatmul.mubr.msk.f32.vlgmr.msra.gmra.mrb[4].mxu0 %vm201_vm0, %v2319_v28 }
  0x85   : > { %3128 = vmatpush3.bf16.msra.mxu0 %v3630_v60  ;;  %2922 = vmatmul.mubr.msk.f32.vlgmr.msra.gmra.mrb[4].mxu1 %vm201_vm0, %v2367_v29 }
  0x86   : > { %3192 = vmatpush3.bf16.msra.mxu1 %v3189_v25  ;;  %3130 = vmatprep.subr.bf16.mxu0 %v3645_v4 }
  0x87   : > { %3194 = vmatprep.subr.bf16.mxu1 %v3193_v30  ;;  %2836 = vmatprep.mubr.msk.f32.mxu0 %vm201_vm0, %v2320_v33 }
  0x88   : > { %2924 = vmatprep.mubr.msk.f32.mxu1 %vm201_vm0, %v2368_v34  ;;  %2837 = vmatmul.mubr.msk.f32.gmra.mrb[6].mxu0 %vm201_vm0, %v2321_v35 }
  0x89   : > { %3132 = vmatpush3.bf16.msra.mxu0 %v3645_v4  ;;  %2925 = vmatmul.mubr.msk.f32.gmra.mrb[6].mxu1 %vm201_vm0, %v2369_v36 }
  0x8a   : > { %3196 = vmatpush3.bf16.msra.mxu1 %v3193_v30  ;;  %3134 = vmatprep.subr.bf16.mxu0 %v3667_v14 }
  0x8b   : > { %3198 = vmatprep.subr.bf16.mxu1 %v3197_v37  ;;  %2855 = vmatprep.mubr.msk.f32.mxu0 %vm201_vm0, %v2334_v40 }
  0x8c   : > { %2943 = vmatprep.mubr.msk.f32.mxu1 %vm201_vm0, %v2374_v41 }
  0x8d   : > { %3136 = vmatpush3.bf16.msra.mxu0 %v3667_v14 }
  0x8e   : > { %3200 = vmatpush3.bf16.msra.mxu1 %v3197_v37  ;;  %3138 = vmatprep.subr.bf16.mxu0 %v3137_v22 }
  0x8f   : > { %3202 = vmatprep.subr.bf16.mxu1 %v3201_v42 }
  0x91   : > { %3140 = vmatpush3.bf16.msra.mxu0 %v3137_v22 }
  0x92   : > { %3204 = vmatpush3.bf16.msra.mxu1 %v3201_v42 }
  0x94   : > { %2856 = vmatmul.mubr.msk.f32.vlgmr.msra.gmra.mrb[4].mxu0 %vm201_vm0, %v2335_v43 }
  0x95   : > { %2944 = vmatmul.mubr.msk.f32.vlgmr.msra.gmra.mrb[4].mxu1 %vm201_vm0, %v2375_v44  ;;  %2858 = vmatprep.mubr.msk.f32.mxu0 %vm201_vm0, %v2336_v45 }
  0x96   : > { %2946 = vmatprep.mubr.msk.f32.mxu1 %vm201_vm0, %v2376_v46 }
  0x98   : > { %2859 = vmatmul.mubr.msk.f32.gmra.mrb[6].mxu0 %vm201_vm0, %v2337_v47 }
  0x99   : > { %2947 = vmatmul.mubr.msk.f32.gmra.mrb[6].mxu1 %vm201_vm0, %v2377_v48 }
  0x9f   : > { %v639_v58 = vpop.permute.xlu1 %638 }
  0xa0   : > { %v629_v57 = vpop.permute.xlu0 %628 }
  0xa3   : > { %v644_v0 = vpop.permute.xlu1 %643 }
  0xab   : > { %v634_v59 = vpop.permute.xlu0 %633 }
 0x127   : > { %v2681_v49 = vpop.f32.mrb[0].mxu0 }
 0x128   : > { %v2769_v50 = vpop.f32.mrb[0].mxu1  ;;  %v603_v53 = vpop.f32.mrb[1].mxu0  ;;  %v647_v60 = vadd.f32 %v2681_v49, %v634_v59 }
 0x129   : > { %v1061_v51 = vpop.f32.mrb[1].mxu1  ;;  %v1085_v61 = vadd.f32 %v2769_v50, %v634_v59  ;;  %v646_v62 = vadd.f32 %v629_v57, %v603_v53 }
 0x12a   : > { %v1084_v63 = vadd.f32 %v1061_v51, %v629_v57 }
 0x12b   : > { %v2684_v52 = vpop.f32.mrb[2].mxu0  ;;  %v1956_v2 = vadd.f32 %v1085_v61, %v647_v60 }
 0x12c   : > { %v2772_v54 = vpop.f32.mrb[2].mxu1  ;;  %v613_v55 = vpop.f32.mrb[3].mxu0  ;;  %v1955_v3 = vadd.f32 %v1084_v63, %v646_v62  ;;  %v3758_v4 = vadd.f32 %v2684_v52, %v644_v0 }
 0x12d   : > { %v1071_v56 = vpop.f32.mrb[3].mxu1  ;;  %v3760_v8 = vadd.f32 %v2772_v54, %v644_v0  ;;  %v3762_v9 = vadd.f32 %v639_v58, %v613_v55 }
 0x12e   : > { %v3764_v10 = vadd.f32 %v1071_v56, %v639_v58 }
 0x12f   : > { %v1958_v22 = vadd.f32 %v3760_v8, %v3758_v4 }
 0x130   : > { %v1957_v23 = vadd.f32 %v3764_v10, %v3762_v9 }
 0x167   : > { %v2857_v1 = vpop.f32.mrb[4].mxu0 }
 0x168   : > { %v1523_v5 = vadd.f32 %v2857_v1, %v634_v59  ;;  %v2945_v6 = vpop.f32.mrb[4].mxu1  ;;  %v1499_v7 = vpop.f32.mrb[5].mxu0 }
 0x169   : > { %v1522_v11 = vadd.f32 %v1499_v7, %v629_v57  ;;  %v1928_v12 = vpop.f32.mrb[5].mxu1  ;;  %v1952_v14 = vadd.f32 %v2945_v6, %v634_v59 }
 0x16a   : > { %v1960_v13 = vadd.f32 %v1956_v2, %v1523_v5  ;;  %v1951_v16 = vadd.f32 %v1928_v12, %v629_v57 }
 0x16b   : > { %v1959_v15 = vadd.f32 %v1955_v3, %v1522_v11  ;;  %v2860_v17 = vpop.f32.mrb[6].mxu0 }
 0x16c   : > { %v3766_v18 = vadd.f32 %v2860_v17, %v644_v0  ;;  %v2948_v19 = vpop.f32.mrb[6].mxu1  ;;  %v1509_v20 = vpop.f32.mrb[7].mxu0  ;;  %v1964_v21 = vadd.f32 %v1960_v13, %v1952_v14 }
 0x16d   : > { %v3772_v24 = vadd.f32 %v1509_v20, %v639_v58  ;;  %v1938_v25 = vpop.f32.mrb[7].mxu1  ;;  %v1963_v26 = vadd.f32 %v1959_v15, %v1951_v16  ;;  %v3780_v32 = vadd.f32 %v2948_v19, %v644_v0 }
 0x16e   : > { %v1971_v27 = vsel %vm1967_vm1, %v1964_v21, 0.0  ;;  %v1962_v28 = vadd.f32 %v1958_v22, %v3766_v18  ;;  %v3777_v30 = vadd.f32 %v1938_v25, %v639_v58 }
 0x16f   : > { %v1961_v29 = vadd.f32 %v1957_v23, %v3772_v24  ;;  %1972 = vadd.xlane.f32.xlu1 %v1971_v27  ;;  %v1968_v31 = vsel %vm1967_vm1, %v1963_v26, 0.0 }
 0x170   : > { %1969 = vadd.xlane.f32.xlu0 %v1968_v31  ;;  %v1966_v35 = vadd.f32 %v1962_v28, %v3780_v32 }
 0x171   : > { %v1965_v33 = vadd.f32 %v1961_v29, %v3777_v30 }
 0x172   : > { %v1977_v36 = vsel %vm1967_vm1, %v1966_v35, 0.0 }
 0x173   : > { %v1974_v34 = vsel %vm1967_vm1, %v1965_v33, 0.0 }
 0x174   : > { %1975 = vadd.xlane.f32.xlu0 %v1974_v34 }
 0x178   : > { %1978 = vadd.xlane.f32.xlu0 %v1977_v36 }
 0x1fc   : > { %v1973_v37 = vpop.xlane.xlu1 %1972 }
 0x1fd   : > { %v1981_v38 = vmul.f32 0.015625, %v1973_v37  ;;  %v1970_v39 = vpop.xlane.xlu0 %1969 }
 0x1fe   : > { %v1980_v40 = vmul.f32 0.015625, %v1970_v39 }
 0x1ff   : > { %v3786_v41 = vsub.f32 %v647_v60, %v1981_v38  ;;  %v3788_v42 = vsub.f32 %v1085_v61, %v1981_v38  ;;  %v3801_v50 = vsub.f32 %v1523_v5, %v1981_v38  ;;  %v3811_v58 = vsub.f32 %v1952_v14, %v1981_v38 }
 0x200   : > { %v3790_v43 = vsub.f32 %v646_v62, %v1980_v40  ;;  %v3792_v44 = vsub.f32 %v1084_v63, %v1980_v40  ;;  %v3806_v52 = vsub.f32 %v1522_v11, %v1980_v40  ;;  %v3816_v62 = vsub.f32 %v1951_v16, %v1980_v40 }
 0x201   : > { %v1976_v45 = vpop.xlane.xlu0 %1975  ;;  %v1989_v46 = vmul.f32 %v3786_v41, %v3786_v41  ;;  %v2009_v49 = vmul.f32 %v3788_v42, %v3788_v42  ;;  %v2033_v57 = vmul.f32 %v3801_v50, %v3801_v50  ;;  %v2057_v0 = vmul.f32 %v3811_v58, %v3811_v58 }
 0x202   : > { %v1988_v47 = vmul.f32 %v3790_v43, %v3790_v43  ;;  %v2008_v51 = vmul.f32 %v3792_v44, %v3792_v44  ;;  %v1982_v59 = vmul.f32 0.015625, %v1976_v45  ;;  %v2032_v61 = vmul.f32 %v3806_v52, %v3806_v52 }
 0x203   : > { %v1995_v48 = vsel %vm1967_vm1, %v1989_v46, 0.0  ;;  %v2015_v56 = vsel %vm1967_vm1, %v2009_v49, 0.0  ;;  %v2039_v63 = vsel %vm1967_vm1, %v2033_v57, 0.0  ;;  %v2056_v3 = vmul.f32 %v3816_v62, %v3816_v62 }
 0x204   : > { %1996 = vadd.xlane.f32.xlu0 %v1995_v48  ;;  %v1992_v53 = vsel %vm1967_vm1, %v1988_v47, 0.0  ;;  %v2012_v60 = vsel %vm1967_vm1, %v2008_v51, 0.0  ;;  %v2036_v2 = vsel %vm1967_vm1, %v2032_v61, 0.0  ;;  %v3828_v5 = vsub.f32 %v3762_v9, %v1982_v59 }
 0x205   : > { %1993 = vadd.xlane.f32.xlu1 %v1992_v53  ;;  %v1979_v54 = vpop.xlane.xlu0 %1978  ;;  %v2063_v6 = vsel %vm1967_vm1, %v2057_v0, 0.0  ;;  %v3840_v13 = vsub.f32 %v3764_v10, %v1982_v59  ;;  %v3852_v17 = vsub.f32 %v3772_v24, %v1982_v59  ;;  %v3864_v22 = vsub.f32 %v3777_v30, %v1982_v59 }
 0x206   : > { %v1983_v55 = vmul.f32 0.015625, %v1979_v54  ;;  %v1990_v12 = vmul.f32 %v3828_v5, %v3828_v5 }
 0x207   : > { %v2010_v16 = vmul.f32 %v3840_v13, %v3840_v13  ;;  %v2034_v21 = vmul.f32 %v3852_v17, %v3852_v17  ;;  %v2058_v26 = vmul.f32 %v3864_v22, %v3864_v22 }
 0x208   : > { %2016 = vadd.xlane.f32.xlu0 %v2015_v56  ;;  %v3822_v1 = vsub.f32 %v3758_v4, %v1983_v55  ;;  %v3834_v11 = vsub.f32 %v3760_v8, %v1983_v55  ;;  %v2060_v4 = vsel %vm1967_vm1, %v2056_v3, 0.0  ;;  %v3846_v15 = vsub.f32 %v3766_v18, %v1983_v55 }
 0x209   : > { %2013 = vadd.xlane.f32.xlu1 %v2012_v60  ;;  %v1998_v8 = vsel %vm1967_vm1, %v1990_v12, 0.0  ;;  %v3858_v20 = vsub.f32 %v3780_v32, %v1983_v55  ;;  %v2018_v18 = vsel %vm1967_vm1, %v2010_v16, 0.0  ;;  %v2042_v25 = vsel %vm1967_vm1, %v2034_v21, 0.0 }
 0x20a   : > { %v1991_v7 = vmul.f32 %v3822_v1, %v3822_v1  ;;  %v2011_v14 = vmul.f32 %v3834_v11, %v3834_v11  ;;  %v2035_v19 = vmul.f32 %v3846_v15, %v3846_v15  ;;  %v2066_v28 = vsel %vm1967_vm1, %v2058_v26, 0.0 }
 0x20b   : > { %v2059_v24 = vmul.f32 %v3858_v20, %v3858_v20 }
 0x20c   : > { %2040 = vadd.xlane.f32.xlu0 %v2039_v63  ;;  %v2001_v9 = vsel %vm1967_vm1, %v1991_v7, 0.0  ;;  %v2021_v10 = vsel %vm1967_vm1, %v2011_v14, 0.0  ;;  %v2045_v23 = vsel %vm1967_vm1, %v2035_v19, 0.0 }
 0x20d   : > { %2037 = vadd.xlane.f32.xlu1 %v2036_v2  ;;  %v2069_v27 = vsel %vm1967_vm1, %v2059_v24, 0.0 }
 0x210   : > { %2064 = vadd.xlane.f32.xlu0 %v2063_v6 }
 0x211   : > { %2061 = vadd.xlane.f32.xlu1 %v2060_v4 }
 0x214   : > { %2002 = vadd.xlane.f32.xlu0 %v2001_v9 }
 0x215   : > { %1999 = vadd.xlane.f32.xlu1 %v1998_v8 }
 0x218   : > { %2022 = vadd.xlane.f32.xlu0 %v2021_v10 }
 0x219   : > { %2019 = vadd.xlane.f32.xlu1 %v2018_v18 }
 0x21c   : > { %2046 = vadd.xlane.f32.xlu0 %v2045_v23 }
 0x21d   : > { %2043 = vadd.xlane.f32.xlu1 %v2042_v25 }
 0x220   : > { %2070 = vadd.xlane.f32.xlu0 %v2069_v27 }
 0x221   : > { %2067 = vadd.xlane.f32.xlu1 %v2066_v28 }
 0x291   : > { %v1997_v29 = vpop.xlane.xlu0 %1996 }
 0x292   : > { %v1994_v30 = vpop.xlane.xlu1 %1993 }
 0x295   : > { %v2017_v31 = vpop.xlane.xlu0 %2016 }
 0x296   : > { %v2014_v32 = vpop.xlane.xlu1 %2013  ;;  %v2025_v34 = vadd.f32 %v2017_v31, %v1997_v29 }
 0x297   : > { %v2024_v36 = vadd.f32 %v2014_v32, %v1994_v30 }
 0x299   : > { %v2041_v33 = vpop.xlane.xlu0 %2040 }
 0x29a   : > { %v2038_v35 = vpop.xlane.xlu1 %2037  ;;  %v2049_v37 = vadd.f32 %v2041_v33, %v2025_v34 }
 0x29b   : > { %v2048_v38 = vadd.f32 %v2038_v35, %v2024_v36 }
 0x29d   : > { %v2065_v39 = vpop.xlane.xlu0 %2064 }
 0x29e   : > { %v2073_v40 = vadd.f32 %v2065_v39, %v2049_v37  ;;  %v2062_v45 = vpop.xlane.xlu1 %2061 }
 0x29f   : > { %v2072_v46 = vadd.f32 %v2062_v45, %v2048_v38 }
 0x2a0   : > { %v2077_v47 = vmul.f32 0.015625, %v2073_v40 }
 0x2a1   : > { %v2076_v48 = vmul.f32 0.015625, %v2072_v46  ;;  %v2003_v49 = vpop.xlane.xlu0 %2002 }
 0x2a2   : > { %v2081_v53 = vadd.f32 1e-05, %v2077_v47  ;;  %v2000_v51 = vpop.xlane.xlu1 %1999 }
 0x2a3   : > { %v2080_v54 = vadd.f32 1e-05, %v2076_v48 }
 0x2a4   : > { %3265 = vrsqrt.f32 %v2081_v53 }
 0x2a5   : > { %3267 = vrsqrt.f32 %v2080_v54  ;;  %v2023_v55 = vpop.xlane.xlu0 %2022 }
 0x2a6   : > { %v2020_v56 = vpop.xlane.xlu1 %2019  ;;  %v2027_v59 = vadd.f32 %v2023_v55, %v2003_v49 }
 0x2a7   : > { %v2026_v61 = vadd.f32 %v2020_v56, %v2000_v51 }
 0x2a9   : > { %v2047_v57 = vpop.xlane.xlu0 %2046 }
 0x2aa   : > { %v2044_v60 = vpop.xlane.xlu1 %2043  ;;  %v2051_v63 = vadd.f32 %v2047_v57, %v2027_v59 }
 0x2ab   : > { %v2050_v3 = vadd.f32 %v2044_v60, %v2026_v61 }
 0x2ad   : > { %v2071_v0 = vpop.xlane.xlu0 %2070 }
 0x2ae   : > { %v3266_v2 = vpop.eup %3265  ;;  %v2075_v6 = vadd.f32 %v2071_v0, %v2051_v63 }
 0x2af   : > { %v3268_v7 = vpop.eup %3267  ;;  %v2089_v4 = vmul.f32 %v3266_v2, %v3786_v41  ;;  %v2101_v12 = vmul.f32 %v3266_v2, %v3788_v42  ;;  %v2114_v9 = vmul.f32 %v3266_v2, %v3801_v50  ;;  %v2127_v14 = vmul.f32 %v3266_v2, %v3811_v58  ;;  %v2068_v50 = vpop.xlane.xlu1 %2067 }
 0x2b0   : > { %v2088_v8 = vmul.f32 %v3268_v7, %v3790_v43  ;;  %v2100_v16 = vmul.f32 %v3268_v7, %v3792_v44  ;;  %v2113_v41 = vmul.f32 %v3268_v7, %v3806_v52  ;;  %v2126_v42 = vmul.f32 %v3268_v7, %v3816_v62 }
 0x2b1   : > { %v2093_v58 = vmax.f32 %v2089_v4, 0.0  ;;  %v2105_v10 = vmax.f32 %v2101_v12, 0.0  ;;  %v2118_v19 = vmax.f32 %v2114_v9, 0.0  ;;  %v2131_v18 = vmax.f32 %v2127_v14, 0.0 }
 0x2b2   : > { %v2092_v21 = vmax.f32 %v2088_v8, 0.0  ;;  %v2104_v23 = vmax.f32 %v2100_v16, 0.0  ;;  %v2117_v24 = vmax.f32 %v2113_v41, 0.0  ;;  %v2130_v43 = vmax.f32 %v2126_v42, 0.0 }
 0x2b3   : > { %2097 = vst.msk [vmem:[%s3882_s9 + $0x8] sm:$0xff] %vm1967_vm1, %v2093_v58  ;;  %2391 = vst.msk [vmem:[%s3882_s9 + $0x28] sm:$0xff] %vm1967_vm1, %v2105_v10  ;;  %v2079_v44 = vmul.f32 0.015625, %v2075_v6  ;;  %v2074_v52 = vadd.f32 %v2068_v50, %v2050_v3 }
 0x2b4   : > { %2395 = vst.msk [vmem:[%s3882_s9 + $0x48] sm:$0xff] %vm1967_vm1, %v2118_v19  ;;  %2399 = vst.msk [vmem:[%s3882_s9 + $0x68] sm:$0xff] %vm1967_vm1, %v2131_v18 }
 0x2b5   : > { %2096 = vst.msk [vmem:[%s3882_s9] sm:$0xff] %vm1967_vm1, %v2092_v21  ;;  %2390 = vst.msk [vmem:[%s3882_s9 + $0x20] sm:$0xff] %vm1967_vm1, %v2104_v23  ;;  %v2083_v62 = vadd.f32 1e-05, %v2079_v44  ;;  %v2078_v25 = vmul.f32 0.015625, %v2074_v52 }
 0x2b6   : > { %2394 = vst.msk [vmem:[%s3882_s9 + $0x40] sm:$0xff] %vm1967_vm1, %v2117_v24  ;;  %2398 = vst.msk [vmem:[%s3882_s9 + $0x60] sm:$0xff] %vm1967_vm1, %v2130_v43 }
 0x2b7   : > { %3269 = vrsqrt.f32 %v2083_v62  ;;  %v2082_v26 = vadd.f32 1e-05, %v2078_v25 }
 0x2b9   : > { %3271 = vrsqrt.f32 %v2082_v26 }
 0x2c1   : > { %v3270_v27 = vpop.eup %3269 }
 0x2c2   : > { %v2091_v28 = vmul.f32 %v3270_v27, %v3822_v1  ;;  %v2103_v29 = vmul.f32 %v3270_v27, %v3834_v11  ;;  %v2116_v30 = vmul.f32 %v3270_v27, %v3846_v15  ;;  %v2129_v31 = vmul.f32 %v3270_v27, %v3858_v20 }
 0x2c3   : > { %v3272_v32 = vpop.eup %3271 }
 0x2c4   : > { %v2095_v33 = vmax.f32 %v2091_v28, 0.0  ;;  %v2107_v34 = vmax.f32 %v2103_v29, 0.0  ;;  %v2120_v35 = vmax.f32 %v2116_v30, 0.0  ;;  %v2133_v36 = vmax.f32 %v2129_v31, 0.0 }
 0x2c5   : > { %v2090_v37 = vmul.f32 %v3272_v32, %v3828_v5  ;;  %v2102_v1 = vmul.f32 %v3272_v32, %v3840_v13  ;;  %v2115_v38 = vmul.f32 %v3272_v32, %v3852_v17  ;;  %v2128_v11 = vmul.f32 %v3272_v32, %v3864_v22 }
 0x2c6   : > { %2099 = vst.msk [vmem:[%s3882_s9 + $0x18] sm:$0xff] %vm1967_vm1, %v2095_v33  ;;  %2393 = vst.msk [vmem:[%s3882_s9 + $0x38] sm:$0xff] %vm1967_vm1, %v2107_v34 }
 0x2c7   : > { %2397 = vst.msk [vmem:[%s3882_s9 + $0x58] sm:$0xff] %vm1967_vm1, %v2120_v35  ;;  %2401 = vst.msk [vmem:[%s3882_s9 + $0x78] sm:$0xff] %vm1967_vm1, %v2133_v36  ;;  %v2094_v15 = vmax.f32 %v2090_v37, 0.0  ;;  %v2106_v20 = vmax.f32 %v2102_v1, 0.0  ;;  %v2119_v39 = vmax.f32 %v2115_v38, 0.0  ;;  %v2132_v40 = vmax.f32 %v2128_v11, 0.0 }
 0x2c9   : > { %2098 = vst.msk [vmem:[%s3882_s9 + $0x10] sm:$0xff] %vm1967_vm1, %v2094_v15  ;;  %2392 = vst.msk [vmem:[%s3882_s9 + $0x30] sm:$0xff] %vm1967_vm1, %v2106_v20 }
 0x2ca   : > { %2396 = vst.msk [vmem:[%s3882_s9 + $0x50] sm:$0xff] %vm1967_vm1, %v2119_v39  ;;  %2400 = vst.msk [vmem:[%s3882_s9 + $0x70] sm:$0xff] %vm1967_vm1, %v2132_v40 }
 0x2cb PF: > { %s13_s12 = sadd.s32 1, %s3279_s12  }
 0x2cc   : > { %p10_p4 = scmp.ge.s32.totalorder %s13_s12, 4  }
 0x2ce   :  { %12 = sbr.rel (!%p10_p4) target bundleno = 1 (0x1), region = 88 }

// kernel: shape_decoder_forward.7
= control target key start
LH: loop header
LB: loop body
LE: loop exit
PB: predicated region body
PF: predicated region fallthrough
CT: control target
= control target key end

     0   :  { %s2323_s12 = smov 0   ;;  %s2576_s0 = inlined_call_operand.vmem [shape: f32[2,9,32,64], index: 0, kind: input, shape index: {}]   ;;  %s2577_s1 = inlined_call_operand.vmem [shape: f32[16,16,32], index: 1, kind: input, shape index: {}]   ;;  %s2578_s2 = inlined_call_operand.vmem [shape: f32[16,1], index: 2, kind: input, shape index: {}]   ;;  %s2579_s3 = inlined_call_operand.vmem [shape: f32[2,4,16,64], index: 3, kind: output, shape index: {}]  }
   0x1 LB: > { %s1744_s13 = sadd.s32 4294967295, %s2300_s12   ;;  %p1748_p0 = scmp.ge.s32.totalorder %s2300_s12, 1  ;;  %s2300_s12 = sphi %s2323_s12, %s13_s12  }
   0x2   : > { %p137_p1 = scmp.lt.s32.totalorder %s2300_s12, 3 }
   0x4   : > { %p138_p2 = pnand %p1748_p0, %p137_p1 }
   0x5   : > { %p161_p3 = scmp.lt.s32.totalorder (!%p138_p2), %s1744_s13, 1  ;;  %v1752_v0 = vld [vmem:[%s2577_s1 + $0x10] sm:$0xff] (!%p138_p2)  ;;  %vm187_vm0 = vcmask (!%p138_p2), 261120   ;;  %v2302_v2 = vmov (!%p138_p2), 0   ;;  %v1753_v20 = vld [vmem:[%s2577_s1 + $0x18] sm:$0xff] (!%p138_p2)  ;;  %v173_v25 = vld [vmem:[%s2577_s1] sm:$0xff] (!%p138_p2) }
   0x6   : > { %141 = sbr.rel (%p138_p2) target bundleno = 646 (0x286), region = 32  ;;  %v1780_v1 = vld [vmem:[%s2577_s1 + $0x50] sm:$0xff] (!%p138_p2)  ;;  %1959 = vmatprep.mubr.msk.f32.mxu0 (!%p138_p2), %vm187_vm0, %v1752_v0  ;;  %2289 = vset.pattern.permute.xlu0 (!%p138_p2), %v2302_v2  ;;  %v1781_v21 = vld [vmem:[%s2577_s1 + $0x58] sm:$0xff] (!%p138_p2)  ;;  %v1778_v28 = vld [vmem:[%s2577_s1 + $0x40] sm:$0xff] (!%p138_p2)  ;;  %vm1601_vm1 = vcmask (!%p138_p2), 523264  }
   0x7   : > { %2003 = vmatprep.mubr.msk.f32.mxu1 (!%p138_p2), %vm187_vm0, %v1780_v1  ;;  %v171_v35 = vld [vmem:[%s2578_s2] sm:$0xff] (!%p138_p2)  ;;  %v174_v36 = vld [vmem:[%s2577_s1 + $0x8] sm:$0xff] (!%p138_p2)  ;;  %v1770_v51 = vld [vmem:[%s2577_s1 + $0x30] sm:$0xff] (!%p138_p2) }
   0x8   : > { %534 = vperm.xlu0 (!%p138_p2), %2289, %v171_v35   ;;  %v1779_v37 = vld [vmem:[%s2577_s1 + $0x48] sm:$0xff] (!%p138_p2)  ;;  %v1762_v40 = vld [vmem:[%s2577_s1 + $0x20] sm:$0xff] (!%p138_p2)  ;;  %v1794_v52 = vld [vmem:[%s2577_s1 + $0x70] sm:$0xff] (!%p138_p2) }
   0x9   : > { %v1790_v43 = vld [vmem:[%s2577_s1 + $0x60] sm:$0xff] (!%p138_p2)  ;;  %v172_v44 = vld [vmem:[%s2578_s2 + $0x8] sm:$0xff] (!%p138_p2)  ;;  %v1771_v53 = vld [vmem:[%s2577_s1 + $0x38] sm:$0xff] (!%p138_p2) }
   0xa   : > { %v1763_v48 = vld [vmem:[%s2577_s1 + $0x28] sm:$0xff] (!%p138_p2)  ;;  %v1795_v54 = vld [vmem:[%s2577_s1 + $0x78] sm:$0xff] (!%p138_p2)  ;;  %v1804_v55 = vld [vmem:[%s2577_s1 + $0x90] sm:$0xff] (!%p138_p2) }
   0xb   : > { %v1791_v49 = vld [vmem:[%s2577_s1 + $0x68] sm:$0xff] (!%p138_p2)  ;;  %v1828_v56 = vld [vmem:[%s2577_s1 + $0xd0] sm:$0xff] (!%p138_p2)  ;;  %v1805_v57 = vld [vmem:[%s2577_s1 + $0x98] sm:$0xff] (!%p138_p2) }
   0xc   : > { %539 = vperm.xlu0 (!%p138_p2), %2289, %v172_v44   ;;  %v1829_v58 = vld [vmem:[%s2577_s1 + $0xd8] sm:$0xff] (!%p138_p2)  ;;  %v1802_v61 = vld [vmem:[%s2577_s1 + $0x80] sm:$0xff] (!%p138_p2) }
   0xd   : > { %s2581_s13 = smov (!%p161_p3, %s1744_s13), 1  ;;  %v1826_v0 = vld [vmem:[%s2577_s1 + $0xc0] sm:$0xff] }
   0xe   : > { %s2279_s18 = smul.u32 288, %s2581_s13  ;;  %s1854_s10 = sshll.u32 %s2581_s13, 6 }
   0xf   : > { %s170_s15 = scalar_lea.vmem %s2579_s3, %s1854_s10 }
  0x10   : > { %s2345_s21 = scalar_lea.vmem %s2576_s0, %s2279_s18 }
  0x11   : > { %v1754_v3 = vld [vmem:[%s2345_s21 + $0x20] sm:$0xff]  ;;  %v1755_v4 = vld [vmem:[%s2345_s21 + $0x28] sm:$0xff]  ;;  %v1756_v8 = vld [vmem:[%s2345_s21 + $0x30] sm:$0xff] }
  0x12   : > { %v1782_v5 = vld [vmem:[%s2345_s21 + $0x40] sm:$0xff]  ;;  %v2127_v6 = vpack.c.bf16 %v1755_v4, %v1754_v3  ;;  %v1783_v7 = vld [vmem:[%s2345_s21 + $0x48] sm:$0xff]  ;;  %v1757_v9 = vld [vmem:[%s2345_s21 + $0x38] sm:$0xff] }
  0x13   : > { %v2159_v10 = vpack.c.bf16 %v1783_v7, %v1782_v5  ;;  %v2131_v11 = vpack.c.bf16 %v1757_v9, %v1756_v8  ;;  %v1784_v12 = vld [vmem:[%s2345_s21 + $0x50] sm:$0xff]  ;;  %v1785_v13 = vld [vmem:[%s2345_s21 + $0x58] sm:$0xff]  ;;  %v175_v14 = vld [vmem:[%s2345_s21] sm:$0xff] }
  0x14   : > { %2128 = vmatprep.subr.bf16.mxu0 %v2127_v6  ;;  %v2163_v15 = vpack.c.bf16 %v1785_v13, %v1784_v12  ;;  %v176_v16 = vld [vmem:[%s2345_s21 + $0x8] sm:$0xff]  ;;  %v177_v18 = vld [vmem:[%s2345_s21 + $0x10] sm:$0xff]  ;;  %v178_v19 = vld [vmem:[%s2345_s21 + $0x18] sm:$0xff] }
  0x15   : > { %2160 = vmatprep.subr.bf16.mxu1 %v2159_v10  ;;  %2130 = vmatpush3.bf16.msra.mxu0 %v2127_v6  ;;  %v2135_v17 = vpack.c.bf16 %v176_v16, %v175_v14  ;;  %v2139_v22 = vpack.c.bf16 %v178_v19, %v177_v18  ;;  %v1764_v23 = vld [vmem:[%s2345_s21 + $0x60] sm:$0xff]  ;;  %v1765_v24 = vld [vmem:[%s2345_s21 + $0x68] sm:$0xff]  ;;  %v1766_v31 = vld [vmem:[%s2345_s21 + $0x70] sm:$0xff] }
  0x16   : > { %2162 = vmatpush3.bf16.msra.mxu1 %v2159_v10  ;;  %2132 = vmatprep.subr.bf16.mxu0 %v2131_v11  ;;  %v1772_v26 = vld [vmem:[%s2345_s21 + $0x80] sm:$0xff]  ;;  %v1773_v27 = vld [vmem:[%s2345_s21 + $0x88] sm:$0xff]  ;;  %v2377_v29 = vpack.c.bf16 %v1765_v24, %v1764_v23  ;;  %v1767_v32 = vld [vmem:[%s2345_s21 + $0x78] sm:$0xff] }
  0x17   : > { %2164 = vmatprep.subr.bf16.mxu1 %v2163_v15  ;;  %v2380_v30 = vpack.c.bf16 %v1773_v27, %v1772_v26  ;;  %v1774_v33 = vld [vmem:[%s2345_s21 + $0x90] sm:$0xff]  ;;  %v1775_v34 = vld [vmem:[%s2345_s21 + $0x98] sm:$0xff]  ;;  %v2397_v38 = vpack.c.bf16 %v1767_v32, %v1766_v31  ;;  %v1796_v41 = vld [vmem:[%s2345_s21 + $0xa0] sm:$0xff] }
  0x18   : > { %v2400_v39 = vpack.c.bf16 %v1775_v34, %v1774_v33  ;;  %v1797_v42 = vld [vmem:[%s2345_s21 + $0xa8] sm:$0xff]  ;;  %v1798_v46 = vld [vmem:[%s2345_s21 + $0xb0] sm:$0xff]  ;;  %v1799_v47 = vld [vmem:[%s2345_s21 + $0xb8] sm:$0xff] }
  0x19   : > { %2134 = vmatpush3.bf16.msra.mxu0 %v2131_v11  ;;  %v2183_v45 = vpack.c.bf16 %v1797_v42, %v1796_v41  ;;  %v2187_v50 = vpack.c.bf16 %v1799_v47, %v1798_v46  ;;  %v1812_v59 = vld [vmem:[%s2345_s21 + $0xc0] sm:$0xff]  ;;  %v1813_v60 = vld [vmem:[%s2345_s21 + $0xc8] sm:$0xff]  ;;  %v1814_v3 = vld [vmem:[%s2345_s21 + $0xd0] sm:$0xff] }
  0x1a   : > { %2166 = vmatpush3.bf16.msra.mxu1 %v2163_v15  ;;  %2136 = vmatprep.subr.bf16.mxu0 %v2135_v17  ;;  %v1820_v62 = vld [vmem:[%s2345_s21 + $0xe0] sm:$0xff]  ;;  %v1821_v63 = vld [vmem:[%s2345_s21 + $0xe8] sm:$0xff]  ;;  %v2207_v1 = vpack.c.bf16 %v1813_v60, %v1812_v59  ;;  %v1815_v4 = vld [vmem:[%s2345_s21 + $0xd8] sm:$0xff] }
  0x1b   : > { %2168 = vmatprep.subr.bf16.mxu1 %v2127_v6  ;;  %v2215_v2 = vpack.c.bf16 %v1821_v63, %v1820_v62  ;;  %v1822_v5 = vld [vmem:[%s2345_s21 + $0xf0] sm:$0xff]  ;;  %v1803_v7 = vld [vmem:[%s2577_s1 + $0x88] sm:$0xff]  ;;  %v2211_v9 = vpack.c.bf16 %v1815_v4, %v1814_v3  ;;  %v1840_v12 = vld [vmem:[%s2345_s21 + $0x100] sm:$0xff] }
  0x1c   : > { %1960 = vmatmul.mubr.msk.f32.vlgmr.msra.gmra.mrb[0].mxu0 %vm187_vm0, %v1753_v20  ;;  %v1827_v8 = vld [vmem:[%s2577_s1 + $0xc8] sm:$0xff]  ;;  %v1834_v14 = vld [vmem:[%s2577_s1 + $0xe0] sm:$0xff]  ;;  %v1842_v16 = vld [vmem:[%s2345_s21 + $0x110] sm:$0xff] }
  0x1d   : > { %2004 = vmatmul.mubr.msk.f32.vlgmr.msra.gmra.mrb[0].mxu1 %vm187_vm0, %v1781_v21  ;;  %2138 = vmatpush3.bf16.msra.mxu0 %v2135_v17  ;;  %v1841_v13 = vld [vmem:[%s2345_s21 + $0x108] sm:$0xff]  ;;  %v1843_v17 = vld [vmem:[%s2345_s21 + $0x118] sm:$0xff]  ;;  %v1818_v21 = vld [vmem:[%s2577_s1 + $0xb0] sm:$0xff] }
  0x1e   : > { %2170 = vmatpush3.bf16.msra.mxu1 %v2127_v6  ;;  %2140 = vmatprep.subr.bf16.mxu0 %v2139_v22  ;;  %v1823_v6 = vld [vmem:[%s2345_s21 + $0xf8] sm:$0xff]  ;;  %v2247_v15 = vpack.c.bf16 %v1841_v13, %v1840_v12  ;;  %v1811_v18 = vld [vmem:[%s2577_s1 + $0xa8] sm:$0xff]  ;;  %v2251_v20 = vpack.c.bf16 %v1843_v17, %v1842_v16 }
  0x1f   : > { %2172 = vmatprep.subr.bf16.mxu1 %v2131_v11  ;;  %1970 = vmatprep.mubr.msk.f32.mxu0 %vm187_vm0, %v173_v25  ;;  %v2219_v10 = vpack.c.bf16 %v1823_v6, %v1822_v5  ;;  %v1835_v19 = vld [vmem:[%s2577_s1 + $0xe8] sm:$0xff]  ;;  %v1819_v23 = vld [vmem:[%s2577_s1 + $0xb8] sm:$0xff] }
  0x20   : > { %2014 = vmatprep.mubr.msk.f32.mxu1 %vm187_vm0, %v1778_v28  ;;  %v1839_v24 = vld [vmem:[%s2577_s1 + $0xf8] sm:$0xff] }
  0x21   : > { %2142 = vmatpush3.bf16.msra.mxu0 %v2139_v22  ;;  %v1838_v22 = vld [vmem:[%s2577_s1 + $0xf0] sm:$0xff] }
  0x22   : > { %2174 = vmatpush3.bf16.msra.mxu1 %v2131_v11  ;;  %2144 = vmatprep.subr.bf16.mxu0 %v2377_v29  ;;  %v1810_v11 = vld [vmem:[%s2577_s1 + $0xa0] sm:$0xff] }
  0x23   : > { %2176 = vmatprep.subr.bf16.mxu1 %v2380_v30 }
  0x24   : > { %1971 = vmatmul.mubr.msk.f32.vlgmr.msra.gmra.mrb[0].mxu0 %vm187_vm0, %v174_v36 }
  0x25   : > { %2015 = vmatmul.mubr.msk.f32.vlgmr.msra.gmra.mrb[0].mxu1 %vm187_vm0, %v1779_v37  ;;  %2146 = vmatpush3.bf16.msra.mxu0 %v2377_v29 }
  0x26   : > { %2178 = vmatpush3.bf16.msra.mxu1 %v2380_v30  ;;  %2148 = vmatprep.subr.bf16.mxu0 %v2397_v38 }
  0x27   : > { %2180 = vmatprep.subr.bf16.mxu1 %v2400_v39  ;;  %1981 = vmatprep.mubr.msk.f32.mxu0 %vm187_vm0, %v1762_v40 }
  0x28   : > { %2025 = vmatprep.mubr.msk.f32.mxu1 %vm187_vm0, %v1790_v43 }
  0x29   : > { %2150 = vmatpush3.bf16.msra.mxu0 %v2397_v38 }
  0x2a   : > { %2182 = vmatpush3.bf16.msra.mxu1 %v2400_v39  ;;  %2152 = vmatprep.subr.bf16.mxu0 %v2380_v30 }
  0x2b   : > { %2184 = vmatprep.subr.bf16.mxu1 %v2183_v45 }
  0x2c   : > { %1982 = vmatmul.mubr.msk.f32.vlgmr.msra.gmra.mrb[0].mxu0 %vm187_vm0, %v1763_v48 }
  0x2d   : > { %2026 = vmatmul.mubr.msk.f32.vlgmr.msra.gmra.mrb[0].mxu1 %vm187_vm0, %v1791_v49  ;;  %2154 = vmatpush3.bf16.msra.mxu0 %v2380_v30 }
  0x2e   : > { %2186 = vmatpush3.bf16.msra.mxu1 %v2183_v45  ;;  %2156 = vmatprep.subr.bf16.mxu0 %v2400_v39 }
  0x2f   : > { %2188 = vmatprep.subr.bf16.mxu1 %v2187_v50  ;;  %1992 = vmatprep.mubr.msk.f32.mxu0 %vm187_vm0, %v1770_v51 }
  0x30   : > { %2036 = vmatprep.mubr.msk.f32.mxu1 %vm187_vm0, %v1794_v52 }
  0x31   : > { %2158 = vmatpush3.bf16.msra.mxu0 %v2400_v39 }
  0x32   : > { %2190 = vmatpush3.bf16.msra.mxu1 %v2187_v50  ;;  %2192 = vmatprep.subr.bf16.mxu0 %v2380_v30 }
  0x33   : > { %2224 = vmatprep.subr.bf16.mxu1 %v2183_v45 }
  0x34   : > { %1993 = vmatmul.mubr.msk.f32.vlgmr.msra.gmra.mrb[0].mxu0 %vm187_vm0, %v1771_v53 }
  0x35   : > { %2037 = vmatmul.mubr.msk.f32.vlgmr.msra.gmra.mrb[0].mxu1 %vm187_vm0, %v1795_v54  ;;  %2194 = vmatpush3.bf16.msra.mxu0 %v2380_v30 }
  0x36   : > { %2226 = vmatpush3.bf16.msra.mxu1 %v2183_v45  ;;  %2196 = vmatprep.subr.bf16.mxu0 %v2400_v39 }
  0x37   : > { %2228 = vmatprep.subr.bf16.mxu1 %v2187_v50  ;;  %2047 = vmatprep.mubr.msk.f32.mxu0 %vm187_vm0, %v1804_v55 }
  0x38   : > { %2091 = vmatprep.mubr.msk.f32.mxu1 %vm187_vm0, %v1828_v56 }
  0x39   : > { %2198 = vmatpush3.bf16.msra.mxu0 %v2400_v39 }
  0x3a   : > { %2230 = vmatpush3.bf16.msra.mxu1 %v2187_v50  ;;  %2200 = vmatprep.subr.bf16.mxu0 %v2377_v29 }
  0x3b   : > { %2232 = vmatprep.subr.bf16.mxu1 %v2380_v30 }
  0x3c   : > { %2048 = vmatmul.mubr.msk.f32.vlgmr.msra.gmra.mrb[2].mxu0 %vm187_vm0, %v1805_v57 }
  0x3d   : > { %2092 = vmatmul.mubr.msk.f32.vlgmr.msra.gmra.mrb[2].mxu1 %vm187_vm0, %v1829_v58  ;;  %2202 = vmatpush3.bf16.msra.mxu0 %v2377_v29 }
  0x3e   : > { %2234 = vmatpush3.bf16.msra.mxu1 %v2380_v30  ;;  %2204 = vmatprep.subr.bf16.mxu0 %v2397_v38 }
  0x3f   : > { %2236 = vmatprep.subr.bf16.mxu1 %v2400_v39  ;;  %2058 = vmatprep.mubr.msk.f32.mxu0 %vm187_vm0, %v1802_v61 }
  0x40   : > { %2102 = vmatprep.mubr.msk.f32.mxu1 %vm187_vm0, %v1826_v0 }
  0x41   : > { %2206 = vmatpush3.bf16.msra.mxu0 %v2397_v38 }
  0x42   : > { %2238 = vmatpush3.bf16.msra.mxu1 %v2400_v39  ;;  %2208 = vmatprep.subr.bf16.mxu0 %v2207_v1 }
  0x43   : > { %2240 = vmatprep.subr.bf16.mxu1 %v2215_v2 }
  0x44   : > { %2059 = vmatmul.mubr.msk.f32.vlgmr.msra.gmra.mrb[2].mxu0 %vm187_vm0, %v1803_v7 }
  0x45   : > { %2103 = vmatmul.mubr.msk.f32.vlgmr.msra.gmra.mrb[2].mxu1 %vm187_vm0, %v1827_v8  ;;  %2210 = vmatpush3.bf16.msra.mxu0 %v2207_v1 }
  0x46   : > { %2242 = vmatpush3.bf16.msra.mxu1 %v2215_v2  ;;  %2212 = vmatprep.subr.bf16.mxu0 %v2211_v9 }
  0x47   : > { %2244 = vmatprep.subr.bf16.mxu1 %v2219_v10  ;;  %2069 = vmatprep.mubr.msk.f32.mxu0 %vm187_vm0, %v1810_v11 }
  0x48   : > { %2113 = vmatprep.mubr.msk.f32.mxu1 %vm187_vm0, %v1834_v14 }
  0x49   : > { %2214 = vmatpush3.bf16.msra.mxu0 %v2211_v9 }
  0x4a   : > { %2246 = vmatpush3.bf16.msra.mxu1 %v2219_v10  ;;  %2216 = vmatprep.subr.bf16.mxu0 %v2215_v2 }
  0x4b   : > { %2248 = vmatprep.subr.bf16.mxu1 %v2247_v15 }
  0x4c   : > { %2070 = vmatmul.mubr.msk.f32.vlgmr.msra.gmra.mrb[2].mxu0 %vm187_vm0, %v1811_v18 }
  0x4d   : > { %2114 = vmatmul.mubr.msk.f32.vlgmr.msra.gmra.mrb[2].mxu1 %vm187_vm0, %v1835_v19  ;;  %2218 = vmatpush3.bf16.msra.mxu0 %v2215_v2 }
  0x4e   : > { %2250 = vmatpush3.bf16.msra.mxu1 %v2247_v15  ;;  %2220 = vmatprep.subr.bf16.mxu0 %v2219_v10 }
  0x4f   : > { %2252 = vmatprep.subr.bf16.mxu1 %v2251_v20  ;;  %2080 = vmatprep.mubr.msk.f32.mxu0 %vm187_vm0, %v1818_v21 }
  0x50   : > { %2124 = vmatprep.mubr.msk.f32.mxu1 %vm187_vm0, %v1838_v22 }
  0x51   : > { %2222 = vmatpush3.bf16.msra.mxu0 %v2219_v10 }
  0x52   : > { %2254 = vmatpush3.bf16.msra.mxu1 %v2251_v20 }
  0x54   : > { %2081 = vmatmul.mubr.msk.f32.vlgmr.msra.gmra.mrb[2].mxu0 %vm187_vm0, %v1819_v23 }
  0x55   : > { %2125 = vmatmul.mubr.msk.f32.vlgmr.msra.gmra.mrb[2].mxu1 %vm187_vm0, %v1839_v24 }
  0x87   : > { %v535_v29 = vpop.permute.xlu0 %534 }
  0x8b   : > { %v540_v30 = vpop.permute.xlu0 %539 }
 0x107   : > { %v1994_v25 = vpop.f32.mrb[0].mxu0 }
 0x108   : > { %v2038_v26 = vpop.f32.mrb[0].mxu1  ;;  %v521_v27 = vpop.f32.mrb[1].mxu0  ;;  %v543_v31 = vadd.f32 %v1994_v25, %v540_v30 }
 0x109   : > { %v883_v28 = vpop.f32.mrb[1].mxu1  ;;  %v895_v32 = vadd.f32 %v2038_v26, %v540_v30  ;;  %v542_v33 = vadd.f32 %v535_v29, %v521_v27 }
 0x10a   : > { %v894_v34 = vadd.f32 %v883_v28, %v535_v29 }
 0x10b   : > { %v1596_v39 = vadd.f32 %v895_v32, %v543_v31 }
 0x10c   : > { %v1595_v40 = vadd.f32 %v894_v34, %v542_v33 }
 0x127   : > { %v2082_v35 = vpop.f32.mrb[2].mxu0 }
 0x128   : > { %v1247_v36 = vadd.f32 %v2082_v35, %v540_v30  ;;  %v2126_v37 = vpop.f32.mrb[2].mxu1  ;;  %v1235_v38 = vpop.f32.mrb[3].mxu0 }
 0x129   : > { %v1246_v41 = vadd.f32 %v1235_v38, %v535_v29  ;;  %v1582_v42 = vpop.f32.mrb[3].mxu1  ;;  %v1594_v46 = vadd.f32 %v2126_v37, %v540_v30 }
 0x12a   : > { %v1598_v43 = vadd.f32 %v1596_v39, %v1247_v36  ;;  %v1593_v45 = vadd.f32 %v1582_v42, %v535_v29 }
 0x12b   : > { %v1597_v44 = vadd.f32 %v1595_v40, %v1246_v41 }
 0x12c   : > { %v1600_v49 = vadd.f32 %v1598_v43, %v1594_v46 }
 0x12d   : > { %v1599_v47 = vadd.f32 %v1597_v44, %v1593_v45 }
 0x12e   : > { %v1605_v50 = vsel %vm1601_vm1, %v1600_v49, 0.0 }
 0x12f   : > { %v1602_v48 = vsel %vm1601_vm1, %v1599_v47, 0.0 }
 0x130   : > { %1603 = vadd.xlane.f32.xlu1 %v1602_v48 }
 0x134   : > { %1606 = vadd.xlane.f32.xlu1 %v1605_v50 }
 0x1bd   : > { %v1604_v51 = vpop.xlane.xlu1 %1603 }
 0x1be   : > { %v1608_v52 = vmul.f32 0.00390625, %v1604_v51 }
 0x1c0   : > { %v1610_v53 = vsub.f32 %v542_v33, %v1608_v52  ;;  %v1620_v2 = vsub.f32 %v894_v34, %v1608_v52  ;;  %v1632_v5 = vsub.f32 %v1246_v41, %v1608_v52  ;;  %v1644_v8 = vsub.f32 %v1593_v45, %v1608_v52 }
 0x1c1   : > { %v1607_v54 = vpop.xlane.xlu1 %1606 }
 0x1c2   : > { %v1609_v55 = vmul.f32 0.00390625, %v1607_v54  ;;  %v1612_v56 = vmul.f32 %v1610_v53, %v1610_v53  ;;  %v1622_v4 = vmul.f32 %v1620_v2, %v1620_v2  ;;  %v1634_v7 = vmul.f32 %v1632_v5, %v1632_v5 }
 0x1c3   : > { %v1646_v10 = vmul.f32 %v1644_v8, %v1644_v8 }
 0x1c4   : > { %v1614_v57 = vsel %vm1601_vm1, %v1612_v56, 0.0  ;;  %v2544_v58 = vsub.f32 %v543_v31, %v1609_v55  ;;  %v2546_v59 = vsub.f32 %v895_v32, %v1609_v55  ;;  %v1633_v63 = vsub.f32 %v1247_v36, %v1609_v55 }
 0x1c5   : > { %1615 = vadd.xlane.f32.xlu0 %v1614_v57  ;;  %v1624_v6 = vsel %vm1601_vm1, %v1622_v4, 0.0  ;;  %v1636_v9 = vsel %vm1601_vm1, %v1634_v7, 0.0  ;;  %v1645_v11 = vsub.f32 %v1594_v46, %v1609_v55  ;;  %v1648_v12 = vsel %vm1601_vm1, %v1646_v10, 0.0 }
 0x1c6   : > { %v1613_v60 = vmul.f32 %v2544_v58, %v2544_v58  ;;  %v1623_v62 = vmul.f32 %v2546_v59, %v2546_v59  ;;  %v1635_v1 = vmul.f32 %v1633_v63, %v1633_v63 }
 0x1c7   : > { %v1647_v13 = vmul.f32 %v1645_v11, %v1645_v11 }
 0x1c8   : > { %v1617_v61 = vsel %vm1601_vm1, %v1613_v60, 0.0  ;;  %v1627_v0 = vsel %vm1601_vm1, %v1623_v62, 0.0  ;;  %v1639_v3 = vsel %vm1601_vm1, %v1635_v1, 0.0 }
 0x1c9   : > { %1618 = vadd.xlane.f32.xlu1 %v1617_v61  ;;  %v1651_v14 = vsel %vm1601_vm1, %v1647_v13, 0.0 }
 0x1cd   : > { %1628 = vadd.xlane.f32.xlu1 %v1627_v0 }
 0x1d1   : > { %1640 = vadd.xlane.f32.xlu1 %v1639_v3 }
 0x1d5   : > { %1625 = vadd.xlane.f32.xlu1 %v1624_v6 }
 0x1d9   : > { %1637 = vadd.xlane.f32.xlu1 %v1636_v9 }
 0x1dd   : > { %1649 = vadd.xlane.f32.xlu1 %v1648_v12 }
 0x1e1   : > { %1652 = vadd.xlane.f32.xlu1 %v1651_v14 }
 0x252   : > { %v1616_v19 = vpop.xlane.xlu0 %1615 }
 0x256   : > { %v1619_v15 = vpop.xlane.xlu1 %1618 }
 0x25a   : > { %v1629_v16 = vpop.xlane.xlu1 %1628 }
 0x25b   : > { %v1631_v24 = vadd.f32 %v1629_v16, %v1619_v15 }
 0x25e   : > { %v1641_v17 = vpop.xlane.xlu1 %1640 }
 0x25f   : > { %v1643_v26 = vadd.f32 %v1641_v17, %v1631_v24 }
 0x262   : > { %v1626_v18 = vpop.xlane.xlu1 %1625 }
 0x263   : > { %v1630_v21 = vadd.f32 %v1626_v18, %v1616_v19 }
 0x266   : > { %v1638_v20 = vpop.xlane.xlu1 %1637 }
 0x267   : > { %v1642_v22 = vadd.f32 %v1638_v20, %v1630_v21 }
 0x26a   : > { %v1650_v23 = vpop.xlane.xlu1 %1649 }
 0x26b   : > { %v1654_v25 = vadd.f32 %v1650_v23, %v1642_v22 }
 0x26d   : > { %v1656_v27 = vmul.f32 0.00390625, %v1654_v25 }
 0x26e   : > { %v1653_v28 = vpop.xlane.xlu1 %1652 }
 0x26f   : > { %v1658_v29 = vadd.f32 1e-05, %v1656_v27  ;;  %v1655_v30 = vadd.f32 %v1653_v28, %v1643_v26 }
 0x271   : > { %2290 = vrsqrt.f32 %v1658_v29  ;;  %v1657_v31 = vmul.f32 0.00390625, %v1655_v30 }
 0x273   : > { %v1659_v32 = vadd.f32 1e-05, %v1657_v31 }
 0x275   : > { %2292 = vrsqrt.f32 %v1659_v32 }
 0x27b   : > { %v2291_v33 = vpop.eup %2290 }
 0x27c   : > { %v1662_v34 = vmul.f32 %v2291_v33, %v1610_v53  ;;  %v1668_v35 = vmul.f32 %v2291_v33, %v1620_v2  ;;  %v1675_v36 = vmul.f32 %v2291_v33, %v1632_v5  ;;  %v1682_v37 = vmul.f32 %v2291_v33, %v1644_v8 }
 0x27e   : > { %v1664_v38 = vmax.f32 %v1662_v34, 0.0  ;;  %v1670_v39 = vmax.f32 %v1668_v35, 0.0  ;;  %v1677_v40 = vmax.f32 %v1675_v36, 0.0  ;;  %v1684_v41 = vmax.f32 %v1682_v37, 0.0 }
 0x27f   : > { %v2293_v42 = vpop.eup %2292 }
 0x280   : > { %1666 = vst.msk [vmem:[%s170_s15] sm:$0xff] %vm1601_vm1, %v1664_v38  ;;  %1846 = vst.msk [vmem:[%s170_s15 + $0x10] sm:$0xff] %vm1601_vm1, %v1670_v39  ;;  %v1663_v43 = vmul.f32 %v2293_v42, %v2544_v58  ;;  %v1669_v44 = vmul.f32 %v2293_v42, %v2546_v59  ;;  %v1676_v45 = vmul.f32 %v2293_v42, %v1633_v63 }
 0x281   : > { %1848 = vst.msk [vmem:[%s170_s15 + $0x20] sm:$0xff] %vm1601_vm1, %v1677_v40  ;;  %1850 = vst.msk [vmem:[%s170_s15 + $0x30] sm:$0xff] %vm1601_vm1, %v1684_v41  ;;  %v1683_v46 = vmul.f32 %v2293_v42, %v1645_v11 }
 0x282   : > { %v1665_v47 = vmax.f32 %v1663_v43, 0.0  ;;  %v1671_v48 = vmax.f32 %v1669_v44, 0.0  ;;  %v1678_v49 = vmax.f32 %v1676_v45, 0.0 }
 0x283   : > { %v1685_v50 = vmax.f32 %v1683_v46, 0.0 }
 0x284   : > { %1667 = vst.msk [vmem:[%s170_s15 + $0x8] sm:$0xff] %vm1601_vm1, %v1665_v47  ;;  %1847 = vst.msk [vmem:[%s170_s15 + $0x18] sm:$0xff] %vm1601_vm1, %v1671_v48 }
 0x285   : > { %1849 = vst.msk [vmem:[%s170_s15 + $0x28] sm:$0xff] %vm1601_vm1, %v1678_v49  ;;  %1851 = vst.msk [vmem:[%s170_s15 + $0x38] sm:$0xff] %vm1601_vm1, %v1685_v50 }
 0x286 PF: > { %s13_s12 = sadd.s32 1, %s2300_s12  }
 0x287   : > { %p10_p4 = scmp.ge.s32.totalorder %s13_s12, 4  }
 0x289   :  { %12 = sbr.rel (!%p10_p4) target bundleno = 1 (0x1), region = 88 }

// kernel: shape_decoder_forward.8
= control target key start
LH: loop header
LB: loop body
LE: loop exit
PB: predicated region body
PF: predicated region fallthrough
CT: control target
= control target key end

     0   :  { %s1799_s12 = smov 0   ;;  %s1941_s0 = inlined_call_operand.vmem [shape: f32[2,9,16,256], index: 0, kind: input, shape index: {}]   ;;  %s1942_s1 = inlined_call_operand.vmem [shape: f32[16,8,16], index: 1, kind: input, shape index: {}]   ;;  %s1943_s2 = inlined_call_operand.vmem [shape: f32[8,1], index: 2, kind: input, shape index: {}]   ;;  %s1944_s3 = inlined_call_operand.vmem [shape: f32[2,4,8,256], index: 3, kind: output, shape index: {}]  }
   0x1 LB: > { %s1587_s13 = sadd.s32 4294967295, %s1775_s12   ;;  %p1591_p0 = scmp.ge.s32.totalorder %s1775_s12, 1  ;;  %s1775_s12 = sphi %s1799_s12, %s13_s12  }
   0x2   : > { %p137_p1 = scmp.lt.s32.totalorder %s1775_s12, 3 }
   0x4   : > { %p138_p2 = pnand %p1591_p0, %p137_p1 }
   0x5   : > { %p161_p3 = scmp.lt.s32.totalorder (!%p138_p2), %s1587_s13, 1  ;;  %v1777_v0 = vmov (!%p138_p2), 0.0   ;;  %v1778_v1 = vmov (!%p138_p2), 0   ;;  %v171_v2 = vld [vmem:[%s1943_s2] sm:$0xff] (!%p138_p2)  ;;  %v1595_v19 = vld [vmem:[%s1942_s1 + $0x8] sm:$0xff] (!%p138_p2)  ;;  %vm184_vm0 = vcmask (!%p138_p2), 130048  }
   0x6   : > { %141 = sbr.rel (%p138_p2) target bundleno = 626 (0x272), region = 32  ;;  %252 = vmatprep.mubr.f32.mxu0 (!%p138_p2), %v1777_v0  ;;  %582 = vmatprep.mubr.f32.mxu1 (!%p138_p2), %v1777_v0  ;;  %v1615_v24 = vld [vmem:[%s1942_s1 + $0x28] sm:$0xff] (!%p138_p2)  ;;  %v172_v33 = vld [vmem:[%s1942_s1] sm:$0xff] (!%p138_p2)  ;;  %v1602_v42 = vld [vmem:[%s1942_s1 + $0x10] sm:$0xff] (!%p138_p2) }
   0x7   : > { %1766 = vset.pattern.permute.xlu0 (!%p138_p2), %v1778_v1  ;;  %v1614_v37 = vld [vmem:[%s1942_s1 + $0x20] sm:$0xff] (!%p138_p2)  ;;  %v1622_v43 = vld [vmem:[%s1942_s1 + $0x30] sm:$0xff] (!%p138_p2)  ;;  %v1608_v45 = vld [vmem:[%s1942_s1 + $0x18] sm:$0xff] (!%p138_p2) }
   0x8   : > { %501 = vperm.xlu0 (!%p138_p2), %1766, %v171_v2   ;;  %v1624_v46 = vld [vmem:[%s1942_s1 + $0x38] sm:$0xff] (!%p138_p2)  ;;  %v1631_v49 = vld [vmem:[%s1942_s1 + $0x48] sm:$0xff] (!%p138_p2)  ;;  %v1630_v59 = vld [vmem:[%s1942_s1 + $0x40] sm:$0xff] (!%p138_p2) }
   0x9   : > { %v1647_v52 = vld [vmem:[%s1942_s1 + $0x68] sm:$0xff] (!%p138_p2)  ;;  %v1646_v63 = vld [vmem:[%s1942_s1 + $0x60] sm:$0xff] (!%p138_p2) }
   0xd   : > { %s1946_s13 = smov (!%p161_p3, %s1587_s13), 1 }
   0xe   : > { %s1755_s14 = smul.u32 288, %s1946_s13  ;;  %s1666_s27 = sshll.u32 %s1946_s13, 6 }
   0xf   : > { %s170_s30 = scalar_lea.vmem %s1944_s3, %s1666_s27 }
  0x10   : > { %s1818_s19 = scalar_lea.vmem %s1941_s0, %s1755_s14 }
  0x11   : > { %v1597_v3 = vld [vmem:[%s1818_s19 + $0x28] sm:$0xff]  ;;  %v1599_v4 = vld [vmem:[%s1818_s19 + $0x38] sm:$0xff]  ;;  %v1596_v8 = vld [vmem:[%s1818_s19 + $0x20] sm:$0xff] }
  0x12   : > { %v1617_v5 = vld [vmem:[%s1818_s19 + $0x48] sm:$0xff]  ;;  %v1667_v6 = vpack.c.bf16 %v1599_v4, %v1597_v3  ;;  %v1619_v7 = vld [vmem:[%s1818_s19 + $0x58] sm:$0xff]  ;;  %v1598_v9 = vld [vmem:[%s1818_s19 + $0x30] sm:$0xff] }
  0x13   : > { %v1683_v10 = vpack.c.bf16 %v1619_v7, %v1617_v5  ;;  %v1669_v11 = vpack.c.bf16 %v1598_v9, %v1596_v8  ;;  %v1616_v12 = vld [vmem:[%s1818_s19 + $0x40] sm:$0xff]  ;;  %v1618_v13 = vld [vmem:[%s1818_s19 + $0x50] sm:$0xff]  ;;  %v174_v14 = vld [vmem:[%s1818_s19 + $0x8] sm:$0xff] }
  0x14   : > { %1668 = vmatprep.subr.bf16.mxu0 %v1667_v6  ;;  %v1685_v15 = vpack.c.bf16 %v1618_v13, %v1616_v12  ;;  %v176_v16 = vld [vmem:[%s1818_s19 + $0x18] sm:$0xff]  ;;  %v173_v17 = vld [vmem:[%s1818_s19] sm:$0xff]  ;;  %v175_v18 = vld [vmem:[%s1818_s19 + $0x10] sm:$0xff] }
  0x15   : > { %1684 = vmatprep.subr.bf16.mxu1 %v1683_v10  ;;  %1670 = vmatpush1.bf16.msra.mxu0 %v1669_v11  ;;  %v1671_v20 = vpack.c.bf16 %v176_v16, %v174_v14  ;;  %v1673_v21 = vpack.c.bf16 %v175_v18, %v173_v17  ;;  %v1604_v22 = vld [vmem:[%s1818_s19 + $0x68] sm:$0xff]  ;;  %v1606_v23 = vld [vmem:[%s1818_s19 + $0x78] sm:$0xff]  ;;  %v1603_v29 = vld [vmem:[%s1818_s19 + $0x60] sm:$0xff] }
  0x16   : > { %1686 = vmatpush1.bf16.msra.mxu1 %v1685_v15  ;;  %v1610_v25 = vld [vmem:[%s1818_s19 + $0x88] sm:$0xff]  ;;  %v1612_v26 = vld [vmem:[%s1818_s19 + $0x98] sm:$0xff]  ;;  %v1675_v27 = vpack.c.bf16 %v1606_v23, %v1604_v22  ;;  %v1605_v30 = vld [vmem:[%s1818_s19 + $0x70] sm:$0xff] }
  0x17   : > { %1672 = vmatprep.subr.bf16.mxu0 %v1671_v20  ;;  %1688 = vmatprep.subr.bf16.mxu1 %v1667_v6  ;;  %v1679_v28 = vpack.c.bf16 %v1612_v26, %v1610_v25  ;;  %v1609_v31 = vld [vmem:[%s1818_s19 + $0x80] sm:$0xff]  ;;  %v1611_v32 = vld [vmem:[%s1818_s19 + $0x90] sm:$0xff]  ;;  %v1677_v34 = vpack.c.bf16 %v1605_v30, %v1603_v29  ;;  %v1626_v35 = vld [vmem:[%s1818_s19 + $0xa8] sm:$0xff] }
  0x18   : > { %1600 = vmatmul.mubr.msk.f32.vlgmr.msra.gmra.mrb[0].mxu0 %vm184_vm0, %v1595_v19  ;;  %v1628_v36 = vld [vmem:[%s1818_s19 + $0xb8] sm:$0xff]  ;;  %v1681_v38 = vpack.c.bf16 %v1611_v32, %v1609_v31  ;;  %v1625_v40 = vld [vmem:[%s1818_s19 + $0xa0] sm:$0xff]  ;;  %v1627_v41 = vld [vmem:[%s1818_s19 + $0xb0] sm:$0xff] }
  0x19   : > { %1620 = vmatmul.mubr.msk.f32.vlgmr.msra.gmra.mrb[0].mxu1 %vm184_vm0, %v1615_v24  ;;  %1674 = vmatpush1.bf16.msra.mxu0 %v1673_v21  ;;  %v1695_v39 = vpack.c.bf16 %v1628_v36, %v1626_v35  ;;  %v1697_v44 = vpack.c.bf16 %v1627_v41, %v1625_v40  ;;  %v1636_v47 = vld [vmem:[%s1818_s19 + $0xc8] sm:$0xff]  ;;  %v1638_v48 = vld [vmem:[%s1818_s19 + $0xd8] sm:$0xff]  ;;  %v1635_v55 = vld [vmem:[%s1818_s19 + $0xc0] sm:$0xff] }
  0x1a   : > { %1690 = vmatpush1.bf16.msra.mxu1 %v1669_v11  ;;  %326 = vmatprep.mubr.f32.mxu0 %v1777_v0  ;;  %v1642_v50 = vld [vmem:[%s1818_s19 + $0xe8] sm:$0xff]  ;;  %v1644_v51 = vld [vmem:[%s1818_s19 + $0xf8] sm:$0xff]  ;;  %v1707_v53 = vpack.c.bf16 %v1638_v48, %v1636_v47  ;;  %v1637_v56 = vld [vmem:[%s1818_s19 + $0xd0] sm:$0xff] }
  0x1b   : > { %656 = vmatprep.mubr.f32.mxu1 %v1777_v0  ;;  %1676 = vmatprep.subr.bf16.mxu0 %v1675_v27  ;;  %v1711_v54 = vpack.c.bf16 %v1644_v51, %v1642_v50  ;;  %v1641_v57 = vld [vmem:[%s1818_s19 + $0xe0] sm:$0xff]  ;;  %v1643_v58 = vld [vmem:[%s1818_s19 + $0xf0] sm:$0xff]  ;;  %v1709_v60 = vpack.c.bf16 %v1637_v56, %v1635_v55  ;;  %v1654_v61 = vld [vmem:[%s1818_s19 + $0x108] sm:$0xff] }
  0x1c   : > { %1692 = vmatprep.subr.bf16.mxu1 %v1679_v28  ;;  %v1656_v62 = vld [vmem:[%s1818_s19 + $0x118] sm:$0xff]  ;;  %v1713_v1 = vpack.c.bf16 %v1643_v58, %v1641_v57  ;;  %v1653_v3 = vld [vmem:[%s1818_s19 + $0x100] sm:$0xff]  ;;  %v1655_v4 = vld [vmem:[%s1818_s19 + $0x110] sm:$0xff] }
  0x1d   : > { %v1727_v2 = vpack.c.bf16 %v1656_v62, %v1654_v61  ;;  %v1634_v5 = vld [vmem:[%s1942_s1 + $0x50] sm:$0xff]  ;;  %v1729_v7 = vpack.c.bf16 %v1655_v4, %v1653_v3  ;;  %v1640_v8 = vld [vmem:[%s1942_s1 + $0x58] sm:$0xff] }
  0x1e   : > { %v1650_v6 = vld [vmem:[%s1942_s1 + $0x70] sm:$0xff]  ;;  %v1652_v9 = vld [vmem:[%s1942_s1 + $0x78] sm:$0xff] }
  0x20   : > { %1601 = vmatmul.mubr.msk.f32.vlgmr.msra.gmra.mrb[0].mxu0 %vm184_vm0, %v172_v33 }
  0x21   : > { %1621 = vmatmul.mubr.msk.f32.vlgmr.msra.gmra.mrb[0].mxu1 %vm184_vm0, %v1614_v37  ;;  %1678 = vmatpush1.bf16.msra.mxu0 %v1677_v34 }
  0x22   : > { %1694 = vmatpush1.bf16.msra.mxu1 %v1681_v38  ;;  %407 = vmatprep.mubr.f32.mxu0 %v1777_v0 }
  0x23   : > { %732 = vmatprep.mubr.f32.mxu1 %v1777_v0  ;;  %1680 = vmatprep.subr.bf16.mxu0 %v1679_v28 }
  0x24   : > { %1696 = vmatprep.subr.bf16.mxu1 %v1695_v39 }
  0x28   : > { %1607 = vmatmul.mubr.msk.f32.vlgmr.msra.gmra.mrb[0].mxu0 %vm184_vm0, %v1602_v42 }
  0x29   : > { %1623 = vmatmul.mubr.msk.f32.vlgmr.msra.gmra.mrb[0].mxu1 %vm184_vm0, %v1622_v43  ;;  %1682 = vmatpush1.bf16.msra.mxu0 %v1681_v38 }
  0x2a   : > { %1698 = vmatpush1.bf16.msra.mxu1 %v1697_v44  ;;  %490 = vmatprep.mubr.f32.mxu0 %v1777_v0 }
  0x2b   : > { %815 = vmatprep.mubr.f32.mxu1 %v1777_v0  ;;  %1700 = vmatprep.subr.bf16.mxu0 %v1679_v28 }
  0x2c   : > { %1716 = vmatprep.subr.bf16.mxu1 %v1695_v39 }
  0x30   : > { %1613 = vmatmul.mubr.msk.f32.vlgmr.msra.gmra.mrb[0].mxu0 %vm184_vm0, %v1608_v45 }
  0x31   : > { %1629 = vmatmul.mubr.msk.f32.vlgmr.msra.gmra.mrb[0].mxu1 %vm184_vm0, %v1624_v46  ;;  %1702 = vmatpush1.bf16.msra.mxu0 %v1681_v38 }
  0x32   : > { %1718 = vmatpush1.bf16.msra.mxu1 %v1697_v44  ;;  %897 = vmatprep.mubr.f32.mxu0 %v1777_v0 }
  0x33   : > { %1217 = vmatprep.mubr.f32.mxu1 %v1777_v0  ;;  %1704 = vmatprep.subr.bf16.mxu0 %v1675_v27 }
  0x34   : > { %1632 = vmatmul.mubr.msk.f32.vlgmr.msra.gmra.mrb[2].mxu0 %vm184_vm0, %v1631_v49  ;;  %1720 = vmatprep.subr.bf16.mxu1 %v1679_v28 }
  0x35   : > { %1648 = vmatmul.mubr.msk.f32.vlgmr.msra.gmra.mrb[2].mxu1 %vm184_vm0, %v1647_v52  ;;  %1706 = vmatpush1.bf16.msra.mxu0 %v1677_v34 }
  0x36   : > { %1722 = vmatpush1.bf16.msra.mxu1 %v1681_v38  ;;  %971 = vmatprep.mubr.f32.mxu0 %v1777_v0 }
  0x37   : > { %1291 = vmatprep.mubr.f32.mxu1 %v1777_v0  ;;  %1708 = vmatprep.subr.bf16.mxu0 %v1707_v53 }
  0x38   : > { %1724 = vmatprep.subr.bf16.mxu1 %v1711_v54 }
  0x3c   : > { %1633 = vmatmul.mubr.msk.f32.vlgmr.msra.gmra.mrb[2].mxu0 %vm184_vm0, %v1630_v59 }
  0x3d   : > { %1649 = vmatmul.mubr.msk.f32.vlgmr.msra.gmra.mrb[2].mxu1 %vm184_vm0, %v1646_v63  ;;  %1710 = vmatpush1.bf16.msra.mxu0 %v1709_v60 }
  0x3e   : > { %1726 = vmatpush1.bf16.msra.mxu1 %v1713_v1  ;;  %1052 = vmatprep.mubr.f32.mxu0 %v1777_v0 }
  0x3f   : > { %1367 = vmatprep.mubr.f32.mxu1 %v1777_v0  ;;  %1712 = vmatprep.subr.bf16.mxu0 %v1711_v54 }
  0x40   : > { %1728 = vmatprep.subr.bf16.mxu1 %v1727_v2 }
  0x44   : > { %1639 = vmatmul.mubr.msk.f32.vlgmr.msra.gmra.mrb[2].mxu0 %vm184_vm0, %v1634_v5 }
  0x45   : > { %1651 = vmatmul.mubr.msk.f32.vlgmr.msra.gmra.mrb[2].mxu1 %vm184_vm0, %v1650_v6  ;;  %1714 = vmatpush1.bf16.msra.mxu0 %v1713_v1 }
  0x46   : > { %1730 = vmatpush1.bf16.msra.mxu1 %v1729_v7  ;;  %1135 = vmatprep.mubr.f32.mxu0 %v1777_v0 }
  0x47   : > { %1450 = vmatprep.mubr.f32.mxu1 %v1777_v0 }
  0x4c   : > { %1645 = vmatmul.mubr.msk.f32.vlgmr.msra.gmra.mrb[2].mxu0 %vm184_vm0, %v1640_v8 }
  0x4d   : > { %1657 = vmatmul.mubr.msk.f32.vlgmr.msra.gmra.mrb[2].mxu1 %vm184_vm0, %v1652_v9 }
  0x87   : > { %v502_v14 = vpop.permute.xlu0 %501 }
 0x103   : > { %v492_v10 = vpop.f32.mrb[0].mxu0 }
 0x104   : > { %v817_v11 = vpop.f32.mrb[0].mxu1  ;;  %v494_v12 = vpop.f32.mrb[1].mxu0  ;;  %v504_v15 = vadd.f32 %v502_v14, %v492_v10 }
 0x105   : > { %v819_v13 = vpop.f32.mrb[1].mxu1  ;;  %v824_v16 = vadd.f32 %v817_v11, %v502_v14  ;;  %v505_v0 = vadd.f32 %v502_v14, %v494_v12 }
 0x106   : > { %v825_v17 = vadd.f32 %v819_v13, %v502_v14 }
 0x107   : > { %v1461_v19 = vadd.f32 %v824_v16, %v504_v15 }
 0x108   : > { %v1462_v23 = vadd.f32 %v825_v17, %v505_v0 }
 0x11f   : > { %v1137_v18 = vpop.f32.mrb[2].mxu0 }
 0x120   : > { %v1144_v20 = vadd.f32 %v1137_v18, %v502_v14  ;;  %v1452_v21 = vpop.f32.mrb[2].mxu1  ;;  %v1139_v22 = vpop.f32.mrb[3].mxu0 }
 0x121   : > { %v1145_v24 = vadd.f32 %v1139_v22, %v502_v14  ;;  %v1454_v25 = vpop.f32.mrb[3].mxu1  ;;  %v1459_v27 = vadd.f32 %v1452_v21, %v502_v14 }
 0x122   : > { %v1463_v26 = vadd.f32 %v1461_v19, %v1144_v20  ;;  %v1460_v29 = vadd.f32 %v1454_v25, %v502_v14 }
 0x123   : > { %v1464_v28 = vadd.f32 %v1462_v23, %v1145_v24 }
 0x124   : > { %v1465_v30 = vadd.f32 %v1463_v26, %v1459_v27 }
 0x125   : > { %v1466_v31 = vadd.f32 %v1464_v28, %v1460_v29 }
 0x127   : > { %v1467_v32 = vadd.f32 %v1466_v31, %v1465_v30 }
 0x129   : > { %1468 = vadd.xlane.f32.xlu0 %v1467_v32 }
 0x1b6   : > { %v1469_v33 = vpop.xlane.xlu0 %1468 }
 0x1b7   : > { %v1470_v34 = vmul.f32 0.0009765625, %v1469_v33 }
 0x1b9   : > { %v1471_v35 = vsub.f32 %v504_v15, %v1470_v34  ;;  %v1472_v36 = vsub.f32 %v505_v0, %v1470_v34  ;;  %v1478_v37 = vsub.f32 %v824_v16, %v1470_v34  ;;  %v1479_v38 = vsub.f32 %v825_v17, %v1470_v34 }
 0x1ba   : > { %v1486_v41 = vsub.f32 %v1144_v20, %v1470_v34  ;;  %v1487_v45 = vsub.f32 %v1145_v24, %v1470_v34  ;;  %v1494_v46 = vsub.f32 %v1459_v27, %v1470_v34  ;;  %v1495_v50 = vsub.f32 %v1460_v29, %v1470_v34 }
 0x1bb   : > { %v1473_v39 = vmul.f32 %v1471_v35, %v1471_v35  ;;  %v1474_v40 = vmul.f32 %v1472_v36, %v1472_v36  ;;  %v1480_v43 = vmul.f32 %v1478_v37, %v1478_v37  ;;  %v1481_v44 = vmul.f32 %v1479_v38, %v1479_v38 }
 0x1bc   : > { %v1488_v48 = vmul.f32 %v1486_v41, %v1486_v41  ;;  %v1489_v49 = vmul.f32 %v1487_v45, %v1487_v45  ;;  %v1496_v52 = vmul.f32 %v1494_v46, %v1494_v46  ;;  %v1497_v53 = vmul.f32 %v1495_v50, %v1495_v50 }
 0x1bd   : > { %v1475_v42 = vadd.f32 %v1474_v40, %v1473_v39  ;;  %v1482_v47 = vadd.f32 %v1481_v44, %v1480_v43 }
 0x1be   : > { %v1490_v51 = vadd.f32 %v1489_v49, %v1488_v48  ;;  %v1498_v54 = vadd.f32 %v1497_v53, %v1496_v52 }
 0x1bf   : > { %1476 = vadd.xlane.f32.xlu1 %v1475_v42 }
 0x1c3   : > { %1483 = vadd.xlane.f32.xlu1 %v1482_v47 }
 0x1c7   : > { %1491 = vadd.xlane.f32.xlu1 %v1490_v51 }
 0x1cb   : > { %1499 = vadd.xlane.f32.xlu1 %v1498_v54 }
 0x24c   : > { %v1477_v55 = vpop.xlane.xlu1 %1476 }
 0x250   : > { %v1484_v56 = vpop.xlane.xlu1 %1483 }
 0x251   : > { %v1485_v58 = vadd.f32 %v1484_v56, %v1477_v55 }
 0x254   : > { %v1492_v57 = vpop.xlane.xlu1 %1491 }
 0x255   : > { %v1493_v59 = vadd.f32 %v1492_v57, %v1485_v58 }
 0x258   : > { %v1500_v60 = vpop.xlane.xlu1 %1499 }
 0x259   : > { %v1501_v61 = vadd.f32 %v1500_v60, %v1493_v59 }
 0x25b   : > { %v1502_v62 = vmul.f32 0.0009765625, %v1501_v61 }
 0x25d   : > { %v1503_v63 = vadd.f32 1e-05, %v1502_v62 }
 0x25f   : > { %1767 = vrsqrt.f32 %v1503_v63 }
 0x269   : > { %v1768_v1 = vpop.eup %1767 }
 0x26a   : > { %v1505_v2 = vmul.f32 %v1768_v1, %v1471_v35  ;;  %v1506_v3 = vmul.f32 %v1768_v1, %v1472_v36  ;;  %v1511_v4 = vmul.f32 %v1768_v1, %v1478_v37  ;;  %v1512_v5 = vmul.f32 %v1768_v1, %v1479_v38 }
 0x26b   : > { %v1518_v6 = vmul.f32 %v1768_v1, %v1486_v41  ;;  %v1519_v7 = vmul.f32 %v1768_v1, %v1487_v45  ;;  %v1525_v8 = vmul.f32 %v1768_v1, %v1494_v46  ;;  %v1526_v9 = vmul.f32 %v1768_v1, %v1495_v50 }
 0x26c   : > { %v1507_v10 = vmax.f32 %v1505_v2, 0.0  ;;  %v1508_v11 = vmax.f32 %v1506_v3, 0.0  ;;  %v1513_v12 = vmax.f32 %v1511_v4, 0.0  ;;  %v1514_v13 = vmax.f32 %v1512_v5, 0.0 }
 0x26d   : > { %v1520_v14 = vmax.f32 %v1518_v6, 0.0  ;;  %v1521_v15 = vmax.f32 %v1519_v7, 0.0  ;;  %v1527_v16 = vmax.f32 %v1525_v8, 0.0  ;;  %v1528_v0 = vmax.f32 %v1526_v9, 0.0 }
 0x26e   : > { %1509 = vst [vmem:[%s170_s30] sm:$0xff] %v1507_v10  ;;  %1510 = vst [vmem:[%s170_s30 + $0x8] sm:$0xff] %v1508_v11 }
 0x26f   : > { %1658 = vst [vmem:[%s170_s30 + $0x10] sm:$0xff] %v1513_v12  ;;  %1659 = vst [vmem:[%s170_s30 + $0x18] sm:$0xff] %v1514_v13 }
 0x270   : > { %1660 = vst [vmem:[%s170_s30 + $0x20] sm:$0xff] %v1520_v14  ;;  %1661 = vst [vmem:[%s170_s30 + $0x28] sm:$0xff] %v1521_v15 }
 0x271   : > { %1662 = vst [vmem:[%s170_s30 + $0x30] sm:$0xff] %v1527_v16  ;;  %1663 = vst [vmem:[%s170_s30 + $0x38] sm:$0xff] %v1528_v0 }
 0x272 PF: > { %s13_s12 = sadd.s32 1, %s1775_s12  }
 0x273   : > { %p10_p4 = scmp.ge.s32.totalorder %s13_s12, 4  }
 0x275   :  { %12 = sbr.rel (!%p10_p4) target bundleno = 1 (0x1), region = 88 }

// kernel: shape_decoder_forward.9
= control target key start
LH: loop header
LB: loop body
LE: loop exit
PB: predicated region body
PF: predicated region fallthrough
CT: control target
= control target key end

     0   :  { %s5923_s14 = smov 0   ;;  %s6412_s0 = inlined_call_operand.vmem [shape: f32[2,9,8,1024], index: 0, kind: input, shape index: {}]   ;;  %s6413_s1 = inlined_call_operand.vmem [shape: f32[16,1,8], index: 1, kind: input, shape index: {}]   ;;  %s6414_s2 = inlined_call_operand.<no memory space> [shape: f32[1,1], index: 2, kind: input, shape index: {}]   ;;  %s6415_s3 = inlined_call_operand.vmem [shape: f32[2,4,1,1024], index: 3, kind: output, shape index: {}]  }
   0x1   :  { %v8_v0 = vstv %s6414_s2 }
   0x2   :  { %9 = vst [vmem:[#allocation2] sm:$0x1] %v8_v0 }
   0x3 LB: > { %s5465_s15 = sadd.s32 4294967295, %s5895_s14   ;;  %p5469_p0 = scmp.ge.s32.totalorder %s5895_s14, 1  ;;  %s5895_s14 = sphi %s5923_s14, %s15_s14  }
   0x4   : > { %p139_p1 = scmp.lt.s32.totalorder %s5895_s14, 3 }
   0x6   : > { %p140_p2 = pnand %p5469_p0, %p139_p1 }
   0x7   : > { %p162_p3 = scmp.lt.s32.totalorder (!%p140_p2), %s5465_s15, 1  ;;  %v5897_v1 = vmov (!%p140_p2), 0.0   ;;  %v5898_v2 = vmov (!%p140_p2), 0   ;;  %v5472_v3 = vld [vmem:[%s6413_s1 + $0x1] sm:$0x1] (!%p140_p2)  ;;  %vm192_vm0 = vcmask (!%p140_p2), 64512  }
   0x8   : > { %143 = sbr.rel (%p140_p2) target bundleno = 401 (0x191), region = 32  ;;  %260 = vmatprep.mubr.f32.mxu0 (!%p140_p2), %v5897_v1  ;;  %331 = vmatprep.mubr.f32.mxu1 (!%p140_p2), %v5897_v1  ;;  %v172_v17 = vld [vmem:[%s6413_s1] sm:$0x1] (!%p140_p2)  ;;  %v5489_v26 = vld [vmem:[%s6413_s1 + $0x2] sm:$0x1] (!%p140_p2) }
   0x9   : > { %5760 = vset.pattern.permute.xlu0 (!%p140_p2), %v5898_v2  ;;  %v171_v4 = vld [vmem:[#allocation2] sm:$0x1] (!%p140_p2)  ;;  %v5502_v35 = vld [vmem:[%s6413_s1 + $0x3] sm:$0x1] (!%p140_p2)  ;;  %v5516_v44 = vld [vmem:[%s6413_s1 + $0x5] sm:$0x1] (!%p140_p2) }
   0xa   : > { %1381 = vperm.xlu0 (!%p140_p2), %5760, %v171_v4   ;;  %v5515_v49 = vld [vmem:[%s6413_s1 + $0x4] sm:$0x1] (!%p140_p2)  ;;  %v5533_v50 = vld [vmem:[%s6413_s1 + $0x6] sm:$0x1] (!%p140_p2)  ;;  %v5538_v55 = vld [vmem:[%s6413_s1 + $0x7] sm:$0x1] (!%p140_p2) }
   0xb   : > { %v5552_v60 = vld [vmem:[%s6413_s1 + $0x9] sm:$0x1] (!%p140_p2)  ;;  %v5551_v61 = vld [vmem:[%s6413_s1 + $0x8] sm:$0x1] (!%p140_p2) }
   0xf   : > { %s6417_s15 = smov (!%p162_p3, %s5465_s15), 1 }
  0x10   : > { %s5748_s2 = smul.u32 576, %s6417_s15 }
  0x12   : > { %s5939_s18 = scalar_lea.vmem %s6412_s0, %s5748_s2 }
  0x13   : > { %v5945_v5 = vld [vmem:[%s5939_s18 + $0x48] sm:$0xff]  ;;  %v5948_v6 = vld [vmem:[%s5939_s18 + $0x58] sm:$0xff]  ;;  %v5951_v7 = vld [vmem:[%s5939_s18 + $0x40] sm:$0xff] }
  0x14   : > { %196 = vmatprep.subr.mxu0 %v5945_v5  ;;  %267 = vmatprep.subr.mxu1 %v5948_v6  ;;  %v5956_v8 = vld [vmem:[%s5939_s18 + $0x50] sm:$0xff]  ;;  %v5959_v9 = vld [vmem:[%s5939_s18 + $0x68] sm:$0xff]  ;;  %v5962_v10 = vld [vmem:[%s5939_s18 + $0x78] sm:$0xff] }
  0x15   : > { %197 = vmatpush1.msra.mxu0 %v5951_v7  ;;  %268 = vmatpush1.msra.mxu1 %v5956_v8  ;;  %v5967_v11 = vld [vmem:[%s5939_s18 + $0x60] sm:$0xff]  ;;  %v5970_v12 = vld [vmem:[%s5939_s18 + $0x70] sm:$0xff]  ;;  %v174_v13 = vld [vmem:[%s5939_s18 + $0x8] sm:$0xff] }
  0x16   : > { %5481 = vmatmul.mubr.msk.f32.vlgmr.msra.gmra.mrb[0].mxu0 %vm192_vm0, %v5472_v3  ;;  %5482 = vmatmul.mubr.msk.f32.vlgmr.msra.gmra.mrb[0].mxu1 %vm192_vm0, %v5472_v3  ;;  %v176_v14 = vld [vmem:[%s5939_s18 + $0x18] sm:$0xff]  ;;  %v173_v15 = vld [vmem:[%s5939_s18] sm:$0xff]  ;;  %v175_v16 = vld [vmem:[%s5939_s18 + $0x10] sm:$0xff] }
  0x17   : > { %338 = vmatprep.subr.mxu0 %v5959_v9  ;;  %409 = vmatprep.subr.mxu1 %v5962_v10  ;;  %v178_v18 = vld [vmem:[%s5939_s18 + $0x28] sm:$0xff]  ;;  %v180_v19 = vld [vmem:[%s5939_s18 + $0x38] sm:$0xff]  ;;  %v177_v20 = vld [vmem:[%s5939_s18 + $0x20] sm:$0xff] }
  0x18   : > { %339 = vmatpush1.msra.mxu0 %v5967_v11  ;;  %410 = vmatpush1.msra.mxu1 %v5970_v12  ;;  %v179_v21 = vld [vmem:[%s5939_s18 + $0x30] sm:$0xff]  ;;  %v5998_v22 = vld [vmem:[%s5939_s18 + $0xc8] sm:$0xff]  ;;  %v6001_v23 = vld [vmem:[%s5939_s18 + $0xd8] sm:$0xff] }
  0x19   : > { %402 = vmatprep.mubr.f32.mxu0 %v5897_v1  ;;  %473 = vmatprep.mubr.f32.mxu1 %v5897_v1  ;;  %v6006_v24 = vld [vmem:[%s5939_s18 + $0xc0] sm:$0xff]  ;;  %v6009_v25 = vld [vmem:[%s5939_s18 + $0xd0] sm:$0xff]  ;;  %v6021_v27 = vld [vmem:[%s5939_s18 + $0xe8] sm:$0xff] }
  0x1a   : > { %5483 = vmatmul.mubr.msk.f32.vlgmr.msra.gmra.mrb[2].mxu0 %vm192_vm0, %v5472_v3  ;;  %5484 = vmatmul.mubr.msk.f32.vlgmr.msra.gmra.mrb[2].mxu1 %vm192_vm0, %v5472_v3  ;;  %v6024_v28 = vld [vmem:[%s5939_s18 + $0xf8] sm:$0xff]  ;;  %v6029_v29 = vld [vmem:[%s5939_s18 + $0xe0] sm:$0xff]  ;;  %v6032_v30 = vld [vmem:[%s5939_s18 + $0xf0] sm:$0xff] }
  0x1b   : > { %483 = vmatprep.subr.mxu0 %v174_v13  ;;  %554 = vmatprep.subr.mxu1 %v176_v14  ;;  %v6041_v31 = vld [vmem:[%s5939_s18 + $0x108] sm:$0xff]  ;;  %v6044_v32 = vld [vmem:[%s5939_s18 + $0x118] sm:$0xff]  ;;  %v6049_v33 = vld [vmem:[%s5939_s18 + $0x100] sm:$0xff] }
  0x1c   : > { %484 = vmatpush1.msra.mxu0 %v173_v15  ;;  %555 = vmatpush1.msra.mxu1 %v175_v16  ;;  %v6052_v34 = vld [vmem:[%s5939_s18 + $0x110] sm:$0xff]  ;;  %v6064_v36 = vld [vmem:[%s5939_s18 + $0x128] sm:$0xff]  ;;  %v6067_v37 = vld [vmem:[%s5939_s18 + $0x138] sm:$0xff] }
  0x1d   : > { %547 = vmatprep.mubr.f32.mxu0 %v5897_v1  ;;  %618 = vmatprep.mubr.f32.mxu1 %v5897_v1  ;;  %v6072_v38 = vld [vmem:[%s5939_s18 + $0x120] sm:$0xff]  ;;  %v6075_v39 = vld [vmem:[%s5939_s18 + $0x130] sm:$0xff]  ;;  %v5518_v40 = vld [vmem:[%s5939_s18 + $0x88] sm:$0xff] }
  0x1e   : > { %5485 = vmatmul.mubr.msk.f32.vlgmr.msra.gmra.mrb[0].mxu0 %vm192_vm0, %v172_v17  ;;  %5486 = vmatmul.mubr.msk.f32.vlgmr.msra.gmra.mrb[0].mxu1 %vm192_vm0, %v172_v17  ;;  %v5520_v41 = vld [vmem:[%s5939_s18 + $0x98] sm:$0xff]  ;;  %v5517_v42 = vld [vmem:[%s5939_s18 + $0x80] sm:$0xff]  ;;  %v5519_v43 = vld [vmem:[%s5939_s18 + $0x90] sm:$0xff] }
  0x1f   : > { %625 = vmatprep.subr.mxu0 %v178_v18  ;;  %696 = vmatprep.subr.mxu1 %v180_v19  ;;  %v5522_v45 = vld [vmem:[%s5939_s18 + $0xa8] sm:$0xff]  ;;  %v5524_v46 = vld [vmem:[%s5939_s18 + $0xb8] sm:$0xff]  ;;  %v5521_v47 = vld [vmem:[%s5939_s18 + $0xa0] sm:$0xff] }
  0x20   : > { %626 = vmatpush1.msra.mxu0 %v177_v20  ;;  %697 = vmatpush1.msra.mxu1 %v179_v21  ;;  %v5523_v48 = vld [vmem:[%s5939_s18 + $0xb0] sm:$0xff]  ;;  %v6141_v51 = vld [vmem:[%s5939_s18 + $0x148] sm:$0xff]  ;;  %v6144_v52 = vld [vmem:[%s5939_s18 + $0x158] sm:$0xff] }
  0x21   : > { %689 = vmatprep.mubr.f32.mxu0 %v5897_v1  ;;  %760 = vmatprep.mubr.f32.mxu1 %v5897_v1  ;;  %v6149_v53 = vld [vmem:[%s5939_s18 + $0x140] sm:$0xff]  ;;  %v6152_v54 = vld [vmem:[%s5939_s18 + $0x150] sm:$0xff]  ;;  %v6164_v56 = vld [vmem:[%s5939_s18 + $0x168] sm:$0xff] }
  0x22   : > { %5487 = vmatmul.mubr.msk.f32.vlgmr.msra.gmra.mrb[2].mxu0 %vm192_vm0, %v172_v17  ;;  %5488 = vmatmul.mubr.msk.f32.vlgmr.msra.gmra.mrb[2].mxu1 %vm192_vm0, %v172_v17  ;;  %v6167_v57 = vld [vmem:[%s5939_s18 + $0x178] sm:$0xff]  ;;  %v6172_v58 = vld [vmem:[%s5939_s18 + $0x160] sm:$0xff]  ;;  %v6175_v59 = vld [vmem:[%s5939_s18 + $0x170] sm:$0xff] }
  0x23   : > { %781 = vmatprep.subr.mxu0 %v5998_v22  ;;  %852 = vmatprep.subr.mxu1 %v6001_v23  ;;  %v5563_v62 = vld [vmem:[%s5939_s18 + $0x188] sm:$0xff]  ;;  %v5565_v63 = vld [vmem:[%s5939_s18 + $0x198] sm:$0xff]  ;;  %v5562_v0 = vld [vmem:[%s5939_s18 + $0x180] sm:$0xff] }
  0x24   : > { %782 = vmatpush1.msra.mxu0 %v6006_v24  ;;  %853 = vmatpush1.msra.mxu1 %v6009_v25  ;;  %v5564_v2 = vld [vmem:[%s5939_s18 + $0x190] sm:$0xff]  ;;  %v5561_v3 = vld [vmem:[%s6413_s1 + $0xa] sm:$0x1]  ;;  %v5582_v14 = vld [vmem:[%s5939_s18 + $0x1f8] sm:$0xff] }
  0x25   : > { %845 = vmatprep.mubr.f32.mxu0 %v5897_v1  ;;  %916 = vmatprep.mubr.f32.mxu1 %v5897_v1  ;;  %v5567_v4 = vld [vmem:[%s5939_s18 + $0x1a8] sm:$0xff]  ;;  %v5579_v15 = vld [vmem:[%s5939_s18 + $0x1e0] sm:$0xff]  ;;  %v5581_v16 = vld [vmem:[%s5939_s18 + $0x1f0] sm:$0xff] }
  0x26   : > { %5498 = vmatmul.mubr.msk.f32.vlgmr.msra.gmra.mrb[0].mxu0 %vm192_vm0, %v5489_v26  ;;  %5499 = vmatmul.mubr.msk.f32.vlgmr.msra.gmra.mrb[0].mxu1 %vm192_vm0, %v5489_v26  ;;  %v5580_v13 = vld [vmem:[%s5939_s18 + $0x1e8] sm:$0xff]  ;;  %v5606_v21 = vld [vmem:[%s5939_s18 + $0x218] sm:$0xff] }
  0x27   : > { %923 = vmatprep.subr.mxu0 %v6021_v27  ;;  %994 = vmatprep.subr.mxu1 %v6024_v28  ;;  %v5588_v17 = vld [vmem:[%s6413_s1 + $0xd] sm:$0x1]  ;;  %v5587_v18 = vld [vmem:[%s6413_s1 + $0xc] sm:$0x1]  ;;  %v5597_v19 = vld [vmem:[%s6413_s1 + $0xe] sm:$0x1] }
  0x28   : > { %924 = vmatpush1.msra.mxu0 %v6029_v29  ;;  %995 = vmatpush1.msra.mxu1 %v6032_v30  ;;  %v5604_v20 = vld [vmem:[%s5939_s18 + $0x208] sm:$0xff] }
  0x29   : > { %987 = vmatprep.mubr.f32.mxu0 %v5897_v1  ;;  %1058 = vmatprep.mubr.f32.mxu1 %v5897_v1 }
  0x2a   : > { %5500 = vmatmul.mubr.msk.f32.vlgmr.msra.gmra.mrb[2].mxu0 %vm192_vm0, %v5489_v26  ;;  %5501 = vmatmul.mubr.msk.f32.vlgmr.msra.gmra.mrb[2].mxu1 %vm192_vm0, %v5489_v26  ;;  %v5610_v26 = vld [vmem:[%s5939_s18 + $0x238] sm:$0xff] }
  0x2b   : > { %1087 = vmatprep.subr.mxu0 %v6041_v31  ;;  %1158 = vmatprep.subr.mxu1 %v6044_v32 }
  0x2c   : > { %1088 = vmatpush1.msra.mxu0 %v6049_v33  ;;  %1159 = vmatpush1.msra.mxu1 %v6052_v34 }
  0x2d   : > { %1151 = vmatprep.mubr.f32.mxu0 %v5897_v1  ;;  %1222 = vmatprep.mubr.f32.mxu1 %v5897_v1 }
  0x2e   : > { %5511 = vmatmul.mubr.msk.f32.vlgmr.msra.gmra.mrb[0].mxu0 %vm192_vm0, %v5502_v35  ;;  %5512 = vmatmul.mubr.msk.f32.vlgmr.msra.gmra.mrb[0].mxu1 %vm192_vm0, %v5502_v35 }
  0x2f   : > { %1229 = vmatprep.subr.mxu0 %v6064_v36  ;;  %1300 = vmatprep.subr.mxu1 %v6067_v37 }
  0x30   : > { %1230 = vmatpush1.msra.mxu0 %v6072_v38  ;;  %1301 = vmatpush1.msra.mxu1 %v6075_v39 }
  0x31   : > { %1293 = vmatprep.mubr.f32.mxu0 %v5897_v1  ;;  %1364 = vmatprep.mubr.f32.mxu1 %v5897_v1 }
  0x32   : > { %5513 = vmatmul.mubr.msk.f32.vlgmr.msra.gmra.mrb[2].mxu0 %vm192_vm0, %v5502_v35  ;;  %5514 = vmatmul.mubr.msk.f32.vlgmr.msra.gmra.mrb[2].mxu1 %vm192_vm0, %v5502_v35 }
  0x33   : > { %1412 = vmatprep.subr.mxu0 %v5518_v40  ;;  %1483 = vmatprep.subr.mxu1 %v5520_v41 }
  0x34   : > { %1413 = vmatpush1.msra.mxu0 %v5517_v42  ;;  %1484 = vmatpush1.msra.mxu1 %v5519_v43 }
  0x35   : > { %1476 = vmatprep.mubr.f32.mxu0 %v5897_v1  ;;  %1547 = vmatprep.mubr.f32.mxu1 %v5897_v1 }
  0x36   : > { %5525 = vmatmul.mubr.msk.f32.vlgmr.msra.gmra.mrb[4].mxu0 %vm192_vm0, %v5516_v44  ;;  %5526 = vmatmul.mubr.msk.f32.vlgmr.msra.gmra.mrb[4].mxu1 %vm192_vm0, %v5516_v44 }
  0x37   : > { %1554 = vmatprep.subr.mxu0 %v5522_v45  ;;  %1625 = vmatprep.subr.mxu1 %v5524_v46 }
  0x38   : > { %1555 = vmatpush1.msra.mxu0 %v5521_v47  ;;  %1626 = vmatpush1.msra.mxu1 %v5523_v48 }
  0x39   : > { %1618 = vmatprep.mubr.f32.mxu0 %v5897_v1  ;;  %1689 = vmatprep.mubr.f32.mxu1 %v5897_v1 }
  0x3a   : > { %5527 = vmatmul.mubr.msk.f32.vlgmr.msra.gmra.mrb[6].mxu0 %vm192_vm0, %v5516_v44  ;;  %5528 = vmatmul.mubr.msk.f32.vlgmr.msra.gmra.mrb[6].mxu1 %vm192_vm0, %v5516_v44 }
  0x3b   : > { %1699 = vmatprep.subr.mxu0 %v5945_v5  ;;  %1770 = vmatprep.subr.mxu1 %v5948_v6  ;;  %v5569_v5 = vld [vmem:[%s5939_s18 + $0x1b8] sm:$0xff]  ;;  %v5566_v6 = vld [vmem:[%s5939_s18 + $0x1a0] sm:$0xff] }
  0x3c   : > { %1700 = vmatpush1.msra.mxu0 %v5951_v7  ;;  %1771 = vmatpush1.msra.mxu1 %v5956_v8  ;;  %v5568_v7 = vld [vmem:[%s5939_s18 + $0x1b0] sm:$0xff]  ;;  %v6241_v8 = vld [vmem:[%s5939_s18 + $0x1c8] sm:$0xff] }
  0x3d   : > { %1763 = vmatprep.mubr.f32.mxu0 %v5897_v1  ;;  %1834 = vmatprep.mubr.f32.mxu1 %v5897_v1 }
  0x3e   : > { %5529 = vmatmul.mubr.msk.f32.vlgmr.msra.gmra.mrb[4].mxu0 %vm192_vm0, %v5515_v49  ;;  %5530 = vmatmul.mubr.msk.f32.vlgmr.msra.gmra.mrb[4].mxu1 %vm192_vm0, %v5515_v49 }
  0x3f   : > { %1841 = vmatprep.subr.mxu0 %v5959_v9  ;;  %1912 = vmatprep.subr.mxu1 %v5962_v10  ;;  %v5578_v9 = vld [vmem:[%s5939_s18 + $0x1d8] sm:$0xff]  ;;  %v5575_v10 = vld [vmem:[%s5939_s18 + $0x1c0] sm:$0xff] }
  0x40   : > { %1842 = vmatpush1.msra.mxu0 %v5967_v11  ;;  %1913 = vmatpush1.msra.mxu1 %v5970_v12  ;;  %v5577_v11 = vld [vmem:[%s5939_s18 + $0x1d0] sm:$0xff]  ;;  %v5574_v12 = vld [vmem:[%s6413_s1 + $0xb] sm:$0x1] }
  0x41   : > { %1905 = vmatprep.mubr.f32.mxu0 %v5897_v1  ;;  %1976 = vmatprep.mubr.f32.mxu1 %v5897_v1 }
  0x42   : > { %5531 = vmatmul.mubr.msk.f32.vlgmr.msra.gmra.mrb[6].mxu0 %vm192_vm0, %v5515_v49  ;;  %5532 = vmatmul.mubr.msk.f32.vlgmr.msra.gmra.mrb[6].mxu1 %vm192_vm0, %v5515_v49 }
  0x43   : > { %1988 = vmatprep.subr.mxu0 %v6041_v31  ;;  %2059 = vmatprep.subr.mxu1 %v6044_v32 }
  0x44   : > { %1989 = vmatpush1.msra.mxu0 %v6049_v33  ;;  %2060 = vmatpush1.msra.mxu1 %v6052_v34 }
  0x45   : > { %2052 = vmatprep.mubr.f32.mxu0 %v5897_v1  ;;  %2123 = vmatprep.mubr.f32.mxu1 %v5897_v1 }
  0x46   : > { %5534 = vmatmul.mubr.msk.f32.vlgmr.msra.gmra.mrb[4].mxu0 %vm192_vm0, %v5533_v50  ;;  %5535 = vmatmul.mubr.msk.f32.vlgmr.msra.gmra.mrb[4].mxu1 %vm192_vm0, %v5533_v50 }
  0x47   : > { %2130 = vmatprep.subr.mxu0 %v6064_v36  ;;  %2201 = vmatprep.subr.mxu1 %v6067_v37 }
  0x48   : > { %2131 = vmatpush1.msra.mxu0 %v6072_v38  ;;  %2202 = vmatpush1.msra.mxu1 %v6075_v39 }
  0x49   : > { %2194 = vmatprep.mubr.f32.mxu0 %v5897_v1  ;;  %2265 = vmatprep.mubr.f32.mxu1 %v5897_v1 }
  0x4a   : > { %5536 = vmatmul.mubr.msk.f32.vlgmr.msra.gmra.mrb[6].mxu0 %vm192_vm0, %v5533_v50  ;;  %5537 = vmatmul.mubr.msk.f32.vlgmr.msra.gmra.mrb[6].mxu1 %vm192_vm0, %v5533_v50 }
  0x4b   : > { %2294 = vmatprep.subr.mxu0 %v6141_v51  ;;  %2365 = vmatprep.subr.mxu1 %v6144_v52 }
  0x4c   : > { %2295 = vmatpush1.msra.mxu0 %v6149_v53  ;;  %2366 = vmatpush1.msra.mxu1 %v6152_v54 }
  0x4d   : > { %2358 = vmatprep.mubr.f32.mxu0 %v5897_v1  ;;  %2429 = vmatprep.mubr.f32.mxu1 %v5897_v1 }
  0x4e   : > { %5547 = vmatmul.mubr.msk.f32.vlgmr.msra.gmra.mrb[4].mxu0 %vm192_vm0, %v5538_v55  ;;  %5548 = vmatmul.mubr.msk.f32.vlgmr.msra.gmra.mrb[4].mxu1 %vm192_vm0, %v5538_v55 }
  0x4f   : > { %2436 = vmatprep.subr.mxu0 %v6164_v56  ;;  %2507 = vmatprep.subr.mxu1 %v6167_v57 }
  0x50   : > { %2437 = vmatpush1.msra.mxu0 %v6172_v58  ;;  %2508 = vmatpush1.msra.mxu1 %v6175_v59 }
  0x51   : > { %2500 = vmatprep.mubr.f32.mxu0 %v5897_v1  ;;  %2571 = vmatprep.mubr.f32.mxu1 %v5897_v1 }
  0x52   : > { %5549 = vmatmul.mubr.msk.f32.vlgmr.msra.gmra.mrb[6].mxu0 %vm192_vm0, %v5538_v55  ;;  %5550 = vmatmul.mubr.msk.f32.vlgmr.msra.gmra.mrb[6].mxu1 %vm192_vm0, %v5538_v55 }
  0x53   : > { %2601 = vmatprep.subr.mxu0 %v6041_v31  ;;  %2672 = vmatprep.subr.mxu1 %v6044_v32 }
  0x54   : > { %2602 = vmatpush1.msra.mxu0 %v6049_v33  ;;  %2673 = vmatpush1.msra.mxu1 %v6052_v34 }
  0x55   : > { %2665 = vmatprep.mubr.f32.mxu0 %v5897_v1  ;;  %2736 = vmatprep.mubr.f32.mxu1 %v5897_v1 }
  0x56   : > { %5553 = vmatmul.mubr.msk.f32.vlgmr.msra.gmra.mrb[8].mxu0 %vm192_vm0, %v5552_v60  ;;  %5554 = vmatmul.mubr.msk.f32.vlgmr.msra.gmra.mrb[8].mxu1 %vm192_vm0, %v5552_v60 }
  0x57   : > { %2743 = vmatprep.subr.mxu0 %v6064_v36  ;;  %2814 = vmatprep.subr.mxu1 %v6067_v37 }
  0x58   : > { %2744 = vmatpush1.msra.mxu0 %v6072_v38  ;;  %2815 = vmatpush1.msra.mxu1 %v6075_v39 }
  0x59   : > { %2807 = vmatprep.mubr.f32.mxu0 %v5897_v1  ;;  %2878 = vmatprep.mubr.f32.mxu1 %v5897_v1 }
  0x5a   : > { %5555 = vmatmul.mubr.msk.f32.vlgmr.msra.gmra.mrb[10].mxu0 %vm192_vm0, %v5552_v60  ;;  %5556 = vmatmul.mubr.msk.f32.vlgmr.msra.gmra.mrb[10].mxu1 %vm192_vm0, %v5552_v60 }
  0x5b   : > { %2888 = vmatprep.subr.mxu0 %v5998_v22  ;;  %2959 = vmatprep.subr.mxu1 %v6001_v23  ;;  %v5603_v22 = vld [vmem:[%s5939_s18 + $0x200] sm:$0xff]  ;;  %v5605_v23 = vld [vmem:[%s5939_s18 + $0x210] sm:$0xff] }
  0x5c   : > { %2889 = vmatpush1.msra.mxu0 %v6006_v24  ;;  %2960 = vmatpush1.msra.mxu1 %v6009_v25  ;;  %v5602_v24 = vld [vmem:[%s6413_s1 + $0xf] sm:$0x1] }
  0x5d   : > { %2952 = vmatprep.mubr.f32.mxu0 %v5897_v1  ;;  %3023 = vmatprep.mubr.f32.mxu1 %v5897_v1  ;;  %v5608_v25 = vld [vmem:[%s5939_s18 + $0x228] sm:$0xff] }
  0x5e   : > { %5557 = vmatmul.mubr.msk.f32.vlgmr.msra.gmra.mrb[8].mxu0 %vm192_vm0, %v5551_v61  ;;  %5558 = vmatmul.mubr.msk.f32.vlgmr.msra.gmra.mrb[8].mxu1 %vm192_vm0, %v5551_v61 }
  0x5f   : > { %3030 = vmatprep.subr.mxu0 %v6021_v27  ;;  %3101 = vmatprep.subr.mxu1 %v6024_v28  ;;  %v5607_v27 = vld [vmem:[%s5939_s18 + $0x220] sm:$0xff]  ;;  %v5609_v28 = vld [vmem:[%s5939_s18 + $0x230] sm:$0xff]  ;;  %s5471_s18 = sshll.u32 %s6417_s15, 5 }
  0x60   : > { %3031 = vmatpush1.msra.mxu0 %v6029_v29  ;;  %3102 = vmatpush1.msra.mxu1 %v6032_v30  ;;  %v1384_v29 = vlaneseq  ;;  %s6369_s28 = scalar_lea.vmem %s6415_s3, %s5471_s18 }
  0x61   : > { %3094 = vmatprep.mubr.f32.mxu0 %v5897_v1  ;;  %3165 = vmatprep.mubr.f32.mxu1 %v5897_v1 }
  0x62   : > { %5559 = vmatmul.mubr.msk.f32.vlgmr.msra.gmra.mrb[10].mxu0 %vm192_vm0, %v5551_v61  ;;  %5560 = vmatmul.mubr.msk.f32.vlgmr.msra.gmra.mrb[10].mxu1 %vm192_vm0, %v5551_v61  ;;  %v6335_v30 = vshrl.u32 %v1384_v29, 7 }
  0x63   : > { %3186 = vmatprep.subr.mxu0 %v5563_v62  ;;  %3257 = vmatprep.subr.mxu1 %v5565_v63 }
  0x64   : > { %3187 = vmatpush1.msra.mxu0 %v5562_v0  ;;  %3258 = vmatpush1.msra.mxu1 %v5564_v2 }
  0x65   : > { %3250 = vmatprep.mubr.f32.mxu0 %v5897_v1  ;;  %3321 = vmatprep.mubr.f32.mxu1 %v5897_v1 }
  0x66   : > { %5570 = vmatmul.mubr.msk.f32.vlgmr.msra.gmra.mrb[8].mxu0 %vm192_vm0, %v5561_v3  ;;  %5571 = vmatmul.mubr.msk.f32.vlgmr.msra.gmra.mrb[8].mxu1 %vm192_vm0, %v5561_v3 }
  0x67   : > { %3328 = vmatprep.subr.mxu0 %v5567_v4  ;;  %3399 = vmatprep.subr.mxu1 %v5569_v5 }
  0x68   : > { %3329 = vmatpush1.msra.mxu0 %v5566_v6  ;;  %3400 = vmatpush1.msra.mxu1 %v5568_v7  ;;  %v5899_v6 = vmov 1966171168  }
  0x69   : > { %3392 = vmatprep.mubr.f32.mxu0 %v5897_v1  ;;  %3463 = vmatprep.mubr.f32.mxu1 %v5897_v1  ;;  %v5042_v7 = vunpack.c.l.s4 %v5899_v6 }
  0x6a   : > { %5572 = vmatmul.mubr.msk.f32.vlgmr.msra.gmra.mrb[10].mxu0 %vm192_vm0, %v5561_v3  ;;  %5573 = vmatmul.mubr.msk.f32.vlgmr.msra.gmra.mrb[10].mxu1 %vm192_vm0, %v5561_v3 }
  0x6b   : > { %3492 = vmatprep.subr.mxu0 %v6241_v8  ;;  %3563 = vmatprep.subr.mxu1 %v5578_v9 }
  0x6c   : > { %3493 = vmatpush1.msra.mxu0 %v5575_v10  ;;  %3564 = vmatpush1.msra.mxu1 %v5577_v11 }
  0x6d   : > { %3556 = vmatprep.mubr.f32.mxu0 %v5897_v1  ;;  %3627 = vmatprep.mubr.f32.mxu1 %v5897_v1 }
  0x6e   : > { %5583 = vmatmul.mubr.msk.f32.vlgmr.msra.gmra.mrb[8].mxu0 %vm192_vm0, %v5574_v12  ;;  %5584 = vmatmul.mubr.msk.f32.vlgmr.msra.gmra.mrb[8].mxu1 %vm192_vm0, %v5574_v12 }
  0x6f   : > { %3634 = vmatprep.subr.mxu0 %v5580_v13  ;;  %3705 = vmatprep.subr.mxu1 %v5582_v14 }
  0x70   : > { %3635 = vmatpush1.msra.mxu0 %v5579_v15  ;;  %3706 = vmatpush1.msra.mxu1 %v5581_v16 }
  0x71   : > { %3698 = vmatprep.mubr.f32.mxu0 %v5897_v1  ;;  %3769 = vmatprep.mubr.f32.mxu1 %v5897_v1 }
  0x72   : > { %5585 = vmatmul.mubr.msk.f32.vlgmr.msra.gmra.mrb[10].mxu0 %vm192_vm0, %v5574_v12  ;;  %5586 = vmatmul.mubr.msk.f32.vlgmr.msra.gmra.mrb[10].mxu1 %vm192_vm0, %v5574_v12  ;;  %v5043_v12 = vunpack.c.0.s8 %v5042_v7 }
  0x73   : > { %3799 = vmatprep.subr.mxu0 %v6141_v51  ;;  %3870 = vmatprep.subr.mxu1 %v6144_v52 }
  0x74   : > { %3800 = vmatpush1.msra.mxu0 %v6149_v53  ;;  %3871 = vmatpush1.msra.mxu1 %v6152_v54 }
  0x75   : > { %3863 = vmatprep.mubr.f32.mxu0 %v5897_v1  ;;  %3934 = vmatprep.mubr.f32.mxu1 %v5897_v1 }
  0x76   : > { %5589 = vmatmul.mubr.msk.f32.vlgmr.msra.gmra.mrb[12].mxu0 %vm192_vm0, %v5588_v17  ;;  %5590 = vmatmul.mubr.msk.f32.vlgmr.msra.gmra.mrb[12].mxu1 %vm192_vm0, %v5588_v17 }
  0x77   : > { %3941 = vmatprep.subr.mxu0 %v6164_v56  ;;  %4012 = vmatprep.subr.mxu1 %v6167_v57 }
  0x78   : > { %3942 = vmatpush1.msra.mxu0 %v6172_v58  ;;  %4013 = vmatpush1.msra.mxu1 %v6175_v59 }
  0x79   : > { %4005 = vmatprep.mubr.f32.mxu0 %v5897_v1  ;;  %4076 = vmatprep.mubr.f32.mxu1 %v5897_v1 }
  0x7a   : > { %5591 = vmatmul.mubr.msk.f32.vlgmr.msra.gmra.mrb[14].mxu0 %vm192_vm0, %v5588_v17  ;;  %5592 = vmatmul.mubr.msk.f32.vlgmr.msra.gmra.mrb[14].mxu1 %vm192_vm0, %v5588_v17 }
  0x7b   : > { %4086 = vmatprep.subr.mxu0 %v6041_v31  ;;  %4157 = vmatprep.subr.mxu1 %v6044_v32  ;;  %v1386_v31 = vsub.s32 0, %v6335_v30 }
  0x7c   : > { %4087 = vmatpush1.msra.mxu0 %v6049_v33  ;;  %4158 = vmatpush1.msra.mxu1 %v6052_v34 }
  0x7d   : > { %4150 = vmatprep.mubr.f32.mxu0 %v5897_v1  ;;  %4221 = vmatprep.mubr.f32.mxu1 %v5897_v1 }
  0x7e   : > { %5593 = vmatmul.mubr.msk.f32.vlgmr.msra.gmra.mrb[12].mxu0 %vm192_vm0, %v5587_v18  ;;  %5594 = vmatmul.mubr.msk.f32.vlgmr.msra.gmra.mrb[12].mxu1 %vm192_vm0, %v5587_v18 }
  0x7f   : > { %4228 = vmatprep.subr.mxu0 %v6064_v36  ;;  %4299 = vmatprep.subr.mxu1 %v6067_v37 }
  0x80   : > { %4229 = vmatpush1.msra.mxu0 %v6072_v38  ;;  %4300 = vmatpush1.msra.mxu1 %v6075_v39 }
  0x81   : > { %4292 = vmatprep.mubr.f32.mxu0 %v5897_v1  ;;  %4363 = vmatprep.mubr.f32.mxu1 %v5897_v1 }
  0x82   : > { %5595 = vmatmul.mubr.msk.f32.vlgmr.msra.gmra.mrb[14].mxu0 %vm192_vm0, %v5587_v18  ;;  %5596 = vmatmul.mubr.msk.f32.vlgmr.msra.gmra.mrb[14].mxu1 %vm192_vm0, %v5587_v18 }
  0x83   : > { %4375 = vmatprep.subr.mxu0 %v6241_v8  ;;  %4446 = vmatprep.subr.mxu1 %v5578_v9 }
  0x84   : > { %4376 = vmatpush1.msra.mxu0 %v5575_v10  ;;  %4447 = vmatpush1.msra.mxu1 %v5577_v11 }
  0x85   : > { %4439 = vmatprep.mubr.f32.mxu0 %v5897_v1  ;;  %4510 = vmatprep.mubr.f32.mxu1 %v5897_v1 }
  0x86   : > { %5598 = vmatmul.mubr.msk.f32.vlgmr.msra.gmra.mrb[12].mxu0 %vm192_vm0, %v5597_v19  ;;  %5599 = vmatmul.mubr.msk.f32.vlgmr.msra.gmra.mrb[12].mxu1 %vm192_vm0, %v5597_v19 }
  0x87   : > { %4517 = vmatprep.subr.mxu0 %v5580_v13  ;;  %4588 = vmatprep.subr.mxu1 %v5582_v14 }
  0x88   : > { %4518 = vmatpush1.msra.mxu0 %v5579_v15  ;;  %4589 = vmatpush1.msra.mxu1 %v5581_v16  ;;  %v6349_v15 = vsub.s32 %v5043_v12, %v6335_v30 }
  0x89   : > { %4581 = vmatprep.mubr.f32.mxu0 %v5897_v1  ;;  %4652 = vmatprep.mubr.f32.mxu1 %v5897_v1  ;;  %v1382_v32 = vpop.permute.xlu0 %1381 }
  0x8a   : > { %5600 = vmatmul.mubr.msk.f32.vlgmr.msra.gmra.mrb[14].mxu0 %vm192_vm0, %v5597_v19  ;;  %5601 = vmatmul.mubr.msk.f32.vlgmr.msra.gmra.mrb[14].mxu1 %vm192_vm0, %v5597_v19  ;;  %v6338_v33 = vrot.slane %v1382_v32, %v1386_v31 }
  0x8b   : > { %4681 = vmatprep.subr.mxu0 %v5604_v20  ;;  %4752 = vmatprep.subr.mxu1 %v5606_v21 }
  0x8c   : > { %4682 = vmatpush1.msra.mxu0 %v5603_v22  ;;  %4753 = vmatpush1.msra.mxu1 %v5605_v23 }
  0x8d   : > { %4745 = vmatprep.mubr.f32.mxu0 %v5897_v1  ;;  %4816 = vmatprep.mubr.f32.mxu1 %v5897_v1 }
  0x8e   : > { %5611 = vmatmul.mubr.msk.f32.vlgmr.msra.gmra.mrb[12].mxu0 %vm192_vm0, %v5602_v24  ;;  %5612 = vmatmul.mubr.msk.f32.vlgmr.msra.gmra.mrb[12].mxu1 %vm192_vm0, %v5602_v24 }
  0x8f   : > { %4823 = vmatprep.subr.mxu0 %v5608_v25  ;;  %4894 = vmatprep.subr.mxu1 %v5610_v26 }
  0x90   : > { %4824 = vmatpush1.msra.mxu0 %v5607_v27  ;;  %4895 = vmatpush1.msra.mxu1 %v5609_v28 }
  0x91   : > { %4887 = vmatprep.mubr.f32.mxu0 %v5897_v1  ;;  %4958 = vmatprep.mubr.f32.mxu1 %v5897_v1 }
  0x92   : > { %5613 = vmatmul.mubr.msk.f32.vlgmr.msra.gmra.mrb[14].mxu0 %vm192_vm0, %v5602_v24  ;;  %5614 = vmatmul.mubr.msk.f32.vlgmr.msra.gmra.mrb[14].mxu1 %vm192_vm0, %v5602_v24 }
 0x101   : > { %v1153_v34 = vpop.f32.mrb[0].mxu0  ;;  %v1224_v35 = vpop.f32.mrb[0].mxu1 }
 0x102   : > { %v1388_v36 = vadd.f32 %v6338_v33, %v1153_v34  ;;  %v1390_v37 = vadd.f32 %v6338_v33, %v1224_v35  ;;  %v1155_v38 = vpop.f32.mrb[1].mxu0  ;;  %v1226_v1 = vpop.f32.mrb[1].mxu1 }
 0x103   : > { %v1389_v39 = vadd.f32 %v6338_v33, %v1155_v38  ;;  %v1391_v40 = vadd.f32 %v6338_v33, %v1226_v1 }
 0x104   : > { %v5615_v41 = vmul.f32 -1.442695, %v1388_v36  ;;  %v5617_v42 = vmul.f32 -1.442695, %v1390_v37 }
 0x105   : > { %v5616_v43 = vmul.f32 -1.442695, %v1389_v39  ;;  %v5618_v44 = vmul.f32 -1.442695, %v1391_v40  ;;  %v1295_v45 = vpop.f32.mrb[2].mxu0  ;;  %v1366_v46 = vpop.f32.mrb[2].mxu1 }
 0x106   : > { %5761 = vpow2.f32 %v5615_v41  ;;  %v1392_v47 = vadd.f32 %v6338_v33, %v1295_v45  ;;  %v1394_v48 = vadd.f32 %v6338_v33, %v1366_v46  ;;  %v1297_v49 = vpop.f32.mrb[3].mxu0  ;;  %v1368_v50 = vpop.f32.mrb[3].mxu1 }
 0x107   : > { %5763 = vpow2.f32 %v5617_v42  ;;  %v1393_v51 = vadd.f32 %v6338_v33, %v1297_v49  ;;  %v1395_v52 = vadd.f32 %v6338_v33, %v1368_v50 }
 0x108   : > { %5765 = vpow2.f32 %v5616_v43  ;;  %v5619_v53 = vmul.f32 -1.442695, %v1392_v47  ;;  %v5621_v54 = vmul.f32 -1.442695, %v1394_v48 }
 0x109   : > { %5767 = vpow2.f32 %v5618_v44  ;;  %v5620_v55 = vmul.f32 -1.442695, %v1393_v51  ;;  %v5622_v56 = vmul.f32 -1.442695, %v1395_v52 }
 0x10a   : > { %5769 = vpow2.f32 %v5619_v53 }
 0x10b   : > { %5771 = vpow2.f32 %v5621_v54 }
 0x10c   : > { %5773 = vpow2.f32 %v5620_v55 }
 0x10d   : > { %5775 = vpow2.f32 %v5622_v56 }
 0x110   : > { %v5762_v57 = vpop.eup %5761 }
 0x111   : > { %v5764_v58 = vpop.eup %5763  ;;  %v5005_v59 = vadd.f32 1.0, %v5762_v57 }
 0x112   : > { %v5766_v60 = vpop.eup %5765  ;;  %v5007_v61 = vadd.f32 1.0, %v5764_v58 }
 0x113   : > { %v5768_v62 = vpop.eup %5767  ;;  %5777 = vrcp.f32 %v5005_v59  ;;  %v5006_v63 = vadd.f32 1.0, %v5766_v60 }
 0x114   : > { %v5770_v0 = vpop.eup %5769  ;;  %5779 = vrcp.f32 %v5007_v61  ;;  %v5008_v2 = vadd.f32 1.0, %v5768_v62 }
 0x115   : > { %v5772_v3 = vpop.eup %5771  ;;  %5781 = vrcp.f32 %v5006_v63  ;;  %v5009_v4 = vadd.f32 1.0, %v5770_v0 }
 0x116   : > { %v5774_v5 = vpop.eup %5773  ;;  %5783 = vrcp.f32 %v5008_v2  ;;  %v5011_v8 = vadd.f32 1.0, %v5772_v3 }
 0x117   : > { %v5776_v9 = vpop.eup %5775  ;;  %5785 = vrcp.f32 %v5009_v4  ;;  %v5010_v10 = vadd.f32 1.0, %v5774_v5 }
 0x118   : > { %5787 = vrcp.f32 %v5011_v8  ;;  %v5012_v11 = vadd.f32 1.0, %v5776_v9 }
 0x119   : > { %5789 = vrcp.f32 %v5010_v10 }
 0x11a   : > { %5791 = vrcp.f32 %v5012_v11 }
 0x11d   : > { %v5778_v13 = vpop.eup %5777 }
 0x11e   : > { %v5780_v14 = vpop.eup %5779 }
 0x11f   : > { %v5782_v16 = vpop.eup %5781 }
 0x120   : > { %v5784_v17 = vpop.eup %5783  ;;  %v5037_v18 = vcombine.low %v5778_v13, %v5782_v16 }
 0x121   : > { %v5786_v19 = vpop.eup %5785  ;;  %v5038_v20 = vcombine.low %v5780_v14, %v5784_v17  ;;  %v2360_v21 = vpop.f32.mrb[4].mxu0 }
 0x122   : > { %v2431_v22 = vpop.f32.mrb[4].mxu1  ;;  %v5788_v23 = vpop.eup %5787  ;;  %v5047_v24 = vrot.slane %v5037_v18, %v6349_v15  ;;  %v2586_v25 = vadd.f32 %v2360_v21, %v6338_v33 }
 0x123   : > { %v2588_v26 = vadd.f32 %v2431_v22, %v6338_v33  ;;  %v2362_v27 = vpop.f32.mrb[5].mxu0  ;;  %v2433_v28 = vpop.f32.mrb[5].mxu1  ;;  %v5054_v30 = vrot.slane %v5038_v20, %v6349_v15 }
 0x124   : > { %v5790_v29 = vpop.eup %5789  ;;  %v2587_v31 = vadd.f32 %v2362_v27, %v6338_v33  ;;  %v2589_v32 = vadd.f32 %v2433_v28, %v6338_v33  ;;  %v5623_v36 = vmul.f32 -1.442695, %v2586_v25 }
 0x125   : > { %v5792_v34 = vpop.eup %5791  ;;  %v5039_v35 = vcombine.low %v5786_v19, %v5790_v29  ;;  %v5625_v37 = vmul.f32 -1.442695, %v2588_v26  ;;  %v5069_v38 = vcombine.low %v5047_v24, %v5054_v30  ;;  %v2502_v41 = vpop.f32.mrb[6].mxu0 }
 0x126   : > { %v5040_v1 = vcombine.low %v5788_v23, %v5792_v34  ;;  %v5624_v39 = vmul.f32 -1.442695, %v2587_v31  ;;  %v5626_v40 = vmul.f32 -1.442695, %v2589_v32  ;;  %v2573_v42 = vpop.f32.mrb[6].mxu1  ;;  %5793 = vpow2.f32 %v5623_v36  ;;  %v2504_v46 = vpop.f32.mrb[7].mxu0 }
 0x127   : > { %v5061_v43 = vrot.slane %v5039_v35, %v6349_v15  ;;  %v2590_v44 = vadd.f32 %v2502_v41, %v6338_v33  ;;  %v2592_v45 = vadd.f32 %v2573_v42, %v6338_v33  ;;  %v2575_v47 = vpop.f32.mrb[7].mxu1  ;;  %5795 = vpow2.f32 %v5625_v37 }
 0x128   : > { %v5068_v48 = vrot.slane %v5040_v1, %v6349_v15  ;;  %v2591_v49 = vadd.f32 %v2504_v46, %v6338_v33  ;;  %5797 = vpow2.f32 %v5624_v39  ;;  %v2593_v52 = vadd.f32 %v2575_v47, %v6338_v33 }
 0x129   : > { %v5627_v50 = vmul.f32 -1.442695, %v2590_v44  ;;  %v5629_v51 = vmul.f32 -1.442695, %v2592_v45  ;;  %5799 = vpow2.f32 %v5626_v40  ;;  %v5077_v56 = vrot.slane %v5069_v38, %v6349_v15 }
 0x12a   : > { %v5070_v53 = vcombine.low %v5061_v43, %v5068_v48  ;;  %v5628_v54 = vmul.f32 -1.442695, %v2591_v49  ;;  %v5630_v55 = vmul.f32 -1.442695, %v2593_v52 }
 0x12b   : > { %5801 = vpow2.f32 %v5627_v50 }
 0x12c   : > { %v5084_v57 = vrot.slane %v5070_v53, %v6349_v15  ;;  %5803 = vpow2.f32 %v5629_v51 }
 0x12d   : > { %5805 = vpow2.f32 %v5628_v54 }
 0x12e   : > { %v5085_v58 = vcombine.low %v5077_v56, %v5084_v57  ;;  %5807 = vpow2.f32 %v5630_v55 }
 0x130   : > { %5087 = vst [vmem:[%s6369_s28] sm:$0xff] %v5085_v58  ;;  %v5794_v59 = vpop.eup %5793 }
 0x131   : > { %v5796_v60 = vpop.eup %5795  ;;  %v5112_v61 = vadd.f32 1.0, %v5794_v59 }
 0x132   : > { %v5798_v62 = vpop.eup %5797  ;;  %v5114_v63 = vadd.f32 1.0, %v5796_v60 }
 0x133   : > { %v5800_v0 = vpop.eup %5799  ;;  %5809 = vrcp.f32 %v5112_v61  ;;  %v5113_v2 = vadd.f32 1.0, %v5798_v62 }
 0x134   : > { %5811 = vrcp.f32 %v5114_v63  ;;  %v5115_v4 = vadd.f32 1.0, %v5800_v0 }
 0x135   : > { %v5802_v3 = vpop.eup %5801  ;;  %5813 = vrcp.f32 %v5113_v2 }
 0x136   : > { %v5804_v5 = vpop.eup %5803  ;;  %v5116_v6 = vadd.f32 1.0, %v5802_v3  ;;  %5815 = vrcp.f32 %v5115_v4 }
 0x137   : > { %v5806_v7 = vpop.eup %5805  ;;  %v5118_v8 = vadd.f32 1.0, %v5804_v5 }
 0x138   : > { %v5808_v9 = vpop.eup %5807  ;;  %5817 = vrcp.f32 %v5116_v6  ;;  %v5117_v10 = vadd.f32 1.0, %v5806_v7 }
 0x139   : > { %5819 = vrcp.f32 %v5118_v8  ;;  %v5119_v11 = vadd.f32 1.0, %v5808_v9 }
 0x13a   : > { %5821 = vrcp.f32 %v5117_v10 }
 0x13b   : > { %5823 = vrcp.f32 %v5119_v11 }
 0x13d   : > { %v5810_v12 = vpop.eup %5809 }
 0x13e   : > { %v5812_v13 = vpop.eup %5811 }
 0x13f   : > { %v5814_v14 = vpop.eup %5813 }
 0x140   : > { %v5816_v16 = vpop.eup %5815  ;;  %v5144_v17 = vcombine.low %v5810_v12, %v5814_v14 }
 0x141   : > { %v5145_v19 = vcombine.low %v5812_v13, %v5816_v16  ;;  %v3558_v20 = vpop.f32.mrb[8].mxu0  ;;  %v3629_v21 = vpop.f32.mrb[8].mxu1 }
 0x142   : > { %v5818_v18 = vpop.eup %5817  ;;  %v5154_v23 = vrot.slane %v5144_v17, %v6349_v15  ;;  %v3784_v24 = vadd.f32 %v3558_v20, %v6338_v33  ;;  %v3786_v25 = vadd.f32 %v3629_v21, %v6338_v33  ;;  %v3560_v26 = vpop.f32.mrb[9].mxu0 }
 0x143   : > { %v5820_v22 = vpop.eup %5819  ;;  %v3631_v27 = vpop.f32.mrb[9].mxu1  ;;  %v5161_v29 = vrot.slane %v5145_v19, %v6349_v15  ;;  %v3785_v30 = vadd.f32 %v3560_v26, %v6338_v33 }
 0x144   : > { %v5822_v28 = vpop.eup %5821  ;;  %v3787_v31 = vadd.f32 %v3631_v27, %v6338_v33  ;;  %v5632_v35 = vmul.f32 -1.442695, %v3784_v24  ;;  %v5634_v36 = vmul.f32 -1.442695, %v3786_v25 }
 0x145   : > { %v5824_v32 = vpop.eup %5823  ;;  %v5146_v34 = vcombine.low %v5818_v18, %v5822_v28  ;;  %v5176_v37 = vcombine.low %v5154_v23, %v5161_v29  ;;  %v5633_v1 = vmul.f32 -1.442695, %v3785_v30  ;;  %v3700_v40 = vpop.f32.mrb[10].mxu0 }
 0x146   : > { %v5147_v38 = vcombine.low %v5820_v22, %v5824_v32  ;;  %v5635_v39 = vmul.f32 -1.442695, %v3787_v31  ;;  %v3771_v41 = vpop.f32.mrb[10].mxu1  ;;  %5825 = vpow2.f32 %v5632_v35  ;;  %v3788_v43 = vadd.f32 %v3700_v40, %v6338_v33  ;;  %v3702_v45 = vpop.f32.mrb[11].mxu0 }
 0x147   : > { %v5168_v42 = vrot.slane %v5146_v34, %v6349_v15  ;;  %v3790_v44 = vadd.f32 %v3771_v41, %v6338_v33  ;;  %v3773_v46 = vpop.f32.mrb[11].mxu1  ;;  %5827 = vpow2.f32 %v5634_v36  ;;  %v3789_v48 = vadd.f32 %v3702_v45, %v6338_v33 }
 0x148   : > { %v5175_v47 = vrot.slane %v5147_v38, %v6349_v15  ;;  %5829 = vpow2.f32 %v5633_v1  ;;  %v5636_v49 = vmul.f32 -1.442695, %v3788_v43  ;;  %v3791_v51 = vadd.f32 %v3773_v46, %v6338_v33 }
 0x149   : > { %v5638_v50 = vmul.f32 -1.442695, %v3790_v44  ;;  %5831 = vpow2.f32 %v5635_v39  ;;  %v5637_v53 = vmul.f32 -1.442695, %v3789_v48  ;;  %v5184_v55 = vrot.slane %v5176_v37, %v6349_v15 }
 0x14a   : > { %v5177_v52 = vcombine.low %v5168_v42, %v5175_v47  ;;  %5833 = vpow2.f32 %v5636_v49  ;;  %v5639_v54 = vmul.f32 -1.442695, %v3791_v51 }
 0x14b   : > { %5835 = vpow2.f32 %v5638_v50 }
 0x14c   : > { %v5191_v56 = vrot.slane %v5177_v52, %v6349_v15  ;;  %5837 = vpow2.f32 %v5637_v53 }
 0x14d   : > { %5839 = vpow2.f32 %v5639_v54 }
 0x14e   : > { %v5192_v57 = vcombine.low %v5184_v55, %v5191_v56 }
 0x150   : > { %5631 = vst [vmem:[%s6369_s28 + $0x8] sm:$0xff] %v5192_v57  ;;  %v5826_v58 = vpop.eup %5825 }
 0x151   : > { %v5828_v59 = vpop.eup %5827  ;;  %v5220_v60 = vadd.f32 1.0, %v5826_v58 }
 0x152   : > { %v5830_v61 = vpop.eup %5829  ;;  %v5222_v62 = vadd.f32 1.0, %v5828_v59 }
 0x153   : > { %v5832_v63 = vpop.eup %5831  ;;  %5841 = vrcp.f32 %v5220_v60  ;;  %v5221_v0 = vadd.f32 1.0, %v5830_v61 }
 0x154   : > { %v5834_v2 = vpop.eup %5833  ;;  %5843 = vrcp.f32 %v5222_v62  ;;  %v5223_v3 = vadd.f32 1.0, %v5832_v63 }
 0x155   : > { %v5836_v4 = vpop.eup %5835  ;;  %5845 = vrcp.f32 %v5221_v0  ;;  %v5224_v5 = vadd.f32 1.0, %v5834_v2 }
 0x156   : > { %v5838_v6 = vpop.eup %5837  ;;  %5847 = vrcp.f32 %v5223_v3  ;;  %v5226_v7 = vadd.f32 1.0, %v5836_v4 }
 0x157   : > { %v5840_v8 = vpop.eup %5839  ;;  %5849 = vrcp.f32 %v5224_v5  ;;  %v5225_v9 = vadd.f32 1.0, %v5838_v6 }
 0x158   : > { %5851 = vrcp.f32 %v5226_v7  ;;  %v5227_v10 = vadd.f32 1.0, %v5840_v8 }
 0x159   : > { %5853 = vrcp.f32 %v5225_v9 }
 0x15a   : > { %5855 = vrcp.f32 %v5227_v10 }
 0x15d   : > { %v5842_v11 = vpop.eup %5841 }
 0x15e   : > { %v5844_v12 = vpop.eup %5843 }
 0x15f   : > { %v5846_v13 = vpop.eup %5845 }
 0x160   : > { %v5848_v14 = vpop.eup %5847  ;;  %v5252_v16 = vcombine.low %v5842_v11, %v5846_v13 }
 0x161   : > { %v5850_v17 = vpop.eup %5849  ;;  %v5253_v18 = vcombine.low %v5844_v12, %v5848_v14  ;;  %v4747_v19 = vpop.f32.mrb[12].mxu0 }
 0x162   : > { %v4818_v20 = vpop.f32.mrb[12].mxu1  ;;  %v5852_v21 = vpop.eup %5851  ;;  %v5262_v22 = vrot.slane %v5252_v16, %v6349_v15  ;;  %v4973_v23 = vadd.f32 %v4747_v19, %v6338_v33 }
 0x163   : > { %v4975_v24 = vadd.f32 %v4818_v20, %v6338_v33  ;;  %v4749_v25 = vpop.f32.mrb[13].mxu0  ;;  %v4820_v26 = vpop.f32.mrb[13].mxu1  ;;  %v5269_v28 = vrot.slane %v5253_v18, %v6349_v15 }
 0x164   : > { %v5854_v27 = vpop.eup %5853  ;;  %v4974_v29 = vadd.f32 %v4749_v25, %v6338_v33  ;;  %v4976_v30 = vadd.f32 %v4820_v26, %v6338_v33  ;;  %v5641_v34 = vmul.f32 -1.442695, %v4973_v23 }
 0x165   : > { %v5856_v31 = vpop.eup %5855  ;;  %v5254_v32 = vcombine.low %v5850_v17, %v5854_v27  ;;  %v5643_v35 = vmul.f32 -1.442695, %v4975_v24  ;;  %v5284_v36 = vcombine.low %v5262_v22, %v5269_v28  ;;  %v4889_v39 = vpop.f32.mrb[14].mxu0 }
 0x166   : > { %v5255_v37 = vcombine.low %v5852_v21, %v5856_v31  ;;  %v5642_v38 = vmul.f32 -1.442695, %v4974_v29  ;;  %v5644_v1 = vmul.f32 -1.442695, %v4976_v30  ;;  %v4960_v40 = vpop.f32.mrb[14].mxu1  ;;  %5857 = vpow2.f32 %v5641_v34  ;;  %v4891_v44 = vpop.f32.mrb[15].mxu0 }
 0x167   : > { %v5276_v41 = vrot.slane %v5254_v32, %v6349_v15  ;;  %v4977_v42 = vadd.f32 %v4889_v39, %v6338_v33  ;;  %v4979_v43 = vadd.f32 %v4960_v40, %v6338_v33  ;;  %v4962_v45 = vpop.f32.mrb[15].mxu1  ;;  %5859 = vpow2.f32 %v5643_v35 }
 0x168   : > { %v5283_v46 = vrot.slane %v5255_v37, %v6349_v15  ;;  %v4978_v47 = vadd.f32 %v4891_v44, %v6338_v33  ;;  %5861 = vpow2.f32 %v5642_v38  ;;  %v4980_v50 = vadd.f32 %v4962_v45, %v6338_v33 }
 0x169   : > { %v5645_v48 = vmul.f32 -1.442695, %v4977_v42  ;;  %v5647_v49 = vmul.f32 -1.442695, %v4979_v43  ;;  %5863 = vpow2.f32 %v5644_v1  ;;  %v5292_v54 = vrot.slane %v5284_v36, %v6349_v15 }
 0x16a   : > { %v5285_v51 = vcombine.low %v5276_v41, %v5283_v46  ;;  %v5646_v52 = vmul.f32 -1.442695, %v4978_v47  ;;  %v5648_v53 = vmul.f32 -1.442695, %v4980_v50 }
 0x16b   : > { %5865 = vpow2.f32 %v5645_v48 }
 0x16c   : > { %v5299_v55 = vrot.slane %v5285_v51, %v6349_v15  ;;  %5867 = vpow2.f32 %v5647_v49 }
 0x16d   : > { %5869 = vpow2.f32 %v5646_v52 }
 0x16e   : > { %v5300_v56 = vcombine.low %v5292_v54, %v5299_v55  ;;  %5871 = vpow2.f32 %v5648_v53 }
 0x170   : > { %5640 = vst [vmem:[%s6369_s28 + $0x10] sm:$0xff] %v5300_v56  ;;  %v5858_v57 = vpop.eup %5857 }
 0x171   : > { %v5860_v58 = vpop.eup %5859  ;;  %v5328_v59 = vadd.f32 1.0, %v5858_v57 }
 0x172   : > { %v5862_v60 = vpop.eup %5861  ;;  %v5330_v61 = vadd.f32 1.0, %v5860_v58 }
 0x173   : > { %v5864_v33 = vpop.eup %5863  ;;  %5873 = vrcp.f32 %v5328_v59  ;;  %v5329_v62 = vadd.f32 1.0, %v5862_v60 }
 0x174   : > { %5875 = vrcp.f32 %v5330_v61  ;;  %v5331_v0 = vadd.f32 1.0, %v5864_v33 }
 0x175   : > { %v5866_v63 = vpop.eup %5865  ;;  %5877 = vrcp.f32 %v5329_v62 }
 0x176   : > { %v5868_v2 = vpop.eup %5867  ;;  %v5332_v3 = vadd.f32 1.0, %v5866_v63  ;;  %5879 = vrcp.f32 %v5331_v0 }
 0x177   : > { %v5870_v4 = vpop.eup %5869  ;;  %v5334_v5 = vadd.f32 1.0, %v5868_v2 }
 0x178   : > { %v5872_v6 = vpop.eup %5871  ;;  %5881 = vrcp.f32 %v5332_v3  ;;  %v5333_v7 = vadd.f32 1.0, %v5870_v4 }
 0x179   : > { %5883 = vrcp.f32 %v5334_v5  ;;  %v5335_v8 = vadd.f32 1.0, %v5872_v6 }
 0x17a   : > { %5885 = vrcp.f32 %v5333_v7 }
 0x17b   : > { %5887 = vrcp.f32 %v5335_v8 }
 0x17d   : > { %v5874_v9 = vpop.eup %5873 }
 0x17e   : > { %v5876_v10 = vpop.eup %5875 }
 0x17f   : > { %v5878_v11 = vpop.eup %5877 }
 0x180   : > { %v5880_v12 = vpop.eup %5879  ;;  %v5360_v13 = vcombine.low %v5874_v9, %v5878_v11 }
 0x181   : > { %v5361_v16 = vcombine.low %v5876_v10, %v5880_v12 }
 0x182   : > { %v5882_v14 = vpop.eup %5881  ;;  %v5370_v18 = vrot.slane %v5360_v13, %v6349_v15 }
 0x183   : > { %v5884_v17 = vpop.eup %5883  ;;  %v5377_v20 = vrot.slane %v5361_v16, %v6349_v15 }
 0x184   : > { %v5886_v19 = vpop.eup %5885 }
 0x185   : > { %v5888_v21 = vpop.eup %5887  ;;  %v5362_v22 = vcombine.low %v5882_v14, %v5886_v19  ;;  %v5392_v23 = vcombine.low %v5370_v18, %v5377_v20 }
 0x186   : > { %v5363_v24 = vcombine.low %v5884_v17, %v5888_v21 }
 0x187   : > { %v5384_v25 = vrot.slane %v5362_v22, %v6349_v15  ;;  %v5400_v28 = vrot.slane %v5392_v23, %v6349_v15 }
 0x188   : > { %v5391_v26 = vrot.slane %v5363_v24, %v6349_v15 }
 0x18a   : > { %v5393_v27 = vcombine.low %v5384_v25, %v5391_v26 }
 0x18c   : > { %v5407_v29 = vrot.slane %v5393_v27, %v6349_v15 }
 0x18e   : > { %v5408_v30 = vcombine.low %v5400_v28, %v5407_v29 }
 0x190   : > { %5649 = vst [vmem:[%s6369_s28 + $0x18] sm:$0xff] %v5408_v30 }
 0x191 PF: > { %s15_s14 = sadd.s32 1, %s5895_s14  }
 0x192   : > { %p12_p4 = scmp.ge.s32.totalorder %s15_s14, 4  }
 0x194   :  { %14 = sbr.rel (!%p12_p4) target bundleno = 3 (0x3), region = 88 }

</bundles_post_ra>
